<compile_context>
chip_gen: v5e
topology: v5e:2x2
jax: 0.10.0
libtpu: 0.0.40
codegen_flags: <defaults>
</compile_context>

<pallas_src>
import jax
import jax.numpy as jnp
import numpy as np
from jax import lax
from jax.experimental import pallas as pl
from jax.experimental.pallas import tpu as pltpu

EPS = 1e-5  # nn.BatchNorm2d default


def _fold_bn(gamma, beta, mean, var):
    scale = gamma / jnp.sqrt(var + EPS)
    bias = beta - mean * scale
    return scale, bias


def _pick_th(H, W):
    """Pick an H-tile: multiple of 8, divides H, th*W lane-dense (mult of 128)."""
    for th in (8, 16, 24, 32):
        if H % th == 0 and (th * W) % 128 == 0 and H // th >= 2:
            return th
    return H  # single tile fallback (output block == full array: always legal)


# -----------------------------------------------------------------------------
# Fused kernel.  Grid = (N, H // th).  Channels-major layout throughout.
#   x_ref : (1, C_in, H, W)      full image for batch n (resident across hi)
#   s1,b1 : (C_in, 1)            folded BN1 scale / bias
#   w1    : (C_mid, C_in)        conv1 weight with BN2 scale folded in
#   b2    : (C_mid, 1)           folded BN2 bias
#   w2    : (3, C_out, 3*C_mid)  conv2 weight, per-kh, K ordered (kw, c)
#   o_ref : (1, C_out, th*W)     lane-dense output tile (rows r0 .. r0+th-1)
#   zbuf  : (C_mid, th+2, W+2)   VMEM scratch = zero-padded bottleneck tile
# -----------------------------------------------------------------------------
def _dense_layer_kernel(x_ref, s1_ref, b1_ref, w1_ref, b2_ref, w2_ref,
                        o_ref, zbuf):
    C_in = x_ref.shape[1]
    H = x_ref.shape[2]
    W = x_ref.shape[3]
    C_mid = w1_ref.shape[0]
    C_out = o_ref.shape[1]
    th = o_ref.shape[2] // W

    hi = pl.program_id(1)
    n_hi = pl.num_programs(1)
    r0 = hi * th
    if th % 8 == 0:
        r0 = pl.multiple_of(r0, 8)

    s1 = s1_ref[...]
    b1 = b1_ref[...]
    w1 = w1_ref[...]
    b2 = b2_ref[...]

    def bottleneck(x2d):  # (C_in, P) f32 -> (C_mid, P) f32
        h = jnp.maximum(x2d * s1 + b1, 0.0)                      # BN1 + ReLU
        z = jnp.dot(w1, h, preferred_element_type=jnp.float32)   # 1x1 conv (BN2 scale folded)
        return jnp.maximum(z + b2, 0.0)                          # BN2 bias + ReLU

    # Zero scratch: provides conv2's zero padding (W borders + invalid H halos).
    zbuf[...] = jnp.zeros_like(zbuf)

    # Interior rows [r0, r0 + th) — always valid.
    x_in = x_ref[0, :, pl.ds(r0, th), :].reshape(C_in, th * W).astype(jnp.float32)
    zbuf[:, 1:th + 1, 1:W + 1] = bottleneck(x_in).reshape(C_mid, th, W)

    # Top halo row (r0 - 1): real data unless this is the first tile.
    @pl.when(hi > 0)
    def _():
        xt = x_ref[0, :, pl.ds(r0 - 1, 1), :].reshape(C_in, W).astype(jnp.float32)
        zbuf[:, 0:1, 1:W + 1] = bottleneck(xt).reshape(C_mid, 1, W)

    # Bottom halo row (r0 + th): real data unless this is the last tile.
    @pl.when(hi < n_hi - 1)
    def _():
        xb = x_ref[0, :, pl.ds(r0 + th, 1), :].reshape(C_in, W).astype(jnp.float32)
        zbuf[:, th + 1:th + 2, 1:W + 1] = bottleneck(xb).reshape(C_mid, 1, W)

    # 3x3 conv: per-kh width-im2col -> 3 matmuls with K = 3*C_mid.
    acc = jnp.zeros((C_out, th * W), jnp.float32)
    for kh in range(3):
        patch = jnp.concatenate(
            [zbuf[:, kh:kh + th, kw:kw + W].reshape(C_mid, th * W) for kw in range(3)],
            axis=0)                                              # (3*C_mid, th*W)
        acc = acc + jnp.dot(w2_ref[kh], patch, preferred_element_type=jnp.float32)

    o_ref[0] = acc.astype(o_ref.dtype)                           # lane-dense store


def dense_layer_forward(x_nchw, params):
    """Forward pass of _DenseLayer. Input/output in PyTorch NCHW layout."""
    N, C_in, H, W = x_nchw.shape
    w1 = params["w1"]          # torch conv1.weight: (C_mid, C_in, 1, 1)
    w2 = params["w2"]          # torch conv2.weight: (C_out, C_mid, 3, 3)
    C_mid = w1.shape[0]
    C_out = w2.shape[0]

    s1, b1 = _fold_bn(params["gamma1"], params["beta1"], params["mean1"], params["var1"])
    s2, b2 = _fold_bn(params["gamma2"], params["beta2"], params["mean2"], params["var2"])

    # Fold BN2 scale into conv1 weight: relu(s2*(w1 @ h) + b2) == relu((s2[:,None]*w1) @ h + b2)
    w1f = (w1[:, :, 0, 0] * s2[:, None]).astype(jnp.float32)            # (C_mid, C_in)
    # conv2 weight for per-kh im2col, channels-major:
    #   w2t[kh, o, kw*C_mid + c] = w2[o, c, kh, kw]
    w2t = jnp.transpose(w2, (2, 0, 3, 1)).reshape(3, C_out, 3 * C_mid).astype(jnp.float32)

    s1c = s1.reshape(C_in, 1).astype(jnp.float32)
    b1c = b1.reshape(C_in, 1).astype(jnp.float32)
    b2c = b2.reshape(C_mid, 1).astype(jnp.float32)

    th = _pick_th(H, W)
    n_hi = H // th

    x32 = x_nchw.astype(jnp.float32)   # stays NCHW: no HBM layout transpose

    out2d = pl.pallas_call(
        _dense_layer_kernel,
        out_shape=jax.ShapeDtypeStruct((N, C_out, H * W), jnp.float32),
        grid_spec=pltpu.PrefetchScalarGridSpec(
            num_scalar_prefetch=0,
            grid=(N, n_hi),
            in_specs=[
                pl.BlockSpec((1, C_in, H, W), lambda n, hi: (n, 0, 0, 0)),
                pl.BlockSpec((C_in, 1), lambda n, hi: (0, 0)),
                pl.BlockSpec((C_in, 1), lambda n, hi: (0, 0)),
                pl.BlockSpec((C_mid, C_in), lambda n, hi: (0, 0)),
                pl.BlockSpec((C_mid, 1), lambda n, hi: (0, 0)),
                pl.BlockSpec((3, C_out, 3 * C_mid), lambda n, hi: (0, 0, 0)),
            ],
            out_specs=pl.BlockSpec((1, C_out, th * W), lambda n, hi: (n, 0, hi)),
            scratch_shapes=[pltpu.VMEM((C_mid, th + 2, W + 2), jnp.float32)],
        ),
        compiler_params=pltpu.CompilerParams(
            dimension_semantics=("parallel", "parallel")),
    )(x32, s1c, b1c, w1f, b2c, w2t)

    return out2d.reshape(N, C_out, H, W)   # free reshape, already NCHW order


def reference_forward(x_nchw, params):
    """Pure-JAX reference of the same forward pass (NCHW in/out)."""
    x = x_nchw.astype(jnp.float32)
    s1, b1 = _fold_bn(params["gamma1"], params["beta1"], params["mean1"], params["var1"])
    s2, b2 = _fold_bn(params["gamma2"], params["beta2"], params["mean2"], params["var2"])
    h = jnp.maximum(x * s1[None, :, None, None] + b1[None, :, None, None], 0.0)
    z = lax.conv_general_dilated(
        h, params["w1"].astype(jnp.float32), (1, 1), "VALID",
        dimension_numbers=("NCHW", "OIHW", "NCHW"), precision=lax.Precision.HIGHEST)
    z = jnp.maximum(z * s2[None, :, None, None] + b2[None, :, None, None], 0.0)
    out = lax.conv_general_dilated(
        z, params["w2"].astype(jnp.float32), (1, 1), ((1, 1), (1, 1)),
        dimension_numbers=("NCHW", "OIHW", "NCHW"), precision=lax.Precision.HIGHEST)
    return out


def make_params(key, num_input_features, growth_rate, bn_size):
    c_in = num_input_features
    c_mid = bn_size * growth_rate
    c_out = growth_rate
    ks = jax.random.split(key, 10)
    return {
        # torch conv weight layouts
        "w1": 0.1 * jax.random.normal(ks[0], (c_mid, c_in, 1, 1), jnp.float32),
        "w2": 0.1 * jax.random.normal(ks[1], (c_out, c_mid, 3, 3), jnp.float32),
        "gamma1": 1.0 + 0.1 * jax.random.normal(ks[2], (c_in,), jnp.float32),
        "beta1": 0.1 * jax.random.normal(ks[3], (c_in,), jnp.float32),
        "mean1": 0.1 * jax.random.normal(ks[4], (c_in,), jnp.float32),
        "var1": jnp.abs(jax.random.normal(ks[5], (c_in,), jnp.float32)) + 0.5,
        "gamma2": 1.0 + 0.1 * jax.random.normal(ks[6], (c_mid,), jnp.float32),
        "beta2": 0.1 * jax.random.normal(ks[7], (c_mid,), jnp.float32),
        "mean2": 0.1 * jax.random.normal(ks[8], (c_mid,), jnp.float32),
        "var2": jnp.abs(jax.random.normal(ks[9], (c_mid,), jnp.float32)) + 0.5,
    }


if __name__ == "__main__":
    # _DenseLayer(num_input_features=4, growth_rate=8, bn_size=4, drop_rate=0.0)
    num_input_features, growth_rate, bn_size = 4, 8, 4
    N, H, W = 2, 16, 16

    key = jax.random.PRNGKey(0)
    k_x, k_p = jax.random.split(key)
    x = jax.random.normal(k_x, (N, num_input_features, H, W), jnp.float32)  # NCHW
    params = make_params(k_p, num_input_features, growth_rate, bn_size)

    out = jax.block_until_ready(dense_layer_forward(x, params))
    ref = jax.block_until_ready(reference_forward(x, params))

    assert out.shape == (N, growth_rate, H, W), out.shape
    np.testing.assert_allclose(np.asarray(out), np.asarray(ref), rtol=2e-3, atol=2e-3)

    print("KERNEL_OK")
</pallas_src>

<mosaic_0001>
module attributes {stable_mosaic.version = 11 : i64} {
  func.func @_dense_layer_kernel(%arg0: i32, %arg1: i32, %arg2: memref<1x4x16x16xf32, #tpu.memory_space<vmem>>, %arg3: memref<4x1xf32, #tpu.memory_space<vmem>>, %arg4: memref<4x1xf32, #tpu.memory_space<vmem>>, %arg5: memref<32x4xf32, #tpu.memory_space<vmem>>, %arg6: memref<32x1xf32, #tpu.memory_space<vmem>>, %arg7: memref<3x8x96xf32, #tpu.memory_space<vmem>>, %arg8: memref<1x8x128xf32, #tpu.memory_space<vmem>>, %arg9: memref<32x10x18xf32, #tpu.memory_space<vmem>>) attributes {dimension_semantics = [#tpu.dimension_semantics<parallel>, #tpu.dimension_semantics<parallel>], iteration_bounds = array<i64: 2, 2>, scalar_prefetch = 0 : i64, scratch_operands = 1 : i64, tpu.core_type = #tpu.core_type<tc>, window_params = [{transform_indices = @transform_0, window_bounds = array<i64: 1, 4, 16, 16>}, {pipeline_mode = #tpu.pipeline_mode<synchronous>, transform_indices = @transform_1, window_bounds = array<i64: 4, 1>}, {pipeline_mode = #tpu.pipeline_mode<synchronous>, transform_indices = @transform_2, window_bounds = array<i64: 4, 1>}, {pipeline_mode = #tpu.pipeline_mode<synchronous>, transform_indices = @transform_3, window_bounds = array<i64: 32, 4>}, {pipeline_mode = #tpu.pipeline_mode<synchronous>, transform_indices = @transform_4, window_bounds = array<i64: 32, 1>}, {pipeline_mode = #tpu.pipeline_mode<synchronous>, transform_indices = @transform_5, window_bounds = array<i64: 3, 8, 96>}, {transform_indices = @transform_6, window_bounds = array<i64: 1, 8, 128>}]} {
    %c8_i32 = arith.constant 8 : i32
    %0 = arith.muli %arg1, %c8_i32 : i32
    %1 = tpu.assume_multiple %0, 8 : i32
    %c0 = arith.constant 0 : index
    %c0_0 = arith.constant 0 : index
    %2 = vector.load %arg3[%c0, %c0_0] : memref<4x1xf32, #tpu.memory_space<vmem>>, vector<4x1xf32>
    %c0_1 = arith.constant 0 : index
    %c0_2 = arith.constant 0 : index
    %3 = vector.load %arg4[%c0_1, %c0_2] : memref<4x1xf32, #tpu.memory_space<vmem>>, vector<4x1xf32>
    %c0_3 = arith.constant 0 : index
    %c0_4 = arith.constant 0 : index
    %4 = vector.load %arg5[%c0_3, %c0_4] : memref<32x4xf32, #tpu.memory_space<vmem>>, vector<32x4xf32>
    %c0_5 = arith.constant 0 : index
    %c0_6 = arith.constant 0 : index
    %5 = vector.load %arg6[%c0_5, %c0_6] : memref<32x1xf32, #tpu.memory_space<vmem>>, vector<32x1xf32>
    %cst = arith.constant 0.000000e+00 : f32
    %6 = vector.broadcast %cst : f32 to vector<32x10x18xf32>
    %c0_7 = arith.constant 0 : index
    %c0_8 = arith.constant 0 : index
    %c0_9 = arith.constant 0 : index
    %7 = vector.load %arg9[%c0_7, %c0_8, %c0_9] : memref<32x10x18xf32, #tpu.memory_space<vmem>>, vector<32x10x18xf32>
    tpu.vector_store %arg9[%c0_7, %c0_8, %c0_9], %6 {strides = array<i32>} : memref<32x10x18xf32, #tpu.memory_space<vmem>>, vector<32x10x18xf32>,
    %c0_10 = arith.constant 0 : index
    %c0_11 = arith.constant 0 : index
    %8 = arith.index_cast %1 : i32 to index
    %c0_12 = arith.constant 0 : index
    %9 = vector.load %arg2[%c0_10, %c0_11, %8, %c0_12] : memref<1x4x16x16xf32, #tpu.memory_space<vmem>>, vector<1x4x8x16xf32>
    %10 = vector.shape_cast %9 : vector<1x4x8x16xf32> to vector<4x8x16xf32>
    %11 = vector.shape_cast %10 : vector<4x8x16xf32> to vector<4x128xf32>
    %12 = vector.broadcast %2 : vector<4x1xf32> to vector<4x128xf32>
    %13 = arith.mulf %11, %12 : vector<4x128xf32>
    %14 = vector.broadcast %3 : vector<4x1xf32> to vector<4x128xf32>
    %15 = arith.addf %13, %14 : vector<4x128xf32>
    %cst_13 = arith.constant 0.000000e+00 : f32
    %16 = vector.broadcast %cst_13 : f32 to vector<4x128xf32>
    %17 = arith.maximumf %15, %16 : vector<4x128xf32>
    %cst_14 = arith.constant dense<0.000000e+00> : vector<32x128xf32>
    %18 = tpu.matmul %4, %17, %cst_14 {dimension_numbers = #tpu.dot_dimension_numbers<[1], [0], [0], [1], [0, 0, 1, 1], [], []>} : vector<32x4xf32>, vector<4x128xf32>, vector<32x128xf32> -> vector<32x128xf32>
    %19 = vector.broadcast %5 : vector<32x1xf32> to vector<32x128xf32>
    %20 = arith.addf %18, %19 : vector<32x128xf32>
    %cst_15 = arith.constant 0.000000e+00 : f32
    %21 = vector.broadcast %cst_15 : f32 to vector<32x128xf32>
    %22 = arith.maximumf %20, %21 : vector<32x128xf32>
    %23 = vector.shape_cast %22 : vector<32x128xf32> to vector<32x8x16xf32>
    %c0_16 = arith.constant 0 : index
    %c1 = arith.constant 1 : index
    %c1_17 = arith.constant 1 : index
    %24 = vector.load %arg9[%c0_16, %c1, %c1_17] : memref<32x10x18xf32, #tpu.memory_space<vmem>>, vector<32x8x16xf32>
    tpu.vector_store %arg9[%c0_16, %c1, %c1_17], %23 {strides = array<i32>} : memref<32x10x18xf32, #tpu.memory_space<vmem>>, vector<32x8x16xf32>,
    %c0_i32 = arith.constant 0 : i32
    %25 = arith.cmpi sgt, %arg1, %c0_i32 : i32
    %26 = arith.extui %25 : i1 to i32
    %c0_i32_18 = arith.constant 0 : i32
    %27 = arith.cmpi ne, %26, %c0_i32_18 : i32
    scf.if %27 {
      %c1_i32_62 = arith.constant 1 : i32
      %68 = arith.subi %1, %c1_i32_62 : i32
      %c0_63 = arith.constant 0 : index
      %c0_64 = arith.constant 0 : index
      %69 = arith.index_cast %68 : i32 to index
      %c0_65 = arith.constant 0 : index
      %70 = vector.load %arg2[%c0_63, %c0_64, %69, %c0_65] : memref<1x4x16x16xf32, #tpu.memory_space<vmem>>, vector<1x4x1x16xf32>
      %71 = vector.shape_cast %70 : vector<1x4x1x16xf32> to vector<4x1x16xf32>
      %72 = vector.shape_cast %71 : vector<4x1x16xf32> to vector<4x16xf32>
      %73 = vector.broadcast %2 : vector<4x1xf32> to vector<4x16xf32>
      %74 = arith.mulf %72, %73 : vector<4x16xf32>
      %75 = vector.broadcast %3 : vector<4x1xf32> to vector<4x16xf32>
      %76 = arith.addf %74, %75 : vector<4x16xf32>
      %cst_66 = arith.constant 0.000000e+00 : f32
      %77 = vector.broadcast %cst_66 : f32 to vector<4x16xf32>
      %78 = arith.maximumf %76, %77 : vector<4x16xf32>
      %cst_67 = arith.constant dense<0.000000e+00> : vector<32x16xf32>
      %79 = tpu.matmul %4, %78, %cst_67 {dimension_numbers = #tpu.dot_dimension_numbers<[1], [0], [0], [1], [0, 0, 1, 1], [], []>} : vector<32x4xf32>, vector<4x16xf32>, vector<32x16xf32> -> vector<32x16xf32>
      %80 = vector.broadcast %5 : vector<32x1xf32> to vector<32x16xf32>
      %81 = arith.addf %79, %80 : vector<32x16xf32>
      %cst_68 = arith.constant 0.000000e+00 : f32
      %82 = vector.broadcast %cst_68 : f32 to vector<32x16xf32>
      %83 = arith.maximumf %81, %82 : vector<32x16xf32>
      %84 = vector.shape_cast %83 : vector<32x16xf32> to vector<32x1x16xf32>
      %c0_69 = arith.constant 0 : index
      %c0_70 = arith.constant 0 : index
      %c1_71 = arith.constant 1 : index
      %85 = vector.load %arg9[%c0_69, %c0_70, %c1_71] : memref<32x10x18xf32, #tpu.memory_space<vmem>>, vector<32x1x16xf32>
      tpu.vector_store %arg9[%c0_69, %c0_70, %c1_71], %84 {strides = array<i32>} : memref<32x10x18xf32, #tpu.memory_space<vmem>>, vector<32x1x16xf32>,
    } else {
    }
    %c1_i32 = arith.constant 1 : i32
    %28 = arith.cmpi slt, %arg1, %c1_i32 : i32
    %29 = arith.extui %28 : i1 to i32
    %c0_i32_19 = arith.constant 0 : i32
    %30 = arith.cmpi ne, %29, %c0_i32_19 : i32
    scf.if %30 {
      %c8_i32_62 = arith.constant 8 : i32
      %68 = arith.addi %1, %c8_i32_62 : i32
      %c0_63 = arith.constant 0 : index
      %c0_64 = arith.constant 0 : index
      %69 = arith.index_cast %68 : i32 to index
      %c0_65 = arith.constant 0 : index
      %70 = vector.load %arg2[%c0_63, %c0_64, %69, %c0_65] : memref<1x4x16x16xf32, #tpu.memory_space<vmem>>, vector<1x4x1x16xf32>
      %71 = vector.shape_cast %70 : vector<1x4x1x16xf32> to vector<4x1x16xf32>
      %72 = vector.shape_cast %71 : vector<4x1x16xf32> to vector<4x16xf32>
      %73 = vector.broadcast %2 : vector<4x1xf32> to vector<4x16xf32>
      %74 = arith.mulf %72, %73 : vector<4x16xf32>
      %75 = vector.broadcast %3 : vector<4x1xf32> to vector<4x16xf32>
      %76 = arith.addf %74, %75 : vector<4x16xf32>
      %cst_66 = arith.constant 0.000000e+00 : f32
      %77 = vector.broadcast %cst_66 : f32 to vector<4x16xf32>
      %78 = arith.maximumf %76, %77 : vector<4x16xf32>
      %cst_67 = arith.constant dense<0.000000e+00> : vector<32x16xf32>
      %79 = tpu.matmul %4, %78, %cst_67 {dimension_numbers = #tpu.dot_dimension_numbers<[1], [0], [0], [1], [0, 0, 1, 1], [], []>} : vector<32x4xf32>, vector<4x16xf32>, vector<32x16xf32> -> vector<32x16xf32>
      %80 = vector.broadcast %5 : vector<32x1xf32> to vector<32x16xf32>
      %81 = arith.addf %79, %80 : vector<32x16xf32>
      %cst_68 = arith.constant 0.000000e+00 : f32
      %82 = vector.broadcast %cst_68 : f32 to vector<32x16xf32>
      %83 = arith.maximumf %81, %82 : vector<32x16xf32>
      %84 = vector.shape_cast %83 : vector<32x16xf32> to vector<32x1x16xf32>
      %c0_69 = arith.constant 0 : index
      %c9 = arith.constant 9 : index
      %c1_70 = arith.constant 1 : index
      %85 = vector.load %arg9[%c0_69, %c9, %c1_70] : memref<32x10x18xf32, #tpu.memory_space<vmem>>, vector<32x1x16xf32>
      tpu.vector_store %arg9[%c0_69, %c9, %c1_70], %84 {strides = array<i32>} : memref<32x10x18xf32, #tpu.memory_space<vmem>>, vector<32x1x16xf32>,
    } else {
    }
    %cst_20 = arith.constant 0.000000e+00 : f32
    %31 = vector.broadcast %cst_20 : f32 to vector<8x128xf32>
    %c0_21 = arith.constant 0 : index
    %c0_22 = arith.constant 0 : index
    %c0_23 = arith.constant 0 : index
    %32 = vector.load %arg9[%c0_21, %c0_22, %c0_23] : memref<32x10x18xf32, #tpu.memory_space<vmem>>, vector<32x8x16xf32>
    %33 = vector.shape_cast %32 : vector<32x8x16xf32> to vector<32x128xf32>
    %c0_24 = arith.constant 0 : index
    %c0_25 = arith.constant 0 : index
    %c1_26 = arith.constant 1 : index
    %34 = vector.load %arg9[%c0_24, %c0_25, %c1_26] : memref<32x10x18xf32, #tpu.memory_space<vmem>>, vector<32x8x16xf32>
    %35 = vector.shape_cast %34 : vector<32x8x16xf32> to vector<32x128xf32>
    %c0_27 = arith.constant 0 : index
    %c0_28 = arith.constant 0 : index
    %c2 = arith.constant 2 : index
    %36 = vector.load %arg9[%c0_27, %c0_28, %c2] : memref<32x10x18xf32, #tpu.memory_space<vmem>>, vector<32x8x16xf32>
    %37 = vector.shape_cast %36 : vector<32x8x16xf32> to vector<32x128xf32>
    %38 = tpu.concatenate %33, %35, %37 in 0 : vector<32x128xf32>, vector<32x128xf32>, vector<32x128xf32> -> vector<96x128xf32>
    %c0_29 = arith.constant 0 : index
    %c0_30 = arith.constant 0 : index
    %c0_31 = arith.constant 0 : index
    %39 = vector.load %arg7[%c0_29, %c0_30, %c0_31] : memref<3x8x96xf32, #tpu.memory_space<vmem>>, vector<1x8x96xf32>
    %40 = vector.shape_cast %39 : vector<1x8x96xf32> to vector<8x96xf32>
    %cst_32 = arith.constant dense<0.000000e+00> : vector<8x128xf32>
    %41 = tpu.matmul %40, %38, %cst_32 {dimension_numbers = #tpu.dot_dimension_numbers<[1], [0], [0], [1], [0, 0, 1, 1], [], []>} : vector<8x96xf32>, vector<96x128xf32>, vector<8x128xf32> -> vector<8x128xf32>
    %42 = arith.addf %31, %41 : vector<8x128xf32>
    %c0_33 = arith.constant 0 : index
    %c1_34 = arith.constant 1 : index
    %c0_35 = arith.constant 0 : index
    %43 = vector.load %arg9[%c0_33, %c1_34, %c0_35] : memref<32x10x18xf32, #tpu.memory_space<vmem>>, vector<32x8x16xf32>
    %44 = vector.shape_cast %43 : vector<32x8x16xf32> to vector<32x128xf32>
    %c0_36 = arith.constant 0 : index
    %c1_37 = arith.constant 1 : index
    %c1_38 = arith.constant 1 : index
    %45 = vector.load %arg9[%c0_36, %c1_37, %c1_38] : memref<32x10x18xf32, #tpu.memory_space<vmem>>, vector<32x8x16xf32>
    %46 = vector.shape_cast %45 : vector<32x8x16xf32> to vector<32x128xf32>
    %c0_39 = arith.constant 0 : index
    %c1_40 = arith.constant 1 : index
    %c2_41 = arith.constant 2 : index
    %47 = vector.load %arg9[%c0_39, %c1_40, %c2_41] : memref<32x10x18xf32, #tpu.memory_space<vmem>>, vector<32x8x16xf32>
    %48 = vector.shape_cast %47 : vector<32x8x16xf32> to vector<32x128xf32>
    %49 = tpu.concatenate %44, %46, %48 in 0 : vector<32x128xf32>, vector<32x128xf32>, vector<32x128xf32> -> vector<96x128xf32>
    %c1_42 = arith.constant 1 : index
    %c0_43 = arith.constant 0 : index
    %c0_44 = arith.constant 0 : index
    %50 = vector.load %arg7[%c1_42, %c0_43, %c0_44] : memref<3x8x96xf32, #tpu.memory_space<vmem>>, vector<1x8x96xf32>
    %51 = vector.shape_cast %50 : vector<1x8x96xf32> to vector<8x96xf32>
    %cst_45 = arith.constant dense<0.000000e+00> : vector<8x128xf32>
    %52 = tpu.matmul %51, %49, %cst_45 {dimension_numbers = #tpu.dot_dimension_numbers<[1], [0], [0], [1], [0, 0, 1, 1], [], []>} : vector<8x96xf32>, vector<96x128xf32>, vector<8x128xf32> -> vector<8x128xf32>
    %53 = arith.addf %42, %52 : vector<8x128xf32>
    %c0_46 = arith.constant 0 : index
    %c2_47 = arith.constant 2 : index
    %c0_48 = arith.constant 0 : index
    %54 = vector.load %arg9[%c0_46, %c2_47, %c0_48] : memref<32x10x18xf32, #tpu.memory_space<vmem>>, vector<32x8x16xf32>
    %55 = vector.shape_cast %54 : vector<32x8x16xf32> to vector<32x128xf32>
    %c0_49 = arith.constant 0 : index
    %c2_50 = arith.constant 2 : index
    %c1_51 = arith.constant 1 : index
    %56 = vector.load %arg9[%c0_49, %c2_50, %c1_51] : memref<32x10x18xf32, #tpu.memory_space<vmem>>, vector<32x8x16xf32>
    %57 = vector.shape_cast %56 : vector<32x8x16xf32> to vector<32x128xf32>
    %c0_52 = arith.constant 0 : index
    %c2_53 = arith.constant 2 : index
    %c2_54 = arith.constant 2 : index
    %58 = vector.load %arg9[%c0_52, %c2_53, %c2_54] : memref<32x10x18xf32, #tpu.memory_space<vmem>>, vector<32x8x16xf32>
    %59 = vector.shape_cast %58 : vector<32x8x16xf32> to vector<32x128xf32>
    %60 = tpu.concatenate %55, %57, %59 in 0 : vector<32x128xf32>, vector<32x128xf32>, vector<32x128xf32> -> vector<96x128xf32>
    %c2_55 = arith.constant 2 : index
    %c0_56 = arith.constant 0 : index
    %c0_57 = arith.constant 0 : index
    %61 = vector.load %arg7[%c2_55, %c0_56, %c0_57] : memref<3x8x96xf32, #tpu.memory_space<vmem>>, vector<1x8x96xf32>
    %62 = vector.shape_cast %61 : vector<1x8x96xf32> to vector<8x96xf32>
    %cst_58 = arith.constant dense<0.000000e+00> : vector<8x128xf32>
    %63 = tpu.matmul %62, %60, %cst_58 {dimension_numbers = #tpu.dot_dimension_numbers<[1], [0], [0], [1], [0, 0, 1, 1], [], []>} : vector<8x96xf32>, vector<96x128xf32>, vector<8x128xf32> -> vector<8x128xf32>
    %64 = arith.addf %53, %63 : vector<8x128xf32>
    %c0_59 = arith.constant 0 : index
    %c0_60 = arith.constant 0 : index
    %c0_61 = arith.constant 0 : index
    %65 = vector.load %arg8[%c0_59, %c0_60, %c0_61] : memref<1x8x128xf32, #tpu.memory_space<vmem>>, vector<1x8x128xf32>
    %66 = vector.shape_cast %65 : vector<1x8x128xf32> to vector<8x128xf32>
    %67 = vector.shape_cast %64 : vector<8x128xf32> to vector<1x8x128xf32>
    tpu.vector_store %arg8[%c0_59, %c0_60, %c0_61], %67 {strides = array<i32>} : memref<1x8x128xf32, #tpu.memory_space<vmem>>, vector<1x8x128xf32>,
    return
  }
  func.func @transform_0(%arg0: i32, %arg1: i32) -> (i32, i32, i32, i32) {
    %c0_i32 = arith.constant 0 : i32
    %c0_i32_0 = arith.constant 0 : i32
    %c0_i32_1 = arith.constant 0 : i32
    %c0_i32_2 = arith.constant 0 : i32
    return %arg0, %c0_i32, %c0_i32_0, %c0_i32_1 : i32, i32, i32, i32
  }
  func.func @transform_1(%arg0: i32, %arg1: i32) -> (i32, i32) {
    %c0_i32 = arith.constant 0 : i32
    %c0_i32_0 = arith.constant 0 : i32
    %c0_i32_1 = arith.constant 0 : i32
    return %c0_i32, %c0_i32_0 : i32, i32
  }
  func.func @transform_2(%arg0: i32, %arg1: i32) -> (i32, i32) {
    %c0_i32 = arith.constant 0 : i32
    %c0_i32_0 = arith.constant 0 : i32
    %c0_i32_1 = arith.constant 0 : i32
    return %c0_i32, %c0_i32_0 : i32, i32
  }
  func.func @transform_3(%arg0: i32, %arg1: i32) -> (i32, i32) {
    %c0_i32 = arith.constant 0 : i32
    %c0_i32_0 = arith.constant 0 : i32
    %c0_i32_1 = arith.constant 0 : i32
    return %c0_i32, %c0_i32_0 : i32, i32
  }
  func.func @transform_4(%arg0: i32, %arg1: i32) -> (i32, i32) {
    %c0_i32 = arith.constant 0 : i32
    %c0_i32_0 = arith.constant 0 : i32
    %c0_i32_1 = arith.constant 0 : i32
    return %c0_i32, %c0_i32_0 : i32, i32
  }
  func.func @transform_5(%arg0: i32, %arg1: i32) -> (i32, i32, i32) {
    %c0_i32 = arith.constant 0 : i32
    %c0_i32_0 = arith.constant 0 : i32
    %c0_i32_1 = arith.constant 0 : i32
    %c0_i32_2 = arith.constant 0 : i32
    return %c0_i32, %c0_i32_0, %c0_i32_1 : i32, i32, i32
  }
  func.func @transform_6(%arg0: i32, %arg1: i32) -> (i32, i32, i32) {
    %c0_i32 = arith.constant 0 : i32
    %c0_i32_0 = arith.constant 0 : i32
    return %arg0, %c0_i32, %arg1 : i32, i32, i32
  }
}

</mosaic_0001>

<bundles_post_ra>
// kernel: tpu_custom_call.1
= control target key start
LH: loop header
LB: loop body
LE: loop exit
PB: predicated region body
PF: predicated region fallthrough
CT: control target
= control target key end

     0   :  { %s15462_s0 = inlined_call_operand.hbm [shape: f32[2,4,16,16], index: 0, kind: input, shape index: {}]   ;;  %s15463_s1 = inlined_call_operand.vmem [shape: f32[4,1], index: 1, kind: input, shape index: {}]   ;;  %s15464_s2 = inlined_call_operand.vmem [shape: f32[4,1], index: 2, kind: input, shape index: {}]   ;;  %s15465_s3 = inlined_call_operand.vmem [shape: f32[32,4], index: 3, kind: input, shape index: {}]   ;;  %s15466_s4 = inlined_call_operand.vmem [shape: f32[32,1], index: 4, kind: input, shape index: {}]   ;;  %s15467_s5 = inlined_call_operand.vmem [shape: f32[3,8,96], index: 5, kind: input, shape index: {}]   ;;  %s15468_s6 = inlined_call_operand.hbm [shape: f32[2,8,256], index: 6, kind: output, shape index: {}]  }
   0x1   :  { %15674 = sst [smem:[#allocation82_spill]] %s15468_s6 }
   0x2   :  { %11 = vsyncpa [#allocation4], 0 }
   0x3   :  { %13 = vsyncpa [#allocation4 + $0x1], 0 }
   0x4   :  { %14 = vsyncpa [#allocation5], 0 }
   0x5   :  { %16 = vsyncpa [#allocation5 + $0x1], 0  ;;  %s9609_s21 = smov 0   ;;  %s9611_s22 = smov 0  }
   0x6   :  { %s9613_s23 = smov 0   ;;  %s9615_s24 = smov 0  }
   0x7   :  { %s9617_s25 = smov 0   ;;  %s9619_s26 = smov 0  }
   0x8   :  { %s9621_s27 = smov 0   ;;  %s9623_s28 = smov 0  }
   0x9   :  { %s9625_s29 = smov 0   ;;  %s9627_s30 = smov 0  }
   0xa   :  { %s9629_s7 = smov 0  }
   0xb LB: > { %15675 = sst [smem:[#allocation9_spill]] %s9546_s29  ;;  %s8040_s8 = sadd.s32 4294967295, %s9554_s7   ;;  %s9554_s7 = sphi %s9629_s7, %s22_s7   ;;  %s9550_s30 = sphi %s9627_s30, %s16147_s30   ;;  %s9546_s29 = sphi %s9625_s29, %s16146_s29   ;;  %s9542_s28 = sphi %s9623_s28, %s16145_s28   ;;  %s9538_s27 = sphi %s9621_s27, %s16144_s27   ;;  %s9534_s26 = sphi %s9619_s26, %s16153_s26   ;;  %s9530_s25 = sphi %s9617_s25, %s16152_s25   ;;  %s9526_s24 = sphi %s9615_s24, %s16151_s24   ;;  %s9522_s23 = sphi %s9613_s23, %s16150_s23   ;;  %s9518_s22 = sphi %s9611_s22, %s16149_s22   ;;  %s9514_s21 = sphi %s9609_s21, %s16148_s21  }
   0xc   : > { %15676 = sst [smem:[#allocation10_spill]] %s9550_s30  ;;  %s8041_s9 = sadd.s32 4294967294, %s9554_s7  }
   0xd   : > { %s31_s10 = sadd.s32 1, %s9546_s29  ;;  %s34_s11 = sadd.s32 1, %s9550_s30 }
   0xe   : > { %p32_p0 = scmp.ge.s32.totalorder %s31_s10, 2  ;;  %s41_s12 = sadd.s32 1, %s9534_s26 }
   0xf   : > { %p48_p1 = scmp.ne.s32.totalorder %s9534_s26, %s9530_s25  ;;  %p49_p2 = scmp.eq.s32.totalorder %s9554_s7, 0 }
  0x10   : > { %s16155_s10 = smov (%p32_p0, %s31_s10), 0  ;;  %s16157_s11 = smov (!%p32_p0, %s34_s11), %s9550_s30 }
  0x11   : > { %15677 = sst [smem:[#allocation11_spill]] %s16155_s10  ;;  %p9673_p3 = por %p49_p2, %p48_p1 }
  0x12   : > { %p54_p4 = scmp.ne.s32.totalorder %s9530_s25, %s9526_s24  ;;  %p36_p5 = scmp.ge.s32.totalorder %s16157_s11, 2 }
  0x13   : > { %p55_p6 = scmp.eq.s32.totalorder %s8040_s8, 0  ;;  %s170_s14 = ssub.s32 %s9546_s29, %s16155_s10 }
  0x14   : > { %s174_s15 = sadd.s32 1, %s9522_s23  ;;  %s16159_s11 = smov (%p36_p5, %s16157_s11), 0 }
  0x15   : > { %15679 = sst [smem:[#allocation12_spill]] %s16159_s11  ;;  %p9683_p7 = por %p55_p6, %p54_p4 }
  0x16   : > { %p184_p8 = scmp.ne.s32.totalorder %s9522_s23, %s9518_s22  ;;  %s38_s17 = ssub.s32 %s9550_s30, %s16159_s11 }
  0x17   : > { %p185_p9 = scmp.eq.s32.totalorder %s8040_s8, 3  ;;  %p39_p10 = scmp.eq.s32.totalorder %s38_s17, 0 }
  0x18   : > { %s171_s18 = sor.u32 %s170_s14, %s38_s17  ;;  %p190_p13 = scmp.ne.s32.totalorder %s9518_s22, %s9514_s21 }
  0x19   : > { %p172_p11 = scmp.eq.s32.totalorder %s171_s18, 0  ;;  %p9691_p12 = por %p185_p9, %p184_p8 }
  0x1a   : > { %s9696_s20 = scalar_select %p39_p10, %s9534_s26, %s41_s12  }
  0x1b   : > { %s9699_s24 = scalar_select %p172_p11, %s9522_s23, %s174_s15  }
  0x1c   : > { %15682 = sst [smem:[#allocation13_spill]] %s9696_s20  ;;  %p191_p0 = scmp.eq.s32.totalorder %s8041_s9, 3 }
  0x1d   : > { %15683 = sst [smem:[#allocation14_spill]] %s9699_s24  ;;  %p8106_p1 = scmp.lt.s32.totalorder %s9554_s7, 4 }
  0x1e   : > { %p9704_p2 = por %p191_p0, %p190_p13  ;;  %s226_s8 = sand.u32 1, %s9534_s26  }
  0x1f   : > { %s8044_s14 = sshll.u32 %s226_s8, 6  ;;  %s8084_s17 = sshll.u32 %s9550_s30, 6 }
  0x20   : > { %s235_s29 = scalar_lea.hbm %s15462_s0, %s8084_s17  ;;  %s230_s12 = scalar_lea.vmem [#allocation3], %s8044_s14 }
  0x21   : > { %s238_s20 = sshll.u32 %s230_s12, 4  ;;  %s236_s6 = sshll.u32 %s235_s29, 4  ;;  %s239_s20 = int_to_ptr.vmem [resolvable:$true] %s238_s20  ;;  %s237_s6 = int_to_ptr.hbm [resolvable:$true] %s236_s6 }
  0x22   : > { %p8099_p4 = pnand %p8106_p1, %p9673_p3  ;;  %p8047_p5 = scmp.ge.s32.totalorder %s9554_s7, 1 }
  0x23   : > { %s227_s9 = scalar_lea.sflag [#allocation4], %s226_s8  ;;  %s9556_s15 = smov 128  }
  0x24   : > { %s9557_s24 = smov 8   ;;  %p246_p6 = scmp.lt.s32.totalorder %s9554_s7, 5 }
  0x25   : > { %8101 = dma.hbm_to_vmem [thread:$0]  (!%p8099_p4), %s237_s6, 1024, %s239_s20, %s227_s9, %s9556_s15, %s9556_s15, %s9557_s24  }
  0x26   : > { %p247_p8 = pnand %p8047_p5, %p246_p6 }
  0x28   : > { %250 = sbr.rel (%p247_p8) target bundleno = 3035 (0xbdb), region = 44 }
  0x2d   : > { %s252_s30 = sand.u32 1, %s9530_s25  }
  0x2e   : > { %s9718_s11 = sshll.u32 %s252_s30, 6  ;;  %s253_s14 = scalar_lea.sflag [#allocation4], %s252_s30 }
  0x2f   : > { %s15474_s29 = scalar_lea.vmem [#allocation3], %s9718_s11 }
  0x30   : > { %9505 = dma.done.wait (%p9683_p7), %s253_s14, 1024  }
  0x31   : > { %9507 = vsyncadd (%p9683_p7), %s253_s14, 4294966272  ;;  %s15475_s6 = sshll.u32 %s9538_s27, 3  ;;  %v9558_v0 = vmov 0   ;;  %v9559_v1 = vmov 1983009808   ;;  %vm369_vm0 = vcmask 1047556  }
  0x32   : > { %8214 = vset.pattern.permute.xlu1 %v9558_v0  ;;  %8215 = vset.pattern.permute.xlu2 %v9558_v0  ;;  %v374_v2 = vunpack.c.l.s4 %v9559_v1  ;;  %s9730_s13 = scalar_lea.vmem %s15474_s29, %s15475_s6 [#allocation3]  ;;  %v9560_v11 = vmov 1934713408   ;;  %s9561_s30 = smov 64   ;;  %v287_v43 = vld [vmem:[%s15463_s1] sm:$0xf]  ;;  %v294_v45 = vld [vmem:[%s15466_s4 + $0x8] sm:$0xff] }
  0x33   : > { %8216 = vset.pattern.permute.xlu0 %v9558_v0  ;;  %v364_v3 = vld [vmem:[%s9730_s13] sm:$0xff]  ;;  %v365_v4 = vld [vmem:[%s9730_s13 + $0x10] sm:$0xff]  ;;  %v398_v12 = vunpack.c.l.s4 %v9560_v11  ;;  %s15479_s16 = smov 32   ;;  %s9563_s20 = smov 96   ;;  %v296_v47 = vld [vmem:[%s15466_s4 + $0x18] sm:$0xff]  ;;  %vm453_vm1 = vcmask 130048  }
  0x34   : > { %v366_v5 = vld [vmem:[%s9730_s13 + $0x20] sm:$0xff]  ;;  %v9735_v6 = vunpack.c.0.s8 %v374_v2  ;;  %v367_v7 = vld [vmem:[%s9730_s13 + $0x30] sm:$0xff]  ;;  %v371_v9 = vrot.slane %v364_v3, 4  ;;  %v383_v10 = vrot.slane %v365_v4, 4  ;;  %s15483_s24 = smov 48   ;;  %s15476_s8 = smov 16  }
  0x35   : > { %v368_v8 = vrot.slane %v366_v5, 4  ;;  %v381_v13 = vrot.slane %v367_v7, 4  ;;  %v9745_v21 = vunpack.c.0.s8 %v398_v12  ;;  %s15482_s17 = sand.u32 1, %s9518_s22   ;;  %s9566_s18 = smov 80   ;;  %v288_v44 = vld [vmem:[%s15464_s2] sm:$0xf] }
  0x36   : > { %15685 = vst [vmem:[#allocation15_spill] sm:$0xff] %v9735_v6  ;;  %v372_v14 = vsel %vm369_vm0, %v366_v5, %v371_v9  ;;  %v384_v15 = vsel %vm369_vm0, %v367_v7, %v383_v10  ;;  %s9768_s12 = sshll.u32 %s15482_s17, 3  ;;  %s9567_s6 = smov 112   ;;  %v295_v46 = vld [vmem:[%s15466_s4 + $0x10] sm:$0xff]  ;;  %v293_v51 = vld [vmem:[%s15466_s4] sm:$0xff]  ;;  %vm455_vm2 = vcmask 261120  }
  0x37   : > { %v370_v16 = vsel %vm369_vm0, %v368_v8, %v364_v3  ;;  %v380_v17 = vperm.slane %v372_v14, %v9735_v6  ;;  %v392_v18 = vperm.slane %v384_v15, %v9735_v6  ;;  %v382_v20 = vsel %vm369_vm0, %v381_v13, %v365_v4  ;;  %v9806_v4 = vld [vmem:[%s15465_s3] sm:$0xff]  ;;  %v9811_v5 = vld [vmem:[%s15465_s3 + $0x8] sm:$0xff]  ;;  %v9818_v7 = vld [vmem:[%s15465_s3 + $0x10] sm:$0xff]  ;;  %s9568_s17 = smov 1   ;;  %s285_s9 = scalar_lea.vmem [#allocation6], %s9768_s12 }
  0x38   : > { %v376_v19 = vperm.slane %v370_v16, %v9735_v6  ;;  %v388_v22 = vperm.slane %v382_v20, %v9735_v6  ;;  %vm457_vm3 = vcmask 392192   ;;  %vm459_vm4 = vcmask 523264   ;;  %v9823_v8 = vld [vmem:[%s15465_s3 + $0x18] sm:$0xff]  ;;  %p8056_p3 = scmp.le.s32.totalorder %s9538_s27, 0 }
  0x39   : > { %v405_v23 = vrot.slane %v392_v18, 4  ;;  %v407_v24 = vrot.slane %v380_v17, 4  ;;  %vm461_vm5 = vcmask 654336   ;;  %vm463_vm6 = vcmask 785408   ;;  %s15689_s15 = sshll.u32 (!%p8056_p3), %s9538_s27, 3  ;;  %s15690_s14 = scalar_lea.vmem (!%p8056_p3), [#allocation3], %s9718_s11 }
  0x3a   : > { %v395_v25 = vrot.slane %v376_v19, 4  ;;  %v393_v26 = vrot.slane %v388_v22, 4  ;;  %vm465_vm7 = vcmask 916480   ;;  %vm513_vm8 = vcmask 1043456   ;;  %s8057_s29 = sadd.s32 (!%p8056_p3), 4294967295, %s15689_s15  ;;  %s9570_s11 = smov (!%p8056_p3), 1  }
  0x3b   : > { %v406_v27 = vsel %vm369_vm0, %v405_v23, %v380_v17  ;;  %v408_v29 = vsel %vm369_vm0, %v392_v18, %v407_v24  ;;  %vm500_vm9 = vcmask 31744   ;;  %vm297_vm10 = vcmask 146432  }
  0x3c   : > { %v396_v28 = vsel %vm369_vm0, %v388_v22, %v395_v25  ;;  %v412_v30 = vperm.slane %v406_v27, %v9745_v21  ;;  %v394_v32 = vsel %vm369_vm0, %v393_v26, %v376_v19  ;;  %v416_v34 = vperm.slane %v408_v29, %v9745_v21 }
  0x3d   : > { %v404_v31 = vperm.slane %v396_v28, %v9745_v21  ;;  %v400_v33 = vperm.slane %v394_v32, %v9745_v21  ;;  %vm299_vm11 = vcmask 140288   ;;  %vm1214_vm12 = vcmask 138248  }
  0x3e   : > { %438 = vrot.lane.b32.xlu1 %v412_v30, %s9561_s30  ;;  %446 = vrot.lane.b32.xlu2 %v416_v34, %s9563_s20  ;;  %v421_v37 = vrot.slane %v412_v30, 4  ;;  %v423_v41 = vrot.slane %v416_v34, 4 }
  0x3f   : > { %430 = vrot.lane.b32.xlu0 %v404_v31, %s15479_s16  ;;  %v419_v35 = vrot.slane %v404_v31, 4  ;;  %v417_v36 = vrot.slane %v400_v33, 4  ;;  %s15686_s16 = smov 48  }
  0x40   : > { %v422_v40 = vsel %vm369_vm0, 0.0, %v421_v37  ;;  %v424_v42 = vsel %vm369_vm0, 0.0, %v423_v41 }
  0x41   : > { %v420_v38 = vsel %vm369_vm0, 0.0, %v419_v35  ;;  %v418_v39 = vsel %vm369_vm0, 0.0, %v417_v36 }
  0x46   : > { %434 = vrot.lane.b32.xlu1 %v420_v38, %s15483_s24  ;;  %442 = vrot.lane.b32.xlu2 %v422_v40, %s9566_s18  ;;  %s15687_s24 = smov 32  }
  0x47   : > { %426 = vrot.lane.b32.xlu0 %v418_v39, %s15476_s8  ;;  %s15688_s8 = smov 16  }
  0x4e   : > { %469 = vperm.xlu1 %8214, %v287_v43   ;;  %475 = vperm.xlu2 %8215, %v288_v44  }
  0x4f   : > { %450 = vrot.lane.b32.xlu0 %v424_v42, %s9567_s6 }
  0x56   : > { %487 = vperm.xlu1 %8214, %v294_v45   ;;  %492 = vperm.xlu2 %8215, %v295_v46  }
  0x57   : > { %482 = vperm.xlu0 %8216, %v293_v51  }
  0x5e   : > { %497 = vperm.xlu1 %8214, %v296_v47  }
  0x98   : > { %v447_v48 = vpop.permute.xlu2 %446 }
  0xa0   : > { %v443_v54 = vpop.permute.xlu2 %442 }
  0xa8   : > { %v9800_v1 = vpop.permute.xlu2 %475 }
  0xb0   : > { %v439_v49 = vpop.permute.xlu1 %438  ;;  %v9860_v18 = vpop.permute.xlu2 %492 }
  0xb1   : > { %v431_v50 = vpop.permute.xlu0 %430 }
  0xb8   : > { %v435_v52 = vpop.permute.xlu1 %434 }
  0xb9   : > { %v427_v53 = vpop.permute.xlu0 %426 }
  0xba   : > { %v454_v55 = vsel %vm453_vm1, %v400_v33, %v427_v53 }
  0xbb   : > { %v456_v56 = vsel %vm455_vm2, %v454_v55, %v431_v50 }
  0xbc   : > { %v458_v57 = vsel %vm457_vm3, %v456_v56, %v435_v52 }
  0xbd   : > { %v460_v58 = vsel %vm459_vm4, %v458_v57, %v439_v49 }
  0xbe   : > { %v462_v59 = vsel %vm461_vm5, %v460_v58, %v443_v54 }
  0xbf   : > { %v464_v61 = vsel %vm463_vm6, %v462_v59, %v447_v48 }
  0xc0   : > { %v9796_v62 = vpop.permute.xlu1 %469 }
  0xc1   : > { %v451_v60 = vpop.permute.xlu0 %450 }
  0xc2   : > { %v466_v63 = vsel %vm465_vm7, %v464_v61, %v451_v60 }
  0xc3   : > { %v472_v0 = vmul.f32 %v9796_v62, %v466_v63 }
  0xc5   : > { %v478_v2 = vadd.f32 %v9800_v1, %v472_v0 }
  0xc7   : > { %v479_v3 = vmax.f32 %v478_v2, 0.0 }
  0xc8   : > { %v9837_v10 = vpop.permute.xlu1 %487 }
  0xc9   : > { %8051 = vmatpush.msk.msra.mxu0 %vm513_vm8, %v479_v3  ;;  %8085 = vmatpush.msk.msra.mxu1 %vm513_vm8, %v479_v3  ;;  %v9835_v9 = vpop.permute.xlu0 %482 }
  0xca   : > { %8086 = vmatpush.msk.msra.mxu2 %vm513_vm8, %v479_v3  ;;  %8087 = vmatpush.msk.msra.mxu3 %vm513_vm8, %v479_v3 }
  0xcb   : > { %8052 = vmatmul.msk.f32.vlgmr.msra.gmra.mxu0 %vm500_vm9, %v9806_v4  ;;  %8053 = vmatmul.msk.f32.vlgmr.msra.gmra.mxu1 %vm500_vm9, %v9811_v5 }
  0xcc   : > { %8054 = vmatmul.msk.f32.vlgmr.msra.gmra.mxu2 %vm500_vm9, %v9818_v7  ;;  %8055 = vmatmul.msk.f32.vlgmr.msra.gmra.mxu3 %vm500_vm9, %v9823_v8 }
  0xd0   : > { %v9869_v23 = vpop.permute.xlu1 %497 }
 0x148   : > { %v534_v11 = vpop.f32.mrf.mxu0  ;;  %v537_v12 = vpop.f32.mrf.mxu1 }
 0x149   : > { %v535_v13 = vadd.f32 %v534_v11, %v9835_v9  ;;  %v538_v14 = vadd.f32 %v537_v12, %v9837_v10 }
 0x14b   : > { %v546_v15 = vmax.f32 %v535_v13, 0.0  ;;  %v9841_v16 = vmax.f32 %v538_v14, 0.0 }
 0x14d   : > { %554 = vrot.lane.b32.xlu2 %v546_v15, %s9567_s6  ;;  %568 = vrot.lane.b32.xlu1 %v9841_v16, %s9563_s20  ;;  %v640_v34 = vrot.slane %v546_v15, 4  ;;  %v752_v36 = vrot.slane %v9841_v16, 4 }
 0x14e   : > { %556 = vrot.lane.b32.xlu0 %v9841_v16, %s9567_s6 }
 0x14f   : > { %v540_v17 = vpop.f32.mrf.mxu2  ;;  %v543_v22 = vpop.f32.mrf.mxu3 }
 0x150   : > { %v541_v19 = vadd.f32 %v540_v17, %v9860_v18  ;;  %v544_v24 = vadd.f32 %v543_v22, %v9869_v23 }
 0x152   : > { %v9864_v20 = vmax.f32 %v541_v19, 0.0  ;;  %v9874_v25 = vmax.f32 %v544_v24, 0.0 }
 0x155   : > { %580 = vrot.lane.b32.xlu2 %v9841_v16, %s9566_s18  ;;  %578 = vrot.lane.b32.xlu1 %v546_v15, %s9566_s18 }
 0x156   : > { %566 = vrot.lane.b32.xlu0 %v546_v15, %s9563_s20 }
 0x15d   : > { %590 = vrot.lane.b32.xlu2 %v546_v15, %s9561_s30  ;;  %604 = vrot.lane.b32.xlu1 %v9841_v16, %s15686_s16 }
 0x15e   : > { %592 = vrot.lane.b32.xlu0 %v9841_v16, %s9561_s30 }
 0x165   : > { %616 = vrot.lane.b32.xlu2 %v9841_v16, %s15687_s24  ;;  %614 = vrot.lane.b32.xlu1 %v546_v15, %s15687_s24 }
 0x166   : > { %602 = vrot.lane.b32.xlu0 %v546_v15, %s15686_s16 }
 0x16d   : > { %626 = vrot.lane.b32.xlu2 %v546_v15, %s15688_s8  ;;  %558 = vrot.lane.b32.xlu1 %v9864_v20, %s9567_s6 }
 0x16e   : > { %628 = vrot.lane.b32.xlu0 %v9841_v16, %s15688_s8 }
 0x175   : > { %584 = vrot.lane.b32.xlu1 %v9874_v25, %s9566_s18  ;;  %560 = vrot.lane.b32.xlu2 %v9874_v25, %s9567_s6 }
 0x176   : > { %572 = vrot.lane.b32.xlu0 %v9874_v25, %s9563_s20 }
 0x17d   : > { %594 = vrot.lane.b32.xlu1 %v9864_v20, %s9561_s30  ;;  %570 = vrot.lane.b32.xlu2 %v9864_v20, %s9563_s20 }
 0x17e   : > { %582 = vrot.lane.b32.xlu0 %v9864_v20, %s9566_s18 }
 0x185   : > { %620 = vrot.lane.b32.xlu1 %v9874_v25, %s15687_s24  ;;  %596 = vrot.lane.b32.xlu2 %v9874_v25, %s9561_s30 }
 0x186   : > { %608 = vrot.lane.b32.xlu0 %v9874_v25, %s15686_s16 }
 0x18d   : > { %630 = vrot.lane.b32.xlu1 %v9864_v20, %s15688_s8  ;;  %606 = vrot.lane.b32.xlu2 %v9864_v20, %s15686_s16  ;;  %s1252_s16 = scalar_lea.vmem (!%p8056_p3), %s15690_s14, %s8057_s29 [#allocation3] }
 0x18e   : > { %618 = vrot.lane.b32.xlu0 %v9864_v20, %s15687_s24 }
 0x195   : > { %632 = vrot.lane.b32.xlu2 %v9874_v25, %s15688_s8 }
 0x1a7   : > { %v555_v26 = vpop.permute.xlu2 %554 }
 0x1a8   : > { %v652_v43 = vrot.slane %v555_v26, 4 }
 0x1af   : > { %v9902_v27 = vpop.permute.xlu2 %580 }
 0x1b0   : > { %v762_v14 = vrot.slane %v9902_v27, 4 }
 0x1b7   : > { %v591_v29 = vpop.permute.xlu2 %590 }
 0x1b8   : > { %v664_v53 = vrot.slane %v591_v29, 4 }
 0x1bf   : > { %v9904_v28 = vpop.permute.xlu1 %568  ;;  %v9908_v33 = vpop.permute.xlu2 %616 }
 0x1c0   : > { %v9906_v30 = vpop.permute.xlu0 %556  ;;  %v753_v40 = vsel %vm369_vm0, %v9904_v28, %v752_v36 }
 0x1c1   : > { %v764_v39 = vrot.slane %v9906_v30, 4  ;;  %v9924_v46 = vperm.slane %v753_v40, %v9735_v6 }
 0x1c3   : > { %v765_v48 = vsel %vm369_vm0, %v9902_v27, %v764_v39  ;;  %v812_v56 = vrot.slane %v9924_v46, 4 }
 0x1c4   : > { %v9934_v55 = vperm.slane %v765_v48, %v9735_v6 }
 0x1c7   : > { %v579_v31 = vpop.permute.xlu1 %578  ;;  %v627_v49 = vpop.permute.xlu2 %626 }
 0x1c8   : > { %v567_v32 = vpop.permute.xlu0 %566  ;;  %v650_v44 = vrot.slane %v579_v31, 4  ;;  %v653_v47 = vsel %vm369_vm0, %v579_v31, %v652_v43  ;;  %v674_v57 = vrot.slane %v627_v49, 4  ;;  %v774_v31 = vrot.slane %v9908_v33, 4 }
 0x1c9   : > { %v641_v35 = vsel %vm369_vm0, %v567_v32, %v640_v34  ;;  %v638_v37 = vrot.slane %v567_v32, 4  ;;  %v661_v54 = vperm.slane %v653_v47, %v9735_v6 }
 0x1ca   : > { %v9918_v41 = vperm.slane %v641_v35, %v9735_v6  ;;  %v651_v52 = vsel %vm369_vm0, %v650_v44, %v555_v26  ;;  %v750_v35 = vrot.slane %v9904_v28, 4 }
 0x1cb   : > { %v639_v45 = vsel %vm369_vm0, %v638_v37, %v546_v15  ;;  %v657_v60 = vperm.slane %v651_v52, %v9735_v6  ;;  %v813_v37 = vsel %vm369_vm0, %v9934_v55, %v812_v56  ;;  %v698_v39 = vrot.slane %v661_v54, 4 }
 0x1cc   : > { %v700_v50 = vrot.slane %v9918_v41, 4  ;;  %v645_v51 = vperm.slane %v639_v45, %v9735_v6 }
 0x1cd   : > { %v686_v32 = vrot.slane %v657_v60, 4 }
 0x1ce   : > { %v701_v61 = vsel %vm369_vm0, %v661_v54, %v700_v50  ;;  %v688_v3 = vrot.slane %v645_v51, 4  ;;  %v9980_v54 = vperm.slane %v813_v37, %v9745_v21 }
 0x1cf   : > { %v9912_v38 = vpop.permute.xlu1 %604  ;;  %v9951_v26 = vperm.slane %v701_v61, %v9745_v21  ;;  %v9962_v43 = vpop.permute.xlu2 %560  ;;  %v687_v56 = vsel %vm369_vm0, %v686_v32, %v645_v51  ;;  %v763_v51 = vsel %vm369_vm0, %v762_v14, %v9906_v30 }
 0x1d0   : > { %v9920_v42 = vpop.permute.xlu0 %592  ;;  %v788_v45 = vrot.slane %v9912_v38, 4 }
 0x1d1   : > { %v776_v58 = vrot.slane %v9920_v42, 4  ;;  %v748_v48 = vrot.slane %v9951_v26, 4 }
 0x1d3   : > { %v777_v19 = vsel %vm369_vm0, %v9908_v33, %v776_v58 }
 0x1d4   : > { %v9960_v40 = vperm.slane %v777_v19, %v9735_v6 }
 0x1d6   : > { %v836_v61 = vrot.slane %v9960_v40, 4 }
 0x1d7   : > { %v615_v59 = vpop.permute.xlu1 %614  ;;  %v10023_v37 = vpop.permute.xlu2 %570 }
 0x1d8   : > { %v603_v63 = vpop.permute.xlu0 %602  ;;  %v662_v0 = vrot.slane %v615_v59, 4  ;;  %v665_v2 = vsel %vm369_vm0, %v615_v59, %v664_v53 }
 0x1d9   : > { %v675_v11 = vsel %vm369_vm0, %v674_v57, %v603_v63  ;;  %v676_v12 = vrot.slane %v603_v63, 4  ;;  %v673_v13 = vperm.slane %v665_v2, %v9735_v6 }
 0x1da   : > { %v681_v15 = vperm.slane %v675_v11, %v9735_v6  ;;  %v663_v17 = vsel %vm369_vm0, %v662_v0, %v591_v29  ;;  %v689_v29 = vsel %vm369_vm0, %v657_v60, %v688_v3  ;;  %v693_v11 = vperm.slane %v687_v56, %v9745_v21 }
 0x1db   : > { %v677_v22 = vsel %vm369_vm0, %v627_v49, %v676_v12  ;;  %v669_v24 = vperm.slane %v663_v17, %v9735_v6  ;;  %v724_v27 = vrot.slane %v673_v13, 4  ;;  %v9974_v52 = vperm.slane %v689_v29, %v9745_v21 }
 0x1dc   : > { %v685_v34 = vperm.slane %v677_v22, %v9735_v6  ;;  %v710_v44 = vrot.slane %v681_v15, 4  ;;  %v699_v12 = vsel %vm369_vm0, %v698_v39, %v9918_v41  ;;  %v751_v29 = vsel %vm369_vm0, %v750_v35, %v9841_v16 }
 0x1dd   : > { %v712_v36 = vrot.slane %v669_v24, 4 }
 0x1de   : > { %v725_v33 = vsel %vm369_vm0, %v685_v34, %v724_v27  ;;  %v722_v57 = vrot.slane %v685_v34, 4  ;;  %v711_v2 = vsel %vm369_vm0, %v710_v44, %v669_v24  ;;  %v705_v24 = vperm.slane %v699_v12, %v9745_v21 }
 0x1df   : > { %v9966_v47 = vpop.permute.xlu1 %558  ;;  %v9969_v28 = vperm.slane %v725_v33, %v9745_v21  ;;  %v713_v49 = vsel %vm369_vm0, %v681_v15, %v712_v36  ;;  %v775_v15 = vsel %vm369_vm0, %v774_v31, %v9920_v42  ;;  %v717_v41 = vperm.slane %v711_v2, %v9745_v21 }
 0x1e0   : > { %v629_v50 = vpop.permute.xlu0 %628  ;;  %v9977_v53 = vperm.slane %v713_v49, %v9745_v21  ;;  %v723_v14 = vsel %vm369_vm0, %v722_v57, %v673_v13  ;;  %v769_v31 = vperm.slane %v763_v51, %v9735_v6  ;;  %v781_v32 = vperm.slane %v775_v15, %v9735_v6 }
 0x1e1   : > { %v786_v58 = vrot.slane %v629_v50, 4  ;;  %v789_v59 = vsel %vm369_vm0, %v629_v50, %v788_v45  ;;  %v749_v60 = vsel %vm369_vm0, %v9969_v28, %v748_v48  ;;  %v736_v36 = vrot.slane %v693_v11, 4 }
 0x1e2   : > { %v9988_v63 = vperm.slane %v789_v59, %v9735_v6  ;;  %1132 = vrot.lane.b32.xlu1 %v749_v60, %s9568_s17  ;;  %v738_v0 = vrot.slane %v9977_v53, 4  ;;  %v729_v13 = vperm.slane %v723_v14, %v9745_v21  ;;  %v744_v45 = vrot.slane %v705_v24, 4 }
 0x1e3   : > { %v787_v3 = vsel %vm369_vm0, %v786_v58, %v9912_v38  ;;  %v860_v38 = vrot.slane %v9980_v54, 4  ;;  %v737_v44 = vsel %vm369_vm0, %v717_v41, %v736_v36  ;;  %v798_v48 = vrot.slane %v769_v31, 4 }
 0x1e4   : > { %v793_v17 = vperm.slane %v787_v3, %v9735_v6  ;;  %v739_v19 = vsel %vm369_vm0, %v738_v0, %v9974_v52  ;;  %v837_v22 = vsel %vm369_vm0, %v9988_v63, %v836_v61  ;;  %v757_v49 = vperm.slane %v751_v29, %v9735_v6 }
 0x1e5   : > { %1122 = vrot.lane.b32.xlu2 %v739_v19, %s9568_s17  ;;  %v10009_v30 = vperm.slane %v837_v22, %v9745_v21  ;;  %v734_v50 = vrot.slane %v717_v41, 4  ;;  %v824_v16 = vrot.slane %v781_v32, 4  ;;  %v745_v35 = vsel %vm369_vm0, %v729_v13, %v744_v45  ;;  %v10048_v19 = vpop.permute.xlu2 %596 }
 0x1e6   : > { %v822_v42 = vrot.slane %v793_v17, 4  ;;  %v742_v57 = vrot.slane %v729_v13, 4  ;;  %v800_v59 = vrot.slane %v757_v49, 4  ;;  %v799_v0 = vsel %vm369_vm0, %v798_v48, %v757_v49 }
 0x1e7   : > { %v861_v34 = vsel %vm369_vm0, %v10009_v30, %v860_v38  ;;  %v10019_v27 = vpop.permute.xlu1 %584  ;;  %v825_v58 = vsel %vm369_vm0, %v793_v17, %v824_v16  ;;  %v735_v60 = vsel %vm369_vm0, %v734_v50, %v693_v11  ;;  %v810_v15 = vrot.slane %v9934_v55, 4 }
 0x1e8   : > { %v10025_v39 = vpop.permute.xlu0 %572  ;;  %1148 = vrot.lane.b32.xlu0 %v861_v34, %s9568_s17  ;;  %v823_v33 = vsel %vm369_vm0, %v822_v42, %v781_v32  ;;  %v743_v3 = vsel %vm369_vm0, %v742_v57, %v705_v24  ;;  %v833_v12 = vperm.slane %v825_v58, %v9745_v21  ;;  %v10052_v11 = vperm.slane %v799_v0, %v9745_v21 }
 0x1e9   : > { %v10035_v56 = vperm.slane %v823_v33, %v9745_v21  ;;  %v801_v17 = vsel %vm369_vm0, %v769_v31, %v800_v59  ;;  %v740_v38 = vrot.slane %v9974_v52, 4  ;;  %v811_v55 = vsel %vm369_vm0, %v810_v15, %v9924_v46 }
 0x1ea   : > { %1120 = vrot.lane.b32.xlu1 %v737_v44, %s9568_s17  ;;  %v850_v41 = vrot.slane %v833_v12, 4  ;;  %v834_v14 = vrot.slane %v9988_v63, 4  ;;  %v809_v42 = vperm.slane %v801_v17, %v9745_v21  ;;  %v864_v24 = vrot.slane %v9864_v20, 4 }
 0x1eb   : > { %v846_v51 = vrot.slane %v10035_v56, 4  ;;  %v741_v31 = vsel %vm369_vm0, %v9977_v53, %v740_v38  ;;  %v10075_v63 = vperm.slane %v811_v55, %v9745_v21  ;;  %v876_v29 = vrot.slane %v9966_v47, 4 }
 0x1ec   : > { %v865_v52 = vsel %vm369_vm0, %v10023_v37, %v864_v24  ;;  %v851_v46 = vsel %vm369_vm0, %v850_v41, %v809_v42  ;;  %v852_v53 = vrot.slane %v809_v42, 4  ;;  %v746_v13 = vrot.slane %v9969_v28, 4 }
 0x1ed   : > { %1128 = vrot.lane.b32.xlu2 %v745_v35, %s9568_s17  ;;  %v847_v22 = vsel %vm369_vm0, %v846_v51, %v10052_v11  ;;  %v835_v44 = vsel %vm369_vm0, %v834_v14, %v9960_v40  ;;  %v10083_v33 = vperm.slane %v865_v52, %v9735_v6  ;;  %v607_v45 = vpop.permute.xlu2 %606  ;;  %v862_v28 = vrot.slane %v10023_v37, 4 }
 0x1ee   : > { %v853_v50 = vsel %vm369_vm0, %v833_v12, %v852_v53  ;;  %v10091_v16 = vperm.slane %v835_v44, %v9745_v21  ;;  %v747_v40 = vsel %vm369_vm0, %v746_v13, %v9951_v26  ;;  %v856_v35 = vrot.slane %v10075_v63, 4 }
 0x1ef   : > { %v10040_v61 = vpop.permute.xlu1 %594  ;;  %v900_v57 = vrot.slane %v607_v45, 4  ;;  %v924_v0 = vrot.slane %v10083_v33, 4  ;;  %v858_v51 = vrot.slane %v10009_v30, 4  ;;  %v863_v17 = vsel %vm369_vm0, %v862_v28, %v9864_v20 }
 0x1f0   : > { %v583_v2 = vpop.permute.xlu0 %582  ;;  %1118 = vrot.lane.b32.xlu0 %v735_v60, %s9568_s17  ;;  %v888_v59 = vrot.slane %v10040_v61, 4  ;;  %v857_v15 = vsel %vm369_vm0, %v10091_v16, %v856_v35 }
 0x1f1   : > { %v874_v34 = vrot.slane %v583_v2, 4  ;;  %v877_v49 = vsel %vm369_vm0, %v583_v2, %v876_v29 }
 0x1f2   : > { %1126 = vrot.lane.b32.xlu1 %v743_v3, %s9568_s17 }
 0x1f3   : > { %v875_v48 = vsel %vm369_vm0, %v874_v34, %v9966_v47  ;;  %v10099_v47 = vperm.slane %v877_v49, %v9735_v6  ;;  %v869_v34 = vperm.slane %v863_v17, %v9735_v6 }
 0x1f4   : > { %v881_v58 = vperm.slane %v875_v48, %v9735_v6 }
 0x1f5   : > { %1134 = vrot.lane.b32.xlu2 %v847_v22, %s9568_s17  ;;  %v925_v30 = vsel %vm369_vm0, %v10099_v47, %v924_v0  ;;  %v912_v48 = vrot.slane %v869_v34, 4  ;;  %v633_v35 = vpop.permute.xlu2 %632 }
 0x1f6   : > { %v910_v41 = vrot.slane %v881_v58, 4  ;;  %v10127_v29 = vperm.slane %v925_v30, %v9745_v21 }
 0x1f7   : > { %v10066_v32 = vpop.permute.xlu1 %620 }
 0x1f8   : > { %v10068_v36 = vpop.permute.xlu0 %608  ;;  %1124 = vrot.lane.b32.xlu0 %v741_v31, %s9568_s17  ;;  %v859_v31 = vsel %vm369_vm0, %v858_v51, %v9980_v54  ;;  %v911_v13 = vsel %vm369_vm0, %v910_v41, %v869_v34  ;;  %v998_v49 = vrot.slane %v10066_v32, 4  ;;  %v974_v51 = vrot.slane %v10025_v39, 4 }
 0x1f9   : > { %v917_v28 = vperm.slane %v911_v13, %v9745_v21 }
 0x1fa   : > { %1138 = vrot.lane.b32.xlu1 %v851_v46, %s9568_s17  ;;  %v848_v46 = vrot.slane %v10052_v11, 4  ;;  %v975_v41 = vsel %vm369_vm0, %v974_v51, %v9874_v25 }
 0x1fc   : > { %v849_v53 = vsel %vm369_vm0, %v10035_v56, %v848_v46 }
 0x1fd   : > { %1140 = vrot.lane.b32.xlu2 %v853_v50, %s9568_s17  ;;  %v972_v50 = vrot.slane %v10127_v29, 4 }
 0x1ff   : > { %v631_v60 = vpop.permute.xlu1 %630 }
 0x200   : > { %v619_v2 = vpop.permute.xlu0 %618  ;;  %1130 = vrot.lane.b32.xlu0 %v747_v40, %s9568_s17  ;;  %v898_v37 = vrot.slane %v631_v60, 4  ;;  %v901_v12 = vsel %vm369_vm0, %v631_v60, %v900_v57  ;;  %v986_v40 = vrot.slane %v10019_v27, 4  ;;  %v854_v57 = vrot.slane %v10091_v16, 4 }
 0x201   : > { %v886_v26 = vrot.slane %v619_v2, 4  ;;  %v889_v3 = vsel %vm369_vm0, %v619_v2, %v888_v59  ;;  %v909_v20 = vperm.slane %v901_v12, %v9735_v6  ;;  %v913_v59 = vsel %vm369_vm0, %v881_v58, %v912_v48 }
 0x202   : > { %v897_v22 = vperm.slane %v889_v3, %v9735_v6  ;;  %v899_v38 = vsel %vm369_vm0, %v898_v37, %v607_v45  ;;  %1144 = vrot.lane.b32.xlu1 %v857_v15, %s9568_s17  ;;  %v999_v16 = vsel %vm369_vm0, %v998_v49, %v10048_v19  ;;  %v921_v58 = vperm.slane %v913_v59, %v9745_v21 }
 0x203   : > { %v887_v55 = vsel %vm369_vm0, %v886_v26, %v10040_v61  ;;  %v905_v14 = vperm.slane %v899_v38, %v9735_v6  ;;  %v946_v60 = vrot.slane %v909_v20, 4  ;;  %v1010_v26 = vrot.slane %v633_v35, 4 }
 0x204   : > { %v893_v42 = vperm.slane %v887_v55, %v9735_v6  ;;  %v948_v24 = vrot.slane %v897_v22, 4  ;;  %v855_v3 = vsel %vm369_vm0, %v854_v57, %v10075_v63  ;;  %v987_v15 = vsel %vm369_vm0, %v986_v40, %v9962_v43 }
 0x205   : > { %v934_v52 = vrot.slane %v905_v14, 4  ;;  %1146 = vrot.lane.b32.xlu2 %v859_v31, %s9568_s17  ;;  %v1011_v17 = vsel %vm369_vm0, %v1010_v26, %v10068_v36  ;;  %v947_v38 = vsel %vm369_vm0, %v946_v60, %v897_v22  ;;  %v1005_v30 = vperm.slane %v999_v16, %v9735_v6 }
 0x206   : > { %v949_v61 = vsel %vm369_vm0, %v909_v20, %v948_v24  ;;  %v936_v54 = vrot.slane %v893_v42, 4  ;;  %v922_v55 = vrot.slane %v10099_v47, 4  ;;  %v1012_v63 = vrot.slane %v10068_v36, 4 }
 0x207   : > { %v935_v44 = vsel %vm369_vm0, %v934_v52, %v893_v42  ;;  %v10136_v45 = vperm.slane %v949_v61, %v9745_v21  ;;  %v964_v42 = vrot.slane %v921_v58, 4  ;;  %v993_v24 = vperm.slane %v987_v15, %v9735_v6 }
 0x208   : > { %1136 = vrot.lane.b32.xlu0 %v849_v53, %s9568_s17  ;;  %v941_v11 = vperm.slane %v935_v44, %v9745_v21  ;;  %v937_v37 = vsel %vm369_vm0, %v905_v14, %v936_v54  ;;  %v960_v14 = vrot.slane %v917_v28, 4  ;;  %v1017_v20 = vperm.slane %v1011_v17, %v9735_v6 }
 0x209   : > { %v973_v0 = vsel %vm369_vm0, %v10136_v45, %v972_v50  ;;  %v945_v12 = vperm.slane %v937_v37, %v9745_v21  ;;  %v953_v34 = vperm.slane %v947_v38, %v9745_v21  ;;  %v988_v22 = vrot.slane %v9962_v43, 4 }
 0x20a   : > { %v958_v56 = vrot.slane %v941_v11, 4  ;;  %v961_v52 = vsel %vm369_vm0, %v941_v11, %v960_v14  ;;  %v1048_v61 = vrot.slane %v1005_v30, 4  ;;  %v981_v36 = vperm.slane %v975_v41, %v9735_v6 }
 0x20b   : > { %v962_v31 = vrot.slane %v945_v12, 4  ;;  %v965_v46 = vsel %vm369_vm0, %v945_v12, %v964_v42  ;;  %v989_v47 = vsel %vm369_vm0, %v10019_v27, %v988_v22  ;;  %v1013_v53 = vsel %vm369_vm0, %v633_v35, %v1012_v63 }
 0x20c   : > { %v959_v2 = vsel %vm369_vm0, %v958_v56, %v917_v28  ;;  %v923_v13 = vsel %vm369_vm0, %v922_v55, %v10083_v33  ;;  %v1022_v43 = vrot.slane %v993_v24, 4  ;;  %v1046_v44 = vrot.slane %v1017_v20, 4 }
 0x20d   : > { %1164 = vrot.lane.b32.xlu2 %v973_v0, %s9568_s17  ;;  %1150 = vrot.lane.b32.xlu1 %v959_v2, %s9568_s17  ;;  %v963_v54 = vsel %vm369_vm0, %v962_v31, %v921_v58  ;;  %v966_v11 = vrot.slane %v953_v34, 4  ;;  %v970_v48 = vrot.slane %v10136_v45, 4  ;;  %v1000_v49 = vrot.slane %v10048_v19, 4 }
 0x20e   : > { %v10188_v27 = vperm.slane %v1013_v53, %v9735_v6  ;;  %v929_v50 = vperm.slane %v923_v13, %v9745_v21  ;;  %v1049_v33 = vsel %vm369_vm0, %v1017_v20, %v1048_v61  ;;  %v9569_v28 = vmov 0.0  }
 0x20f   : > { %303 = vst.msk [vmem:[#allocation2 + $0x20] sm:$0xff] %vm297_vm10, %v9569_v28  ;;  %v997_v56 = vperm.slane %v989_v47, %v9735_v6  ;;  %v976_v45 = vrot.slane %v9874_v25, 4  ;;  %v1024_v40 = vrot.slane %v981_v36, 4  ;;  %v1001_v19 = vsel %vm369_vm0, %v10066_v32, %v1000_v49 }
 0x210   : > { %1142 = vrot.lane.b32.xlu0 %v855_v3, %s9568_s17  ;;  %304 = vst.msk [vmem:[#allocation2 + $0x28] sm:$0x3] %vm299_vm11, %v9569_v28  ;;  %v1023_v35 = vsel %vm369_vm0, %v1022_v43, %v981_v36  ;;  %v967_v57 = vsel %vm369_vm0, %v966_v11, %v929_v50  ;;  %v971_v59 = vsel %vm369_vm0, %v970_v48, %v10127_v29  ;;  %v1058_v25 = vrot.slane %v10188_v27, 4 }
 0x211   : > { %298 = vst.msk [vmem:[#allocation2] sm:$0xff] %vm297_vm10, %v9569_v28  ;;  %v1057_v60 = vperm.slane %v1049_v33, %v9745_v21  ;;  %v1047_v0 = vsel %vm369_vm0, %v1046_v44, %v1005_v30  ;;  %v968_v32 = vrot.slane %v929_v50, 4  ;;  %v977_v29 = vsel %vm369_vm0, %v10025_v39, %v976_v45 }
 0x212   : > { %300 = vst.msk [vmem:[#allocation2 + $0x8] sm:$0x3] %vm299_vm11, %v9569_v28  ;;  %v1034_v2 = vrot.slane %v997_v56, 4  ;;  %v1029_v37 = vperm.slane %v1023_v35, %v9745_v21  ;;  %v1009_v51 = vperm.slane %v1001_v19, %v9735_v6  ;;  %v1025_v16 = vsel %vm369_vm0, %v993_v24, %v1024_v40 }
 0x213   : > { %301 = vst.msk [vmem:[#allocation2 + $0x10] sm:$0xff] %vm297_vm10, %v9569_v28  ;;  %v969_v26 = vsel %vm369_vm0, %v953_v34, %v968_v32  ;;  %v1053_v58 = vperm.slane %v1047_v0, %v9745_v21  ;;  %v1074_v39 = vrot.slane %v1057_v60, 4  ;;  %v985_v3 = vperm.slane %v977_v29, %v9735_v6 }
 0x214   : > { %302 = vst.msk [vmem:[#allocation2 + $0x18] sm:$0x3] %vm299_vm11, %v9569_v28  ;;  %v1059_v12 = vsel %vm369_vm0, %v1058_v25, %v1009_v51  ;;  %v1033_v15 = vperm.slane %v1025_v16, %v9745_v21  ;;  %v1072_v17 = vrot.slane %v1029_v37, 4  ;;  %v1060_v20 = vrot.slane %v1009_v51, 4 }
 0x215   : > { %1152 = vrot.lane.b32.xlu2 %v961_v52, %s9568_s17  ;;  %1156 = vrot.lane.b32.xlu1 %v965_v46, %s9568_s17  ;;  %305 = vst.msk [vmem:[#allocation2 + $0x30] sm:$0xff] %vm297_vm10, %v9569_v28  ;;  %v1070_v38 = vrot.slane %v1053_v58, 4  ;;  %v1035_v41 = vsel %vm369_vm0, %v1034_v2, %v985_v3  ;;  %v1065_v63 = vperm.slane %v1059_v12, %v9745_v21  ;;  %v1036_v42 = vrot.slane %v985_v3, 4 }
 0x216   : > { %306 = vst.msk [vmem:[#allocation2 + $0x38] sm:$0x3] %vm299_vm11, %v9569_v28  ;;  %v1075_v30 = vsel %vm369_vm0, %v1074_v39, %v1033_v15  ;;  %v1073_v55 = vsel %vm369_vm0, %v1053_v58, %v1072_v17  ;;  %v1041_v14 = vperm.slane %v1035_v41, %v9745_v21  ;;  %v1061_v61 = vsel %vm369_vm0, %v10188_v27, %v1060_v20 }
 0x217   : > { %307 = vst.msk [vmem:[#allocation2 + $0x40] sm:$0xff] %vm297_vm10, %v9569_v28  ;;  %v1071_v24 = vsel %vm369_vm0, %v1070_v38, %v1029_v37  ;;  %v1078_v31 = vrot.slane %v1065_v63, 4  ;;  %v1037_v22 = vsel %vm369_vm0, %v997_v56, %v1036_v42  ;;  %v1076_v36 = vrot.slane %v1033_v15, 4 }
 0x218   : > { %1154 = vrot.lane.b32.xlu0 %v963_v54, %s9568_s17  ;;  %308 = vst.msk [vmem:[#allocation2 + $0x48] sm:$0x3] %vm299_vm11, %v9569_v28  ;;  %v1080_v34 = vrot.slane %v1041_v14, 4  ;;  %v1045_v47 = vperm.slane %v1037_v22, %v9745_v21  ;;  %v1069_v13 = vperm.slane %v1061_v61, %v9745_v21 }
 0x219   : > { %309 = vst.msk [vmem:[#allocation2 + $0x50] sm:$0xff] %vm297_vm10, %v9569_v28  ;;  %v1079_v46 = vsel %vm369_vm0, %v1078_v31, %v1041_v14  ;;  %v1077_v53 = vsel %vm369_vm0, %v1057_v60, %v1076_v36 }
 0x21a   : > { %310 = vst.msk [vmem:[#allocation2 + $0x58] sm:$0x3] %vm299_vm11, %v9569_v28  ;;  %v1081_v52 = vsel %vm369_vm0, %v1065_v63, %v1080_v34  ;;  %v1084_v43 = vrot.slane %v1045_v47, 4  ;;  %v1082_v44 = vrot.slane %v1069_v13, 4 }
 0x21b   : > { %311 = vst.msk [vmem:[#allocation2 + $0x60] sm:$0xff] %vm297_vm10, %v9569_v28 }
 0x21c   : > { %312 = vst.msk [vmem:[#allocation2 + $0x68] sm:$0x3] %vm299_vm11, %v9569_v28  ;;  %v1085_v54 = vsel %vm369_vm0, %v1069_v13, %v1084_v43  ;;  %v1083_v11 = vsel %vm369_vm0, %v1082_v44, %v1045_v47 }
 0x21d   : > { %1158 = vrot.lane.b32.xlu2 %v967_v57, %s9568_s17  ;;  %1162 = vrot.lane.b32.xlu1 %v971_v59, %s9568_s17  ;;  %313 = vst.msk [vmem:[#allocation2 + $0x70] sm:$0xff] %vm297_vm10, %v9569_v28 }
 0x21e   : > { %314 = vst.msk [vmem:[#allocation2 + $0x78] sm:$0x3] %vm299_vm11, %v9569_v28 }
 0x21f   : > { %315 = vst.msk [vmem:[#allocation2 + $0x80] sm:$0xff] %vm297_vm10, %v9569_v28 }
 0x220   : > { %1160 = vrot.lane.b32.xlu0 %v969_v26, %s9568_s17  ;;  %316 = vst.msk [vmem:[#allocation2 + $0x88] sm:$0x3] %vm299_vm11, %v9569_v28 }
 0x221   : > { %317 = vst.msk [vmem:[#allocation2 + $0x90] sm:$0xff] %vm297_vm10, %v9569_v28 }
 0x222   : > { %318 = vst.msk [vmem:[#allocation2 + $0x98] sm:$0x3] %vm299_vm11, %v9569_v28 }
 0x223   : > { %319 = vst.msk [vmem:[#allocation2 + $0xa0] sm:$0xff] %vm297_vm10, %v9569_v28 }
 0x224   : > { %320 = vst.msk [vmem:[#allocation2 + $0xa8] sm:$0x3] %vm299_vm11, %v9569_v28 }
 0x225   : > { %1170 = vrot.lane.b32.xlu2 %v1075_v30, %s9568_s17  ;;  %1168 = vrot.lane.b32.xlu1 %v1073_v55, %s9568_s17  ;;  %321 = vst.msk [vmem:[#allocation2 + $0xb0] sm:$0xff] %vm297_vm10, %v9569_v28 }
 0x226   : > { %322 = vst.msk [vmem:[#allocation2 + $0xb8] sm:$0x3] %vm299_vm11, %v9569_v28 }
 0x227   : > { %323 = vst.msk [vmem:[#allocation2 + $0xc0] sm:$0xff] %vm297_vm10, %v9569_v28 }
 0x228   : > { %1166 = vrot.lane.b32.xlu0 %v1071_v24, %s9568_s17  ;;  %324 = vst.msk [vmem:[#allocation2 + $0xc8] sm:$0x3] %vm299_vm11, %v9569_v28 }
 0x229   : > { %325 = vst.msk [vmem:[#allocation2 + $0xd0] sm:$0xff] %vm297_vm10, %v9569_v28 }
 0x22a   : > { %326 = vst.msk [vmem:[#allocation2 + $0xd8] sm:$0x3] %vm299_vm11, %v9569_v28 }
 0x22b   : > { %327 = vst.msk [vmem:[#allocation2 + $0xe0] sm:$0xff] %vm297_vm10, %v9569_v28 }
 0x22c   : > { %328 = vst.msk [vmem:[#allocation2 + $0xe8] sm:$0x3] %vm299_vm11, %v9569_v28 }
 0x22d   : > { %1176 = vrot.lane.b32.xlu2 %v1081_v52, %s9568_s17  ;;  %1174 = vrot.lane.b32.xlu1 %v1079_v46, %s9568_s17  ;;  %329 = vst.msk [vmem:[#allocation2 + $0xf0] sm:$0xff] %vm297_vm10, %v9569_v28 }
 0x22e   : > { %330 = vst.msk [vmem:[#allocation2 + $0xf8] sm:$0x3] %vm299_vm11, %v9569_v28 }
 0x22f   : > { %331 = vst.msk [vmem:[#allocation2 + $0x100] sm:$0xff] %vm297_vm10, %v9569_v28 }
 0x230   : > { %1172 = vrot.lane.b32.xlu0 %v1077_v53, %s9568_s17  ;;  %332 = vst.msk [vmem:[#allocation2 + $0x108] sm:$0x3] %vm299_vm11, %v9569_v28 }
 0x231   : > { %333 = vst.msk [vmem:[#allocation2 + $0x110] sm:$0xff] %vm297_vm10, %v9569_v28 }
 0x232   : > { %334 = vst.msk [vmem:[#allocation2 + $0x118] sm:$0x3] %vm299_vm11, %v9569_v28 }
 0x233   : > { %335 = vst.msk [vmem:[#allocation2 + $0x120] sm:$0xff] %vm297_vm10, %v9569_v28 }
 0x234   : > { %336 = vst.msk [vmem:[#allocation2 + $0x128] sm:$0x3] %vm299_vm11, %v9569_v28 }
 0x235   : > { %1180 = vrot.lane.b32.xlu1 %v1085_v54, %s9568_s17  ;;  %337 = vst.msk [vmem:[#allocation2 + $0x130] sm:$0xff] %vm297_vm10, %v9569_v28 }
 0x236   : > { %338 = vst.msk [vmem:[#allocation2 + $0x138] sm:$0x3] %vm299_vm11, %v9569_v28 }
 0x237   : > { %339 = vst.msk [vmem:[#allocation2 + $0x140] sm:$0xff] %vm297_vm10, %v9569_v28 }
 0x238   : > { %1178 = vrot.lane.b32.xlu0 %v1083_v11, %s9568_s17  ;;  %340 = vst.msk [vmem:[#allocation2 + $0x148] sm:$0x3] %vm299_vm11, %v9569_v28 }
 0x239   : > { %341 = vst.msk [vmem:[#allocation2 + $0x150] sm:$0xff] %vm297_vm10, %v9569_v28 }
 0x23a   : > { %342 = vst.msk [vmem:[#allocation2 + $0x158] sm:$0x3] %vm299_vm11, %v9569_v28 }
 0x23b   : > { %343 = vst.msk [vmem:[#allocation2 + $0x160] sm:$0xff] %vm297_vm10, %v9569_v28 }
 0x23c   : > { %344 = vst.msk [vmem:[#allocation2 + $0x168] sm:$0x3] %vm299_vm11, %v9569_v28 }
 0x23d   : > { %345 = vst.msk [vmem:[#allocation2 + $0x170] sm:$0xff] %vm297_vm10, %v9569_v28 }
 0x23e   : > { %346 = vst.msk [vmem:[#allocation2 + $0x178] sm:$0x3] %vm299_vm11, %v9569_v28 }
 0x23f   : > { %v1123_v48 = vpop.permute.xlu2 %1122  ;;  %347 = vst.msk [vmem:[#allocation2 + $0x180] sm:$0xff] %vm297_vm10, %v9569_v28 }
 0x240   : > { %1217 = vst.msk [vmem:[#allocation2 + $0x21] sm:$0xff] %vm1214_vm12, %v1123_v48 }
 0x241   : > { %348 = vst.msk [vmem:[#allocation2 + $0x188] sm:$0x3] %vm299_vm11, %v9569_v28 }
 0x242   : > { %349 = vst.msk [vmem:[#allocation2 + $0x190] sm:$0xff] %vm297_vm10, %v9569_v28 }
 0x243   : > { %350 = vst.msk [vmem:[#allocation2 + $0x198] sm:$0x3] %vm299_vm11, %v9569_v28 }
 0x244   : > { %351 = vst.msk [vmem:[#allocation2 + $0x1a0] sm:$0xff] %vm297_vm10, %v9569_v28 }
 0x245   : > { %352 = vst.msk [vmem:[#allocation2 + $0x1a8] sm:$0x3] %vm299_vm11, %v9569_v28 }
 0x246   : > { %353 = vst.msk [vmem:[#allocation2 + $0x1b0] sm:$0xff] %vm297_vm10, %v9569_v28 }
 0x247   : > { %v1129_v49 = vpop.permute.xlu2 %1128  ;;  %354 = vst.msk [vmem:[#allocation2 + $0x1b8] sm:$0x3] %vm299_vm11, %v9569_v28 }
 0x248   : > { %355 = vst.msk [vmem:[#allocation2 + $0x1c0] sm:$0xff] %vm297_vm10, %v9569_v28 }
 0x249   : > { %356 = vst.msk [vmem:[#allocation2 + $0x1c8] sm:$0x3] %vm299_vm11, %v9569_v28 }
 0x24a   : > { %357 = vst.msk [vmem:[#allocation2 + $0x1d0] sm:$0xff] %vm297_vm10, %v9569_v28 }
 0x24b   : > { %358 = vst.msk [vmem:[#allocation2 + $0x1d8] sm:$0x3] %vm299_vm11, %v9569_v28 }
 0x24c   : > { %359 = vst.msk [vmem:[#allocation2 + $0x1e0] sm:$0xff] %vm297_vm10, %v9569_v28 }
 0x24d   : > { %360 = vst.msk [vmem:[#allocation2 + $0x1e8] sm:$0x3] %vm299_vm11, %v9569_v28 }
 0x24e   : > { %361 = vst.msk [vmem:[#allocation2 + $0x1f0] sm:$0xff] %vm297_vm10, %v9569_v28 }
 0x24f   : > { %v1135_v27 = vpop.permute.xlu2 %1134  ;;  %362 = vst.msk [vmem:[#allocation2 + $0x1f8] sm:$0x3] %vm299_vm11, %v9569_v28 }
 0x250   : > { %1220 = vst.msk [vmem:[#allocation2 + $0x51] sm:$0xff] %vm1214_vm12, %v1129_v49 }
 0x251   : > { %1223 = vst.msk [vmem:[#allocation2 + $0x81] sm:$0xff] %vm1214_vm12, %v1135_v27 }
 0x254   : > { %v1133_v50 = vpop.permute.xlu1 %1132 }
 0x255   : > { %1222 = vst.msk [vmem:[#allocation2 + $0x71] sm:$0xff] %vm1214_vm12, %v1133_v50 }
 0x257   : > { %v1141_v33 = vpop.permute.xlu2 %1140 }
 0x258   : > { %1226 = vst.msk [vmem:[#allocation2 + $0xb1] sm:$0xff] %vm1214_vm12, %v1141_v33 }
 0x25a   : > { %v1149_v56 = vpop.permute.xlu0 %1148 }
 0x25b   : > { %1230 = vst.msk [vmem:[#allocation2 + $0xf1] sm:$0xff] %vm1214_vm12, %v1149_v56 }
 0x25c   : > { %v1121_v45 = vpop.permute.xlu1 %1120 }
 0x25d   : > { %1216 = vst.msk [vmem:[#allocation2 + $0x11] sm:$0xff] %vm1214_vm12, %v1121_v45 }
 0x25f   : > { %v1147_v40 = vpop.permute.xlu2 %1146 }
 0x260   : > { %1229 = vst.msk [vmem:[#allocation2 + $0xe1] sm:$0xff] %vm1214_vm12, %v1147_v40 }
 0x262   : > { %v1119_v19 = vpop.permute.xlu0 %1118 }
 0x263   : > { %1215 = vst.msk [vmem:[#allocation2 + $0x1] sm:$0xff] %vm1214_vm12, %v1119_v19 }
 0x264   : > { %v1127_v28 = vpop.permute.xlu1 %1126 }
 0x265   : > { %1219 = vst.msk [vmem:[#allocation2 + $0x41] sm:$0xff] %vm1214_vm12, %v1127_v28 }
 0x267   : > { %v1165_v35 = vpop.permute.xlu2 %1164 }
 0x268   : > { %1238 = vst.msk [vmem:[#allocation2 + $0x171] sm:$0xff] %vm1214_vm12, %v1165_v35 }
 0x26a   : > { %v1125_v57 = vpop.permute.xlu0 %1124 }
 0x26b   : > { %1218 = vst.msk [vmem:[#allocation2 + $0x31] sm:$0xff] %vm1214_vm12, %v1125_v57 }
 0x26c   : > { %v1139_v59 = vpop.permute.xlu1 %1138 }
 0x26d   : > { %1225 = vst.msk [vmem:[#allocation2 + $0xa1] sm:$0xff] %vm1214_vm12, %v1139_v59 }
 0x26f   : > { %v1153_v60 = vpop.permute.xlu2 %1152 }
 0x270   : > { %1232 = vst.msk [vmem:[#allocation2 + $0x111] sm:$0xff] %vm1214_vm12, %v1153_v60 }
 0x272   : > { %v1131_v0 = vpop.permute.xlu0 %1130 }
 0x273   : > { %1221 = vst.msk [vmem:[#allocation2 + $0x61] sm:$0xff] %vm1214_vm12, %v1131_v0 }
 0x274   : > { %v1145_v25 = vpop.permute.xlu1 %1144 }
 0x275   : > { %1228 = vst.msk [vmem:[#allocation2 + $0xd1] sm:$0xff] %vm1214_vm12, %v1145_v25 }
 0x277   : > { %v1159_v32 = vpop.permute.xlu2 %1158 }
 0x278   : > { %1235 = vst.msk [vmem:[#allocation2 + $0x141] sm:$0xff] %vm1214_vm12, %v1159_v32 }
 0x27a   : > { %v1137_v29 = vpop.permute.xlu0 %1136 }
 0x27b   : > { %1224 = vst.msk [vmem:[#allocation2 + $0x91] sm:$0xff] %vm1214_vm12, %v1137_v29 }
 0x27f   : > { %v1171_v2 = vpop.permute.xlu2 %1170  ;;  %v1151_v37 = vpop.permute.xlu1 %1150 }
 0x280   : > { %1241 = vst.msk [vmem:[#allocation2 + $0x1a1] sm:$0xff] %vm1214_vm12, %v1171_v2 }
 0x281   : > { %1231 = vst.msk [vmem:[#allocation2 + $0x101] sm:$0xff] %vm1214_vm12, %v1151_v37 }
 0x282   : > { %v1143_v51 = vpop.permute.xlu0 %1142 }
 0x283   : > { %1227 = vst.msk [vmem:[#allocation2 + $0xc1] sm:$0xff] %vm1214_vm12, %v1143_v51 }
 0x287   : > { %v1177_v26 = vpop.permute.xlu2 %1176  ;;  %v1157_v16 = vpop.permute.xlu1 %1156 }
 0x288   : > { %1244 = vst.msk [vmem:[#allocation2 + $0x1d1] sm:$0xff] %vm1214_vm12, %v1177_v26 }
 0x289   : > { %1234 = vst.msk [vmem:[#allocation2 + $0x131] sm:$0xff] %vm1214_vm12, %v1157_v16 }
 0x28a   : > { %v1155_v58 = vpop.permute.xlu0 %1154 }
 0x28b   : > { %1233 = vst.msk [vmem:[#allocation2 + $0x121] sm:$0xff] %vm1214_vm12, %v1155_v58 }
 0x28f   : > { %v1163_v39 = vpop.permute.xlu1 %1162 }
 0x290   : > { %1237 = vst.msk [vmem:[#allocation2 + $0x161] sm:$0xff] %vm1214_vm12, %v1163_v39 }
 0x292   : > { %v1161_v3 = vpop.permute.xlu0 %1160 }
 0x293   : > { %1236 = vst.msk [vmem:[#allocation2 + $0x151] sm:$0xff] %vm1214_vm12, %v1161_v3 }
 0x297   : > { %v1169_v12 = vpop.permute.xlu1 %1168 }
 0x298   : > { %1240 = vst.msk [vmem:[#allocation2 + $0x191] sm:$0xff] %vm1214_vm12, %v1169_v12 }
 0x29a   : > { %v1167_v15 = vpop.permute.xlu0 %1166 }
 0x29b   : > { %1239 = vst.msk [vmem:[#allocation2 + $0x181] sm:$0xff] %vm1214_vm12, %v1167_v15 }
 0x29f   : > { %v1175_v17 = vpop.permute.xlu1 %1174 }
 0x2a0   : > { %1243 = vst.msk [vmem:[#allocation2 + $0x1c1] sm:$0xff] %vm1214_vm12, %v1175_v17 }
 0x2a2   : > { %v1173_v38 = vpop.permute.xlu0 %1172 }
 0x2a3   : > { %1242 = vst.msk [vmem:[#allocation2 + $0x1b1] sm:$0xff] %vm1214_vm12, %v1173_v38 }
 0x2a7   : > { %v1181_v41 = vpop.permute.xlu1 %1180  ;;  %1250 = sbr.rel (%p8056_p3) target bundleno = 1028 (0x404), region = 52 }
 0x2a8   : > { %1246 = vst.msk [vmem:[#allocation2 + $0x1f1] sm:$0xff] %vm1214_vm12, %v1181_v41 }
 0x2aa   : > { %v1179_v30 = vpop.permute.xlu0 %1178 }
 0x2ab   : > { %1245 = vst.msk [vmem:[#allocation2 + $0x1e1] sm:$0xff] %vm1214_vm12, %v1179_v30 }
 0x2ac   : > { %v1257_v55 = vrot.slane %v9796_v62, 1  ;;  %v1258_v63 = vrot.slane %v9796_v62, 2  ;;  %v1259_v14 = vrot.slane %v9796_v62, 3  ;;  %v1267_v42 = vrot.slane %v9800_v1, 1  ;;  %v1253_v31 = vld [vmem:[%s1252_s16] sm:$0x1] }
 0x2ad   : > { %v1268_v24 = vrot.slane %v9800_v1, 2  ;;  %v1269_v20 = vrot.slane %v9800_v1, 3  ;;  %v1254_v34 = vld [vmem:[%s1252_s16 + $0x10] sm:$0x1]  ;;  %v1255_v22 = vld [vmem:[%s1252_s16 + $0x20] sm:$0x1]  ;;  %v1263_v46 = vmul.f32 %v1253_v31, %v9796_v62 }
 0x2ae   : > { %v1256_v52 = vld [vmem:[%s1252_s16 + $0x30] sm:$0x1]  ;;  %v1264_v61 = vmul.f32 %v1257_v55, %v1254_v34  ;;  %v1265_v36 = vmul.f32 %v1258_v63, %v1255_v22  ;;  %vm1286_vm13 = vcmask 1041409   ;;  %vm1289_vm14 = vcmask 1042434  }
 0x2af   : > { %v1266_v47 = vmul.f32 %v1259_v14, %v1256_v52  ;;  %v1273_v53 = vadd.f32 %v1263_v46, %v9800_v1  ;;  %vm1292_vm15 = vcmask 1043459   ;;  %vm1489_vm10 = vcmask 131080  }
 0x2b0   : > { %v1274_v13 = vadd.f32 %v1267_v42, %v1264_v61  ;;  %v1275_v43 = vadd.f32 %v1268_v24, %v1265_v36 }
 0x2b1   : > { %v1276_v44 = vadd.f32 %v1269_v20, %v1266_v47  ;;  %v1277_v54 = vmax.f32 %v1273_v53, 0.0 }
 0x2b2   : > { %v1278_v11 = vmax.f32 %v1274_v13, 0.0  ;;  %v1279_v48 = vmax.f32 %v1275_v43, 0.0 }
 0x2b3   : > { %v1280_v49 = vmax.f32 %v1276_v44, 0.0 }
 0x2b4   : > { %v1285_v27 = vrot.slane %v1278_v11, 7  ;;  %v1288_v50 = vrot.slane %v1279_v48, 6 }
 0x2b5   : > { %v1291_v33 = vrot.slane %v1280_v49, 5 }
 0x2b6   : > { %v1287_v56 = vsel %vm1286_vm13, %v1285_v27, %v1277_v54 }
 0x2b7   : > { %v1290_v45 = vsel %vm1289_vm14, %v1288_v50, %v1287_v56 }
 0x2b8   : > { %v1293_v40 = vsel %vm1292_vm15, %v1291_v33, %v1290_v45 }
 0x2b9   : > { %8058 = vmatpush.msk.msra.mxu0 %vm513_vm8, %v1293_v40  ;;  %8088 = vmatpush.msk.msra.mxu1 %vm513_vm8, %v1293_v40 }
 0x2ba   : > { %8059 = vmatmul.msk.f32.vlgmr.msra.gmra.mxu0 %vm500_vm9, %v9806_v4  ;;  %8060 = vmatmul.msk.f32.vlgmr.msra.gmra.mxu1 %vm500_vm9, %v9811_v5 }
 0x2bb   : > { %8089 = vmatpush.msk.msra.mxu2 %vm513_vm8, %v1293_v40  ;;  %8090 = vmatpush.msk.msra.mxu3 %vm513_vm8, %v1293_v40 }
 0x2bc   : > { %8061 = vmatmul.msk.f32.vlgmr.msra.gmra.mxu2 %vm500_vm9, %v9818_v7  ;;  %8062 = vmatmul.msk.f32.vlgmr.msra.gmra.mxu3 %vm500_vm9, %v9823_v8 }
 0x337   : > { %v1313_v19 = vpop.f32.mrf.mxu0  ;;  %v1316_v28 = vpop.f32.mrf.mxu1 }
 0x338   : > { %v1314_v35 = vadd.f32 %v1313_v19, %v9835_v9  ;;  %v1317_v57 = vadd.f32 %v1316_v28, %v9837_v10 }
 0x33a   : > { %v1325_v59 = vmax.f32 %v1314_v35, 0.0  ;;  %v1326_v60 = vmax.f32 %v1317_v57, 0.0 }
 0x33c   : > { %v1369_v0 = vperm.slane %v1326_v60, 0  ;;  %v1361_v25 = vperm.slane %v1325_v59, 0  ;;  %v1334_v32 = vrot.slane %v1325_v59, 2  ;;  %v1336_v2 = vrot.slane %v1325_v59, 4 }
 0x33d   : > { %v1333_v37 = vrot.slane %v1325_v59, 1  ;;  %v1335_v51 = vrot.slane %v1325_v59, 3  ;;  %v1337_v39 = vrot.slane %v1325_v59, 5  ;;  %v1338_v3 = vrot.slane %v1325_v59, 6 }
 0x33e   : > { %1409 = vrot.lane.b32.xlu2 %v1369_v0, %s9570_s11  ;;  %1393 = vrot.lane.b32.xlu0 %v1361_v25, %s9570_s11  ;;  %v1363_v29 = vperm.slane %v1334_v32, 0  ;;  %v1365_v26 = vperm.slane %v1336_v2, 0  ;;  %v1339_v12 = vrot.slane %v1325_v59, 7  ;;  %v1342_v41 = vrot.slane %v1326_v60, 3 }
 0x33f   : > { %v1362_v16 = vperm.slane %v1333_v37, 0  ;;  %v1364_v58 = vperm.slane %v1335_v51, 0  ;;  %v1366_v15 = vperm.slane %v1337_v39, 0  ;;  %v1367_v17 = vperm.slane %v1338_v3, 0  ;;  %v1319_v42 = vpop.f32.mrf.mxu2  ;;  %v1322_v53 = vpop.f32.mrf.mxu3 }
 0x340   : > { %1397 = vrot.lane.b32.xlu1 %v1363_v29, %s9570_s11  ;;  %v1368_v38 = vperm.slane %v1339_v12, 0  ;;  %v1340_v30 = vrot.slane %v1326_v60, 1  ;;  %v1341_v55 = vrot.slane %v1326_v60, 2  ;;  %v1372_v63 = vperm.slane %v1342_v41, 0 }
 0x341   : > { %v1320_v20 = vadd.f32 %v1319_v42, %v9860_v18  ;;  %v1345_v31 = vrot.slane %v1326_v60, 6  ;;  %v1343_v34 = vrot.slane %v1326_v60, 4  ;;  %v1344_v52 = vrot.slane %v1326_v60, 5 }
 0x342   : > { %v1370_v14 = vperm.slane %v1340_v30, 0  ;;  %v1371_v24 = vperm.slane %v1341_v55, 0  ;;  %v1346_v13 = vrot.slane %v1326_v60, 7  ;;  %v1323_v44 = vadd.f32 %v1322_v53, %v9869_v23 }
 0x343   : > { %v1327_v22 = vmax.f32 %v1320_v20, 0.0  ;;  %v1375_v46 = vperm.slane %v1345_v31, 0  ;;  %v1373_v61 = vperm.slane %v1343_v34, 0  ;;  %v1374_v36 = vperm.slane %v1344_v52, 0 }
 0x344   : > { %v1376_v54 = vperm.slane %v1346_v13, 0  ;;  %v1328_v48 = vmax.f32 %v1323_v44, 0.0 }
 0x345   : > { %v1347_v47 = vrot.slane %v1327_v22, 1  ;;  %v1377_v11 = vperm.slane %v1327_v22, 0  ;;  %v1350_v49 = vrot.slane %v1327_v22, 4  ;;  %v1349_v50 = vrot.slane %v1327_v22, 3 }
 0x346   : > { %1401 = vrot.lane.b32.xlu2 %v1365_v26, %s9570_s11  ;;  %1395 = vrot.lane.b32.xlu0 %v1362_v16, %s9570_s11  ;;  %v1385_v27 = vperm.slane %v1328_v48, 0  ;;  %v1353_v45 = vrot.slane %v1327_v22, 7  ;;  %v1348_v40 = vrot.slane %v1327_v22, 2  ;;  %v1352_v19 = vrot.slane %v1327_v22, 6 }
 0x347   : > { %v1378_v43 = vperm.slane %v1347_v47, 0  ;;  %v1381_v33 = vperm.slane %v1350_v49, 0  ;;  %v1380_v56 = vperm.slane %v1349_v50, 0  ;;  %v1355_v59 = vrot.slane %v1328_v48, 2 }
 0x348   : > { %1399 = vrot.lane.b32.xlu1 %v1364_v58, %s9570_s11  ;;  %v1384_v28 = vperm.slane %v1353_v45, 0  ;;  %v1379_v35 = vperm.slane %v1348_v40, 0  ;;  %v1383_v57 = vperm.slane %v1352_v19, 0  ;;  %v1351_v60 = vrot.slane %v1327_v22, 5 }
 0x349   : > { %v1354_v0 = vrot.slane %v1328_v48, 1  ;;  %v1387_v25 = vperm.slane %v1355_v59, 0  ;;  %v1358_v2 = vrot.slane %v1328_v48, 5  ;;  %v1356_v37 = vrot.slane %v1328_v48, 3 }
 0x34a   : > { %v1382_v32 = vperm.slane %v1351_v60, 0  ;;  %v1357_v51 = vrot.slane %v1328_v48, 4  ;;  %v1359_v39 = vrot.slane %v1328_v48, 6  ;;  %v1360_v3 = vrot.slane %v1328_v48, 7 }
 0x34b   : > { %v1386_v29 = vperm.slane %v1354_v0, 0  ;;  %v1390_v26 = vperm.slane %v1358_v2, 0  ;;  %v1388_v16 = vperm.slane %v1356_v37, 0 }
 0x34c   : > { %v1389_v58 = vperm.slane %v1357_v51, 0  ;;  %v1391_v12 = vperm.slane %v1359_v39, 0 }
 0x34e   : > { %1403 = vrot.lane.b32.xlu2 %v1366_v15, %s9570_s11  ;;  %1405 = vrot.lane.b32.xlu0 %v1367_v17, %s9570_s11  ;;  %v1392_v15 = vperm.slane %v1360_v3, 0 }
 0x350   : > { %1407 = vrot.lane.b32.xlu1 %v1368_v38, %s9570_s11 }
 0x356   : > { %1415 = vrot.lane.b32.xlu2 %v1372_v63, %s9570_s11  ;;  %1411 = vrot.lane.b32.xlu0 %v1370_v14, %s9570_s11 }
 0x358   : > { %1413 = vrot.lane.b32.xlu1 %v1371_v24, %s9570_s11 }
 0x35e   : > { %1421 = vrot.lane.b32.xlu2 %v1375_v46, %s9570_s11  ;;  %1417 = vrot.lane.b32.xlu0 %v1373_v61, %s9570_s11 }
 0x360   : > { %1419 = vrot.lane.b32.xlu1 %v1374_v36, %s9570_s11 }
 0x366   : > { %1427 = vrot.lane.b32.xlu2 %v1378_v43, %s9570_s11  ;;  %1423 = vrot.lane.b32.xlu0 %v1376_v54, %s9570_s11 }
 0x368   : > { %1425 = vrot.lane.b32.xlu1 %v1377_v11, %s9570_s11 }
 0x36e   : > { %1433 = vrot.lane.b32.xlu2 %v1381_v33, %s9570_s11  ;;  %1441 = vrot.lane.b32.xlu0 %v1385_v27, %s9570_s11 }
 0x370   : > { %1431 = vrot.lane.b32.xlu1 %v1380_v56, %s9570_s11 }
 0x376   : > { %1439 = vrot.lane.b32.xlu2 %v1384_v28, %s9570_s11  ;;  %1429 = vrot.lane.b32.xlu0 %v1379_v35, %s9570_s11 }
 0x378   : > { %1437 = vrot.lane.b32.xlu1 %v1383_v57, %s9570_s11 }
 0x37e   : > { %1445 = vrot.lane.b32.xlu2 %v1387_v25, %s9570_s11  ;;  %1435 = vrot.lane.b32.xlu0 %v1382_v32, %s9570_s11 }
 0x380   : > { %1443 = vrot.lane.b32.xlu1 %v1386_v29, %s9570_s11 }
 0x386   : > { %1451 = vrot.lane.b32.xlu2 %v1390_v26, %s9570_s11  ;;  %1447 = vrot.lane.b32.xlu0 %v1388_v16, %s9570_s11 }
 0x388   : > { %1449 = vrot.lane.b32.xlu1 %v1389_v58, %s9570_s11 }
 0x38e   : > { %1453 = vrot.lane.b32.xlu0 %v1391_v12, %s9570_s11 }
 0x390   : > { %1455 = vrot.lane.b32.xlu1 %v1392_v15, %s9570_s11 }
 0x398   : > { %v1410_v17 = vpop.permute.xlu2 %1409 }
 0x399   : > { %1498 = vst.msk [vmem:[#allocation2 + $0x80] sm:$0x1] %vm1489_vm10, %v1410_v17 }
 0x3a0   : > { %v1402_v38 = vpop.permute.xlu2 %1401 }
 0x3a1   : > { %1494 = vst.msk [vmem:[#allocation2 + $0x40] sm:$0x1] %vm1489_vm10, %v1402_v38 }
 0x3a8   : > { %v1404_v41 = vpop.permute.xlu2 %1403 }
 0x3a9   : > { %1495 = vst.msk [vmem:[#allocation2 + $0x50] sm:$0x1] %vm1489_vm10, %v1404_v41 }
 0x3b0   : > { %v1394_v30 = vpop.permute.xlu0 %1393  ;;  %v1416_v55 = vpop.permute.xlu2 %1415 }
 0x3b1   : > { %1490 = vst.msk [vmem:[#allocation2] sm:$0x1] %vm1489_vm10, %v1394_v30 }
 0x3b2   : > { %1501 = vst.msk [vmem:[#allocation2 + $0xb0] sm:$0x1] %vm1489_vm10, %v1416_v55  ;;  %v1398_v63 = vpop.permute.xlu1 %1397 }
 0x3b3   : > { %1492 = vst.msk [vmem:[#allocation2 + $0x20] sm:$0x1] %vm1489_vm10, %v1398_v63 }
 0x3b8   : > { %v1422_v14 = vpop.permute.xlu2 %1421  ;;  %v1396_v42 = vpop.permute.xlu0 %1395 }
 0x3b9   : > { %1504 = vst.msk [vmem:[#allocation2 + $0xe0] sm:$0x1] %vm1489_vm10, %v1422_v14 }
 0x3ba   : > { %1491 = vst.msk [vmem:[#allocation2 + $0x10] sm:$0x1] %vm1489_vm10, %v1396_v42  ;;  %v1400_v24 = vpop.permute.xlu1 %1399 }
 0x3bb   : > { %1493 = vst.msk [vmem:[#allocation2 + $0x30] sm:$0x1] %vm1489_vm10, %v1400_v24 }
 0x3c0   : > { %v1428_v20 = vpop.permute.xlu2 %1427  ;;  %v1406_v31 = vpop.permute.xlu0 %1405 }
 0x3c1   : > { %1507 = vst.msk [vmem:[#allocation2 + $0x110] sm:$0x1] %vm1489_vm10, %v1428_v20 }
 0x3c2   : > { %1496 = vst.msk [vmem:[#allocation2 + $0x60] sm:$0x1] %vm1489_vm10, %v1406_v31  ;;  %v1408_v34 = vpop.permute.xlu1 %1407 }
 0x3c3   : > { %1497 = vst.msk [vmem:[#allocation2 + $0x70] sm:$0x1] %vm1489_vm10, %v1408_v34 }
 0x3c8   : > { %v1434_v22 = vpop.permute.xlu2 %1433  ;;  %v1412_v52 = vpop.permute.xlu0 %1411 }
 0x3c9   : > { %1510 = vst.msk [vmem:[#allocation2 + $0x140] sm:$0x1] %vm1489_vm10, %v1434_v22 }
 0x3ca   : > { %1499 = vst.msk [vmem:[#allocation2 + $0x90] sm:$0x1] %vm1489_vm10, %v1412_v52  ;;  %v1414_v46 = vpop.permute.xlu1 %1413 }
 0x3cb   : > { %1500 = vst.msk [vmem:[#allocation2 + $0xa0] sm:$0x1] %vm1489_vm10, %v1414_v46 }
 0x3d0   : > { %v1440_v61 = vpop.permute.xlu2 %1439  ;;  %v1418_v36 = vpop.permute.xlu0 %1417 }
 0x3d1   : > { %1513 = vst.msk [vmem:[#allocation2 + $0x170] sm:$0x1] %vm1489_vm10, %v1440_v61 }
 0x3d2   : > { %1502 = vst.msk [vmem:[#allocation2 + $0xc0] sm:$0x1] %vm1489_vm10, %v1418_v36  ;;  %v1420_v47 = vpop.permute.xlu1 %1419 }
 0x3d3   : > { %1503 = vst.msk [vmem:[#allocation2 + $0xd0] sm:$0x1] %vm1489_vm10, %v1420_v47 }
 0x3d8   : > { %v1446_v53 = vpop.permute.xlu2 %1445  ;;  %v1424_v13 = vpop.permute.xlu0 %1423 }
 0x3d9   : > { %1516 = vst.msk [vmem:[#allocation2 + $0x1a0] sm:$0x1] %vm1489_vm10, %v1446_v53 }
 0x3da   : > { %1505 = vst.msk [vmem:[#allocation2 + $0xf0] sm:$0x1] %vm1489_vm10, %v1424_v13  ;;  %v1426_v43 = vpop.permute.xlu1 %1425 }
 0x3db   : > { %1506 = vst.msk [vmem:[#allocation2 + $0x100] sm:$0x1] %vm1489_vm10, %v1426_v43 }
 0x3e0   : > { %v1452_v44 = vpop.permute.xlu2 %1451  ;;  %v1442_v54 = vpop.permute.xlu0 %1441 }
 0x3e1   : > { %1519 = vst.msk [vmem:[#allocation2 + $0x1d0] sm:$0x1] %vm1489_vm10, %v1452_v44 }
 0x3e2   : > { %1514 = vst.msk [vmem:[#allocation2 + $0x180] sm:$0x1] %vm1489_vm10, %v1442_v54  ;;  %v1432_v11 = vpop.permute.xlu1 %1431 }
 0x3e3   : > { %1509 = vst.msk [vmem:[#allocation2 + $0x130] sm:$0x1] %vm1489_vm10, %v1432_v11 }
 0x3e8   : > { %v1430_v48 = vpop.permute.xlu0 %1429 }
 0x3e9   : > { %1508 = vst.msk [vmem:[#allocation2 + $0x120] sm:$0x1] %vm1489_vm10, %v1430_v48 }
 0x3ea   : > { %v1438_v49 = vpop.permute.xlu1 %1437 }
 0x3eb   : > { %1512 = vst.msk [vmem:[#allocation2 + $0x160] sm:$0x1] %vm1489_vm10, %v1438_v49 }
 0x3f0   : > { %v1436_v27 = vpop.permute.xlu0 %1435 }
 0x3f1   : > { %1511 = vst.msk [vmem:[#allocation2 + $0x150] sm:$0x1] %vm1489_vm10, %v1436_v27 }
 0x3f2   : > { %v1444_v50 = vpop.permute.xlu1 %1443 }
 0x3f3   : > { %1515 = vst.msk [vmem:[#allocation2 + $0x190] sm:$0x1] %vm1489_vm10, %v1444_v50 }
 0x3f8   : > { %v1448_v33 = vpop.permute.xlu0 %1447 }
 0x3f9   : > { %1517 = vst.msk [vmem:[#allocation2 + $0x1b0] sm:$0x1] %vm1489_vm10, %v1448_v33 }
 0x3fa   : > { %v1450_v56 = vpop.permute.xlu1 %1449 }
 0x3fb   : > { %1518 = vst.msk [vmem:[#allocation2 + $0x1c0] sm:$0x1] %vm1489_vm10, %v1450_v56 }
 0x400   : > { %v1454_v45 = vpop.permute.xlu0 %1453 }
 0x401   : > { %1520 = vst.msk [vmem:[#allocation2 + $0x1e0] sm:$0x1] %vm1489_vm10, %v1454_v45 }
 0x402   : > { %v1456_v40 = vpop.permute.xlu1 %1455 }
 0x403   : > { %1521 = vst.msk [vmem:[#allocation2 + $0x1f0] sm:$0x1] %vm1489_vm10, %v1456_v40 }
 0x404 PF: > { %p8063_p7 = scmp.ge.s32.totalorder %s9538_s27, 1 }
 0x406   : > { %1525 = sbr.rel (%p8063_p7) target bundleno = 1379 (0x563), region = 56 }
 0x40b   : > { %v8065_v19 = vld [vmem:[%s9730_s13 + $0x8] sm:$0x1]  ;;  %v8066_v28 = vld [vmem:[%s9730_s13 + $0x18] sm:$0x1]  ;;  %v1532_v59 = vrot.slane %v9796_v62, 1  ;;  %v1533_v60 = vrot.slane %v9796_v62, 2 }
 0x40c   : > { %v8067_v35 = vld [vmem:[%s9730_s13 + $0x28] sm:$0x1]  ;;  %v8068_v57 = vld [vmem:[%s9730_s13 + $0x38] sm:$0x1]  ;;  %v1534_v0 = vrot.slane %v9796_v62, 3  ;;  %v1538_v25 = vmul.f32 %v8065_v19, %v9796_v62  ;;  %v1542_v32 = vrot.slane %v9800_v1, 1 }
 0x40d   : > { %v1543_v29 = vrot.slane %v9800_v1, 2  ;;  %v1544_v2 = vrot.slane %v9800_v1, 3  ;;  %v1539_v37 = vmul.f32 %v8066_v28, %v1532_v59  ;;  %v1540_v51 = vmul.f32 %v8067_v35, %v1533_v60  ;;  %s9571_s13 = smov 1  }
 0x40e   : > { %v1541_v26 = vmul.f32 %v8068_v57, %v1534_v0  ;;  %v1548_v16 = vadd.f32 %v1538_v25, %v9800_v1  ;;  %vm1561_vm11 = vcmask 1041409   ;;  %vm1564_vm12 = vcmask 1042434  }
 0x40f   : > { %v1549_v58 = vadd.f32 %v1542_v32, %v1539_v37  ;;  %v1550_v39 = vadd.f32 %v1543_v29, %v1540_v51  ;;  %vm1567_vm13 = vcmask 1043459  }
 0x410   : > { %v1551_v3 = vadd.f32 %v1544_v2, %v1541_v26  ;;  %v1552_v12 = vmax.f32 %v1548_v16, 0.0 }
 0x411   : > { %v1553_v15 = vmax.f32 %v1549_v58, 0.0  ;;  %v1554_v17 = vmax.f32 %v1550_v39, 0.0 }
 0x412   : > { %v1555_v38 = vmax.f32 %v1551_v3, 0.0 }
 0x413   : > { %v1560_v62 = vrot.slane %v1553_v15, 7  ;;  %v1563_v41 = vrot.slane %v1554_v17, 6 }
 0x414   : > { %v1566_v30 = vrot.slane %v1555_v38, 5 }
 0x415   : > { %v1562_v55 = vsel %vm1561_vm11, %v1560_v62, %v1552_v12 }
 0x416   : > { %v1565_v63 = vsel %vm1564_vm12, %v1563_v41, %v1562_v55 }
 0x417   : > { %v1568_v14 = vsel %vm1567_vm13, %v1566_v30, %v1565_v63 }
 0x418   : > { %8069 = vmatpush.msk.msra.mxu0 %vm513_vm8, %v1568_v14  ;;  %8091 = vmatpush.msk.msra.mxu1 %vm513_vm8, %v1568_v14 }
 0x419   : > { %8070 = vmatmul.msk.f32.vlgmr.msra.gmra.mxu0 %vm500_vm9, %v9806_v4  ;;  %8071 = vmatmul.msk.f32.vlgmr.msra.gmra.mxu1 %vm500_vm9, %v9811_v5 }
 0x41a   : > { %8092 = vmatpush.msk.msra.mxu2 %vm513_vm8, %v1568_v14  ;;  %8093 = vmatpush.msk.msra.mxu3 %vm513_vm8, %v1568_v14  ;;  %vm1764_vm8 = vcmask 131080  }
 0x41b   : > { %8072 = vmatmul.msk.f32.vlgmr.msra.gmra.mxu2 %vm500_vm9, %v9818_v7  ;;  %8073 = vmatmul.msk.f32.vlgmr.msra.gmra.mxu3 %vm500_vm9, %v9823_v8 }
 0x496   : > { %v1588_v1 = vpop.f32.mrf.mxu0  ;;  %v1591_v42 = vpop.f32.mrf.mxu1 }
 0x497   : > { %v1589_v24 = vadd.f32 %v1588_v1, %v9835_v9  ;;  %v1592_v20 = vadd.f32 %v1591_v42, %v9837_v10 }
 0x499   : > { %v1600_v4 = vmax.f32 %v1589_v24, 0.0  ;;  %v1601_v31 = vmax.f32 %v1592_v20, 0.0 }
 0x49b   : > { %v1644_v34 = vperm.slane %v1601_v31, 0  ;;  %v1636_v5 = vperm.slane %v1600_v4, 0  ;;  %v1609_v22 = vrot.slane %v1600_v4, 2  ;;  %v1611_v8 = vrot.slane %v1600_v4, 4 }
 0x49c   : > { %v1608_v52 = vrot.slane %v1600_v4, 1  ;;  %v1610_v46 = vrot.slane %v1600_v4, 3  ;;  %v1612_v36 = vrot.slane %v1600_v4, 5  ;;  %v1613_v47 = vrot.slane %v1600_v4, 6 }
 0x49d   : > { %1684 = vrot.lane.b32.xlu2 %v1644_v34, %s9571_s13  ;;  %1668 = vrot.lane.b32.xlu0 %v1636_v5, %s9571_s13  ;;  %v1638_v7 = vperm.slane %v1609_v22, 0  ;;  %v1640_v61 = vperm.slane %v1611_v8, 0  ;;  %v1614_v53 = vrot.slane %v1600_v4, 7  ;;  %v1617_v54 = vrot.slane %v1601_v31, 3 }
 0x49e   : > { %v1637_v9 = vperm.slane %v1608_v52, 0  ;;  %v1639_v10 = vperm.slane %v1610_v46, 0  ;;  %v1641_v13 = vperm.slane %v1612_v36, 0  ;;  %v1642_v43 = vperm.slane %v1613_v47, 0  ;;  %v1594_v50 = vpop.f32.mrf.mxu2  ;;  %v1597_v0 = vpop.f32.mrf.mxu3 }
 0x49f   : > { %1672 = vrot.lane.b32.xlu1 %v1638_v7, %s9571_s13  ;;  %v1643_v44 = vperm.slane %v1614_v53, 0  ;;  %v1615_v11 = vrot.slane %v1601_v31, 1  ;;  %v1616_v48 = vrot.slane %v1601_v31, 2  ;;  %v1647_v49 = vperm.slane %v1617_v54, 0 }
 0x4a0   : > { %v1595_v56 = vadd.f32 %v1594_v50, %v9860_v18  ;;  %v1620_v45 = vrot.slane %v1601_v31, 6  ;;  %v1618_v40 = vrot.slane %v1601_v31, 4  ;;  %v1619_v28 = vrot.slane %v1601_v31, 5 }
 0x4a1   : > { %v1645_v27 = vperm.slane %v1615_v11, 0  ;;  %v1646_v33 = vperm.slane %v1616_v48, 0  ;;  %v1621_v25 = vrot.slane %v1601_v31, 7  ;;  %v1598_v18 = vadd.f32 %v1597_v0, %v9869_v23 }
 0x4a2   : > { %v1602_v19 = vmax.f32 %v1595_v56, 0.0  ;;  %v1650_v35 = vperm.slane %v1620_v45, 0  ;;  %v1648_v57 = vperm.slane %v1618_v40, 0  ;;  %v1649_v59 = vperm.slane %v1619_v28, 0 }
 0x4a3   : > { %v1651_v29 = vperm.slane %v1621_v25, 0  ;;  %v1603_v37 = vmax.f32 %v1598_v18, 0.0 }
 0x4a4   : > { %v1622_v60 = vrot.slane %v1602_v19, 1  ;;  %v1652_v2 = vperm.slane %v1602_v19, 0  ;;  %v1625_v51 = vrot.slane %v1602_v19, 4  ;;  %v1624_v16 = vrot.slane %v1602_v19, 3 }
 0x4a5   : > { %1676 = vrot.lane.b32.xlu2 %v1640_v61, %s9571_s13  ;;  %1670 = vrot.lane.b32.xlu0 %v1637_v9, %s9571_s13  ;;  %v1660_v26 = vperm.slane %v1603_v37, 0  ;;  %v1628_v23 = vrot.slane %v1602_v19, 7  ;;  %v1623_v3 = vrot.slane %v1602_v19, 2  ;;  %v1627_v12 = vrot.slane %v1602_v19, 6 }
 0x4a6   : > { %v1653_v32 = vperm.slane %v1622_v60, 0  ;;  %v1656_v58 = vperm.slane %v1625_v51, 0  ;;  %v1655_v39 = vperm.slane %v1624_v16, 0  ;;  %v1630_v62 = vrot.slane %v1603_v37, 2 }
 0x4a7   : > { %1674 = vrot.lane.b32.xlu1 %v1639_v10, %s9571_s13  ;;  %v1659_v15 = vperm.slane %v1628_v23, 0  ;;  %v1654_v17 = vperm.slane %v1623_v3, 0  ;;  %v1658_v38 = vperm.slane %v1627_v12, 0  ;;  %v1626_v41 = vrot.slane %v1602_v19, 5 }
 0x4a8   : > { %v1629_v30 = vrot.slane %v1603_v37, 1  ;;  %v1662_v55 = vperm.slane %v1630_v62, 0  ;;  %v1633_v1 = vrot.slane %v1603_v37, 5  ;;  %v1631_v42 = vrot.slane %v1603_v37, 3 }
 0x4a9   : > { %v1657_v63 = vperm.slane %v1626_v41, 0  ;;  %v1632_v24 = vrot.slane %v1603_v37, 4  ;;  %v1634_v34 = vrot.slane %v1603_v37, 6  ;;  %v1635_v5 = vrot.slane %v1603_v37, 7 }
 0x4aa   : > { %v1661_v14 = vperm.slane %v1629_v30, 0  ;;  %v1665_v20 = vperm.slane %v1633_v1, 0  ;;  %v1663_v4 = vperm.slane %v1631_v42, 0 }
 0x4ab   : > { %v1664_v31 = vperm.slane %v1632_v24, 0  ;;  %v1666_v22 = vperm.slane %v1634_v34, 0  ;;  %v1667_v7 = vperm.slane %v1635_v5, 0 }
 0x4ad   : > { %1678 = vrot.lane.b32.xlu2 %v1641_v13, %s9571_s13  ;;  %1680 = vrot.lane.b32.xlu0 %v1642_v43, %s9571_s13 }
 0x4af   : > { %1682 = vrot.lane.b32.xlu1 %v1643_v44, %s9571_s13 }
 0x4b5   : > { %1690 = vrot.lane.b32.xlu2 %v1647_v49, %s9571_s13  ;;  %1686 = vrot.lane.b32.xlu0 %v1645_v27, %s9571_s13 }
 0x4b7   : > { %1688 = vrot.lane.b32.xlu1 %v1646_v33, %s9571_s13 }
 0x4bd   : > { %1696 = vrot.lane.b32.xlu2 %v1650_v35, %s9571_s13  ;;  %1692 = vrot.lane.b32.xlu0 %v1648_v57, %s9571_s13 }
 0x4bf   : > { %1694 = vrot.lane.b32.xlu1 %v1649_v59, %s9571_s13 }
 0x4c5   : > { %1702 = vrot.lane.b32.xlu2 %v1653_v32, %s9571_s13  ;;  %1698 = vrot.lane.b32.xlu0 %v1651_v29, %s9571_s13 }
 0x4c7   : > { %1700 = vrot.lane.b32.xlu1 %v1652_v2, %s9571_s13 }
 0x4cd   : > { %1708 = vrot.lane.b32.xlu2 %v1656_v58, %s9571_s13  ;;  %1716 = vrot.lane.b32.xlu0 %v1660_v26, %s9571_s13 }
 0x4cf   : > { %1706 = vrot.lane.b32.xlu1 %v1655_v39, %s9571_s13 }
 0x4d5   : > { %1714 = vrot.lane.b32.xlu2 %v1659_v15, %s9571_s13  ;;  %1704 = vrot.lane.b32.xlu0 %v1654_v17, %s9571_s13 }
 0x4d7   : > { %1712 = vrot.lane.b32.xlu1 %v1658_v38, %s9571_s13 }
 0x4dd   : > { %1720 = vrot.lane.b32.xlu2 %v1662_v55, %s9571_s13  ;;  %1710 = vrot.lane.b32.xlu0 %v1657_v63, %s9571_s13 }
 0x4df   : > { %1718 = vrot.lane.b32.xlu1 %v1661_v14, %s9571_s13 }
 0x4e5   : > { %1726 = vrot.lane.b32.xlu2 %v1665_v20, %s9571_s13  ;;  %1722 = vrot.lane.b32.xlu0 %v1663_v4, %s9571_s13 }
 0x4e7   : > { %1724 = vrot.lane.b32.xlu1 %v1664_v31, %s9571_s13 }
 0x4ed   : > { %1728 = vrot.lane.b32.xlu0 %v1666_v22, %s9571_s13 }
 0x4ef   : > { %1730 = vrot.lane.b32.xlu1 %v1667_v7, %s9571_s13 }
 0x4f7   : > { %v1685_v8 = vpop.permute.xlu2 %1684 }
 0x4f8   : > { %1773 = vst.msk [vmem:[#allocation2 + $0x89] sm:$0x1] %vm1764_vm8, %v1685_v8 }
 0x4ff   : > { %v1677_v52 = vpop.permute.xlu2 %1676 }
 0x500   : > { %1769 = vst.msk [vmem:[#allocation2 + $0x49] sm:$0x1] %vm1764_vm8, %v1677_v52 }
 0x507   : > { %v1679_v46 = vpop.permute.xlu2 %1678 }
 0x508   : > { %1770 = vst.msk [vmem:[#allocation2 + $0x59] sm:$0x1] %vm1764_vm8, %v1679_v46 }
 0x50f   : > { %v1669_v61 = vpop.permute.xlu0 %1668  ;;  %v1691_v9 = vpop.permute.xlu2 %1690 }
 0x510   : > { %1765 = vst.msk [vmem:[#allocation2 + $0x9] sm:$0x1] %vm1764_vm8, %v1669_v61 }
 0x511   : > { %1776 = vst.msk [vmem:[#allocation2 + $0xb9] sm:$0x1] %vm1764_vm8, %v1691_v9  ;;  %v1673_v10 = vpop.permute.xlu1 %1672 }
 0x512   : > { %1767 = vst.msk [vmem:[#allocation2 + $0x29] sm:$0x1] %vm1764_vm8, %v1673_v10 }
 0x517   : > { %v1697_v36 = vpop.permute.xlu2 %1696  ;;  %v1671_v47 = vpop.permute.xlu0 %1670 }
 0x518   : > { %1779 = vst.msk [vmem:[#allocation2 + $0xe9] sm:$0x1] %vm1764_vm8, %v1697_v36 }
 0x519   : > { %1766 = vst.msk [vmem:[#allocation2 + $0x19] sm:$0x1] %vm1764_vm8, %v1671_v47  ;;  %v1675_v53 = vpop.permute.xlu1 %1674 }
 0x51a   : > { %1768 = vst.msk [vmem:[#allocation2 + $0x39] sm:$0x1] %vm1764_vm8, %v1675_v53 }
 0x51f   : > { %v1703_v13 = vpop.permute.xlu2 %1702  ;;  %v1681_v43 = vpop.permute.xlu0 %1680 }
 0x520   : > { %1782 = vst.msk [vmem:[#allocation2 + $0x119] sm:$0x1] %vm1764_vm8, %v1703_v13 }
 0x521   : > { %1771 = vst.msk [vmem:[#allocation2 + $0x69] sm:$0x1] %vm1764_vm8, %v1681_v43  ;;  %v1683_v44 = vpop.permute.xlu1 %1682 }
 0x522   : > { %1772 = vst.msk [vmem:[#allocation2 + $0x79] sm:$0x1] %vm1764_vm8, %v1683_v44 }
 0x527   : > { %v1709_v54 = vpop.permute.xlu2 %1708  ;;  %v1687_v11 = vpop.permute.xlu0 %1686 }
 0x528   : > { %1785 = vst.msk [vmem:[#allocation2 + $0x149] sm:$0x1] %vm1764_vm8, %v1709_v54 }
 0x529   : > { %1774 = vst.msk [vmem:[#allocation2 + $0x99] sm:$0x1] %vm1764_vm8, %v1687_v11  ;;  %v1689_v48 = vpop.permute.xlu1 %1688 }
 0x52a   : > { %1775 = vst.msk [vmem:[#allocation2 + $0xa9] sm:$0x1] %vm1764_vm8, %v1689_v48 }
 0x52f   : > { %v1715_v49 = vpop.permute.xlu2 %1714  ;;  %v1693_v27 = vpop.permute.xlu0 %1692 }
 0x530   : > { %1788 = vst.msk [vmem:[#allocation2 + $0x179] sm:$0x1] %vm1764_vm8, %v1715_v49 }
 0x531   : > { %1777 = vst.msk [vmem:[#allocation2 + $0xc9] sm:$0x1] %vm1764_vm8, %v1693_v27  ;;  %v1695_v50 = vpop.permute.xlu1 %1694 }
 0x532   : > { %1778 = vst.msk [vmem:[#allocation2 + $0xd9] sm:$0x1] %vm1764_vm8, %v1695_v50 }
 0x537   : > { %v1721_v33 = vpop.permute.xlu2 %1720  ;;  %v1699_v56 = vpop.permute.xlu0 %1698 }
 0x538   : > { %1791 = vst.msk [vmem:[#allocation2 + $0x1a9] sm:$0x1] %vm1764_vm8, %v1721_v33 }
 0x539   : > { %1780 = vst.msk [vmem:[#allocation2 + $0xf9] sm:$0x1] %vm1764_vm8, %v1699_v56  ;;  %v1701_v45 = vpop.permute.xlu1 %1700 }
 0x53a   : > { %1781 = vst.msk [vmem:[#allocation2 + $0x109] sm:$0x1] %vm1764_vm8, %v1701_v45 }
 0x53f   : > { %v1727_v40 = vpop.permute.xlu2 %1726  ;;  %v1717_v19 = vpop.permute.xlu0 %1716 }
 0x540   : > { %1794 = vst.msk [vmem:[#allocation2 + $0x1d9] sm:$0x1] %vm1764_vm8, %v1727_v40 }
 0x541   : > { %1789 = vst.msk [vmem:[#allocation2 + $0x189] sm:$0x1] %vm1764_vm8, %v1717_v19  ;;  %v1707_v28 = vpop.permute.xlu1 %1706 }
 0x542   : > { %1784 = vst.msk [vmem:[#allocation2 + $0x139] sm:$0x1] %vm1764_vm8, %v1707_v28 }
 0x547   : > { %v1705_v35 = vpop.permute.xlu0 %1704 }
 0x548   : > { %1783 = vst.msk [vmem:[#allocation2 + $0x129] sm:$0x1] %vm1764_vm8, %v1705_v35 }
 0x549   : > { %v1713_v57 = vpop.permute.xlu1 %1712 }
 0x54a   : > { %1787 = vst.msk [vmem:[#allocation2 + $0x169] sm:$0x1] %vm1764_vm8, %v1713_v57 }
 0x54f   : > { %v1711_v59 = vpop.permute.xlu0 %1710 }
 0x550   : > { %1786 = vst.msk [vmem:[#allocation2 + $0x159] sm:$0x1] %vm1764_vm8, %v1711_v59 }
 0x551   : > { %v1719_v60 = vpop.permute.xlu1 %1718 }
 0x552   : > { %1790 = vst.msk [vmem:[#allocation2 + $0x199] sm:$0x1] %vm1764_vm8, %v1719_v60 }
 0x557   : > { %v1723_v0 = vpop.permute.xlu0 %1722 }
 0x558   : > { %1792 = vst.msk [vmem:[#allocation2 + $0x1b9] sm:$0x1] %vm1764_vm8, %v1723_v0 }
 0x559   : > { %v1725_v25 = vpop.permute.xlu1 %1724 }
 0x55a   : > { %1793 = vst.msk [vmem:[#allocation2 + $0x1c9] sm:$0x1] %vm1764_vm8, %v1725_v25 }
 0x55f   : > { %v1729_v32 = vpop.permute.xlu0 %1728 }
 0x560   : > { %1795 = vst.msk [vmem:[#allocation2 + $0x1e9] sm:$0x1] %vm1764_vm8, %v1729_v32 }
 0x561   : > { %v1731_v18 = vpop.permute.xlu1 %1730 }
 0x562   : > { %1796 = vst.msk [vmem:[#allocation2 + $0x1f9] sm:$0x1] %vm1764_vm8, %v1731_v18 }
 0x563 PF: > { %v10587_v29 = vld [vmem:[#allocation2] sm:$0xff]  ;;  %v10591_v37 = vld [vmem:[#allocation2 + $0x10] sm:$0xff]  ;;  %s15707_s24 = smov 32   ;;  %s15710_s8 = smov 16  }
 0x564   : > { %v10589_v2 = vld [vmem:[#allocation2 + $0x20] sm:$0xff]  ;;  %v10593_v51 = vld [vmem:[#allocation2 + $0x30] sm:$0xff]  ;;  %s15716_s17 = smov 48   ;;  %s9572_s15 = smov 127  }
 0x565   : > { %v10595_v26 = vld [vmem:[#allocation2 + $0x40] sm:$0xff]  ;;  %v1829_v16 = vrot.slane %v10589_v2, 4  ;;  %v10598_v58 = vld [vmem:[#allocation2 + $0x50] sm:$0xff]  ;;  %v1841_v3 = vrot.slane %v10593_v51, 4  ;;  %s9573_s29 = smov 126   ;;  %s8080_s11 = sshll.u32 %s9542_s28, 1 }
 0x566   : > { %v10600_v39 = vld [vmem:[#allocation2 + $0x60] sm:$0xff]  ;;  %v10602_v23 = vld [vmem:[#allocation2 + $0x70] sm:$0xff]  ;;  %s7944_s13 = sadd.s32 %s9538_s27, %s8080_s11  ;;  %s16141_s28 = sand.u32 1, %s9518_s22  }
 0x567   : > { %v10605_v12 = vld [vmem:[#allocation2 + $0x80] sm:$0xff]  ;;  %v10609_v17 = vld [vmem:[#allocation2 + $0xb0] sm:$0xff]  ;;  %v1830_v38 = vsel %vm369_vm0, %v1829_v16, %v10587_v29  ;;  %v1853_v62 = vrot.slane %v10600_v39, 4  ;;  %v1865_v41 = vrot.slane %v10602_v23, 4  ;;  %v1842_v1 = vsel %vm369_vm0, %v1841_v3, %v10591_v37  ;;  %s7934_s27 = scalar_lea.sflag [#allocation5], %s16141_s28 }
 0x568   : > { %v10607_v15 = vld [vmem:[#allocation2 + $0xa0] sm:$0xff]  ;;  %v10615_v30 = vld [vmem:[#allocation2 + $0x90] sm:$0xff]  ;;  %v1836_v14 = vperm.slane %v1830_v38, %v9735_v6  ;;  %v1953_v24 = vrot.slane %v10609_v17, 4  ;;  %v1848_v4 = vperm.slane %v1842_v1, %v9735_v6 }
 0x569   : > { %v10617_v55 = vld [vmem:[#allocation2 + $0xc0] sm:$0xff]  ;;  %v1941_v42 = vrot.slane %v10607_v15, 4  ;;  %v10626_v20 = vld [vmem:[#allocation2 + $0xf0] sm:$0xff]  ;;  %v1854_v31 = vsel %vm369_vm0, %v1853_v62, %v10595_v26  ;;  %v1866_v34 = vsel %vm369_vm0, %v1865_v41, %v10598_v58 }
 0x56a   : > { %v10619_v63 = vld [vmem:[#allocation2 + $0xe0] sm:$0xff]  ;;  %v10634_v22 = vld [vmem:[#allocation2 + $0xd0] sm:$0xff]  ;;  %v1860_v7 = vperm.slane %v1854_v31, %v9735_v6  ;;  %v1872_v8 = vperm.slane %v1866_v34, %v9735_v6  ;;  %v1879_v52 = vrot.slane %v1836_v14, 4  ;;  %v1954_v9 = vsel %vm369_vm0, %v1953_v24, %v10615_v30 }
 0x56b   : > { %v1965_v5 = vrot.slane %v10619_v63, 4  ;;  %15691 = vst [vmem:[#allocation16_spill] sm:$0xff] %v10634_v22  ;;  %v1942_v46 = vsel %vm369_vm0, %v1941_v42, %v10605_v12  ;;  %v1977_v36 = vrot.slane %v10626_v20, 4  ;;  %v1960_v13 = vperm.slane %v1954_v9, %v9735_v6  ;;  %v10661_v28 = vld [vmem:[#allocation2 + $0x120] sm:$0xff]  ;;  %v10671_v0 = vld [vmem:[#allocation2 + $0x130] sm:$0xff] }
 0x56c   : > { %v1948_v61 = vperm.slane %v1942_v46, %v9735_v6  ;;  %v1880_v47 = vsel %vm369_vm0, %v1848_v4, %v1879_v52  ;;  %v1903_v53 = vrot.slane %v1860_v7, 4  ;;  %v1877_v48 = vrot.slane %v1848_v4, 4  ;;  %15692 = vst [vmem:[#allocation17_spill] sm:$0xff] %v10661_v28  ;;  %v10681_v3 = vld [vmem:[#allocation2 + $0x100] sm:$0xff]  ;;  %v10695_v31 = vld [vmem:[#allocation2 + $0x170] sm:$0xff] }
 0x56d   : > { %v1966_v10 = vsel %vm369_vm0, %v1965_v5, %v10617_v55  ;;  %v10650_v44 = vperm.slane %v1880_v47, %v9745_v21  ;;  %v1978_v54 = vsel %vm369_vm0, %v1977_v36, %v10634_v22  ;;  %v1901_v33 = vrot.slane %v1872_v8, 4  ;;  %15694 = vst [vmem:[#allocation19_spill] sm:$0xff] %v10671_v0  ;;  %v10693_v4 = vld [vmem:[#allocation2 + $0x160] sm:$0xff]  ;;  %v10713_v36 = vld [vmem:[#allocation2 + $0x150] sm:$0xff] }
 0x56e   : > { %v1972_v43 = vperm.slane %v1966_v10, %v9735_v6  ;;  %v1991_v11 = vrot.slane %v1948_v61, 4  ;;  %v1904_v49 = vsel %vm369_vm0, %v1872_v8, %v1903_v53  ;;  %v1984_v27 = vperm.slane %v1978_v54, %v9735_v6  ;;  %15697 = vst [vmem:[#allocation22_spill] sm:$0xff] %v10693_v4  ;;  %v10702_v52 = vld [vmem:[#allocation2 + $0x1a0] sm:$0xff]  ;;  %v10715_v47 = vld [vmem:[#allocation2 + $0x1b0] sm:$0xff] }
 0x56f   : > { %v10657_v56 = vperm.slane %v1904_v49, %v9745_v21  ;;  %v1878_v40 = vsel %vm369_vm0, %v1877_v48, %v1836_v14  ;;  %v1989_v19 = vrot.slane %v1960_v13, 4  ;;  %v1902_v60 = vsel %vm369_vm0, %v1901_v33, %v1860_v7  ;;  %v10687_v14 = vld [vmem:[#allocation2 + $0x110] sm:$0xff]  ;;  %15698 = vst [vmem:[#allocation23_spill] sm:$0xff] %v10695_v31  ;;  %v10711_v10 = vld [vmem:[#allocation2 + $0x140] sm:$0xff] }
 0x570   : > { %v2015_v50 = vrot.slane %v1972_v43, 4  ;;  %v1992_v45 = vsel %vm369_vm0, %v1960_v13, %v1991_v11  ;;  %v10668_v59 = vperm.slane %v1878_v40, %v9745_v21  ;;  %v10678_v18 = vperm.slane %v1902_v60, %v9745_v21  ;;  %15699 = vst [vmem:[#allocation24_spill] sm:$0xff] %v10702_v52  ;;  %v10720_v54 = vld [vmem:[#allocation2 + $0x180] sm:$0xff] }
 0x571   : > { %v10664_v35 = vperm.slane %v1992_v45, %v9745_v21  ;;  %v1929_v25 = vrot.slane %v10657_v56, 4  ;;  %v1990_v16 = vsel %vm369_vm0, %v1989_v19, %v1948_v61  ;;  %v2013_v41 = vrot.slane %v1984_v27, 4  ;;  %15701 = vst [vmem:[#allocation26_spill] sm:$0xff] %v10711_v10 }
 0x572   : > { %v2016_v57 = vsel %vm369_vm0, %v1984_v27, %v2015_v50  ;;  %15693 = vst [vmem:[#allocation18_spill] sm:$0xff] %v10668_v59  ;;  %v1927_v38 = vrot.slane %v10668_v59, 4  ;;  %v10685_v62 = vperm.slane %v1990_v16, %v9745_v21  ;;  %v2053_v1 = vrot.slane %v10661_v28, 4  ;;  %v10726_v27 = vld [vmem:[#allocation2 + $0x190] sm:$0xff]  ;;  %v10728_v50 = vld [vmem:[#allocation2 + $0x1e0] sm:$0xff] }
 0x573   : > { %v10675_v32 = vperm.slane %v2016_v57, %v9745_v21  ;;  %15695 = vst [vmem:[#allocation20_spill] sm:$0xff] %v10678_v18  ;;  %v1930_v42 = vsel %vm369_vm0, %v1929_v25, %v10650_v44  ;;  %v2065_v34 = vrot.slane %v10671_v0, 4  ;;  %v2014_v7 = vsel %vm369_vm0, %v2013_v41, %v1972_v43  ;;  %v10733_v57 = vld [vmem:[#allocation2 + $0x1f0] sm:$0xff] }
 0x574   : > { %15696 = vst [vmem:[#allocation21_spill] sm:$0xff] %v10685_v62  ;;  %v1928_v5 = vsel %vm369_vm0, %v10678_v18, %v1927_v38  ;;  %v2039_v8 = vrot.slane %v10685_v62, 4  ;;  %v2054_v46 = vsel %vm369_vm0, %v2053_v1, %v10681_v3  ;;  %v10709_v9 = vperm.slane %v2014_v7, %v9745_v21  ;;  %v10740_v38 = vld [vmem:[#allocation2 + $0x1c0] sm:$0xff] }
 0x575   : > { %v2041_v24 = vrot.slane %v10675_v32, 4  ;;  %15702 = vst [vmem:[#allocation27_spill] sm:$0xff] %v10713_v36  ;;  %v2060_v53 = vperm.slane %v2054_v46, %v9735_v6  ;;  %v2066_v13 = vsel %vm369_vm0, %v2065_v34, %v10687_v14  ;;  %v2077_v11 = vrot.slane %v10693_v4, 4 }
 0x576   : > { %15700 = vst [vmem:[#allocation25_spill] sm:$0xff] %v10709_v9  ;;  %v2089_v48 = vrot.slane %v10695_v31, 4  ;;  %v2040_v49 = vsel %vm369_vm0, %v10709_v9, %v2039_v8  ;;  %v2072_v33 = vperm.slane %v2066_v13, %v9735_v6  ;;  %v2165_v40 = vrot.slane %v10702_v52, 4 }
 0x577   : > { %v2042_v61 = vsel %vm369_vm0, %v2041_v24, %v10664_v35  ;;  %15703 = vst [vmem:[#allocation28_spill] sm:$0xff] %v10715_v47  ;;  %v2103_v45 = vrot.slane %v2060_v53, 4  ;;  %v8217_v19 = vpack.i.bf16 %v2040_v49, %v1928_v5  ;;  %v2078_v60 = vsel %vm369_vm0, %v2077_v11, %v10711_v10  ;;  %v10747_v24 = vld [vmem:[#allocation2 + $0x1d0] sm:$0xff] }
 0x578   : > { %v8227_v43 = vpack.i.bf16 %v2042_v61, %v1930_v42  ;;  %15704 = vst [vmem:[#allocation29_spill] sm:$0xff] %v10720_v54  ;;  %v2090_v25 = vsel %vm369_vm0, %v2089_v48, %v10713_v36  ;;  %v2177_v16 = vrot.slane %v10715_v47, 4  ;;  %v2084_v41 = vperm.slane %v2078_v60, %v9735_v6 }
 0x579   : > { %15705 = vst [vmem:[#allocation30_spill] sm:$0xff] %v10726_v27  ;;  %v2096_v1 = vperm.slane %v2090_v25, %v9735_v6  ;;  %v2166_v42 = vsel %vm369_vm0, %v2165_v40, %v10720_v54  ;;  %8218 = vrot.lane.b32.xlu0 %v8217_v19, %s15710_s8  ;;  %v2104_v34 = vsel %vm369_vm0, %v2072_v33, %v2103_v45  ;;  %v2189_v8 = vrot.slane %v10728_v50, 4 }
 0x57a   : > { %15706 = vst [vmem:[#allocation31_spill] sm:$0xff] %v10728_v50  ;;  %8228 = vrot.lane.b32.xlu1 %v8227_v43, %s15707_s24  ;;  %v2172_v5 = vperm.slane %v2166_v42, %v9735_v6  ;;  %v2178_v7 = vsel %vm369_vm0, %v2177_v16, %v10726_v27  ;;  %v2127_v46 = vrot.slane %v2084_v41, 4  ;;  %v2201_v13 = vrot.slane %v10733_v57, 4 }
 0x57b   : > { %15708 = vst [vmem:[#allocation32_spill] sm:$0xff] %v10733_v57  ;;  %v2184_v61 = vperm.slane %v2178_v7, %v9735_v6  ;;  %v2101_v43 = vrot.slane %v2072_v33, 4  ;;  %v2190_v11 = vsel %vm369_vm0, %v2189_v8, %v10740_v38  ;;  %v2125_v49 = vrot.slane %v2096_v1, 4 }
 0x57c   : > { %15709 = vst [vmem:[#allocation33_spill] sm:$0xff] %v10740_v38  ;;  %v2215_v48 = vrot.slane %v2172_v5, 4  ;;  %v2055_v45 = vrot.slane %v10681_v3, 4  ;;  %v2128_v40 = vsel %vm369_vm0, %v2096_v1, %v2127_v46  ;;  %v2196_v19 = vperm.slane %v2190_v11, %v9735_v6 }
 0x57d   : > { %15711 = vst [vmem:[#allocation34_spill] sm:$0xff] %v10747_v24  ;;  %v2202_v60 = vsel %vm369_vm0, %v2201_v13, %v10747_v24  ;;  %v2102_v25 = vsel %vm369_vm0, %v2101_v43, %v2060_v53  ;;  %v10765_v16 = vperm.slane %v2104_v34, %v9745_v21  ;;  %v10768_v33 = vperm.slane %v2128_v40, %v9745_v21 }
 0x57e   : > { %v2208_v42 = vperm.slane %v2202_v60, %v9735_v6  ;;  %v10772_v7 = vperm.slane %v2102_v25, %v9745_v21  ;;  %v2216_v1 = vsel %vm369_vm0, %v2184_v61, %v2215_v48  ;;  %v2239_v8 = vrot.slane %v2196_v19, 4 }
 0x57f   : > { %v2126_v46 = vsel %vm369_vm0, %v2125_v49, %v2084_v41  ;;  %v2213_v11 = vrot.slane %v2184_v61, 4  ;;  %v2153_v13 = vrot.slane %v10768_v33, 4  ;;  %v2056_v25 = vsel %vm369_vm0, %v10661_v28, %v2055_v45 }
 0x580   : > { %15712 = vst [vmem:[#allocation35_spill] sm:$0xff] %v10772_v7  ;;  %v10778_v53 = vperm.slane %v2126_v46, %v9745_v21  ;;  %v2151_v34 = vrot.slane %v10772_v7, 4  ;;  %v2237_v43 = vrot.slane %v2208_v42, 4  ;;  %v2240_v40 = vsel %vm369_vm0, %v2208_v42, %v2239_v8 }
 0x581   : > { %v2214_v60 = vsel %vm369_vm0, %v2213_v11, %v2172_v5  ;;  %v2067_v48 = vrot.slane %v10687_v14, 4  ;;  %v2154_v41 = vsel %vm369_vm0, %v2153_v13, %v10765_v16  ;;  %v10789_v61 = vperm.slane %v2216_v1, %v9745_v21 }
 0x582   : > { %15713 = vst [vmem:[#allocation36_spill] sm:$0xff] %v10778_v53  ;;  %v10792_v49 = vperm.slane %v2240_v40, %v9745_v21  ;;  %v2152_v46 = vsel %vm369_vm0, %v10778_v53, %v2151_v34  ;;  %v10797_v42 = vperm.slane %v2214_v60, %v9745_v21  ;;  %v2238_v5 = vsel %vm369_vm0, %v2237_v43, %v2196_v19 }
 0x583   : > { %v10801_v45 = vperm.slane %v2056_v25, %v9735_v6  ;;  %v2068_v8 = vsel %vm369_vm0, %v10671_v0, %v2067_v48  ;;  %v10807_v11 = vperm.slane %v2238_v5, %v9745_v21  ;;  %v2079_v34 = vrot.slane %v10711_v10, 4 }
 0x584   : > { %15714 = vst [vmem:[#allocation37_spill] sm:$0xff] %v10797_v42  ;;  %v2265_v1 = vrot.slane %v10792_v49, 4  ;;  %v10810_v13 = vperm.slane %v2068_v8, %v9735_v6  ;;  %v2263_v40 = vrot.slane %v10797_v42, 4  ;;  %v2091_v19 = vrot.slane %v10713_v36, 4 }
 0x585   : > { %15715 = vst [vmem:[#allocation38_spill] sm:$0xff] %v10807_v11  ;;  %v2167_v43 = vrot.slane %v10720_v54, 4  ;;  %v2179_v60 = vrot.slane %v10726_v27, 4  ;;  %v2080_v48 = vsel %vm369_vm0, %v10693_v4, %v2079_v34  ;;  %v1967_v54 = vrot.slane %v10617_v55, 4 }
 0x586   : > { %v2266_v25 = vsel %vm369_vm0, %v2265_v1, %v10789_v61  ;;  %v2113_v5 = vrot.slane %v10810_v13, 4  ;;  %v2264_v7 = vsel %vm369_vm0, %v10807_v11, %v2263_v40  ;;  %v10825_v42 = vperm.slane %v2080_v48, %v9735_v6 }
 0x587   : > { %v8232_v8 = vpack.i.bf16 %v2266_v25, %v2154_v41  ;;  %v2092_v59 = vsel %vm369_vm0, %v10695_v31, %v2091_v19  ;;  %v8222_v62 = vpack.i.bf16 %v2264_v7, %v2152_v46  ;;  %v2168_v34 = vsel %vm369_vm0, %v10702_v52, %v2167_v43 }
 0x588   : > { %v10830_v53 = vperm.slane %v2092_v59, %v9735_v6  ;;  %v2114_v1 = vsel %vm369_vm0, %v2113_v5, %v10801_v45  ;;  %v10841_v40 = vperm.slane %v2168_v34, %v9735_v6  ;;  %v2180_v7 = vsel %vm369_vm0, %v10715_v47, %v2179_v60 }
 0x589   : > { %8233 = vrot.lane.b32.xlu1 %v8232_v8, %s15707_s24  ;;  %v10838_v41 = vperm.slane %v2114_v1, %v9745_v21  ;;  %v2191_v59 = vrot.slane %v10740_v38, 4  ;;  %8223 = vrot.lane.b32.xlu0 %v8222_v62, %s15710_s8  ;;  %v10849_v19 = vperm.slane %v2180_v7, %v9735_v6  ;;  %v2203_v43 = vrot.slane %v10747_v24, 4 }
 0x58a   : > { %v2137_v46 = vrot.slane %v10830_v53, 4  ;;  %v1831_v25 = vrot.slane %v10587_v29, 4  ;;  %v1843_v5 = vrot.slane %v10591_v37, 4  ;;  %v1855_v60 = vrot.slane %v10595_v26, 4 }
 0x58b   : > { %v2192_v48 = vsel %vm369_vm0, %v10728_v50, %v2191_v59  ;;  %v1867_v8 = vrot.slane %v10598_v58, 4  ;;  %v2204_v34 = vsel %vm369_vm0, %v10733_v57, %v2203_v43  ;;  %v2225_v7 = vrot.slane %v10849_v19, 4 }
 0x58c   : > { %v2138_v62 = vsel %vm369_vm0, %v2137_v46, %v10825_v42  ;;  %v10861_v1 = vperm.slane %v2192_v48, %v9735_v6  ;;  %v10870_v59 = vperm.slane %v2204_v34, %v9735_v6  ;;  %v1832_v18 = vsel %vm369_vm0, %v10589_v2, %v1831_v25 }
 0x58d   : > { %v10867_v11 = vperm.slane %v2138_v62, %v9745_v21  ;;  %v1844_v46 = vsel %vm369_vm0, %v10593_v51, %v1843_v5  ;;  %v2226_v48 = vsel %vm369_vm0, %v2225_v7, %v10841_v40  ;;  %v1840_v9 = vperm.slane %v1832_v18, %v9735_v6 }
 0x58e   : > { %v1852_v43 = vperm.slane %v1844_v46, %v9735_v6  ;;  %v1856_v62 = vsel %vm369_vm0, %v10600_v39, %v1855_v60  ;;  %v10884_v34 = vperm.slane %v2226_v48, %v9745_v21  ;;  %v2249_v25 = vrot.slane %v10870_v59, 4 }
 0x58f   : > { %v2157_v57 = vrot.slane %v10867_v11, 4  ;;  %v1864_v50 = vperm.slane %v1856_v62, %v9735_v6  ;;  %v1868_v5 = vsel %vm369_vm0, %v10602_v23, %v1867_v8  ;;  %v1943_v18 = vrot.slane %v10605_v12, 4 }
 0x590   : > { %v1889_v7 = vrot.slane %v1852_v43, 4  ;;  %v1955_v46 = vrot.slane %v10615_v30, 4  ;;  %v2250_v27 = vsel %vm369_vm0, %v2249_v25, %v10861_v1  ;;  %v1876_v48 = vperm.slane %v1868_v5, %v9735_v6 }
 0x591   : > { %v2158_v60 = vsel %vm369_vm0, %v2157_v57, %v10838_v41  ;;  %v10899_v62 = vperm.slane %v2250_v27, %v9745_v21  ;;  %v1944_v47 = vsel %vm369_vm0, %v10607_v15, %v1943_v18  ;;  %v1968_v27 = vsel %vm369_vm0, %v10619_v63, %v1967_v54 }
 0x592   : > { %v1890_v8 = vsel %vm369_vm0, %v1889_v7, %v1840_v9  ;;  %v1956_v52 = vsel %vm369_vm0, %v10609_v17, %v1955_v46  ;;  %v1913_v24 = vrot.slane %v1876_v48, 4  ;;  %v1952_v25 = vperm.slane %v1944_v47, %v9735_v6 }
 0x593   : > { %v10907_v57 = vperm.slane %v1890_v8, %v9745_v21  ;;  %v1964_v5 = vperm.slane %v1956_v52, %v9735_v6  ;;  %v2269_v38 = vrot.slane %v10899_v62, 4  ;;  %v1979_v7 = vrot.slane %v10634_v22, 4 }
 0x594   : > { %v1931_v18 = vrot.slane %v10650_v44, 4  ;;  %v1914_v0 = vsel %vm369_vm0, %v1913_v24, %v1864_v50  ;;  %v1976_v46 = vperm.slane %v1968_v27, %v9735_v6  ;;  %v2043_v28 = vrot.slane %v10664_v35, 4 }
 0x595   : > { %v2001_v8 = vrot.slane %v1964_v5, 4  ;;  %v2270_v47 = vsel %vm369_vm0, %v2269_v38, %v10884_v34  ;;  %v10922_v52 = vperm.slane %v1914_v0, %v9745_v21  ;;  %v1980_v54 = vsel %vm369_vm0, %v10626_v20, %v1979_v7 }
 0x596   : > { %v1932_v36 = vsel %vm369_vm0, %v10657_v56, %v1931_v18  ;;  %v8252_v44 = vpack.i.bf16 %v2270_v47, %v2158_v60  ;;  %v1988_v24 = vperm.slane %v1980_v54, %v9735_v6  ;;  %v2044_v35 = vsel %vm369_vm0, %v10675_v32, %v2043_v28 }
 0x597   : > { %v2002_v27 = vsel %vm369_vm0, %v2001_v8, %v1952_v25  ;;  %v1933_v10 = vrot.slane %v10922_v52, 4  ;;  %v8237_v38 = vpack.i.bf16 %v2044_v35, %v1932_v36  ;;  %v1891_v31 = vrot.slane %v1840_v9, 4 }
 0x598   : > { %8253 = vrot.lane.b32.xlu1 %v8252_v44, %s9561_s30  ;;  %v2025_v0 = vrot.slane %v1988_v24, 4  ;;  %v1915_v4 = vrot.slane %v1864_v50, 4  ;;  %v2003_v7 = vrot.slane %v1952_v25, 4  ;;  %v2027_v22 = vrot.slane %v1976_v46, 4 }
 0x599   : > { %v2008_v56 = vperm.slane %v2002_v27, %v9745_v21  ;;  %8238 = vrot.lane.b32.xlu2 %v8237_v38, %s15716_s17  ;;  %v1892_v60 = vsel %vm369_vm0, %v1852_v43, %v1891_v31  ;;  %v1934_v18 = vsel %vm369_vm0, %v1933_v10, %v10907_v57  ;;  %v2159_v10 = vrot.slane %v10838_v41, 4 }
 0x59a   : > { %v2026_v28 = vsel %vm369_vm0, %v2025_v0, %v1976_v46  ;;  %v1916_v32 = vsel %vm369_vm0, %v1876_v48, %v1915_v4  ;;  %v2004_v9 = vsel %vm369_vm0, %v1964_v5, %v2003_v7  ;;  %v1900_v50 = vperm.slane %v1892_v60, %v9745_v21 }
 0x59b   : > { %v2032_v36 = vperm.slane %v2026_v28, %v9745_v21  ;;  %v1924_v25 = vperm.slane %v1916_v32, %v9745_v21  ;;  %v2028_v8 = vsel %vm369_vm0, %v1988_v24, %v2027_v22  ;;  %v2012_v47 = vperm.slane %v2004_v9, %v9745_v21 }
 0x59c   : > { %v2036_v31 = vperm.slane %v2028_v8, %v9745_v21  ;;  %v2155_v43 = vrot.slane %v10765_v16, 4  ;;  %v2271_v48 = vrot.slane %v10884_v34, 4  ;;  %v2267_v5 = vrot.slane %v10789_v61, 4 }
 0x59d   : > { %v2045_v46 = vrot.slane %v2032_v36, 4  ;;  %v1937_v4 = vrot.slane %v1924_v25, 4  ;;  %v2115_v22 = vrot.slane %v10801_v45, 4  ;;  %v2139_v24 = vrot.slane %v10825_v42, 4 }
 0x59e   : > { %v2049_v54 = vrot.slane %v2036_v31, 4  ;;  %v2156_v44 = vsel %vm369_vm0, %v10768_v33, %v2155_v43  ;;  %v2268_v16 = vsel %vm369_vm0, %v10792_v49, %v2267_v5  ;;  %v2227_v35 = vrot.slane %v10841_v40, 4 }
 0x59f   : > { %v2046_v27 = vsel %vm369_vm0, %v2045_v46, %v2008_v56  ;;  %v1938_v41 = vsel %vm369_vm0, %v1937_v4, %v1900_v50  ;;  %v8242_v38 = vpack.i.bf16 %v2268_v16, %v2156_v44  ;;  %v2116_v33 = vsel %vm369_vm0, %v10810_v13, %v2115_v22 }
 0x5a0   : > { %v8247_v34 = vpack.i.bf16 %v2046_v27, %v1934_v18  ;;  %v2050_v61 = vsel %vm369_vm0, %v2049_v54, %v2012_v47  ;;  %v2124_v45 = vperm.slane %v2116_v33, %v9745_v21  ;;  %v2140_v42 = vsel %vm369_vm0, %v10830_v53, %v2139_v24  ;;  %v15724_v27 = vld [vmem:[#allocation33_spill] sm:$0xff]  ;;  %v15731_v33 = vld [vmem:[#allocation32_spill] sm:$0xff] }
 0x5a1   : > { %v8267_v0 = vpack.i.bf16 %v2050_v61, %v1938_v41  ;;  %v2228_v7 = vsel %vm369_vm0, %v10849_v19, %v2227_v35  ;;  %v2160_v49 = vsel %vm369_vm0, %v10867_v11, %v2159_v10  ;;  %8243 = vrot.lane.b32.xlu2 %v8242_v38, %s15716_s17  ;;  %v2148_v40 = vperm.slane %v2140_v42, %v9745_v21  ;;  %v15727_v41 = vld [vmem:[#allocation28_spill] sm:$0xff]  ;;  %v15728_v35 = vld [vmem:[#allocation29_spill] sm:$0xff]  ;;  %v15730_v38 = vld [vmem:[#allocation31_spill] sm:$0xff] }
 0x5a2   : > { %8248 = vrot.lane.b32.xlu0 %v8247_v34, %s9561_s30  ;;  %v2236_v13 = vperm.slane %v2228_v7, %v9745_v21  ;;  %v2251_v60 = vrot.slane %v10861_v1, 4  ;;  %v2272_v53 = vsel %vm369_vm0, %v10899_v62, %v2271_v48  ;;  %v2163_v18 = vrot.slane %v2124_v45, 4  ;;  %v15729_v34 = vld [vmem:[#allocation30_spill] sm:$0xff] }
 0x5a3   : > { %8268 = vrot.lane.b32.xlu1 %v8267_v0, %s9563_s20  ;;  %v1935_v19 = vrot.slane %v10907_v57, 4  ;;  %v2047_v28 = vrot.slane %v2008_v56, 4  ;;  %v8262_v10 = vpack.i.bf16 %v2272_v53, %v2160_v49  ;;  %v1939_v43 = vrot.slane %v1900_v50, 4 }
 0x5a4   : > { %v2252_v11 = vsel %vm369_vm0, %v10870_v59, %v2251_v60  ;;  %v2275_v32 = vrot.slane %v2236_v13, 4  ;;  %v2164_v9 = vsel %vm369_vm0, %v2148_v40, %v2163_v18  ;;  %v2051_v46 = vrot.slane %v2012_v47, 4 }
 0x5a5   : > { %v2260_v8 = vperm.slane %v2252_v11, %v9745_v21  ;;  %v1936_v1 = vsel %vm369_vm0, %v10922_v52, %v1935_v19  ;;  %v2048_v62 = vsel %vm369_vm0, %v2032_v36, %v2047_v28  ;;  %v2161_v56 = vrot.slane %v2148_v40, 4 }
 0x5a6   : > { %v8257_v57 = vpack.i.bf16 %v2048_v62, %v1936_v1  ;;  %v1940_v59 = vsel %vm369_vm0, %v1924_v25, %v1939_v43  ;;  %v2052_v52 = vsel %vm369_vm0, %v2036_v31, %v2051_v46  ;;  %v8297_v44 = vpack.i.bf16 %v10598_v58, %v10595_v26 }
 0x5a7   : > { %v2276_v4 = vsel %vm369_vm0, %v2260_v8, %v2275_v32  ;;  %v2273_v48 = vrot.slane %v2260_v8, 4  ;;  %v2162_v50 = vsel %vm369_vm0, %v2161_v56, %v2124_v45  ;;  %v8277_v47 = vpack.i.bf16 %v2052_v52, %v1940_v59 }
 0x5a8   : > { %v8282_v5 = vpack.i.bf16 %v2276_v4, %v2164_v9  ;;  %v8292_v25 = vpack.i.bf16 %v10593_v51, %v10589_v2  ;;  %v8287_v31 = vpack.i.bf16 %v10591_v37, %v10587_v29  ;;  %v11006_v22 = vpack.i.bf16 %v10609_v17, %v10607_v15  ;;  %v15717_v51 = vld [vmem:[#allocation16_spill] sm:$0xff]  ;;  %v15718_v15 = vld [vmem:[#allocation22_spill] sm:$0xff] }
 0x5a9   : > { %8258 = vrot.lane.b32.xlu2 %v8257_v57, %s9566_s18  ;;  %v2274_v36 = vsel %vm369_vm0, %v2273_v48, %v2236_v13  ;;  %v8307_v26 = vpack.i.bf16 %v10615_v30, %v10605_v12  ;;  %v8302_v2 = vpack.i.bf16 %v10602_v23, %v10600_v39  ;;  %v8327_v29 = vpack.i.bf16 %v10687_v14, %v10681_v3  ;;  %v15719_v12 = vld [vmem:[#allocation23_spill] sm:$0xff]  ;;  %v15720_v39 = vld [vmem:[#allocation26_spill] sm:$0xff]  ;;  %v15722_v3 = vld [vmem:[#allocation17_spill] sm:$0xff] }
 0x5aa   : > { %8263 = vrot.lane.b32.xlu0 %v8262_v10, %s9566_s18  ;;  %v8272_v54 = vpack.i.bf16 %v2274_v36, %v2162_v50  ;;  %v8322_v37 = vpack.i.bf16 %v10626_v20, %v10619_v63  ;;  %v8317_v58 = vpack.i.bf16 %v15717_v51, %v10617_v55  ;;  %v8342_v17 = vpack.i.bf16 %v15719_v12, %v15718_v15  ;;  %v15721_v23 = vld [vmem:[#allocation27_spill] sm:$0xff]  ;;  %v15725_v63 = vld [vmem:[#allocation34_spill] sm:$0xff]  ;;  %v15726_v55 = vld [vmem:[#allocation24_spill] sm:$0xff] }
 0x5ab   : > { %8283 = vrot.lane.b32.xlu1 %v8282_v5, %s9567_s6  ;;  %v8337_v30 = vpack.i.bf16 %v15721_v23, %v15720_v39  ;;  %v15723_v14 = vld [vmem:[#allocation19_spill] sm:$0xff]  ;;  %v8357_v20 = vpack.i.bf16 %v15725_v63, %v15724_v27  ;;  %v8352_v16 = vpack.i.bf16 %v15727_v41, %v15726_v55  ;;  %v8347_v61 = vpack.i.bf16 %v15729_v34, %v15728_v35 }
 0x5ac   : > { %v8332_v24 = vpack.i.bf16 %v15723_v14, %v15722_v3  ;;  %v8362_v0 = vpack.i.bf16 %v15731_v33, %v15730_v38 }
 0x5b1   : > { %8273 = vrot.lane.b32.xlu2 %v8272_v54, %s9563_s20 }
 0x5b2   : > { %8278 = vrot.lane.b32.xlu0 %v8277_v47, %s9567_s6 }
 0x5b3   : > { %8298 = vrot.lane.b32.xlu1 %v8297_v44, %s9572_s15 }
 0x5b9   : > { %8288 = vrot.lane.b32.xlu2 %v8287_v31, %s9572_s15 }
 0x5ba   : > { %8293 = vrot.lane.b32.xlu0 %v8292_v25, %s9572_s15 }
 0x5bb   : > { %8313 = vrot.lane.b32.xlu1 %v11006_v22, %s9572_s15 }
 0x5c1   : > { %8303 = vrot.lane.b32.xlu2 %v8302_v2, %s9572_s15 }
 0x5c2   : > { %8308 = vrot.lane.b32.xlu0 %v8307_v26, %s9572_s15 }
 0x5c3   : > { %8328 = vrot.lane.b32.xlu1 %v8327_v29, %s9572_s15 }
 0x5c9   : > { %8318 = vrot.lane.b32.xlu2 %v8317_v58, %s9572_s15 }
 0x5ca   : > { %8323 = vrot.lane.b32.xlu0 %v8322_v37, %s9572_s15 }
 0x5cb   : > { %8343 = vrot.lane.b32.xlu1 %v8342_v17, %s9572_s15 }
 0x5d1   : > { %8333 = vrot.lane.b32.xlu2 %v8332_v24, %s9572_s15 }
 0x5d2   : > { %8338 = vrot.lane.b32.xlu0 %v8337_v30, %s9572_s15 }
 0x5d3   : > { %8358 = vrot.lane.b32.xlu1 %v8357_v20, %s9572_s15 }
 0x5d9   : > { %8348 = vrot.lane.b32.xlu2 %v8347_v61, %s9572_s15 }
 0x5da   : > { %8353 = vrot.lane.b32.xlu0 %v8352_v16, %s9572_s15 }
 0x5db   : > { %8378 = vrot.lane.b32.xlu1 %v8297_v44, %s9573_s29 }
 0x5e1   : > { %8363 = vrot.lane.b32.xlu2 %v8362_v0, %s9572_s15 }
 0x5e2   : > { %8373 = vrot.lane.b32.xlu0 %v8292_v25, %s9573_s29 }
 0x5e3   : > { %8393 = vrot.lane.b32.xlu1 %v11006_v22, %s9573_s29 }
 0x5e9   : > { %8368 = vrot.lane.b32.xlu2 %v8287_v31, %s9573_s29 }
 0x5ea   : > { %8388 = vrot.lane.b32.xlu0 %v8307_v26, %s9573_s29 }
 0x5eb   : > { %v11054_v49 = vpop.permute.xlu0 %8218 }
 0x5ec   : > { %v11050_v42 = vpop.permute.xlu1 %8228  ;;  %15735 = vst [vmem:[#allocation26_spill] sm:$0xff] %v11054_v49 }
 0x5ed   : > { %15733 = vst [vmem:[#allocation22_spill] sm:$0xff] %v11050_v42 }
 0x5f1   : > { %8383 = vrot.lane.b32.xlu2 %v8302_v2, %s9573_s29 }
 0x5f3   : > { %v11048_v45 = vpop.permute.xlu2 %8238 }
 0x5f4   : > { %15732 = vst [vmem:[#allocation16_spill] sm:$0xff] %v11048_v45 }
 0x5f9   : > { %8398 = vrot.lane.b32.xlu2 %v8317_v58, %s9573_s29 }
 0x5fb   : > { %v11052_v7 = vpop.permute.xlu2 %8243  ;;  %v11056_v40 = vpop.permute.xlu1 %8233 }
 0x5fc   : > { %15734 = vst [vmem:[#allocation23_spill] sm:$0xff] %v11052_v7  ;;  %v11060_v60 = vpop.permute.xlu0 %8223  ;;  %v12030_v7 = vld [vmem:[#allocation2 + $0xf1] sm:$0xff] }
 0x5fd   : > { %15736 = vst [vmem:[#allocation27_spill] sm:$0xff] %v11056_v40  ;;  %v12050_v40 = vld [vmem:[#allocation2 + $0xc1] sm:$0xff] }
 0x5fe   : > { %15738 = vst [vmem:[#allocation19_spill] sm:$0xff] %v11060_v60 }
 0x5ff   : > { %15808 = vst [vmem:[#allocation77_spill] sm:$0xff] %v12030_v7 }
 0x603   : > { %v11058_v13 = vpop.permute.xlu2 %8258 }
 0x604   : > { %15737 = vst [vmem:[#allocation17_spill] sm:$0xff] %v11058_v13 }
 0x60a   : > { %v11062_v53 = vpop.permute.xlu1 %8253 }
 0x60b   : > { %15739 = vst [vmem:[#allocation33_spill] sm:$0xff] %v11062_v53  ;;  %v11064_v18 = vpop.permute.xlu2 %8273 }
 0x60c   : > { %15740 = vst [vmem:[#allocation34_spill] sm:$0xff] %v11064_v18 }
 0x613   : > { %v8289_v28 = vpop.permute.xlu2 %8288 }
 0x614   : > { %v11066_v19 = vpop.permute.xlu0 %8248  ;;  %v8291_v5 = vunpack.i.h.bf16 %v8289_v28  ;;  %v8290_v59 = vunpack.i.l.bf16 %v8289_v28 }
 0x615   : > { %15741 = vst [vmem:[#allocation24_spill] sm:$0xff] %v11066_v19  ;;  %v11068_v11 = vpop.permute.xlu1 %8268 }
 0x616   : > { %15742 = vst [vmem:[#allocation28_spill] sm:$0xff] %v11068_v11  ;;  %v2559_v31 = vrot.slane %v8291_v5, 4  ;;  %v2547_v26 = vrot.slane %v8290_v59, 4 }
 0x61b   : > { %v8304_v9 = vpop.permute.xlu2 %8303 }
 0x61c   : > { %v11071_v32 = vpop.permute.xlu0 %8263  ;;  %v8306_v1 = vunpack.i.h.bf16 %v8304_v9  ;;  %v8305_v10 = vunpack.i.l.bf16 %v8304_v9 }
 0x61d   : > { %15743 = vst [vmem:[#allocation29_spill] sm:$0xff] %v11071_v32  ;;  %v11074_v8 = vpop.permute.xlu1 %8283 }
 0x61e   : > { %15744 = vst [vmem:[#allocation30_spill] sm:$0xff] %v11074_v8  ;;  %v2581_v46 = vrot.slane %v8306_v1, 4  ;;  %v2569_v62 = vrot.slane %v8305_v10, 4 }
 0x623   : > { %v11079_v4 = vpop.permute.xlu2 %8318 }
 0x624   : > { %v11077_v43 = vpop.permute.xlu0 %8278  ;;  %v8321_v47 = vunpack.i.h.bf16 %v11079_v4  ;;  %v8320_v51 = vunpack.i.l.bf16 %v11079_v4 }
 0x625   : > { %15745 = vst [vmem:[#allocation31_spill] sm:$0xff] %v11077_v43  ;;  %v8299_v57 = vpop.permute.xlu1 %8298 }
 0x626   : > { %v8301_v56 = vunpack.i.h.bf16 %v8299_v57  ;;  %v8300_v48 = vunpack.i.l.bf16 %v8299_v57  ;;  %v11092_v37 = vrot.slane %v8321_v47, 4  ;;  %v11114_v34 = vrot.slane %v8320_v51, 4 }
 0x628   : > { %v2582_v52 = vsel %vm369_vm0, %v2581_v46, %v8301_v56  ;;  %v2583_v50 = vrot.slane %v8301_v56, 4  ;;  %v2570_v36 = vsel %vm369_vm0, %v2569_v62, %v8300_v48  ;;  %v2571_v25 = vrot.slane %v8300_v48, 4 }
 0x629   : > { %v2588_v54 = vperm.slane %v2582_v52, %v9735_v6  ;;  %v2576_v44 = vperm.slane %v2570_v36, %v9735_v6 }
 0x62a   : > { %v2584_v2 = vsel %vm369_vm0, %v8306_v1, %v2583_v50  ;;  %v2572_v12 = vsel %vm369_vm0, %v8305_v10, %v2571_v25 }
 0x62b   : > { %v11095_v58 = vpop.permute.xlu2 %8333  ;;  %v2617_v15 = vrot.slane %v2588_v54, 4  ;;  %v2619_v17 = vrot.slane %v2576_v44, 4  ;;  %v11107_v16 = vperm.slane %v2584_v2, %v9735_v6  ;;  %v11124_v9 = vperm.slane %v2572_v12, %v9735_v6 }
 0x62c   : > { %v8294_v29 = vpop.permute.xlu0 %8293  ;;  %v8336_v24 = vunpack.i.h.bf16 %v11095_v58  ;;  %v8335_v27 = vunpack.i.l.bf16 %v11095_v58 }
 0x62d   : > { %v8296_v39 = vunpack.i.h.bf16 %v8294_v29  ;;  %v8295_v23 = vunpack.i.l.bf16 %v8294_v29  ;;  %v11098_v30 = vpop.permute.xlu1 %8313  ;;  %v2618_v61 = vsel %vm369_vm0, %v2617_v15, %v2576_v44  ;;  %v2620_v28 = vsel %vm369_vm0, %v2588_v54, %v2619_v17 }
 0x62e   : > { %v8316_v3 = vunpack.i.h.bf16 %v11098_v30  ;;  %v15509_v14 = vunpack.i.l.bf16 %v11098_v30  ;;  %v2781_v57 = vrot.slane %v8336_v24, 4  ;;  %v2769_v56 = vrot.slane %v8335_v27, 4 }
 0x62f   : > { %v2557_v63 = vrot.slane %v8296_v39, 4  ;;  %v2560_v20 = vsel %vm369_vm0, %v8296_v39, %v2559_v31  ;;  %v2545_v55 = vrot.slane %v8295_v23, 4  ;;  %v2548_v41 = vsel %vm369_vm0, %v8295_v23, %v2547_v26 }
 0x630   : > { %v11110_v35 = vperm.slane %v2548_v41, %v9735_v6  ;;  %v11119_v33 = vperm.slane %v2560_v20, %v9735_v6  ;;  %v2669_v46 = vrot.slane %v8316_v3, 4  ;;  %v2657_v62 = vrot.slane %v15509_v14, 4 }
 0x631   : > { %v2558_v38 = vsel %vm369_vm0, %v2557_v63, %v8291_v5  ;;  %v2546_v0 = vsel %vm369_vm0, %v2545_v55, %v8290_v59  ;;  %v11134_v50 = vperm.slane %v2618_v61, %v9745_v21  ;;  %v11137_v36 = vperm.slane %v2620_v28, %v9745_v21 }
 0x632   : > { %v2564_v1 = vperm.slane %v2558_v38, %v9735_v6  ;;  %v2552_v10 = vperm.slane %v2546_v0, %v9735_v6 }
 0x633   : > { %v11131_v52 = vpop.permute.xlu2 %8348 }
 0x634   : > { %v8309_v5 = vpop.permute.xlu0 %8308  ;;  %v2593_v59 = vrot.slane %v2564_v1, 4  ;;  %v2595_v44 = vrot.slane %v2552_v10, 4  ;;  %v15511_v15 = vunpack.i.h.bf16 %v11131_v52  ;;  %v15512_v39 = vunpack.i.l.bf16 %v11131_v52 }
 0x635   : > { %v8311_v54 = vunpack.i.h.bf16 %v8309_v5  ;;  %v8329_v25 = vpop.permute.xlu1 %8328  ;;  %v8310_v2 = vunpack.i.l.bf16 %v8309_v5 }
 0x636   : > { %v8331_v29 = vunpack.i.h.bf16 %v8329_v25  ;;  %v8330_v58 = vunpack.i.l.bf16 %v8329_v25  ;;  %v2594_v23 = vsel %vm369_vm0, %v2593_v59, %v2552_v10  ;;  %v2596_v5 = vsel %vm369_vm0, %v2564_v1, %v2595_v44 }
 0x637   : > { %v2670_v12 = vsel %vm369_vm0, %v2669_v46, %v8311_v54  ;;  %v2671_v17 = vrot.slane %v8311_v54, 4  ;;  %v2658_v22 = vsel %vm369_vm0, %v2657_v62, %v8310_v2  ;;  %v11158_v46 = vrot.slane %v8310_v2, 4 }
 0x638   : > { %v11148_v63 = vperm.slane %v2670_v12, %v9735_v6  ;;  %v2782_v20 = vsel %vm369_vm0, %v2781_v57, %v8331_v29  ;;  %v2783_v55 = vrot.slane %v8331_v29, 4  ;;  %v2770_v38 = vsel %vm369_vm0, %v2769_v56, %v8330_v58 }
 0x639   : > { %v2672_v41 = vsel %vm369_vm0, %v8316_v3, %v2671_v17  ;;  %v11154_v61 = vperm.slane %v2782_v20, %v9735_v6  ;;  %v2771_v0 = vrot.slane %v8330_v58, 4  ;;  %v2664_v57 = vperm.slane %v2658_v22, %v9735_v6 }
 0x63a   : > { %v2705_v28 = vrot.slane %v11148_v63, 4  ;;  %v2784_v10 = vsel %vm369_vm0, %v8336_v24, %v2783_v55  ;;  %v11163_v62 = vperm.slane %v2672_v41, %v9735_v6  ;;  %v11170_v59 = vperm.slane %v2770_v38, %v9735_v6 }
 0x63b   : > { %v11167_v3 = vperm.slane %v2784_v10, %v9735_v6  ;;  %v2817_v56 = vrot.slane %v11154_v61, 4  ;;  %v2772_v54 = vsel %vm369_vm0, %v8335_v27, %v2771_v0  ;;  %v11176_v24 = vrot.slane %v15511_v15, 4  ;;  %v11178_v1 = vpop.permute.xlu2 %8363 }
 0x63c   : > { %v8324_v25 = vpop.permute.xlu0 %8323  ;;  %v11181_v44 = vperm.slane %v2594_v23, %v9745_v21  ;;  %v8366_v12 = vunpack.i.h.bf16 %v11178_v1  ;;  %v2706_v17 = vsel %vm369_vm0, %v2705_v28, %v2664_v57  ;;  %v15513_v20 = vunpack.i.l.bf16 %v11178_v1 }
 0x63d   : > { %v8326_v2 = vunpack.i.h.bf16 %v8324_v25  ;;  %v8325_v29 = vunpack.i.l.bf16 %v8324_v25  ;;  %v11183_v58 = vpop.permute.xlu1 %8343  ;;  %v11196_v10 = vperm.slane %v2772_v54, %v9735_v6  ;;  %v11203_v25 = vrot.slane %v15512_v39, 4 }
 0x63e   : > { %v8346_v27 = vunpack.i.h.bf16 %v11183_v58  ;;  %v15510_v22 = vunpack.i.l.bf16 %v11183_v58  ;;  %v2643_v55 = vrot.slane %v11181_v44, 4  ;;  %v11206_v48 = vperm.slane %v2706_v17, %v9745_v21 }
 0x63f   : > { %v2693_v41 = vrot.slane %v8326_v2, 4  ;;  %v2696_v23 = vsel %vm369_vm0, %v8326_v2, %v11092_v37  ;;  %v2681_v38 = vrot.slane %v8325_v29, 4  ;;  %v2684_v0 = vsel %vm369_vm0, %v8325_v29, %v11114_v34 }
 0x640   : > { %v11199_v28 = vperm.slane %v2696_v23, %v9735_v6  ;;  %v11212_v2 = vperm.slane %v2684_v0, %v9735_v6  ;;  %v2805_v34 = vrot.slane %v8346_v27, 4  ;;  %v2793_v54 = vrot.slane %v15510_v22, 4 }
 0x641   : > { %v2694_v37 = vsel %vm369_vm0, %v2693_v41, %v8321_v47  ;;  %v2917_v23 = vrot.slane %v8366_v12, 4  ;;  %v2905_v14 = vrot.slane %v15513_v20, 4  ;;  %v2682_v17 = vsel %vm369_vm0, %v2681_v38, %v8320_v51 }
 0x642   : > { %v2700_v29 = vperm.slane %v2694_v37, %v9735_v6  ;;  %v2644_v47 = vsel %vm369_vm0, %v11134_v50, %v2643_v55  ;;  %v11225_v41 = vperm.slane %v2596_v5, %v9745_v21  ;;  %v2645_v0 = vrot.slane %v11137_v36, 4 }
 0x643   : > { %v2707_v26 = vrot.slane %v2664_v57, 4  ;;  %v2688_v15 = vperm.slane %v2682_v17, %v9735_v6  ;;  %v2755_v20 = vrot.slane %v11206_v48, 4  ;;  %v2819_v38 = vrot.slane %v11170_v59, 4 }
 0x644   : > { %v8339_v37 = vpop.permute.xlu0 %8338  ;;  %v2729_v39 = vrot.slane %v2700_v29, 4  ;;  %v2818_v5 = vsel %vm369_vm0, %v2817_v56, %v11170_v59  ;;  %v15746_v22 = vrot.slane %v11119_v33, 4  ;;  %v11246_v18 = vsel %vm369_vm0, %v2645_v0, %v11225_v41 }
 0x645   : > { %v8341_v4 = vunpack.i.h.bf16 %v8339_v37  ;;  %v8340_v31 = vunpack.i.l.bf16 %v8339_v37  ;;  %v8359_v51 = vpop.permute.xlu1 %8358  ;;  %v2708_v57 = vsel %vm369_vm0, %v11148_v63, %v2707_v26 }
 0x646   : > { %v8361_v55 = vunpack.i.h.bf16 %v8359_v51  ;;  %v8360_v43 = vunpack.i.l.bf16 %v8359_v51  ;;  %v11240_v17 = vsel %vm369_vm0, %v15746_v22, %v11110_v35  ;;  %v2730_v63 = vsel %vm369_vm0, %v2729_v39, %v2688_v15 }
 0x647   : > { %v2806_v11 = vsel %vm369_vm0, %v2805_v34, %v8341_v4  ;;  %v2807_v37 = vrot.slane %v8341_v4, 4  ;;  %v2794_v8 = vsel %vm369_vm0, %v2793_v54, %v8340_v31  ;;  %v11252_v22 = vrot.slane %v8340_v31, 4 }
 0x648   : > { %v2800_v59 = vperm.slane %v2794_v8, %v9735_v6  ;;  %v2918_v56 = vsel %vm369_vm0, %v2917_v23, %v8361_v55  ;;  %v2919_v26 = vrot.slane %v8361_v55, 4  ;;  %v2906_v34 = vsel %vm369_vm0, %v2905_v14, %v8360_v43 }
 0x649   : > { %v2808_v51 = vsel %vm369_vm0, %v8346_v27, %v2807_v37  ;;  %v11256_v4 = vperm.slane %v2708_v57, %v9745_v21  ;;  %v2812_v54 = vperm.slane %v2806_v11, %v9735_v6  ;;  %v2924_v32 = vperm.slane %v2918_v56, %v9735_v6 }
 0x64a   : > { %v2843_v0 = vrot.slane %v2800_v59, 4  ;;  %v2912_v8 = vperm.slane %v2906_v34, %v9735_v6  ;;  %v11261_v23 = vrot.slane %v8360_v43, 4  ;;  %v11264_v39 = vperm.slane %v2730_v63, %v9745_v21 }
 0x64b   : > { %v2731_v27 = vrot.slane %v2688_v15, 4  ;;  %v2820_v31 = vsel %vm369_vm0, %v11154_v61, %v2819_v38  ;;  %v11269_v14 = vperm.slane %v2808_v51, %v9735_v6  ;;  %v2920_v55 = vsel %vm369_vm0, %v8366_v12, %v2919_v26 }
 0x64c   : > { %v2955_v11 = vrot.slane %v2912_v8, 4  ;;  %v8354_v57 = vpop.permute.xlu0 %8353  ;;  %v2844_v37 = vsel %vm369_vm0, %v2812_v54, %v2843_v0  ;;  %v2756_v43 = vsel %vm369_vm0, %v11264_v39, %v2755_v20  ;;  %v2828_v63 = vperm.slane %v2820_v31, %v9745_v21 }
 0x64d   : > { %v8356_v56 = vunpack.i.h.bf16 %v8354_v57  ;;  %v8355_v34 = vunpack.i.l.bf16 %v8354_v57  ;;  %v8402_v15 = vpack.i.bf16 %v2756_v43, %v2644_v47  ;;  %v2732_v19 = vsel %vm369_vm0, %v2700_v29, %v2731_v27 }
 0x64e   : > { %v2852_v61 = vperm.slane %v2844_v37, %v9745_v21  ;;  %v2956_v38 = vsel %vm369_vm0, %v2924_v32, %v2955_v11  ;;  %v2740_v20 = vperm.slane %v2732_v19, %v9745_v21  ;;  %v11289_v47 = vperm.slane %v2818_v5, %v9745_v21 }
 0x64f   : > { %v2893_v51 = vrot.slane %v8356_v56, 4  ;;  %v2896_v12 = vsel %vm369_vm0, %v8356_v56, %v11176_v24  ;;  %v2881_v26 = vrot.slane %v8355_v34, 4  ;;  %v2884_v0 = vsel %vm369_vm0, %v8355_v34, %v11203_v25  ;;  %8403 = vrot.lane.b32.xlu0 %v8402_v15, %s15710_s8 }
 0x650   : > { %v11284_v57 = vperm.slane %v2896_v12, %v9735_v6  ;;  %v2869_v29 = vrot.slane %v2852_v61, 4  ;;  %v15747_v27 = vunpack.i.l.bf16 %v11131_v52  ;;  %v15748_v24 = vunpack.i.h.bf16 %v11131_v52 }
 0x651   : > { %v2964_v25 = vperm.slane %v2956_v38, %v9745_v21  ;;  %v2841_v37 = vrot.slane %v2812_v54, 4  ;;  %v11299_v56 = vperm.slane %v2920_v55, %v9735_v6  ;;  %v11303_v34 = vperm.slane %v2884_v0, %v9735_v6 }
 0x652   : > { %v2882_v31 = vsel %vm369_vm0, %v2881_v26, %v15747_v27  ;;  %v2894_v11 = vsel %vm369_vm0, %v2893_v51, %v15748_v24  ;;  %v2757_v5 = vrot.slane %v2740_v20, 4  ;;  %v2941_v43 = vrot.slane %v11284_v57, 4 }
 0x653   : > { %v2888_v19 = vperm.slane %v2882_v31, %v9735_v6  ;;  %v2870_v15 = vsel %vm369_vm0, %v2869_v29, %v2828_v63  ;;  %v2900_v52 = vperm.slane %v2894_v11, %v9735_v6  ;;  %v2842_v51 = vsel %vm369_vm0, %v2841_v37, %v2800_v59 }
 0x654   : > { %v2758_v54 = vsel %vm369_vm0, %v2757_v5, %v11256_v4  ;;  %v11312_v55 = vperm.slane %v2842_v51, %v9745_v21  ;;  %v2953_v12 = vrot.slane %v2924_v32, 4  ;;  %v2981_v0 = vrot.slane %v2964_v25, 4 }
 0x655   : > { %v2931_v38 = vrot.slane %v2888_v19, 4  ;;  %v8412_v26 = vpack.i.bf16 %v2758_v54, %v11246_v18  ;;  %v2867_v27 = vrot.slane %v11289_v47, 4  ;;  %v2929_v31 = vrot.slane %v2900_v52, 4 }
 0x656   : > { %v2954_v24 = vsel %vm369_vm0, %v2953_v12, %v2912_v8  ;;  %v2871_v11 = vrot.slane %v2828_v63, 4  ;;  %v2612_v59 = vperm.slane %v11240_v17, %v9745_v21  ;;  %v15749_v8 = vrot.slane %v11107_v16, 4 }
 0x657   : > { %v2932_v29 = vsel %vm369_vm0, %v2900_v52, %v2931_v38  ;;  %8413 = vrot.lane.b32.xlu2 %v8412_v26, %s15707_s24  ;;  %v2868_v32 = vsel %vm369_vm0, %v11312_v55, %v2867_v27  ;;  %v2930_v18 = vsel %vm369_vm0, %v2929_v31, %v2888_v19  ;;  %v11326_v5 = vperm.slane %v2954_v24, %v9745_v21 }
 0x658   : > { %v2940_v37 = vperm.slane %v2932_v29, %v9745_v21  ;;  %v11329_v52 = vperm.slane %v2930_v18, %v9745_v21  ;;  %v2630_v17 = vsel %vm369_vm0, %v15749_v8, %v11124_v9  ;;  %v15750_v63 = vunpack.i.l.bf16 %v11098_v30 }
 0x659   : > { %v2717_v54 = vrot.slane %v11163_v62, 4  ;;  %v2872_v38 = vsel %vm369_vm0, %v2852_v61, %v2871_v11  ;;  %v2636_v26 = vperm.slane %v2630_v17, %v9745_v21  ;;  %v15751_v30 = vrot.slane %v11199_v28, 4 }
 0x65a   : > { %v2660_v51 = vsel %vm369_vm0, %v15750_v63, %v11158_v46  ;;  %v2982_v19 = vsel %vm369_vm0, %v2981_v0, %v2940_v37  ;;  %v2983_v12 = vrot.slane %v2940_v37, 4  ;;  %v2979_v31 = vrot.slane %v11329_v52, 4 }
 0x65b   : > { %v8417_v27 = vpack.i.bf16 %v2982_v19, %v2870_v15  ;;  %v11345_v29 = vperm.slane %v2660_v51, %v9735_v6  ;;  %v2742_v46 = vsel %vm369_vm0, %v15751_v30, %v11212_v2  ;;  %v2649_v18 = vrot.slane %v2636_v26, 4 }
 0x65c   : > { %v2984_v24 = vsel %vm369_vm0, %v2964_v25, %v2983_v12  ;;  %v2748_v0 = vperm.slane %v2742_v46, %v9745_v21  ;;  %v2647_v61 = vrot.slane %v11225_v41, 4  ;;  %v2980_v15 = vsel %vm369_vm0, %v11326_v5, %v2979_v31 }
 0x65d   : > { %8418 = vrot.lane.b32.xlu0 %v8417_v27, %s15707_s24  ;;  %v8427_v11 = vpack.i.bf16 %v2984_v24, %v2872_v38  ;;  %v2718_v37 = vsel %vm369_vm0, %v2717_v54, %v11345_v29  ;;  %v2759_v8 = vrot.slane %v11256_v4, 4  ;;  %v8407_v17 = vpack.i.bf16 %v2980_v15, %v2868_v32 }
 0x65e   : > { %v2650_v63 = vsel %vm369_vm0, %v2649_v18, %v2612_v59  ;;  %v2724_v25 = vperm.slane %v2718_v37, %v9745_v21  ;;  %v2761_v51 = vrot.slane %v2748_v0, 4  ;;  %v2648_v41 = vsel %vm369_vm0, %v11137_v36, %v2647_v61 }
 0x65f   : > { %v2760_v19 = vsel %vm369_vm0, %v2740_v20, %v2759_v8  ;;  %v2651_v12 = vrot.slane %v2612_v59, 4  ;;  %v15752_v38 = vunpack.i.l.bf16 %v11183_v58  ;;  %8408 = vrot.lane.b32.xlu1 %v8407_v17, %s15710_s8  ;;  %8428 = vrot.lane.b32.xlu2 %v8427_v11, %s15716_s17  ;;  %v2829_v20 = vrot.slane %v11167_v3, 4 }
 0x660   : > { %v2762_v4 = vsel %vm369_vm0, %v2761_v51, %v2724_v25  ;;  %v8422_v32 = vpack.i.bf16 %v2760_v19, %v2648_v41  ;;  %v2763_v54 = vrot.slane %v2724_v25, 4  ;;  %v2853_v59 = vrot.slane %v11269_v14, 4 }
 0x661   : > { %v2796_v27 = vsel %vm369_vm0, %v15752_v38, %v11252_v22  ;;  %v8432_v30 = vpack.i.bf16 %v2762_v4, %v2650_v63  ;;  %v2652_v36 = vsel %vm369_vm0, %v2636_v26, %v2651_v12  ;;  %v15753_v22 = vunpack.i.l.bf16 %v11178_v1 }
 0x662   : > { %v2804_v31 = vperm.slane %v2796_v27, %v9735_v6  ;;  %v2764_v58 = vsel %vm369_vm0, %v2748_v0, %v2763_v54  ;;  %v2942_v24 = vsel %vm369_vm0, %v2941_v43, %v11303_v34  ;;  %v2965_v18 = vrot.slane %v11299_v56, 4 }
 0x663   : > { %v2908_v46 = vsel %vm369_vm0, %v15753_v22, %v11261_v23  ;;  %v8442_v61 = vpack.i.bf16 %v2764_v58, %v2652_v36  ;;  %v2830_v26 = vsel %vm369_vm0, %v2829_v20, %v11196_v10  ;;  %v2948_v23 = vperm.slane %v2942_v24, %v9745_v21 }
 0x664   : > { %v2854_v15 = vsel %vm369_vm0, %v2853_v59, %v2804_v31  ;;  %v2916_v0 = vperm.slane %v2908_v46, %v9735_v6  ;;  %v2836_v11 = vperm.slane %v2830_v26, %v9745_v21  ;;  %v2831_v37 = vrot.slane %v11196_v10, 4 }
 0x665   : > { %v2860_v1 = vperm.slane %v2854_v15, %v9745_v21  ;;  %8433 = vrot.lane.b32.xlu0 %v8432_v30, %s9561_s30  ;;  %v2855_v8 = vrot.slane %v2804_v31, 4  ;;  %v2943_v17 = vrot.slane %v11303_v34, 4  ;;  %v2987_v41 = vrot.slane %v2948_v23, 4 }
 0x666   : > { %v2966_v43 = vsel %vm369_vm0, %v2965_v18, %v2916_v0  ;;  %v2967_v63 = vrot.slane %v2916_v0, 4  ;;  %v2875_v25 = vrot.slane %v2836_v11, 4  ;;  %v2832_v4 = vsel %vm369_vm0, %v11167_v3, %v2831_v37 }
 0x667   : > { %v2972_v51 = vperm.slane %v2966_v43, %v9745_v21  ;;  %v2873_v19 = vrot.slane %v2860_v1, 4  ;;  %v2856_v12 = vsel %vm369_vm0, %v11269_v14, %v2855_v8  ;;  %8423 = vrot.lane.b32.xlu1 %v8422_v32, %s15716_s17  ;;  %8443 = vrot.lane.b32.xlu2 %v8442_v61, %s9566_s18  ;;  %v15754_v36 = vrot.slane %v11110_v35, 4 }
 0x668   : > { %v2968_v38 = vsel %vm369_vm0, %v11299_v56, %v2967_v63  ;;  %v2876_v10 = vsel %vm369_vm0, %v2860_v1, %v2875_v25  ;;  %v2864_v14 = vperm.slane %v2856_v12, %v9745_v21  ;;  %v2944_v56 = vsel %vm369_vm0, %v11284_v57, %v2943_v17 }
 0x669   : > { %v2988_v34 = vsel %vm369_vm0, %v2972_v51, %v2987_v41  ;;  %v2985_v27 = vrot.slane %v2972_v51, 4  ;;  %v2874_v31 = vsel %vm369_vm0, %v2873_v19, %v2836_v11  ;;  %v2976_v30 = vperm.slane %v2968_v38, %v9745_v21  ;;  %v9323_v38 = vld [vmem:[#allocation2 + $0x130] sm:$0xff] }
 0x66a   : > { %v8447_v54 = vpack.i.bf16 %v2988_v34, %v2876_v10  ;;  %v2608_v20 = vsel %vm369_vm0, %v11119_v33, %v15754_v36  ;;  %v2631_v59 = vrot.slane %v11124_v9, 4  ;;  %v2840_v3 = vperm.slane %v2832_v4, %v9745_v21  ;;  %v9324_v34 = vld [vmem:[#allocation2 + $0xe0] sm:$0xff] }
 0x66b   : > { %v2986_v32 = vsel %vm369_vm0, %v2985_v27, %v2948_v23  ;;  %v2877_v58 = vrot.slane %v2864_v14, 4  ;;  %v2616_v22 = vperm.slane %v2608_v20, %v9745_v21  ;;  %v2719_v46 = vrot.slane %v11345_v29, 4  ;;  %v9325_v27 = vld [vmem:[#allocation2 + $0xf0] sm:$0xff]  ;;  %v9328_v36 = vld [vmem:[#allocation2 + $0x140] sm:$0xff] }
 0x66c   : > { %v2952_v57 = vperm.slane %v2944_v56, %v9745_v21  ;;  %v2989_v24 = vrot.slane %v2976_v30, 4  ;;  %v2632_v18 = vsel %vm369_vm0, %v11107_v16, %v2631_v59  ;;  %v2743_v35 = vrot.slane %v11212_v2, 4  ;;  %v9327_v56 = vld [vmem:[#allocation2 + $0x190] sm:$0xff] }
 0x66d   : > { %8448 = vrot.lane.b32.xlu0 %v8447_v54, %s9566_s18  ;;  %v8437_v33 = vpack.i.bf16 %v2986_v32, %v2874_v31  ;;  %v2878_v9 = vsel %vm369_vm0, %v2877_v58, %v2840_v3  ;;  %v2640_v61 = vperm.slane %v2632_v18, %v9745_v21  ;;  %v2720_v26 = vsel %vm369_vm0, %v11163_v62, %v2719_v46  ;;  %v9326_v31 = vld [vmem:[#allocation2 + $0x180] sm:$0xff]  ;;  %v9329_v20 = vld [vmem:[#allocation2 + $0x150] sm:$0xff] }
 0x66e   : > { %v2990_v29 = vsel %vm369_vm0, %v2989_v24, %v2952_v57  ;;  %v2655_v15 = vrot.slane %v2616_v22, 4  ;;  %v2728_v0 = vperm.slane %v2720_v26, %v9745_v21  ;;  %v2744_v16 = vsel %vm369_vm0, %v11199_v28, %v2743_v35  ;;  %v9330_v58 = vld [vmem:[#allocation2 + $0x100] sm:$0xff]  ;;  %v9335_v24 = vld [vmem:[#allocation2 + $0x170] sm:$0xff] }
 0x66f   : > { %v8457_v11 = vpack.i.bf16 %v2990_v29, %v2878_v9  ;;  %v2752_v2 = vperm.slane %v2744_v16, %v9745_v21  ;;  %v2641_v1 = vrot.slane %v11134_v50, 4  ;;  %v2753_v23 = vrot.slane %v11264_v39, 4  ;;  %8438 = vrot.lane.b32.xlu1 %v8437_v33, %s9561_s30  ;;  %v9336_v35 = vld [vmem:[#allocation2 + $0x1e0] sm:$0xff]  ;;  %v9337_v33 = vld [vmem:[#allocation2 + $0x1f0] sm:$0xff] }
 0x670   : > { %v2767_v37 = vrot.slane %v2728_v0, 4  ;;  %v2977_v62 = vrot.slane %v11326_v5, 4  ;;  %v2865_v43 = vrot.slane %v11312_v55, 4  ;;  %v2653_v8 = vrot.slane %v2640_v61, 4  ;;  %v9339_v26 = vld [vmem:[#allocation2 + $0x1d0] sm:$0xff] }
 0x671   : > { %8458 = vrot.lane.b32.xlu2 %v8457_v11, %s9563_s20  ;;  %v2765_v17 = vrot.slane %v2752_v2, 4  ;;  %v2656_v28 = vsel %vm369_vm0, %v2640_v61, %v2655_v15  ;;  %v11447_v39 = vsel %vm369_vm0, %v2753_v23, %v11206_v48  ;;  %v11453_v55 = vsel %vm369_vm0, %v2641_v1, %v11181_v44  ;;  %v9322_v48 = vld [vmem:[#allocation2 + $0x120] sm:$0xff]  ;;  %v8369_v15 = vpop.permute.xlu2 %8368  ;;  %v8374_v11 = vpop.permute.xlu0 %8373 }
 0x672   : > { %v2768_v63 = vsel %vm369_vm0, %v2752_v2, %v2767_v37  ;;  %15755 = vst [vmem:[#allocation32_spill] sm:$0xff] %v11447_v39  ;;  %v2654_v5 = vsel %vm369_vm0, %v2653_v8, %v2616_v22  ;;  %v11457_v51 = vsel %vm369_vm0, %v2977_v62, %v11329_v52  ;;  %v11461_v41 = vsel %vm369_vm0, %v2865_v43, %v11289_v47  ;;  %v9331_v22 = vld [vmem:[#allocation2 + $0x110] sm:$0xff]  ;;  %v9338_v61 = vld [vmem:[#allocation2 + $0x1c0] sm:$0xff]  ;;  %v8379_v23 = vpop.permute.xlu1 %8378 }
 0x673   : > { %v8462_v25 = vpack.i.bf16 %v2768_v63, %v2656_v28  ;;  %v2766_v50 = vsel %vm369_vm0, %v2765_v17, %v2728_v0  ;;  %15756 = vst [vmem:[#allocation39_spill] sm:$0xff] %v11453_v55  ;;  %v2991_v12 = vrot.slane %v2952_v57, 4  ;;  %v8482_v10 = vpack.i.bf16 %v9323_v38, %v9322_v48  ;;  %v9334_v57 = vld [vmem:[#allocation2 + $0x160] sm:$0xff] }
 0x674   : > { %15757 = vst [vmem:[#allocation40_spill] sm:$0xff] %v11457_v51  ;;  %v8452_v19 = vpack.i.bf16 %v2766_v50, %v2654_v5  ;;  %v8467_v4 = vpack.i.bf16 %v9325_v27, %v9324_v34  ;;  %v2879_v44 = vrot.slane %v2840_v3, 4  ;;  %v8497_v32 = vpack.i.bf16 %v9327_v56, %v9326_v31 }
 0x675   : > { %8463 = vrot.lane.b32.xlu0 %v8462_v25, %s9567_s6  ;;  %15758 = vst [vmem:[#allocation41_spill] sm:$0xff] %v11461_v41  ;;  %v2992_v52 = vsel %vm369_vm0, %v2976_v30, %v2991_v12  ;;  %v8487_v59 = vpack.i.bf16 %v9329_v20, %v9328_v36  ;;  %v8477_v3 = vpack.i.bf16 %v9331_v22, %v9330_v58  ;;  %v9332_v30 = vld [vmem:[#allocation2 + $0x1a0] sm:$0xff]  ;;  %v8376_v28 = vunpack.i.h.bf16 %v8374_v11 }
 0x676   : > { %v2880_v47 = vsel %vm369_vm0, %v2864_v14, %v2879_v44  ;;  %v9333_v14 = vld [vmem:[#allocation2 + $0x1b0] sm:$0xff]  ;;  %v8492_v18 = vpack.i.bf16 %v9335_v24, %v9334_v57  ;;  %v8512_v9 = vpack.i.bf16 %v9337_v33, %v9336_v35  ;;  %v8507_v29 = vpack.i.bf16 %v9339_v26, %v9338_v61 }
 0x677   : > { %8453 = vrot.lane.b32.xlu1 %v8452_v19, %s9563_s20  ;;  %v8472_v54 = vpack.i.bf16 %v2992_v52, %v2880_v47  ;;  %v8502_v46 = vpack.i.bf16 %v9333_v14, %v9332_v30  ;;  %v3241_v19 = vrot.slane %v8376_v28, 4  ;;  %v8381_v12 = vunpack.i.h.bf16 %v8379_v23 }
 0x678   : > { %v8371_v38 = vunpack.i.h.bf16 %v8369_v15  ;;  %v8380_v27 = vunpack.i.l.bf16 %v8379_v23  ;;  %v8370_v56 = vunpack.i.l.bf16 %v8369_v15 }
 0x679   : > { %8483 = vrot.lane.b32.xlu2 %v8482_v10, %s9573_s29  ;;  %v8384_v0 = vpop.permute.xlu2 %8383  ;;  %v11480_v1 = vpop.permute.xlu0 %8388  ;;  %v8375_v10 = vunpack.i.l.bf16 %v8374_v11  ;;  %v3267_v52 = vrot.slane %v8381_v12, 4 }
 0x67a   : > { %v11486_v43 = vpop.permute.xlu1 %8393  ;;  %v8386_v8 = vunpack.i.h.bf16 %v8384_v0  ;;  %v8385_v25 = vunpack.i.l.bf16 %v8384_v0  ;;  %v8390_v0 = vunpack.i.l.bf16 %v11480_v1 }
 0x67b   : > { %v8396_v30 = vunpack.i.h.bf16 %v11486_v43  ;;  %v8395_v24 = vunpack.i.l.bf16 %v11486_v43 }
 0x67c   : > { %v3265_v50 = vrot.slane %v8386_v8, 4  ;;  %v3253_v48 = vrot.slane %v8385_v25, 4  ;;  %v3268_v22 = vsel %vm369_vm0, %v8386_v8, %v3267_v52 }
 0x67d   : > { %8468 = vrot.lane.b32.xlu0 %v8467_v4, %s9573_s29  ;;  %v3242_v4 = vsel %vm369_vm0, %v3241_v19, %v8371_v38  ;;  %v3276_v61 = vperm.slane %v3268_v22, %v9735_v6  ;;  %v3353_v11 = vrot.slane %v8396_v30, 4  ;;  %v3341_v8 = vrot.slane %v8395_v24, 4 }
 0x67e   : > { %v3266_v34 = vsel %vm369_vm0, %v3265_v50, %v8381_v12  ;;  %v11505_v36 = vperm.slane %v3242_v4, %v9735_v6 }
 0x67f   : > { %8473 = vrot.lane.b32.xlu1 %v8472_v54, %s9567_s6  ;;  %v11499_v47 = vperm.slane %v3266_v34, %v9735_v6  ;;  %v3254_v54 = vsel %vm369_vm0, %v3253_v48, %v8380_v27  ;;  %v3342_v52 = vsel %vm369_vm0, %v3341_v8, %v8390_v0 }
 0x680   : > { %v3260_v58 = vperm.slane %v3254_v54, %v9735_v6  ;;  %v3277_v35 = vrot.slane %v11505_v36, 4 }
 0x681   : > { %8498 = vrot.lane.b32.xlu2 %v8497_v32, %s9573_s29  ;;  %v11476_v16 = vpop.permute.xlu2 %8398  ;;  %v3229_v32 = vrot.slane %v8375_v10, 4  ;;  %v3301_v14 = vrot.slane %v11499_v47, 4 }
 0x682   : > { %v15520_v48 = vunpack.i.h.bf16 %v11476_v16 }
 0x683   : > { %v3230_v57 = vsel %vm369_vm0, %v3229_v32, %v8370_v56  ;;  %v3302_v33 = vsel %vm369_vm0, %v3301_v14, %v3260_v58  ;;  %v8400_v32 = vunpack.i.l.bf16 %v11476_v16 }
 0x684   : > { %v11528_v50 = vperm.slane %v3302_v33, %v9745_v21 }
 0x685   : > { %8488 = vrot.lane.b32.xlu0 %v8487_v59, %s9573_s29  ;;  %v3243_v59 = vrot.slane %v8371_v38, 4 }
 0x687   : > { %8478 = vrot.lane.b32.xlu1 %v8477_v3, %s9573_s29  ;;  %v8391_v3 = vunpack.i.h.bf16 %v11480_v1  ;;  %v3313_v1 = vrot.slane %v3276_v61, 4 }
 0x689   : > { %8513 = vrot.lane.b32.xlu2 %v8512_v9, %s9573_s29  ;;  %v3244_v9 = vsel %vm369_vm0, %v8376_v28, %v3243_v59  ;;  %v3355_v15 = vrot.slane %v8391_v3, 4  ;;  %v3303_v59 = vrot.slane %v3260_v58, 4 }
 0x68a   : > { %v3252_v38 = vperm.slane %v3244_v9, %v9735_v6  ;;  %v11555_v9 = vrot.slane %v15520_v48, 4 }
 0x68b   : > { %v3356_v4 = vsel %vm369_vm0, %v8396_v30, %v3355_v15 }
 0x68c   : > { %v3289_v22 = vrot.slane %v3252_v38, 4 }
 0x68d   : > { %8503 = vrot.lane.b32.xlu0 %v8502_v46, %s9573_s29  ;;  %v3231_v46 = vrot.slane %v8370_v56, 4  ;;  %v3325_v56 = vrot.slane %v11528_v50, 4 }
 0x68f   : > { %8493 = vrot.lane.b32.xlu1 %v8492_v18, %s9573_s29  ;;  %v3255_v18 = vrot.slane %v8380_v27, 4  ;;  %v3232_v43 = vsel %vm369_vm0, %v8375_v10, %v3231_v46  ;;  %v3343_v27 = vrot.slane %v8390_v0, 4  ;;  %v3354_v10 = vsel %vm369_vm0, %v3353_v11, %v8391_v3 }
 0x690   : > { %v3240_v34 = vperm.slane %v3232_v43, %v9735_v6  ;;  %v3360_v14 = vperm.slane %v3354_v10, %v9735_v6  ;;  %v3304_v43 = vsel %vm369_vm0, %v11499_v47, %v3303_v59 }
 0x691   : > { %v3256_v12 = vsel %vm369_vm0, %v8385_v25, %v3255_v18  ;;  %v3348_v18 = vperm.slane %v3342_v52, %v9735_v6  ;;  %v3312_v47 = vperm.slane %v3304_v43, %v9745_v21 }
 0x692   : > { %v3264_v25 = vperm.slane %v3256_v12, %v9735_v6  ;;  %v3291_v33 = vrot.slane %v3240_v34, 4  ;;  %v3290_v52 = vsel %vm369_vm0, %v3289_v22, %v3240_v34 }
 0x694   : > { %v3314_v30 = vsel %vm369_vm0, %v3313_v1, %v3264_v25  ;;  %v3315_v58 = vrot.slane %v3264_v25, 4  ;;  %v3389_v1 = vrot.slane %v3360_v14, 4 }
 0x695   : > { %v3320_v8 = vperm.slane %v3314_v30, %v9745_v21 }
 0x696   : > { %v3316_v59 = vsel %vm369_vm0, %v3276_v61, %v3315_v58 }
 0x697   : > { %8508 = vrot.lane.b32.xlu1 %v8507_v29, %s9573_s29  ;;  %v3236_v29 = vperm.slane %v3230_v57, %v9735_v6  ;;  %v3344_v57 = vsel %vm369_vm0, %v8395_v24, %v3343_v27  ;;  %v3333_v22 = vrot.slane %v3320_v8, 4  ;;  %v3324_v48 = vperm.slane %v3316_v59, %v9745_v21 }
 0x698   : > { %v3352_v12 = vperm.slane %v3344_v57, %v9735_v6  ;;  %v3296_v57 = vperm.slane %v3290_v52, %v9745_v21 }
 0x699   : > { %v3278_v28 = vsel %vm369_vm0, %v3277_v35, %v3236_v29  ;;  %v3279_v3 = vrot.slane %v3236_v29, 4  ;;  %v3364_v35 = vperm.slane %v3356_v4, %v9735_v6  ;;  %v3391_v4 = vrot.slane %v3348_v18, 4 }
 0x69a   : > { %v11541_v54 = vperm.slane %v3278_v28, %v9745_v21  ;;  %v3367_v28 = vrot.slane %v8400_v32, 4  ;;  %v3403_v43 = vrot.slane %v3352_v12, 4 }
 0x69b   : > { %v3280_v27 = vsel %vm369_vm0, %v11505_v36, %v3279_v3  ;;  %v3401_v10 = vrot.slane %v3364_v35, 4  ;;  %v3390_v3 = vsel %vm369_vm0, %v3389_v1, %v3348_v18  ;;  %v3329_v1 = vrot.slane %v3312_v47, 4 }
 0x69c   : > { %v11559_v15 = vsel %vm369_vm0, %v3325_v56, %v11541_v54  ;;  %v3292_v56 = vsel %vm369_vm0, %v3252_v38, %v3291_v33  ;;  %v3288_v34 = vperm.slane %v3280_v27, %v9745_v21  ;;  %v3327_v18 = vrot.slane %v11541_v54, 4 }
 0x69d   : > { %15771 = vst [vmem:[#allocation54_spill] sm:$0xff] %v11559_v15  ;;  %v3300_v33 = vperm.slane %v3292_v56, %v9745_v21  ;;  %v3404_v15 = vsel %vm369_vm0, %v3364_v35, %v3403_v43 }
 0x69e   : > { %v3328_v35 = vsel %vm369_vm0, %v11528_v50, %v3327_v18 }
 0x6b1   : > { %v11478_v2 = vpop.permute.xlu2 %8413 }
 0x6b2   : > { %15759 = vst [vmem:[#allocation42_spill] sm:$0xff] %v11478_v2 }
 0x6b9   : > { %v11482_v37 = vpop.permute.xlu2 %8428 }
 0x6ba   : > { %15760 = vst [vmem:[#allocation43_spill] sm:$0xff] %v11482_v37 }
 0x6c1   : > { %v11484_v62 = vpop.permute.xlu0 %8403  ;;  %v11488_v17 = vpop.permute.xlu2 %8443 }
 0x6c2   : > { %15761 = vst [vmem:[#allocation44_spill] sm:$0xff] %v11484_v62  ;;  %v12011_v62 = vld [vmem:[#allocation2 + $0xa1] sm:$0xff] }
 0x6c3   : > { %15762 = vst [vmem:[#allocation45_spill] sm:$0xff] %v11488_v17 }
 0x6cb   : > { %v11502_v31 = vpop.permute.xlu2 %8458 }
 0x6cc   : > { %15766 = vst [vmem:[#allocation49_spill] sm:$0xff] %v11502_v31 }
 0x6cf   : > { %v11490_v63 = vpop.permute.xlu0 %8418 }
 0x6d0   : > { %15763 = vst [vmem:[#allocation46_spill] sm:$0xff] %v11490_v63  ;;  %v11950_v63 = vld [vmem:[#allocation2 + $0x11] sm:$0xff] }
 0x6d1   : > { %v11492_v5 = vpop.permute.xlu1 %8408 }
 0x6d2   : > { %15764 = vst [vmem:[#allocation47_spill] sm:$0xff] %v11492_v5  ;;  %v11993_v5 = vld [vmem:[#allocation2 + $0x51] sm:$0xff] }
 0x6d3   : > { %v11524_v23 = vpop.permute.xlu2 %8483 }
 0x6d4   : > { %v15521_v29 = vunpack.i.h.bf16 %v11524_v23  ;;  %v15522_v24 = vunpack.i.l.bf16 %v11524_v23 }
 0x6d6   : > { %v11581_v30 = vrot.slane %v15521_v29, 4  ;;  %v11585_v36 = vrot.slane %v15522_v24, 4  ;;  %v3392_v29 = vsel %vm369_vm0, %v3360_v14, %v3391_v4  ;;  %v3402_v14 = vsel %vm369_vm0, %v3401_v10, %v3352_v12 }
 0x6d7   : > { %v11496_v44 = vpop.permute.xlu0 %8433  ;;  %v11606_v4 = vperm.slane %v3390_v3, %v9745_v21  ;;  %v3400_v59 = vperm.slane %v3392_v29, %v9745_v21  ;;  %v3330_v10 = vsel %vm369_vm0, %v3329_v1, %v3288_v34  ;;  %v11618_v3 = vperm.slane %v3402_v14, %v9745_v21 }
 0x6d8   : > { %15765 = vst [vmem:[#allocation48_spill] sm:$0xff] %v11496_v44  ;;  %v11626_v29 = vsel %vm369_vm0, %v3333_v22, %v3296_v57 }
 0x6d9   : > { %v11507_v20 = vpop.permute.xlu1 %8423  ;;  %15775 = vst [vmem:[#allocation57_spill] sm:$0xff] %v11606_v4 }
 0x6da   : > { %15767 = vst [vmem:[#allocation50_spill] sm:$0xff] %v11507_v20 }
 0x6db   : > { %v11565_v11 = vpop.permute.xlu2 %8498 }
 0x6dc   : > { %v15525_v25 = vunpack.i.h.bf16 %v11565_v11  ;;  %v15773_v27 = vunpack.i.l.bf16 %v11565_v11 }
 0x6de   : > { %v11595_v24 = vrot.slane %v15525_v25, 4  ;;  %v3335_v25 = vrot.slane %v3296_v57, 4 }
 0x6df   : > { %v11520_v26 = vpop.permute.xlu0 %8448 }
 0x6e0   : > { %15768 = vst [vmem:[#allocation51_spill] sm:$0xff] %v11520_v26  ;;  %v3339_v26 = vrot.slane %v3300_v33, 4 }
 0x6e1   : > { %v11530_v19 = vpop.permute.xlu1 %8438 }
 0x6e2   : > { %15769 = vst [vmem:[#allocation52_spill] sm:$0xff] %v11530_v19  ;;  %v3337_v19 = vrot.slane %v3324_v48, 4 }
 0x6e4   : > { %v11642_v22 = vsel %vm369_vm0, %v3337_v19, %v3300_v33 }
 0x6e7   : > { %v11547_v46 = vpop.permute.xlu0 %8463 }
 0x6e8   : > { %15770 = vst [vmem:[#allocation53_spill] sm:$0xff] %v11547_v46  ;;  %v11599_v46 = vrot.slane %v15773_v27, 4  ;;  %v15776_v27 = vunpack.i.h.bf16 %v11476_v16 }
 0x6e9   : > { %v11561_v0 = vpop.permute.xlu1 %8453 }
 0x6ea   : > { %15772 = vst [vmem:[#allocation55_spill] sm:$0xff] %v11561_v0 }
 0x6ef   : > { %v8469_v38 = vpop.permute.xlu0 %8468 }
 0x6f0   : > { %v8471_v61 = vunpack.i.h.bf16 %v8469_v38  ;;  %v8470_v58 = vunpack.i.l.bf16 %v8469_v38  ;;  %v3331_v38 = vrot.slane %v3288_v34, 4  ;;  %v3439_v34 = vrot.slane %v11606_v4, 4 }
 0x6f1   : > { %v11602_v0 = vpop.permute.xlu1 %8473 }
 0x6f2   : > { %v3377_v52 = vrot.slane %v8471_v61, 4  ;;  %v3365_v56 = vrot.slane %v8470_v58, 4  ;;  %15774 = vst [vmem:[#allocation56_spill] sm:$0xff] %v11602_v0  ;;  %v11623_v16 = vsel %vm369_vm0, %v3312_v47, %v3331_v38  ;;  %v3380_v50 = vsel %vm369_vm0, %v8471_v61, %v11555_v9 }
 0x6f3   : > { %v3443_v47 = vrot.slane %v3400_v59, 4  ;;  %v3368_v57 = vsel %vm369_vm0, %v8470_v58, %v3367_v28 }
 0x6f4   : > { %v3378_v54 = vsel %vm369_vm0, %v3377_v52, %v15776_v27  ;;  %v3366_v31 = vsel %vm369_vm0, %v3365_v56, %v8400_v32  ;;  %v11629_v32 = vperm.slane %v3404_v15, %v9745_v21  ;;  %v11634_v52 = vpop.permute.xlu2 %8513  ;;  %v11637_v56 = vsel %vm369_vm0, %v3320_v8, %v3335_v25 }
 0x6f5   : > { %v3384_v0 = vperm.slane %v3378_v54, %v9735_v6  ;;  %v3372_v12 = vperm.slane %v3366_v31, %v9735_v6  ;;  %v11645_v15 = vsel %vm369_vm0, %v3324_v48, %v3339_v26  ;;  %v15530_v19 = vunpack.i.h.bf16 %v11634_v52 }
 0x6f6   : > { %v11658_v26 = vperm.slane %v3380_v50, %v9735_v6  ;;  %v15531_v61 = vunpack.i.l.bf16 %v11634_v52 }
 0x6f7   : > { %v11631_v43 = vpop.permute.xlu0 %8488  ;;  %v3413_v31 = vrot.slane %v3384_v0, 4  ;;  %v3415_v1 = vrot.slane %v3372_v12, 4 }
 0x6f8   : > { %v8491_v58 = vunpack.i.h.bf16 %v11631_v43  ;;  %v3425_v4 = vrot.slane %v11658_v26, 4 }
 0x6f9   : > { %v3414_v18 = vsel %vm369_vm0, %v3413_v31, %v3372_v12  ;;  %v3416_v38 = vsel %vm369_vm0, %v3384_v0, %v3415_v1  ;;  %v8479_v8 = vpop.permute.xlu1 %8478  ;;  %v11662_v0 = vperm.slane %v3368_v57, %v9735_v6  ;;  %v8490_v12 = vunpack.i.l.bf16 %v11631_v43 }
 0x6fa   : > { %v11652_v25 = vperm.slane %v3414_v18, %v9745_v21  ;;  %v3424_v9 = vperm.slane %v3416_v38, %v9745_v21  ;;  %v8481_v48 = vunpack.i.h.bf16 %v8479_v8  ;;  %v8480_v28 = vunpack.i.l.bf16 %v8479_v8 }
 0x6fb   : > { %v3589_v43 = vrot.slane %v15531_v61, 4 }
 0x6fc   : > { %15777 = vst [vmem:[#allocation58_spill] sm:$0xff] %v11652_v25  ;;  %v3440_v27 = vsel %vm369_vm0, %v11652_v25, %v3439_v34  ;;  %v3441_v54 = vrot.slane %v3424_v9, 4  ;;  %v3467_v31 = vrot.slane %v8481_v48, 4  ;;  %v3454_v1 = vsel %vm369_vm0, %v11585_v36, %v8480_v28 }
 0x6fd   : > { %v3466_v50 = vsel %vm369_vm0, %v11581_v30, %v8481_v48  ;;  %v3460_v18 = vperm.slane %v3454_v1, %v9735_v6  ;;  %v8517_v38 = vpack.i.bf16 %v3440_v27, %v3328_v35  ;;  %v11677_v34 = vrot.slane %v15530_v19, 4 }
 0x6fe   : > { %v3472_v57 = vperm.slane %v3466_v50, %v9735_v6  ;;  %v3442_v8 = vsel %vm369_vm0, %v3441_v54, %v3400_v59  ;;  %v11682_v36 = vsel %vm369_vm0, %v3424_v9, %v3443_v47  ;;  %v3491_v48 = vrot.slane %v8491_v58, 4 }
 0x6ff   : > { %v8504_v33 = vpop.permute.xlu0 %8503  ;;  %v8527_v14 = vpack.i.bf16 %v3442_v8, %v3330_v10  ;;  %8518 = vrot.lane.b32.xlu0 %v8517_v38, %s15710_s8  ;;  %v3479_v59 = vrot.slane %v8490_v12, 4  ;;  %v11686_v35 = vrot.slane %v8480_v28, 4  ;;  %v15778_v10 = vunpack.i.h.bf16 %v11524_v23 }
 0x700   : > { %v3501_v1 = vrot.slane %v3472_v57, 4  ;;  %v8506_v50 = vunpack.i.h.bf16 %v8504_v33  ;;  %v8505_v54 = vunpack.i.l.bf16 %v8504_v33  ;;  %v3503_v8 = vrot.slane %v3460_v18, 4 }
 0x701   : > { %v3468_v27 = vsel %vm369_vm0, %v15778_v10, %v3467_v31  ;;  %8528 = vrot.lane.b32.xlu2 %v8527_v14, %s15707_s24  ;;  %v8494_v9 = vpop.permute.xlu1 %8493  ;;  %v15779_v31 = vunpack.i.h.bf16 %v11565_v11  ;;  %v15781_v19 = vunpack.i.l.bf16 %v11565_v11 }
 0x702   : > { %v3577_v47 = vrot.slane %v8506_v50, 4  ;;  %v3502_v30 = vsel %vm369_vm0, %v3501_v1, %v3460_v18  ;;  %v3580_v38 = vsel %vm369_vm0, %v8506_v50, %v11595_v24  ;;  %v3565_v28 = vrot.slane %v8505_v54, 4 }
 0x703   : > { %v8496_v61 = vunpack.i.h.bf16 %v8494_v9  ;;  %v3568_v14 = vsel %vm369_vm0, %v8505_v54, %v11599_v46  ;;  %v8495_v10 = vunpack.i.l.bf16 %v8494_v9  ;;  %v11704_v18 = vperm.slane %v3502_v30, %v9745_v21 }
 0x704   : > { %v3578_v33 = vsel %vm369_vm0, %v3577_v47, %v15779_v31  ;;  %v3566_v24 = vsel %vm369_vm0, %v3565_v28, %v15781_v19  ;;  %v11717_v30 = vperm.slane %v3468_v27, %v9735_v6  ;;  %v3504_v11 = vsel %vm369_vm0, %v3472_v57, %v3503_v8 }
 0x705   : > { %15780 = vst [vmem:[#allocation59_spill] sm:$0xff] %v11704_v18  ;;  %v3584_v1 = vperm.slane %v3578_v33, %v9735_v6  ;;  %v3489_v50 = vrot.slane %v8496_v61, 4  ;;  %v3492_v25 = vsel %vm369_vm0, %v8496_v61, %v3491_v48  ;;  %v3572_v20 = vperm.slane %v3566_v24, %v9735_v6 }
 0x706   : > { %v3477_v44 = vrot.slane %v8495_v10, 4  ;;  %v3480_v47 = vsel %vm369_vm0, %v8495_v10, %v3479_v59  ;;  %v11714_v46 = vperm.slane %v3492_v25, %v9735_v6  ;;  %v11722_v19 = vperm.slane %v3580_v38, %v9735_v6 }
 0x707   : > { %v3490_v54 = vsel %vm369_vm0, %v3489_v50, %v8491_v58  ;;  %v3613_v9 = vrot.slane %v3584_v1, 4  ;;  %v11725_v61 = vperm.slane %v3568_v14, %v9735_v6  ;;  %v11730_v25 = vperm.slane %v3480_v47, %v9735_v6 }
 0x708   : > { %v3496_v48 = vperm.slane %v3490_v54, %v9735_v6  ;;  %v3478_v59 = vsel %vm369_vm0, %v3477_v44, %v8490_v12  ;;  %v3615_v28 = vrot.slane %v3572_v20, 4  ;;  %v3537_v57 = vrot.slane %v11714_v46, 4 }
 0x709   : > { %v3484_v27 = vperm.slane %v3478_v59, %v9735_v6  ;;  %v3614_v58 = vsel %vm369_vm0, %v3613_v9, %v3572_v20  ;;  %v8509_v8 = vpop.permute.xlu1 %8508  ;;  %v3551_v31 = vrot.slane %v11704_v18, 4  ;;  %v3426_v33 = vsel %vm369_vm0, %v3425_v4, %v11662_v0 }
 0x70a   : > { %v3525_v38 = vrot.slane %v3496_v48, 4  ;;  %v8511_v14 = vunpack.i.h.bf16 %v8509_v8  ;;  %v8510_v10 = vunpack.i.l.bf16 %v8509_v8  ;;  %v3616_v12 = vsel %vm369_vm0, %v3584_v1, %v3615_v28 }
 0x70b   : > { %v3527_v44 = vrot.slane %v3484_v27, 4  ;;  %v11741_v50 = vperm.slane %v3614_v58, %v9745_v21  ;;  %v3512_v20 = vperm.slane %v3504_v11, %v9745_v21  ;;  %v3624_v47 = vperm.slane %v3616_v12, %v9745_v21 }
 0x70c   : > { %v3526_v24 = vsel %vm369_vm0, %v3525_v38, %v3484_v27  ;;  %v3603_v54 = vrot.slane %v8511_v14, 4  ;;  %v3590_v9 = vsel %vm369_vm0, %v3589_v43, %v8510_v10  ;;  %v3591_v59 = vrot.slane %v8510_v10, 4 }
 0x70d   : > { %15782 = vst [vmem:[#allocation60_spill] sm:$0xff] %v11741_v50  ;;  %v3602_v4 = vsel %vm369_vm0, %v11677_v34, %v8511_v14  ;;  %v3596_v8 = vperm.slane %v3590_v9, %v9735_v6  ;;  %v3528_v27 = vsel %vm369_vm0, %v3496_v48, %v3527_v44  ;;  %v3432_v58 = vperm.slane %v3426_v33, %v9745_v21 }
 0x70e   : > { %v3608_v1 = vperm.slane %v3602_v4, %v9735_v6  ;;  %v15783_v28 = vunpack.i.l.bf16 %v11634_v52  ;;  %v15784_v38 = vunpack.i.h.bf16 %v11634_v52  ;;  %v11759_v10 = vperm.slane %v3526_v24, %v9745_v21 }
 0x70f   : > { %v3536_v34 = vperm.slane %v3528_v27, %v9745_v21  ;;  %v3539_v14 = vrot.slane %v11730_v25, 4  ;;  %v3663_v48 = vrot.slane %v11741_v50, 4  ;;  %v3555_v44 = vrot.slane %v3512_v20, 4 }
 0x710   : > { %v3592_v11 = vsel %vm369_vm0, %v15783_v28, %v3591_v59  ;;  %v3604_v43 = vsel %vm369_vm0, %v15784_v38, %v3603_v54  ;;  %15785 = vst [vmem:[#allocation61_spill] sm:$0xff] %v11759_v10  ;;  %v3637_v12 = vrot.slane %v3608_v1, 4  ;;  %v3639_v9 = vrot.slane %v3596_v8, 4 }
 0x711   : > { %v3600_v33 = vperm.slane %v3592_v11, %v9735_v6  ;;  %v3667_v4 = vrot.slane %v3624_v47, 4  ;;  %v3553_v59 = vrot.slane %v3536_v34, 4  ;;  %v3612_v52 = vperm.slane %v3604_v43, %v9735_v6 }
 0x712   : > { %v3638_v54 = vsel %vm369_vm0, %v3637_v12, %v3596_v8  ;;  %v3445_v28 = vrot.slane %v3432_v58, 4  ;;  %v15786_v24 = vunpack.i.l.bf16 %v11524_v23  ;;  %v3552_v38 = vsel %vm369_vm0, %v11759_v10, %v3551_v31 }
 0x713   : > { %v11774_v18 = vperm.slane %v3638_v54, %v9745_v21  ;;  %v3556_v11 = vsel %vm369_vm0, %v3536_v34, %v3555_v44  ;;  %v3640_v50 = vsel %vm369_vm0, %v3608_v1, %v3639_v9  ;;  %v15788_v8 = vrot.slane %v11618_v3, 4 }
 0x714   : > { %v3456_v27 = vsel %vm369_vm0, %v15786_v24, %v11686_v35  ;;  %v3648_v43 = vperm.slane %v3640_v50, %v9745_v21  ;;  %v3513_v35 = vrot.slane %v11717_v30, 4  ;;  %v3554_v54 = vsel %vm369_vm0, %v3553_v59, %v3512_v20 }
 0x715   : > { %15787 = vst [vmem:[#allocation62_spill] sm:$0xff] %v11774_v18  ;;  %v3448_v12 = vsel %vm369_vm0, %v3432_v58, %v15788_v8  ;;  %v3464_v23 = vperm.slane %v3456_v27, %v9735_v6  ;;  %v3664_v31 = vsel %vm369_vm0, %v11774_v18, %v3663_v48  ;;  %v11789_v34 = vsel %vm369_vm0, %v3445_v28, %v11618_v3 }
 0x716   : > { %v3538_v50 = vsel %vm369_vm0, %v3537_v57, %v11730_v25  ;;  %v8522_v1 = vpack.i.bf16 %v3664_v31, %v3552_v38  ;;  %v3668_v44 = vsel %vm369_vm0, %v3648_v43, %v3667_v4  ;;  %v3665_v58 = vrot.slane %v3648_v43, 4 }
 0x717   : > { %v3514_v9 = vsel %vm369_vm0, %v3513_v35, %v3464_v23  ;;  %v8542_v24 = vpack.i.bf16 %v3668_v44, %v3556_v11  ;;  %v3544_v48 = vperm.slane %v3538_v50, %v9745_v21  ;;  %v3625_v20 = vrot.slane %v11722_v19, 4 }
 0x718   : > { %v3520_v27 = vperm.slane %v3514_v9, %v9745_v21  ;;  %8523 = vrot.lane.b32.xlu1 %v8522_v1, %s15710_s8  ;;  %v3666_v3 = vsel %vm369_vm0, %v3665_v58, %v3624_v47  ;;  %v3649_v59 = vrot.slane %v3612_v52, 4  ;;  %v3515_v28 = vrot.slane %v3464_v23, 4 }
 0x719   : > { %v3540_v25 = vsel %vm369_vm0, %v11714_v46, %v3539_v14  ;;  %8543 = vrot.lane.b32.xlu2 %v8542_v24, %s15716_s17  ;;  %v8532_v57 = vpack.i.bf16 %v3666_v3, %v3554_v54  ;;  %v3557_v4 = vrot.slane %v3544_v48, 4  ;;  %v3626_v38 = vsel %vm369_vm0, %v3625_v20, %v11725_v61 }
 0x71a   : > { %v11806_v11 = vperm.slane %v3540_v25, %v9745_v21  ;;  %v3632_v43 = vperm.slane %v3626_v38, %v9745_v21  ;;  %v3650_v8 = vsel %vm369_vm0, %v3649_v59, %v3600_v33  ;;  %v3516_v47 = vsel %vm369_vm0, %v11717_v30, %v3515_v28  ;;  %v11936_v59 = vld [vmem:[#allocation2 + $0x1] sm:$0xff] }
 0x71b   : > { %v3627_v23 = vrot.slane %v11725_v61, 4  ;;  %8533 = vrot.lane.b32.xlu0 %v8532_v57, %s15707_s24  ;;  %v8557_v46 = vpack.i.bf16 %v3448_v12, %v11637_v56  ;;  %v8547_v14 = vpack.i.bf16 %v11789_v34, %v11626_v29  ;;  %v3656_v35 = vperm.slane %v3650_v8, %v9745_v21 }
 0x71c   : > { %v3561_v31 = vrot.slane %v11806_v11, 4  ;;  %v11820_v54 = vperm.slane %v3516_v47, %v9745_v21  ;;  %v3651_v30 = vrot.slane %v3600_v33, 4  ;;  %v3671_v1 = vrot.slane %v3632_v43, 4  ;;  %v11835_v33 = vld [vmem:[#allocation2 + $0x121] sm:$0xff] }
 0x71d   : > { %v3628_v50 = vsel %vm369_vm0, %v11722_v19, %v3627_v23  ;;  %v3669_v61 = vrot.slane %v3656_v35, 4  ;;  %v3559_v58 = vrot.slane %v3520_v27, 4  ;;  %v15789_v56 = vrot.slane %v11662_v0, 4 }
 0x71e   : > { %v3636_v44 = vperm.slane %v3628_v50, %v9745_v21  ;;  %v3558_v12 = vsel %vm369_vm0, %v3557_v4, %v3520_v27  ;;  %v3652_v34 = vsel %vm369_vm0, %v3612_v52, %v3651_v30  ;;  %v11832_v9 = vsel %vm369_vm0, %v3656_v35, %v3671_v1  ;;  %v11846_v27 = vld [vmem:[#allocation2 + $0x131] sm:$0xff]  ;;  %v11848_v52 = vld [vmem:[#allocation2 + $0x161] sm:$0xff] }
 0x71f   : > { %v3428_v29 = vsel %vm369_vm0, %v11658_v26, %v15789_v56  ;;  %v3670_v24 = vsel %vm369_vm0, %v3669_v61, %v3632_v43  ;;  %v11840_v20 = vsel %vm369_vm0, %v3561_v31, %v11820_v54  ;;  %v3660_v0 = vperm.slane %v3652_v34, %v9745_v21  ;;  %v11862_v4 = vld [vmem:[#allocation2 + $0x101] sm:$0xff]  ;;  %v11876_v31 = vld [vmem:[#allocation2 + $0x171] sm:$0xff] }
 0x720   : > { %v3436_v19 = vperm.slane %v3428_v29, %v9745_v21  ;;  %v11844_v26 = vsel %vm369_vm0, %v3544_v48, %v3559_v58  ;;  %v15790_v3 = vpack.i.bf16 %v11682_v36, %v11623_v16  ;;  %v15791_v25 = vrot.slane %v11629_v32, 4  ;;  %v11865_v16 = vld [vmem:[#allocation2 + $0x111] sm:$0xff]  ;;  %v11867_v36 = vld [vmem:[#allocation2 + $0x141] sm:$0xff] }
 0x721   : > { %8558 = vrot.lane.b32.xlu2 %v8557_v46, %s9566_s18  ;;  %v8552_v38 = vpack.i.bf16 %v3670_v24, %v3558_v12  ;;  %v3673_v43 = vrot.slane %v3660_v0, 4  ;;  %v3675_v8 = vrot.slane %v3636_v44, 4  ;;  %15792 = vst [vmem:[#allocation63_spill] sm:$0xff] %v11867_v36  ;;  %v4074_v47 = vrot.slane %v11835_v33, 4  ;;  %v11878_v50 = vld [vmem:[#allocation2 + $0x1a1] sm:$0xff]  ;;  %v11880_v46 = vld [vmem:[#allocation2 + $0x1b1] sm:$0xff] }
 0x722   : > { %8538 = vrot.lane.b32.xlu1 %v15790_v3, %s15716_s17  ;;  %v3449_v28 = vrot.slane %v3436_v19, 4  ;;  %v11859_v57 = vsel %vm369_vm0, %v3436_v19, %v15791_v25  ;;  %15793 = vst [vmem:[#allocation64_spill] sm:$0xff] %v11878_v50  ;;  %v4086_v30 = vrot.slane %v11846_v27, 4  ;;  %v4098_v1 = vrot.slane %v11848_v52, 4  ;;  %v11891_v56 = vld [vmem:[#allocation2 + $0x1e1] sm:$0xff]  ;;  %v11893_v29 = vld [vmem:[#allocation2 + $0x1f1] sm:$0xff] }
 0x723   : > { %15794 = vst [vmem:[#allocation65_spill] sm:$0xff] %v11880_v46  ;;  %8548 = vrot.lane.b32.xlu0 %v8547_v14, %s9561_s30  ;;  %v3674_v61 = vsel %vm369_vm0, %v3673_v43, %v3636_v44  ;;  %v11889_v58 = vsel %vm369_vm0, %v3660_v0, %v3675_v8  ;;  %v4075_v12 = vsel %vm369_vm0, %v4074_v47, %v11862_v4  ;;  %v11897_v34 = vld [vmem:[#allocation2 + $0x21] sm:$0xff]  ;;  %v11900_v14 = vld [vmem:[#allocation2 + $0x151] sm:$0xff]  ;;  %v4110_v47 = vrot.slane %v11876_v31, 4 }
 0x724   : > { %v11872_v23 = vsel %vm369_vm0, %v3449_v28, %v11629_v32  ;;  %15795 = vst [vmem:[#allocation66_spill] sm:$0xff] %v11891_v56  ;;  %v8572_v19 = vpack.i.bf16 %v3674_v61, %v11840_v20  ;;  %v11902_v44 = vld [vmem:[#allocation2 + $0x181] sm:$0xff]  ;;  %v11905_v24 = vperm.slane %v4075_v12, %v9735_v6  ;;  %v4087_v0 = vsel %vm369_vm0, %v4086_v30, %v11865_v16  ;;  %v11911_v28 = vld [vmem:[#allocation2 + $0x31] sm:$0xff] }
 0x725   : > { %15796 = vst [vmem:[#allocation67_spill] sm:$0xff] %v11893_v29  ;;  %v4099_v3 = vsel %vm369_vm0, %v4098_v1, %v11867_v36  ;;  %v11913_v25 = vld [vmem:[#allocation2 + $0x191] sm:$0xff]  ;;  %v11915_v43 = vld [vmem:[#allocation2 + $0x1c1] sm:$0xff]  ;;  %v11918_v20 = vperm.slane %v4087_v0, %v9735_v6  ;;  %v4186_v61 = vrot.slane %v11878_v50, 4  ;;  %v4198_v1 = vrot.slane %v11880_v46, 4 }
 0x726   : > { %15797 = vst [vmem:[#allocation68_spill] sm:$0xff] %v11900_v14  ;;  %v11921_v8 = vperm.slane %v4099_v3, %v9735_v6  ;;  %v11925_v30 = vld [vmem:[#allocation2 + $0x1d1] sm:$0xff]  ;;  %v4210_v12 = vrot.slane %v11891_v56, 4  ;;  %v4222_v35 = vrot.slane %v11893_v29, 4  ;;  %v3850_v32 = vrot.slane %v11897_v34, 4 }
 0x727   : > { %15798 = vst [vmem:[#allocation69_spill] sm:$0xff] %v11902_v44  ;;  %v4111_v0 = vsel %vm369_vm0, %v4110_v47, %v11900_v14  ;;  %v4122_v3 = vrot.slane %v11918_v20, 4  ;;  %v4187_v48 = vsel %vm369_vm0, %v4186_v61, %v11902_v44  ;;  %v3862_v10 = vrot.slane %v11911_v28, 4  ;;  %v11952_v61 = vld [vmem:[#allocation2 + $0x61] sm:$0xff] }
 0x728   : > { %15799 = vst [vmem:[#allocation70_spill] sm:$0xff] %v11913_v25  ;;  %v11941_v18 = vperm.slane %v4111_v0, %v9735_v6  ;;  %v11944_v41 = vperm.slane %v4187_v48, %v9735_v6  ;;  %v4199_v47 = vsel %vm369_vm0, %v4198_v1, %v11913_v25  ;;  %v4211_v51 = vsel %vm369_vm0, %v4210_v12, %v11915_v43 }
 0x729   : > { %15800 = vst [vmem:[#allocation71_spill] sm:$0xff] %v11915_v43  ;;  %8573 = vrot.lane.b32.xlu2 %v8572_v19, %s9563_s20  ;;  %v11958_v0 = vperm.slane %v4199_v47, %v9735_v6  ;;  %v11961_v48 = vperm.slane %v4211_v51, %v9735_v6  ;;  %v4223_v1 = vsel %vm369_vm0, %v4222_v35, %v11925_v30  ;;  %v11972_v19 = vld [vmem:[#allocation2 + $0x41] sm:$0xff]  ;;  %v3874_v17 = vrot.slane %v11952_v61, 4 }
 0x72a   : > { %15801 = vst [vmem:[#allocation72_spill] sm:$0xff] %v11925_v30  ;;  %8553 = vrot.lane.b32.xlu1 %v8552_v38, %s9561_s30  ;;  %v4123_v38 = vsel %vm369_vm0, %v4122_v3, %v11905_v24  ;;  %v4146_v55 = vrot.slane %v11941_v18, 4  ;;  %v11970_v39 = vperm.slane %v4223_v1, %v9735_v6  ;;  %v11974_v3 = vld [vmem:[#allocation2 + $0x71] sm:$0xff]  ;;  %v3851_v47 = vsel %vm369_vm0, %v3850_v32, %v11936_v59 }
 0x72b   : > { %v11966_v12 = vperm.slane %v4123_v38, %v9745_v21  ;;  %v15803_v51 = vpack.i.bf16 %v11832_v9, %v11844_v26  ;;  %v4234_v35 = vrot.slane %v11958_v0, 4  ;;  %v11984_v38 = vperm.slane %v3851_v47, %v9735_v6 }
 0x72c   : > { %v3863_v1 = vsel %vm369_vm0, %v3862_v10, %v11950_v63  ;;  %v4147_v37 = vsel %vm369_vm0, %v4146_v55, %v11921_v8  ;;  %v4258_v2 = vrot.slane %v11970_v39, 4  ;;  %v3875_v47 = vsel %vm369_vm0, %v3874_v17, %v11972_v19 }
 0x72d   : > { %15802 = vst [vmem:[#allocation73_spill] sm:$0xff] %v11966_v12  ;;  %8563 = vrot.lane.b32.xlu0 %v15803_v51, %s9566_s18  ;;  %v4172_v32 = vrot.slane %v11966_v12, 4  ;;  %v11996_v9 = vperm.slane %v3863_v1, %v9735_v6  ;;  %v11999_v26 = vperm.slane %v4147_v37, %v9745_v21  ;;  %v4235_v10 = vsel %vm369_vm0, %v4234_v35, %v11944_v41  ;;  %v12013_v1 = vld [vmem:[#allocation2 + $0xb1] sm:$0xff] }
 0x72e   : > { %v3886_v55 = vrot.slane %v11974_v3, 4  ;;  %v12007_v51 = vperm.slane %v4235_v10, %v9745_v21  ;;  %v4259_v12 = vsel %vm369_vm0, %v4258_v2, %v11961_v48  ;;  %v12016_v37 = vperm.slane %v3875_v47, %v9735_v6  ;;  %v12028_v2 = vld [vmem:[#allocation2 + $0xe1] sm:$0xff] }
 0x72f   : > { %15804 = vst [vmem:[#allocation74_spill] sm:$0xff] %v11999_v26  ;;  %v3900_v35 = vrot.slane %v11984_v38, 4  ;;  %v15806_v53 = vrot.slane %v11820_v54, 4  ;;  %v4173_v10 = vsel %vm369_vm0, %v11999_v26, %v4172_v32  ;;  %v12026_v13 = vperm.slane %v4259_v12, %v9745_v21  ;;  %v12041_v32 = vld [vmem:[#allocation2 + $0x91] sm:$0xff] }
 0x730   : > { %15805 = vst [vmem:[#allocation75_spill] sm:$0xff] %v12007_v51  ;;  %v3887_v47 = vsel %vm369_vm0, %v3886_v55, %v11993_v5  ;;  %v15809_v54 = vpack.i.bf16 %v11872_v23, %v11642_v22  ;;  %v3924_v45 = vrot.slane %v12016_v37, 4  ;;  %v12052_v22 = vld [vmem:[#allocation2 + $0xd1] sm:$0xff]  ;;  %v3986_v42 = vrot.slane %v12028_v2, 4 }
 0x731   : > { %v3564_v17 = vsel %vm369_vm0, %v11806_v11, %v15806_v53  ;;  %15807 = vst [vmem:[#allocation76_spill] sm:$0xff] %v12026_v13  ;;  %v4284_v53 = vrot.slane %v12007_v51, 4  ;;  %v12039_v11 = vld [vmem:[#allocation2 + $0x81] sm:$0xff]  ;;  %v12044_v12 = vperm.slane %v3887_v47, %v9735_v6  ;;  %v3901_v26 = vsel %vm369_vm0, %v11996_v9, %v3900_v35 }
 0x732   : > { %8568 = vrot.lane.b32.xlu1 %v15809_v54, %s9563_s20  ;;  %v8582_v55 = vpack.i.bf16 %v11889_v58, %v3564_v17  ;;  %v3909_v23 = vperm.slane %v3901_v26, %v9745_v21  ;;  %v3962_v54 = vrot.slane %v12011_v62, 4  ;;  %v3974_v51 = vrot.slane %v12013_v1, 4 }
 0x733   : > { %v4285_v47 = vsel %vm369_vm0, %v12026_v13, %v4284_v53  ;;  %v3925_v35 = vsel %vm369_vm0, %v12044_v12, %v3924_v45  ;;  %v3998_v58 = vrot.slane %v12030_v7, 4  ;;  %v15810_v17 = vpack.i.bf16 %v11859_v57, %v11645_v15 }
 0x734   : > { %v8592_v26 = vpack.i.bf16 %v4285_v47, %v4173_v10  ;;  %v3933_v60 = vperm.slane %v3925_v35, %v9745_v21  ;;  %v3963_v49 = vsel %vm369_vm0, %v3962_v54, %v12039_v11  ;;  %v3975_v53 = vsel %vm369_vm0, %v3974_v51, %v12041_v32 }
 0x735   : > { %8578 = vrot.lane.b32.xlu0 %v15810_v17, %s9567_s6  ;;  %v12073_v45 = vperm.slane %v3963_v49, %v9735_v6  ;;  %v12076_v13 = vperm.slane %v3975_v53, %v9735_v6  ;;  %v3987_v7 = vsel %vm369_vm0, %v3986_v42, %v12050_v40  ;;  %v3999_v15 = vsel %vm369_vm0, %v3998_v58, %v12052_v22 }
 0x736   : > { %v3950_v57 = vrot.slane %v3933_v60, 4  ;;  %v12083_v10 = vperm.slane %v3987_v7, %v9735_v6  ;;  %v12086_v54 = vperm.slane %v3999_v15, %v9735_v6  ;;  %v3952_v51 = vrot.slane %v3909_v23, 4 }
 0x737   : > { %v4012_v49 = vrot.slane %v12073_v45, 4  ;;  %v4124_v47 = vrot.slane %v11905_v24, 4  ;;  %v4148_v35 = vrot.slane %v11921_v8, 4  ;;  %v4236_v17 = vrot.slane %v11944_v41, 4 }
 0x738   : > { %v3951_v42 = vsel %vm369_vm0, %v3950_v57, %v3909_v23  ;;  %v4036_v58 = vrot.slane %v12083_v10, 4  ;;  %v3953_v53 = vsel %vm369_vm0, %v3933_v60, %v3952_v51  ;;  %v4260_v7 = vrot.slane %v11961_v48, 4 }
 0x739   : > { %v4013_v15 = vsel %vm369_vm0, %v12076_v13, %v4012_v49  ;;  %v4125_v24 = vsel %vm369_vm0, %v11918_v20, %v4124_v47  ;;  %v4149_v8 = vsel %vm369_vm0, %v11941_v18, %v4148_v35  ;;  %v4237_v41 = vsel %vm369_vm0, %v11958_v0, %v4236_v17 }
 0x73a   : > { %8583 = vrot.lane.b32.xlu1 %v8582_v55, %s9567_s6  ;;  %v4021_v23 = vperm.slane %v4013_v15, %v9745_v21  ;;  %v4037_v60 = vsel %vm369_vm0, %v12086_v54, %v4036_v58  ;;  %v12109_v48 = vperm.slane %v4125_v24, %v9745_v21  ;;  %v12112_v55 = vperm.slane %v4149_v8, %v9745_v21 }
 0x73b   : > { %v4045_v57 = vperm.slane %v4037_v60, %v9745_v21  ;;  %v12116_v20 = vperm.slane %v4237_v41, %v9745_v21  ;;  %v4261_v18 = vsel %vm369_vm0, %v11970_v39, %v4260_v7  ;;  %v4076_v0 = vrot.slane %v11862_v4, 4 }
 0x73c   : > { %v4064_v51 = vrot.slane %v4021_v23, 4  ;;  %v4176_v49 = vrot.slane %v12109_v48, 4  ;;  %v12124_v47 = vperm.slane %v4261_v18, %v9745_v21  ;;  %v4088_v35 = vrot.slane %v11865_v16, 4 }
 0x73d   : > { %8593 = vrot.lane.b32.xlu0 %v8592_v26, %s15710_s8  ;;  %v4062_v17 = vrot.slane %v4045_v57, 4  ;;  %v4288_v58 = vrot.slane %v12116_v20, 4  ;;  %v4077_v15 = vsel %vm369_vm0, %v11835_v33, %v4076_v0  ;;  %v4100_v39 = vrot.slane %v11867_v36, 4 }
 0x73e   : > { %v4065_v7 = vsel %vm369_vm0, %v4045_v57, %v4064_v51  ;;  %v4177_v26 = vsel %vm369_vm0, %v12112_v55, %v4176_v49  ;;  %v4089_v24 = vsel %vm369_vm0, %v11846_v27, %v4088_v35  ;;  %v12140_v60 = vperm.slane %v4077_v15, %v9735_v6 }
 0x73f   : > { %v4063_v8 = vsel %vm369_vm0, %v4062_v17, %v4021_v23  ;;  %v4289_v41 = vsel %vm369_vm0, %v12124_v47, %v4288_v58  ;;  %v12143_v18 = vperm.slane %v4089_v24, %v9735_v6  ;;  %v8607_v36 = vpack.i.bf16 %v4065_v7, %v3953_v53 }
 0x740   : > { %v8597_v0 = vpack.i.bf16 %v4063_v8, %v3951_v42  ;;  %v4101_v57 = vsel %vm369_vm0, %v11848_v52, %v4100_v39  ;;  %v4112_v51 = vrot.slane %v11900_v14, 4  ;;  %v8612_v49 = vpack.i.bf16 %v4289_v41, %v4177_v26 }
 0x741   : > { %v4134_v35 = vrot.slane %v12143_v18, 4  ;;  %v4188_v23 = vrot.slane %v11902_v44, 4  ;;  %v4200_v17 = vrot.slane %v11913_v25, 4  ;;  %v4212_v42 = vrot.slane %v11915_v43, 4 }
 0x742   : > { %8598 = vrot.lane.b32.xlu1 %v8597_v0, %s15707_s24  ;;  %v4113_v58 = vsel %vm369_vm0, %v11876_v31, %v4112_v51  ;;  %v4224_v53 = vrot.slane %v11925_v30, 4  ;;  %v3898_v15 = vrot.slane %v11996_v9, 4  ;;  %v12158_v39 = vperm.slane %v4101_v57, %v9735_v6 }
 0x743   : > { %v12161_v7 = vperm.slane %v4113_v58, %v9735_v6  ;;  %v4189_v26 = vsel %vm369_vm0, %v11878_v50, %v4188_v23  ;;  %v4201_v24 = vsel %vm369_vm0, %v11880_v46, %v4200_v17  ;;  %v4135_v8 = vsel %vm369_vm0, %v4134_v35, %v12140_v60 }
 0x744   : > { %v12171_v41 = vperm.slane %v4189_v26, %v9735_v6  ;;  %v12174_v9 = vperm.slane %v4201_v24, %v9735_v6  ;;  %v4213_v0 = vsel %vm369_vm0, %v11891_v56, %v4212_v42  ;;  %v3899_v35 = vsel %vm369_vm0, %v3898_v15, %v11984_v38 }
 0x745   : > { %8608 = vrot.lane.b32.xlu0 %v8607_v36, %s15716_s17  ;;  %v4158_v57 = vrot.slane %v12161_v7, 4  ;;  %v12180_v51 = vperm.slane %v4213_v0, %v9735_v6  ;;  %v4225_v36 = vsel %vm369_vm0, %v11893_v29, %v4224_v53  ;;  %v12191_v58 = vperm.slane %v3899_v35, %v9745_v21  ;;  %v15815_v29 = vld [vmem:[#allocation77_spill] sm:$0xff] }
 0x746   : > { %v12187_v23 = vperm.slane %v4225_v36, %v9735_v6  ;;  %v4246_v17 = vrot.slane %v12174_v9, 4  ;;  %v3922_v42 = vrot.slane %v12044_v12, 4  ;;  %v4010_v24 = vrot.slane %v12076_v13, 4 }
 0x747   : > { %15811 = vst [vmem:[#allocation78_spill] sm:$0xff] %v12191_v58  ;;  %v4159_v26 = vsel %vm369_vm0, %v4158_v57, %v12158_v39  ;;  %v4034_v53 = vrot.slane %v12086_v54, 4  ;;  %v3852_v0 = vrot.slane %v11936_v59, 4  ;;  %v12208_v35 = vperm.slane %v4135_v8, %v9745_v21 }
 0x748   : > { %v12200_v38 = vperm.slane %v4159_v26, %v9745_v21  ;;  %v4247_v15 = vsel %vm369_vm0, %v4246_v17, %v12171_v41  ;;  %v4270_v36 = vrot.slane %v12187_v23, 4  ;;  %v3923_v12 = vsel %vm369_vm0, %v3922_v42, %v12016_v37 }
 0x749   : > { %v12211_v13 = vperm.slane %v3923_v12, %v9745_v21  ;;  %v3948_v54 = vrot.slane %v12191_v58, 4  ;;  %v4011_v57 = vsel %vm369_vm0, %v4010_v24, %v12073_v45  ;;  %v4035_v8 = vsel %vm369_vm0, %v4034_v53, %v12083_v10 }
 0x74a   : > { %8613 = vrot.lane.b32.xlu1 %v8612_v49, %s15716_s17  ;;  %v4178_v17 = vrot.slane %v12200_v38, 4  ;;  %v4271_v26 = vsel %vm369_vm0, %v4270_v36, %v12180_v51  ;;  %v12221_v37 = vperm.slane %v4011_v57, %v9745_v21  ;;  %v12226_v42 = vperm.slane %v4247_v15, %v9745_v21 }
 0x74b   : > { %15812 = vst [vmem:[#allocation79_spill] sm:$0xff] %v12211_v13  ;;  %v12229_v12 = vperm.slane %v4271_v26, %v9745_v21  ;;  %v12232_v45 = vperm.slane %v4035_v8, %v9745_v21  ;;  %v3949_v49 = vsel %vm369_vm0, %v12211_v13, %v3948_v54  ;;  %v3853_v36 = vsel %vm369_vm0, %v11897_v34, %v3852_v0 }
 0x74c   : > { %15813 = vst [vmem:[#allocation80_spill] sm:$0xff] %v12221_v37  ;;  %v4060_v24 = vrot.slane %v12221_v37, 4  ;;  %v3864_v57 = vrot.slane %v11950_v63, 4  ;;  %v4179_v10 = vsel %vm369_vm0, %v4178_v17, %v12208_v35  ;;  %v3861_v15 = vperm.slane %v3853_v36, %v9735_v6 }
 0x74d   : > { %15814 = vst [vmem:[#allocation81_spill] sm:$0xff] %v12232_v45  ;;  %v4290_v53 = vrot.slane %v12229_v12, 4  ;;  %v3876_v26 = vrot.slane %v11972_v19, 4  ;;  %v3888_v37 = vrot.slane %v11993_v5, 4  ;;  %v3964_v0 = vrot.slane %v12039_v11, 4 }
 0x74e   : > { %v4061_v8 = vsel %vm369_vm0, %v12232_v45, %v4060_v24  ;;  %v3865_v54 = vsel %vm369_vm0, %v11911_v28, %v3864_v57 }
 0x74f   : > { %v4291_v58 = vsel %vm369_vm0, %v4290_v53, %v12226_v42  ;;  %v8587_v17 = vpack.i.bf16 %v4061_v8, %v3949_v49  ;;  %v3873_v13 = vperm.slane %v3865_v54, %v9735_v6  ;;  %v3877_v36 = vsel %vm369_vm0, %v11952_v61, %v3876_v26 }
 0x750   : > { %v8622_v46 = vpack.i.bf16 %v4291_v58, %v4179_v10  ;;  %v3885_v50 = vperm.slane %v3877_v36, %v9735_v6  ;;  %v3889_v24 = vsel %vm369_vm0, %v11974_v3, %v3888_v37  ;;  %v3965_v57 = vsel %vm369_vm0, %v12011_v62, %v3964_v0 }
 0x751   : > { %8588 = vrot.lane.b32.xlu2 %v8587_v17, %s15710_s8  ;;  %v3897_v45 = vperm.slane %v3889_v24, %v9735_v6  ;;  %v3910_v53 = vrot.slane %v3873_v13, 4  ;;  %v3973_v49 = vperm.slane %v3965_v57, %v9735_v6  ;;  %v3976_v8 = vrot.slane %v12041_v32, 4 }
 0x752   : > { %8623 = vrot.lane.b32.xlu0 %v8622_v46, %s9561_s30  ;;  %v3988_v58 = vrot.slane %v12050_v40, 4  ;;  %v4000_v10 = vrot.slane %v12052_v22, 4  ;;  %v3912_v26 = vrot.slane %v3861_v15, 4  ;;  %v3936_v37 = vrot.slane %v3885_v50, 4 }
 0x753   : > { %v3911_v54 = vsel %vm369_vm0, %v3910_v53, %v3861_v15  ;;  %v3934_v0 = vrot.slane %v3897_v45, 4  ;;  %v3977_v17 = vsel %vm369_vm0, %v12013_v1, %v3976_v8  ;;  %v4024_v36 = vrot.slane %v3973_v49, 4 }
 0x754   : > { %v3917_v24 = vperm.slane %v3911_v54, %v9745_v21  ;;  %v3985_v57 = vperm.slane %v3977_v17, %v9735_v6  ;;  %v3989_v46 = vsel %vm369_vm0, %v12028_v2, %v3988_v58  ;;  %v4001_v56 = vsel %vm369_vm0, %v15815_v29, %v4000_v10 }
 0x755   : > { %v3935_v14 = vsel %vm369_vm0, %v3934_v0, %v3885_v50  ;;  %v3997_v30 = vperm.slane %v3989_v46, %v9735_v6  ;;  %v4009_v15 = vperm.slane %v4001_v56, %v9735_v6  ;;  %v3913_v53 = vsel %vm369_vm0, %v3873_v13, %v3912_v26 }
 0x756   : > { %v3941_v8 = vperm.slane %v3935_v14, %v9745_v21  ;;  %v3956_v43 = vrot.slane %v3917_v24, 4  ;;  %v4022_v54 = vrot.slane %v3985_v57, 4  ;;  %v12283_v17 = vperm.slane %v3913_v53, %v9745_v21 }
 0x757   : > { %v4046_v25 = vrot.slane %v4009_v15, 4  ;;  %v3937_v58 = vsel %vm369_vm0, %v3897_v45, %v3936_v37  ;;  %v4025_v10 = vsel %vm369_vm0, %v3985_v57, %v4024_v36  ;;  %v4048_v44 = vrot.slane %v3997_v30, 4 }
 0x758   : > { %v3957_v50 = vsel %vm369_vm0, %v3941_v8, %v3956_v43  ;;  %v4023_v0 = vsel %vm369_vm0, %v4022_v54, %v3973_v49  ;;  %v12290_v56 = vperm.slane %v3937_v58, %v9745_v21  ;;  %v12293_v14 = vperm.slane %v4025_v10, %v9745_v21 }
 0x759   : > { %v4029_v13 = vperm.slane %v4023_v0, %v9745_v21  ;;  %v4047_v26 = vsel %vm369_vm0, %v4046_v25, %v3997_v30  ;;  %v4049_v46 = vsel %vm369_vm0, %v4009_v15, %v4048_v44  ;;  %v4174_v45 = vrot.slane %v12112_v55, 4 }
 0x75a   : > { %v4053_v37 = vperm.slane %v4047_v26, %v9745_v21  ;;  %v3958_v43 = vrot.slane %v12290_v56, 4  ;;  %v4057_v49 = vperm.slane %v4049_v46, %v9745_v21  ;;  %v4286_v36 = vrot.slane %v12124_v47, 4 }
 0x75b   : > { %v4068_v57 = vrot.slane %v4029_v13, 4  ;;  %v4175_v53 = vsel %vm369_vm0, %v4174_v45, %v12109_v48  ;;  %v4136_v54 = vrot.slane %v12140_v60, 4  ;;  %v4160_v25 = vrot.slane %v12158_v39, 4 }
 0x75c   : > { %v3959_v44 = vsel %vm369_vm0, %v3958_v43, %v12283_v17  ;;  %v4070_v30 = vrot.slane %v4057_v49, 4  ;;  %v4287_v55 = vsel %vm369_vm0, %v4286_v36, %v12116_v20  ;;  %v4248_v15 = vrot.slane %v12171_v41, 4 }
 0x75d   : > { %v4069_v58 = vsel %vm369_vm0, %v4053_v37, %v4068_v57  ;;  %v8602_v47 = vpack.i.bf16 %v4287_v55, %v4175_v53  ;;  %v4137_v10 = vsel %vm369_vm0, %v12143_v18, %v4136_v54  ;;  %v4161_v48 = vsel %vm369_vm0, %v12161_v7, %v4160_v25 }
 0x75e   : > { %v8627_v60 = vpack.i.bf16 %v4069_v58, %v3957_v50  ;;  %v4071_v39 = vsel %vm369_vm0, %v4070_v30, %v12293_v14  ;;  %v4145_v0 = vperm.slane %v4137_v10, %v9745_v21  ;;  %v4169_v26 = vperm.slane %v4161_v48, %v9745_v21 }
 0x75f   : > { %v8637_v20 = vpack.i.bf16 %v4071_v39, %v3959_v44  ;;  %8603 = vrot.lane.b32.xlu2 %v8602_v47, %s15707_s24  ;;  %v4249_v41 = vsel %vm369_vm0, %v12174_v9, %v4248_v15  ;;  %v4272_v46 = vrot.slane %v12180_v51, 4  ;;  %v3954_v18 = vrot.slane %v3941_v8, 4 }
 0x760   : > { %8628 = vrot.lane.b32.xlu1 %v8627_v60, %s9566_s18  ;;  %v4182_v7 = vrot.slane %v4169_v26, 4  ;;  %v4257_v50 = vperm.slane %v4249_v41, %v9745_v21  ;;  %v4184_v45 = vrot.slane %v4145_v0, 4  ;;  %v4066_v43 = vrot.slane %v4053_v37, 4  ;;  %v12393_v60 = vpop.permute.xlu2 %8528 }
 0x761   : > { %8638 = vrot.lane.b32.xlu0 %v8637_v20, %s9563_s20  ;;  %v4273_v36 = vsel %vm369_vm0, %v12187_v23, %v4272_v46  ;;  %v3955_v57 = vsel %vm369_vm0, %v3954_v18, %v3917_v24  ;;  %v4180_v25 = vrot.slane %v12208_v35, 4  ;;  %v4292_v55 = vrot.slane %v12226_v42, 4  ;;  %v15823_v20 = vld [vmem:[#allocation18_spill] sm:$0xff]  ;;  %v15824_v46 = vld [vmem:[#allocation37_spill] sm:$0xff] }
 0x762   : > { %v4281_v53 = vperm.slane %v4273_v36, %v9745_v21  ;;  %v4185_v9 = vsel %vm369_vm0, %v4169_v26, %v4184_v45  ;;  %v4296_v51 = vrot.slane %v4257_v50, 4  ;;  %v4183_v8 = vsel %vm369_vm0, %v4182_v7, %v4145_v0 }
 0x763   : > { %v4067_v54 = vsel %vm369_vm0, %v4066_v43, %v4029_v13  ;;  %v4181_v58 = vsel %vm369_vm0, %v12200_v38, %v4180_v25  ;;  %v4293_v13 = vsel %vm369_vm0, %v12229_v12, %v4292_v55  ;;  %v3960_v47 = vrot.slane %v12283_v17, 4  ;;  %v15826_v43 = vld [vmem:[#allocation35_spill] sm:$0xff]  ;;  %v15832_v55 = vld [vmem:[#allocation16_spill] sm:$0xff] }
 0x764   : > { %v4294_v44 = vrot.slane %v4281_v53, 4  ;;  %v4297_v37 = vsel %vm369_vm0, %v4281_v53, %v4296_v51  ;;  %v8617_v30 = vpack.i.bf16 %v4067_v54, %v3955_v57  ;;  %v8632_v35 = vpack.i.bf16 %v4293_v13, %v4181_v58  ;;  %v15827_v57 = vld [vmem:[#allocation69_spill] sm:$0xff]  ;;  %v15828_v53 = vld [vmem:[#allocation70_spill] sm:$0xff]  ;;  %v15831_v54 = vld [vmem:[#allocation27_spill] sm:$0xff] }
 0x765   : > { %v8652_v23 = vpack.i.bf16 %v4297_v37, %v4185_v9  ;;  %v4072_v42 = vrot.slane %v12293_v14, 4  ;;  %v8657_v10 = vpack.i.bf16 %v11950_v63, %v11936_v59  ;;  %v8667_v48 = vpack.i.bf16 %v11993_v5, %v11972_v19  ;;  %v15830_v9 = vld [vmem:[#allocation72_spill] sm:$0xff]  ;;  %v15867_v13 = vld [vmem:[#allocation59_spill] sm:$0xff] }
 0x766   : > { %v4295_v24 = vsel %vm369_vm0, %v4294_v44, %v4257_v50  ;;  %v3961_v38 = vsel %vm369_vm0, %v12290_v56, %v3960_v47  ;;  %v8672_v14 = vpack.i.bf16 %v11974_v3, %v11952_v61  ;;  %v8682_v63 = vpack.i.bf16 %v12013_v1, %v12011_v62  ;;  %v15818_v1 = vld [vmem:[#allocation38_spill] sm:$0xff]  ;;  %v15819_v56 = vld [vmem:[#allocation36_spill] sm:$0xff] }
 0x767   : > { %v8642_v15 = vpack.i.bf16 %v4295_v24, %v4183_v8  ;;  %8618 = vrot.lane.b32.xlu2 %v8617_v30, %s9561_s30  ;;  %v4073_v12 = vsel %vm369_vm0, %v4057_v49, %v4072_v42  ;;  %v8662_v5 = vpack.i.bf16 %v11911_v28, %v11897_v34  ;;  %v8687_v59 = vpack.i.bf16 %v12052_v22, %v12050_v40  ;;  %v15816_v40 = vld [vmem:[#allocation25_spill] sm:$0xff]  ;;  %v15825_v50 = vld [vmem:[#allocation22_spill] sm:$0xff] }
 0x768   : > { %v8647_v17 = vpack.i.bf16 %v4073_v12, %v3961_v38  ;;  %v8697_v19 = vpack.i.bf16 %v11865_v16, %v11862_v4  ;;  %v8677_v62 = vpack.i.bf16 %v12041_v32, %v12039_v11  ;;  %v8702_v61 = vpack.i.bf16 %v11846_v27, %v11835_v33  ;;  %v15817_v4 = vld [vmem:[#allocation20_spill] sm:$0xff]  ;;  %v15820_v33 = vld [vmem:[#allocation26_spill] sm:$0xff]  ;;  %v15821_v11 = vld [vmem:[#allocation21_spill] sm:$0xff] }
 0x769   : > { %8643 = vrot.lane.b32.xlu1 %v8642_v15, %s9563_s20  ;;  %8653 = vrot.lane.b32.xlu0 %v8652_v23, %s9567_s6  ;;  %v8712_v34 = vpack.i.bf16 %v11876_v31, %v11848_v52  ;;  %v2037_v3 = vrot.slane %v15816_v40, 4  ;;  %v1925_v16 = vrot.slane %v15817_v4, 4  ;;  %v2261_v22 = vrot.slane %v15818_v1, 4  ;;  %v15822_v31 = vld [vmem:[#allocation19_spill] sm:$0xff]  ;;  %v15835_v12 = vld [vmem:[#allocation33_spill] sm:$0xff]  ;;  %v15839_v40 = vld [vmem:[#allocation68_spill] sm:$0xff] }
 0x76a   : > { %v2149_v49 = vrot.slane %v15819_v56, 4  ;;  %v8221_v27 = vunpack.i.h.bf16 %v15820_v33  ;;  %v8226_v32 = vunpack.i.h.bf16 %v15822_v31  ;;  %v8692_v39 = vpack.i.bf16 %v15815_v29, %v12028_v2  ;;  %v15829_v2 = vld [vmem:[#allocation71_spill] sm:$0xff]  ;;  %v15869_v38 = vld [vmem:[#allocation49_spill] sm:$0xff] }
 0x76b   : > { %v2038_v52 = vsel %vm369_vm0, %v2037_v3, %v15821_v11  ;;  %v8220_v26 = vunpack.i.l.bf16 %v15820_v33  ;;  %v1926_v41 = vsel %vm369_vm0, %v1925_v16, %v15823_v20  ;;  %v2262_v18 = vsel %vm369_vm0, %v2261_v22, %v15824_v46  ;;  %v15840_v33 = vld [vmem:[#allocation44_spill] sm:$0xff] }
 0x76c   : > { %v8225_v7 = vunpack.i.l.bf16 %v15822_v31  ;;  %v8231_v45 = vunpack.i.h.bf16 %v15825_v50  ;;  %v2150_v36 = vsel %vm369_vm0, %v2149_v49, %v15826_v43  ;;  %v8717_v29 = vpack.i.bf16 %v15828_v53, %v15827_v57  ;;  %v15842_v31 = vld [vmem:[#allocation67_spill] sm:$0xff]  ;;  %v15845_v43 = vld [vmem:[#allocation34_spill] sm:$0xff] }
 0x76d   : > { %v8727_v51 = vpack.i.bf16 %v15830_v9, %v15829_v2  ;;  %v2390_v8 = vsel %vm453_vm1, %v2038_v52, %v8221_v27  ;;  %v8236_v25 = vunpack.i.h.bf16 %v15831_v54  ;;  %v8235_v37 = vunpack.i.l.bf16 %v15831_v54  ;;  %v15841_v52 = vld [vmem:[#allocation66_spill] sm:$0xff]  ;;  %v15846_v2 = vld [vmem:[#allocation43_spill] sm:$0xff] }
 0x76e   : > { %v2392_v30 = vsel %vm453_vm1, %v2262_v18, %v8226_v32  ;;  %v8241_v23 = vunpack.i.h.bf16 %v15832_v55  ;;  %v8230_v24 = vunpack.i.l.bf16 %v15825_v50  ;;  %v2389_v15 = vsel %vm453_vm1, %v1926_v41, %v8220_v26  ;;  %v15843_v26 = vld [vmem:[#allocation47_spill] sm:$0xff]  ;;  %v15844_v50 = vld [vmem:[#allocation42_spill] sm:$0xff] }
 0x76f   : > { %8633 = vrot.lane.b32.xlu2 %v8632_v35, %s9566_s18  ;;  %v2391_v58 = vsel %vm453_vm1, %v2150_v36, %v8225_v7  ;;  %v15833_v35 = vld [vmem:[#allocation23_spill] sm:$0xff]  ;;  %v8406_v27 = vunpack.i.h.bf16 %v15840_v33  ;;  %v8405_v11 = vunpack.i.l.bf16 %v15840_v33  ;;  %v8732_v32 = vpack.i.bf16 %v15842_v31, %v15841_v52  ;;  %v15857_v33 = vld [vmem:[#allocation65_spill] sm:$0xff] }
 0x770   : > { %v8246_v47 = vunpack.i.h.bf16 %v15833_v35  ;;  %v8245_v42 = vunpack.i.l.bf16 %v15833_v35  ;;  %v2395_v16 = vsel %vm455_vm2, %v2391_v58, %v8235_v37  ;;  %v12448_v49 = vsel %vm455_vm2, %v2389_v15, %v8230_v24  ;;  %v15850_v15 = vld [vmem:[#allocation46_spill] sm:$0xff]  ;;  %v15858_v31 = vld [vmem:[#allocation51_spill] sm:$0xff]  ;;  %v15865_v36 = vld [vmem:[#allocation81_spill] sm:$0xff] }
 0x771   : > { %8658 = vrot.lane.b32.xlu1 %v8657_v10, %s9572_s15  ;;  %8668 = vrot.lane.b32.xlu0 %v8667_v48, %s9572_s15  ;;  %v12380_v28 = vpop.permute.xlu0 %8518  ;;  %v2394_v10 = vsel %vm455_vm2, %v2390_v8, %v8231_v45  ;;  %v15834_v48 = vld [vmem:[#allocation17_spill] sm:$0xff]  ;;  %v8411_v20 = vunpack.i.h.bf16 %v15843_v26  ;;  %v8410_v41 = vunpack.i.l.bf16 %v15843_v26  ;;  %v8416_v45 = vunpack.i.h.bf16 %v15844_v50 }
 0x772   : > { %v12445_v56 = vsel %vm457_vm3, %v2394_v10, %v8241_v23  ;;  %v2399_v7 = vsel %vm457_vm3, %v2395_v16, %v8245_v42  ;;  %v8431_v9 = vunpack.i.h.bf16 %v15846_v2  ;;  %v15847_v8 = vld [vmem:[#allocation45_spill] sm:$0xff]  ;;  %v8421_v58 = vunpack.i.h.bf16 %v15850_v15  ;;  %v15856_v16 = vld [vmem:[#allocation64_spill] sm:$0xff] }
 0x773   : > { %v8420_v35 = vunpack.i.l.bf16 %v15850_v15  ;;  %v15852_v10 = vld [vmem:[#allocation41_spill] sm:$0xff]  ;;  %v8531_v22 = vunpack.i.h.bf16 %v12393_v60  ;;  %v8530_v24 = vunpack.i.l.bf16 %v12393_v60  ;;  %v8520_v54 = vunpack.i.l.bf16 %v12380_v28 }
 0x777   : > { %8648 = vrot.lane.b32.xlu2 %v8647_v17, %s9567_s6  ;;  %v8256_v17 = vunpack.i.h.bf16 %v15835_v12 }
 0x779   : > { %8673 = vrot.lane.b32.xlu1 %v8672_v14, %s9572_s15  ;;  %8683 = vrot.lane.b32.xlu0 %v8682_v63, %s9572_s15  ;;  %v8255_v14 = vunpack.i.l.bf16 %v15835_v12  ;;  %v2396_v63 = vsel %vm455_vm2, %v2392_v30, %v8236_v25  ;;  %v15848_v25 = vld [vmem:[#allocation32_spill] sm:$0xff]  ;;  %v15849_v30 = vld [vmem:[#allocation39_spill] sm:$0xff]  ;;  %v3107_v12 = vsel %vm453_vm1, %v15852_v10, %v8410_v41 }
 0x77a   : > { %v12476_v37 = vsel %vm453_vm1, %v15848_v25, %v8406_v27  ;;  %v12480_v23 = vsel %vm453_vm1, %v15849_v30, %v8405_v11  ;;  %v8722_v27 = vpack.i.bf16 %v15857_v33, %v15856_v16  ;;  %v15861_v25 = vld [vmem:[#allocation61_spill] sm:$0xff]  ;;  %v15864_v33 = vld [vmem:[#allocation79_spill] sm:$0xff]  ;;  %v8521_v16 = vunpack.i.h.bf16 %v12380_v28 }
 0x77b   : > { %v12468_v53 = vsel %vm459_vm4, %v2399_v7, %v8255_v14  ;;  %v15860_v7 = vld [vmem:[#allocation58_spill] sm:$0xff]  ;;  %v3549_v30 = vrot.slane %v15861_v25, 4 }
 0x77f   : > { %8663 = vrot.lane.b32.xlu2 %v8662_v5, %s9572_s15  ;;  %v15836_v5 = vld [vmem:[#allocation24_spill] sm:$0xff] }
 0x781   : > { %8688 = vrot.lane.b32.xlu1 %v8687_v59, %s9572_s15  ;;  %8698 = vrot.lane.b32.xlu0 %v8697_v19, %s9572_s15  ;;  %v15837_v19 = vld [vmem:[#allocation29_spill] sm:$0xff]  ;;  %v15866_v59 = vld [vmem:[#allocation60_spill] sm:$0xff] }
 0x787   : > { %8678 = vrot.lane.b32.xlu2 %v8677_v62, %s9572_s15  ;;  %v8266_v62 = vunpack.i.h.bf16 %v15837_v19 }
 0x789   : > { %8703 = vrot.lane.b32.xlu1 %v8702_v61, %s9572_s15  ;;  %8713 = vrot.lane.b32.xlu0 %v8712_v34, %s9572_s15  ;;  %v12435_v61 = vpop.permute.xlu2 %8543  ;;  %v15838_v34 = vld [vmem:[#allocation63_spill] sm:$0xff] }
 0x78a   : > { %v12397_v0 = vpop.permute.xlu1 %8523  ;;  %v8707_v3 = vpack.i.bf16 %v15839_v40, %v15838_v34  ;;  %v15855_v40 = vld [vmem:[#allocation62_spill] sm:$0xff] }
 0x78b   : > { %v8526_v26 = vunpack.i.h.bf16 %v12397_v0 }
 0x78d   : > { %v12414_v44 = vpop.permute.xlu0 %8533 }
 0x78f   : > { %8693 = vrot.lane.b32.xlu2 %v8692_v39, %s9572_s15  ;;  %v2400_v39 = vsel %vm457_vm3, %v2396_v63, %v8246_v47  ;;  %v15851_v47 = vld [vmem:[#allocation40_spill] sm:$0xff]  ;;  %v8461_v63 = vunpack.i.h.bf16 %v15869_v38 }
 0x790   : > { %v2404_v18 = vsel %vm459_vm4, %v2400_v39, %v8256_v17  ;;  %v3108_v42 = vsel %vm453_vm1, %v15851_v47, %v8411_v20  ;;  %v15853_v17 = vld [vmem:[#allocation48_spill] sm:$0xff]  ;;  %v8450_v39 = vunpack.i.l.bf16 %v15858_v31  ;;  %v15862_v47 = vld [vmem:[#allocation74_spill] sm:$0xff] }
 0x791   : > { %8718 = vrot.lane.b32.xlu1 %v8717_v29, %s9572_s15  ;;  %8728 = vrot.lane.b32.xlu0 %v8727_v51, %s9572_s15  ;;  %v12465_v57 = vsel %vm461_vm5, %v2404_v18, %v8266_v62  ;;  %v8415_v29 = vunpack.i.l.bf16 %v15844_v50  ;;  %v8430_v51 = vunpack.i.l.bf16 %v15846_v2  ;;  %v8436_v14 = vunpack.i.h.bf16 %v15853_v17  ;;  %v15854_v62 = vld [vmem:[#allocation50_spill] sm:$0xff]  ;;  %v15859_v20 = vld [vmem:[#allocation52_spill] sm:$0xff]  ;;  %v12504_v15 = vpop.permute.xlu2 %8558 }
 0x792   : > { %v8426_v34 = vunpack.i.h.bf16 %v15854_v62  ;;  %v8425_v52 = vunpack.i.l.bf16 %v15854_v62  ;;  %v8441_v41 = vunpack.i.h.bf16 %v15859_v20  ;;  %v8440_v18 = vunpack.i.l.bf16 %v15859_v20 }
 0x793   : > { %v3437_v2 = vrot.slane %v15860_v7, 4  ;;  %v8536_v7 = vunpack.i.h.bf16 %v12414_v44  ;;  %v3112_v25 = vsel %vm455_vm2, %v3108_v42, %v8421_v58 }
 0x794   : > { %v12439_v4 = vpop.permute.xlu1 %8538 }
 0x795   : > { %v12457_v46 = vpop.permute.xlu0 %8548 }
 0x797   : > { %8708 = vrot.lane.b32.xlu2 %v8707_v3, %s9572_s15  ;;  %v3661_v3 = vrot.slane %v15855_v40, 4  ;;  %v15863_v40 = vld [vmem:[#allocation76_spill] sm:$0xff] }
 0x799   : > { %8733 = vrot.lane.b32.xlu1 %v8732_v32, %s9572_s15  ;;  %v8451_v32 = vunpack.i.h.bf16 %v15858_v31  ;;  %v8525_v31 = vunpack.i.l.bf16 %v12397_v0  ;;  %v3662_v20 = vsel %vm369_vm0, %v3661_v3, %v15866_v59  ;;  %v3111_v0 = vsel %vm455_vm2, %v3107_v12, %v8420_v35 }
 0x79a   : > { %v3792_v10 = vsel %vm453_vm1, %v3662_v20, %v8526_v26  ;;  %v3550_v59 = vsel %vm369_vm0, %v3549_v30, %v15867_v13  ;;  %v8535_v3 = vunpack.i.l.bf16 %v12414_v44  ;;  %v3116_v26 = vsel %vm457_vm3, %v3112_v25, %v8431_v9 }
 0x79b   : > { %v3791_v42 = vsel %vm453_vm1, %v3550_v59, %v8525_v31  ;;  %v3796_v60 = vsel %vm455_vm2, %v3792_v10, %v8536_v7  ;;  %v3120_v28 = vsel %vm459_vm4, %v3116_v26, %v8441_v41  ;;  %v3115_v13 = vsel %vm457_vm3, %v3111_v0, %v8430_v51  ;;  %v15870_v31 = vld [vmem:[#allocation54_spill] sm:$0xff] }
 0x79c   : > { %v8554_v11 = vpop.permute.xlu1 %8553  ;;  %v8546_v44 = vunpack.i.h.bf16 %v12435_v61  ;;  %v3119_v30 = vsel %vm459_vm4, %v3115_v13, %v8440_v18  ;;  %v3789_v9 = vsel %vm453_vm1, %v15870_v31, %v8520_v54  ;;  %v8540_v25 = vunpack.i.l.bf16 %v12439_v4 }
 0x79d   : > { %v8556_v20 = vunpack.i.h.bf16 %v8554_v11  ;;  %v8555_v59 = vunpack.i.l.bf16 %v8554_v11  ;;  %v3795_v10 = vsel %vm455_vm2, %v3791_v42, %v8535_v3  ;;  %v8545_v41 = vunpack.i.l.bf16 %v12435_v61 }
 0x79e   : > { %v3800_v0 = vsel %vm457_vm3, %v3796_v60, %v8546_v44  ;;  %v3110_v18 = vsel %vm455_vm2, %v12476_v37, %v8416_v45  ;;  %v8551_v54 = vunpack.i.h.bf16 %v12457_v46  ;;  %v3793_v42 = vsel %vm455_vm2, %v3789_v9, %v8530_v24 }
 0x79f   : > { %v8564_v1 = vpop.permute.xlu0 %8563  ;;  %8723 = vrot.lane.b32.xlu2 %v8722_v27, %s9572_s15  ;;  %v15868_v27 = vld [vmem:[#allocation57_spill] sm:$0xff]  ;;  %v3804_v11 = vsel %vm459_vm4, %v3800_v0, %v8556_v20  ;;  %v3797_v45 = vsel %vm457_vm3, %v3793_v42, %v8540_v25  ;;  %v3124_v37 = vsel %vm461_vm5, %v3120_v28, %v8451_v32  ;;  %v3114_v20 = vsel %vm457_vm3, %v3110_v18, %v8426_v34 }
 0x7a0   : > { %v3438_v58 = vsel %vm369_vm0, %v3437_v2, %v15868_v27  ;;  %v8541_v2 = vunpack.i.h.bf16 %v12439_v4  ;;  %v8566_v7 = vunpack.i.h.bf16 %v8564_v1  ;;  %v8550_v4 = vunpack.i.l.bf16 %v12457_v46 }
 0x7a1   : > { %v3790_v12 = vsel %vm453_vm1, %v3438_v58, %v8521_v16  ;;  %v8574_v16 = vpop.permute.xlu2 %8573  ;;  %v8565_v61 = vunpack.i.l.bf16 %v8564_v1  ;;  %v3799_v27 = vsel %vm457_vm3, %v3795_v10, %v8545_v41  ;;  %v3109_v46 = vsel %vm455_vm2, %v12480_v23, %v8415_v29 }
 0x7a2   : > { %v3794_v3 = vsel %vm455_vm2, %v3790_v12, %v8531_v22  ;;  %v3803_v26 = vsel %vm459_vm4, %v3799_v27, %v8555_v59  ;;  %v3808_v22 = vsel %vm461_vm5, %v3804_v11, %v8566_v7  ;;  %v3123_v1 = vsel %vm461_vm5, %v3119_v30, %v8450_v39 }
 0x7a3   : > { %v3798_v58 = vsel %vm457_vm3, %v3794_v3, %v8541_v2  ;;  %v3113_v24 = vsel %vm457_vm3, %v3109_v46, %v8425_v52  ;;  %v8561_v60 = vunpack.i.h.bf16 %v12504_v15  ;;  %v8576_v28 = vunpack.i.h.bf16 %v8574_v16  ;;  %v15874_v3 = vld [vmem:[#allocation80_spill] sm:$0xff] }
 0x7a4   : > { %v12530_v35 = vpop.permute.xlu1 %8568  ;;  %v3802_v29 = vsel %vm459_vm4, %v3798_v58, %v8551_v54  ;;  %v3807_v39 = vsel %vm461_vm5, %v3803_v26, %v8565_v61  ;;  %v3801_v44 = vsel %vm459_vm4, %v3797_v45, %v8550_v4  ;;  %v8560_v34 = vunpack.i.l.bf16 %v12504_v15  ;;  %v15876_v26 = vld [vmem:[#allocation56_spill] sm:$0xff] }
 0x7a5   : > { %v8571_v50 = vunpack.i.h.bf16 %v12530_v35  ;;  %v3812_v62 = vsel %vm463_vm6, %v3808_v22, %v8576_v28  ;;  %v8575_v12 = vunpack.i.l.bf16 %v8574_v16  ;;  %v8570_v52 = vunpack.i.l.bf16 %v12530_v35 }
 0x7a6   : > { %v3806_v9 = vsel %vm461_vm5, %v3802_v29, %v8561_v60  ;;  %v3118_v25 = vsel %vm459_vm4, %v3114_v20, %v8436_v14  ;;  %v3805_v41 = vsel %vm461_vm5, %v3801_v44, %v8560_v34  ;;  %v15871_v35 = vunpack.i.l.bf16 %v15853_v17  ;;  %v15872_v14 = vld [vmem:[#allocation78_spill] sm:$0xff]  ;;  %v15882_v34 = vld [vmem:[#allocation75_spill] sm:$0xff] }
 0x7a7   : > { %v12544_v51 = vpop.permute.xlu0 %8578  ;;  %v3811_v15 = vsel %vm463_vm6, %v3807_v39, %v8575_v12  ;;  %v3810_v10 = vsel %vm463_vm6, %v3806_v9, %v8571_v50  ;;  %v15873_v4 = vrot.slane %v15864_v33, 4  ;;  %v15875_v61 = vrot.slane %v15865_v36, 4  ;;  %v15877_v33 = vld [vmem:[#allocation55_spill] sm:$0xff]  ;;  %v15880_v39 = vld [vmem:[#allocation73_spill] sm:$0xff] }
 0x7a8   : > { %v8581_v31 = vunpack.i.h.bf16 %v12544_v51  ;;  %v3117_v7 = vsel %vm459_vm4, %v3113_v24, %v15871_v35  ;;  %v8580_v54 = vunpack.i.l.bf16 %v12544_v51  ;;  %v3809_v17 = vsel %vm463_vm6, %v3805_v41, %v8570_v52  ;;  %v15885_v41 = vld [vmem:[#allocation30_spill] sm:$0xff] }
 0x7a9   : > { %v3947_v11 = vsel %vm369_vm0, %v15873_v4, %v15872_v14  ;;  %v4059_v27 = vsel %vm369_vm0, %v15875_v61, %v15874_v3  ;;  %v8460_v58 = vunpack.i.l.bf16 %v15869_v38  ;;  %v8476_v45 = vunpack.i.h.bf16 %v15876_v26 }
 0x7aa   : > { %v3814_v42 = vsel %vm465_vm7, %v3810_v10, %v8581_v31  ;;  %v3128_v51 = vsel %vm463_vm6, %v3124_v37, %v8461_v63  ;;  %v8456_v46 = vunpack.i.h.bf16 %v15877_v33  ;;  %v8475_v22 = vunpack.i.l.bf16 %v15876_v26 }
 0x7ab   : > { %v8589_v59 = vpop.permute.xlu2 %8588  ;;  %v3127_v36 = vsel %vm463_vm6, %v3123_v1, %v8460_v58  ;;  %v15878_v20 = vunpack.i.h.bf16 %v15847_v8  ;;  %v15879_v60 = vunpack.i.l.bf16 %v15847_v8  ;;  %v3813_v37 = vsel %vm465_vm7, %v3809_v17, %v8580_v54 }
 0x7ac   : > { %v8584_v32 = vpop.permute.xlu1 %8583  ;;  %v8591_v0 = vunpack.i.h.bf16 %v8589_v59  ;;  %v8590_v18 = vunpack.i.l.bf16 %v8589_v59  ;;  %v8455_v50 = vunpack.i.l.bf16 %v15877_v33  ;;  %v15881_v44 = vrot.slane %v15862_v47, 4 }
 0x7ad   : > { %v8586_v23 = vunpack.i.h.bf16 %v8584_v32  ;;  %v8585_v13 = vunpack.i.l.bf16 %v8584_v32  ;;  %v3122_v24 = vsel %vm461_vm5, %v3118_v25, %v15878_v20  ;;  %v3121_v32 = vsel %vm461_vm5, %v3117_v7, %v15879_v60 }
 0x7ae   : > { %v4410_v38 = vsel %vm453_vm1, %v3947_v11, %v8590_v18  ;;  %v4411_v63 = vsel %vm453_vm1, %v4059_v27, %v8591_v0  ;;  %v4171_v8 = vsel %vm369_vm0, %v15881_v44, %v15880_v39  ;;  %v3126_v31 = vsel %vm463_vm6, %v3122_v24, %v8456_v46 }
 0x7af   : > { %v8594_v2 = vpop.permute.xlu0 %8593  ;;  %v3816_v30 = vsel %vm465_vm7, %v3812_v62, %v8586_v23  ;;  %v3815_v16 = vsel %vm465_vm7, %v3811_v15, %v8585_v13  ;;  %v15883_v62 = vrot.slane %v15863_v40, 4  ;;  %v3131_v47 = vsel %vm465_vm7, %v3127_v36, %v8475_v22  ;;  %v15884_v15 = vld [vmem:[#allocation53_spill] sm:$0xff] }
 0x7b0   : > { %5870 = vmatpush.msra.mxu1 %v3816_v30  ;;  %v8596_v29 = vunpack.i.h.bf16 %v8594_v2  ;;  %v8595_v23 = vunpack.i.l.bf16 %v8594_v2  ;;  %v3132_v30 = vsel %vm465_vm7, %v3128_v51, %v8476_v45  ;;  %v8466_v10 = vunpack.i.h.bf16 %v15884_v15 }
 0x7b1   : > { %v4283_v12 = vsel %vm369_vm0, %v15883_v62, %v15882_v34  ;;  %v3125_v40 = vsel %vm463_vm6, %v3121_v32, %v8455_v50  ;;  %v8286_v35 = vunpack.i.h.bf16 %v15885_v41  ;;  %v8465_v3 = vunpack.i.l.bf16 %v15884_v15  ;;  %v15891_v32 = vld [vmem:[#allocation31_spill] sm:$0xff] }
 0x7b2   : > { %5871 = vmatpush.msra.mxu1 %v3815_v16  ;;  %v4412_v0 = vsel %vm453_vm1, %v4171_v8, %v8595_v23  ;;  %v4413_v18 = vsel %vm453_vm1, %v4283_v12, %v8596_v29  ;;  %v3130_v11 = vsel %vm465_vm7, %v3126_v31, %v8466_v10  ;;  %v8275_v61 = vunpack.i.l.bf16 %v15845_v43 }
 0x7b3   : > { %v15886_v27 = vunpack.i.l.bf16 %v15837_v19  ;;  %v15887_v58 = vunpack.i.h.bf16 %v15836_v5  ;;  %v15888_v26 = vunpack.i.l.bf16 %v15832_v55  ;;  %v3129_v19 = vsel %vm465_vm7, %v3125_v40, %v8465_v3 }
 0x7b4   : > { %5872 = vmatpush.msra.mxu1 %v3814_v42  ;;  %v8599_v28 = vpop.permute.xlu1 %8598  ;;  %v8285_v22 = vunpack.i.l.bf16 %v15885_v41  ;;  %v15889_v20 = vunpack.i.h.bf16 %v15845_v43  ;;  %v15893_v23 = vunpack.i.h.bf16 %v15834_v48 }
 0x7b5   : > { %v8601_v1 = vunpack.i.h.bf16 %v8599_v28  ;;  %v8600_v13 = vunpack.i.l.bf16 %v8599_v28  ;;  %v2407_v17 = vsel %vm461_vm5, %v12468_v53, %v15886_v27  ;;  %v2402_v42 = vsel %vm459_vm4, %v12445_v56, %v15887_v58  ;;  %v15890_v56 = vld [vmem:[#allocation28_spill] sm:$0xff] }
 0x7b6   : > { %5873 = vmatpush.msra.mxu1 %v3813_v37  ;;  %v2397_v45 = vsel %vm457_vm3, %v12448_v49, %v15888_v26  ;;  %v2412_v55 = vsel %vm463_vm6, %v12465_v57, %v15889_v20  ;;  %v8271_v24 = vunpack.i.h.bf16 %v15890_v56  ;;  %v8260_v49 = vunpack.i.l.bf16 %v15834_v48 }
 0x7b7   : > { %v8609_v52 = vpop.permute.xlu0 %8608  ;;  %v4414_v2 = vsel %vm455_vm2, %v4410_v38, %v8600_v13  ;;  %v4415_v9 = vsel %vm455_vm2, %v4411_v63, %v8601_v1  ;;  %v2416_v60 = vsel %vm465_vm7, %v2412_v55, %v8286_v35  ;;  %v8281_v28 = vunpack.i.h.bf16 %v15891_v32 }
 0x7b8   : > { %v8611_v25 = vunpack.i.h.bf16 %v8609_v52  ;;  %v8610_v59 = vunpack.i.l.bf16 %v8609_v52  ;;  %5874 = vmatpush.msra.mxu1 %v3132_v30  ;;  %v15892_v38 = vunpack.i.l.bf16 %v15836_v5  ;;  %v2411_v57 = vsel %vm463_vm6, %v2407_v17, %v8275_v61 }
 0x7b9   : > { %v8604_v7 = vpop.permute.xlu2 %8603  ;;  %v8270_v50 = vunpack.i.l.bf16 %v15890_v56  ;;  %v2415_v29 = vsel %vm465_vm7, %v2411_v57, %v8285_v22  ;;  %v2406_v1 = vsel %vm461_vm5, %v2402_v42, %v15893_v23  ;;  %v8280_v5 = vunpack.i.l.bf16 %v15891_v32 }
 0x7ba   : > { %v12642_v16 = vsel %vm457_vm3, %v4415_v9, %v8611_v25  ;;  %v12645_v54 = vsel %vm457_vm3, %v4414_v2, %v8610_v59  ;;  %5875 = vmatpush.msra.mxu1 %v3131_v47  ;;  %v8606_v14 = vunpack.i.h.bf16 %v8604_v7  ;;  %v8605_v4 = vunpack.i.l.bf16 %v8604_v7 }
 0x7bb   : > { %v2401_v63 = vsel %vm459_vm4, %v2397_v45, %v15892_v38  ;;  %v2410_v39 = vsel %vm463_vm6, %v2406_v1, %v8271_v24 }
 0x7bc   : > { %5876 = vmatpush.msra.mxu1 %v3130_v11  ;;  %v4416_v51 = vsel %vm455_vm2, %v4412_v0, %v8605_v4  ;;  %v4417_v33 = vsel %vm455_vm2, %v4413_v18, %v8606_v14  ;;  %v8614_v46 = vpop.permute.xlu1 %8613  ;;  %v2414_v44 = vsel %vm465_vm7, %v2410_v39, %v8281_v28  ;;  %v2405_v8 = vsel %vm461_vm5, %v2401_v63, %v8260_v49 }
 0x7bd   : > { %v8616_v53 = vunpack.i.h.bf16 %v8614_v46  ;;  %v8615_v36 = vunpack.i.l.bf16 %v8614_v46  ;;  %v2409_v34 = vsel %vm463_vm6, %v2405_v8, %v8270_v50 }
 0x7be   : > { %5877 = vmatpush.msra.mxu1 %v3129_v19  ;;  %v2413_v62 = vsel %vm465_vm7, %v2409_v34, %v8280_v5 }
 0x7bf   : > { %v12678_v37 = vsel %vm457_vm3, %v4416_v51, %v8615_v36  ;;  %v12681_v43 = vsel %vm457_vm3, %v4417_v33, %v8616_v53 }
 0x7c0   : > { %5878 = vmatpush.msra.mxu1 %v2416_v60 }
 0x7c1   : > { %v12690_v13 = vpop.permute.xlu2 %8618 }
 0x7c2   : > { %5879 = vmatpush.msra.mxu1 %v2415_v29 }
 0x7c4   : > { %5880 = vmatpush.msra.mxu1 %v2414_v44  ;;  %v12697_v48 = vpop.permute.xlu0 %8623 }
 0x7c6   : > { %5881 = vmatpush.msra.mxu1 %v2413_v62 }
 0x7c9   : > { %v12699_v12 = vpop.permute.xlu2 %8633 }
 0x7d1   : > { %v12701_v52 = vpop.permute.xlu2 %8648 }
 0x7d2   : > { %v12703_v30 = vpop.permute.xlu1 %8628 }
 0x7d3   : > { %v12705_v31 = vpop.permute.xlu0 %8638 }
 0x7d9   : > { %v8664_v2 = vpop.permute.xlu2 %8663 }
 0x7da   : > { %v8666_v59 = vunpack.i.h.bf16 %v8664_v2  ;;  %v8665_v15 = vunpack.i.l.bf16 %v8664_v2 }
 0x7db   : > { %v12707_v9 = vpop.permute.xlu1 %8643  ;;  %v12709_v25 = vpop.permute.xlu0 %8653 }
 0x7dc   : > { %15894 = vst [vmem:[#allocation77_spill] sm:$0xff] %v12709_v25  ;;  %v4578_v10 = vrot.slane %v8666_v59, 4  ;;  %v4566_v7 = vrot.slane %v8665_v15, 4 }
 0x7e1   : > { %v12711_v47 = vpop.permute.xlu2 %8678 }
 0x7e2   : > { %v8681_v14 = vunpack.i.h.bf16 %v12711_v47  ;;  %v8680_v51 = vunpack.i.l.bf16 %v12711_v47 }
 0x7e3   : > { %v8659_v40 = vpop.permute.xlu1 %8658  ;;  %v8669_v41 = vpop.permute.xlu0 %8668 }
 0x7e4   : > { %v8661_v35 = vunpack.i.h.bf16 %v8659_v40  ;;  %v8660_v0 = vunpack.i.l.bf16 %v8659_v40  ;;  %v8671_v11 = vunpack.i.h.bf16 %v8669_v41  ;;  %v8670_v58 = vunpack.i.l.bf16 %v8669_v41 }
 0x7e5   : > { %v4692_v45 = vrot.slane %v8681_v14, 4  ;;  %v4680_v29 = vrot.slane %v8680_v51, 4 }
 0x7e6   : > { %v4579_v18 = vsel %vm369_vm0, %v4578_v10, %v8661_v35  ;;  %v4580_v4 = vrot.slane %v8661_v35, 4  ;;  %v4567_v61 = vsel %vm369_vm0, %v4566_v7, %v8660_v0  ;;  %v4568_v27 = vrot.slane %v8660_v0, 4 }
 0x7e7   : > { %v12719_v17 = vperm.slane %v4579_v18, %v9735_v6  ;;  %v12723_v19 = vperm.slane %v4567_v61, %v9735_v6  ;;  %v4604_v53 = vrot.slane %v8671_v11, 4  ;;  %v4592_v56 = vrot.slane %v8670_v58, 4 }
 0x7e8   : > { %v4581_v22 = vsel %vm369_vm0, %v8666_v59, %v4580_v4  ;;  %v4569_v20 = vsel %vm369_vm0, %v8665_v15, %v4568_v27 }
 0x7e9   : > { %v12715_v3 = vpop.permute.xlu2 %8693  ;;  %v4614_v55 = vrot.slane %v12719_v17, 4  ;;  %v12730_v28 = vperm.slane %v4581_v22, %v9735_v6  ;;  %v12735_v57 = vperm.slane %v4569_v20, %v9735_v6  ;;  %v4616_v50 = vrot.slane %v12723_v19, 4 }
 0x7ea   : > { %v8695_v24 = vunpack.i.l.bf16 %v12715_v3  ;;  %v8696_v63 = vunpack.i.h.bf16 %v12715_v3 }
 0x7eb   : > { %v8674_v42 = vpop.permute.xlu1 %8673  ;;  %v8684_v26 = vpop.permute.xlu0 %8683  ;;  %v4615_v1 = vsel %vm369_vm0, %v4614_v55, %v12723_v19 }
 0x7ec   : > { %v8675_v33 = vunpack.i.l.bf16 %v8674_v42  ;;  %v8686_v46 = vunpack.i.h.bf16 %v8684_v26  ;;  %v8676_v36 = vunpack.i.h.bf16 %v8674_v42  ;;  %v8685_v32 = vunpack.i.l.bf16 %v8684_v26 }
 0x7ed   : > { %v4702_v44 = vrot.slane %v8695_v24, 4  ;;  %v4714_v40 = vrot.slane %v8696_v63, 4  ;;  %v12753_v7 = vperm.slane %v4615_v1, %v9745_v21 }
 0x7ee   : > { %v4590_v49 = vrot.slane %v8675_v33, 4  ;;  %v4690_v60 = vrot.slane %v8686_v46, 4  ;;  %v4693_v38 = vsel %vm369_vm0, %v8686_v46, %v4692_v45  ;;  %v4602_v23 = vrot.slane %v8676_v36, 4 }
 0x7ef   : > { %v4593_v5 = vsel %vm369_vm0, %v8675_v33, %v4592_v56  ;;  %v4605_v39 = vsel %vm369_vm0, %v8676_v36, %v4604_v53  ;;  %v12747_v2 = vperm.slane %v4693_v38, %v9735_v6  ;;  %v4678_v59 = vrot.slane %v8685_v32, 4  ;;  %15895 = vst [vmem:[#allocation25_spill] sm:$0xff] %v12753_v7 }
 0x7f0   : > { %v4591_v34 = vsel %vm369_vm0, %v4590_v49, %v8670_v58  ;;  %v4691_v62 = vsel %vm369_vm0, %v4690_v60, %v8681_v14  ;;  %v12756_v0 = vperm.slane %v4593_v5, %v9735_v6  ;;  %v4603_v18 = vsel %vm369_vm0, %v4602_v23, %v8671_v11 }
 0x7f1   : > { %v12742_v8 = vpop.permute.xlu2 %8708  ;;  %v12760_v14 = vperm.slane %v4605_v39, %v9735_v6  ;;  %v12763_v4 = vperm.slane %v4591_v34, %v9735_v6  ;;  %v12766_v3 = vperm.slane %v4691_v62, %v9735_v6  ;;  %v4681_v61 = vsel %vm369_vm0, %v8685_v32, %v4680_v29 }
 0x7f2   : > { %v4738_v58 = vrot.slane %v12747_v2, 4  ;;  %v4679_v42 = vsel %vm369_vm0, %v4678_v59, %v8680_v51  ;;  %v8711_v22 = vunpack.i.h.bf16 %v12742_v8  ;;  %v12777_v53 = vperm.slane %v4603_v18, %v9735_v6 }
 0x7f3   : > { %v8689_v47 = vpop.permute.xlu1 %8688  ;;  %v12749_v15 = vpop.permute.xlu0 %8698  ;;  %v12781_v20 = vperm.slane %v4681_v61, %v9735_v6  ;;  %v4640_v55 = vrot.slane %v12763_v4, 4  ;;  %v4726_v49 = vrot.slane %v12766_v3, 4  ;;  %v12788_v60 = vperm.slane %v4679_v42, %v9735_v6 }
 0x7f4   : > { %v8691_v41 = vunpack.i.h.bf16 %v8689_v47  ;;  %v8690_v35 = vunpack.i.l.bf16 %v8689_v47  ;;  %v8701_v46 = vunpack.i.h.bf16 %v12749_v15  ;;  %v8700_v51 = vunpack.i.l.bf16 %v12749_v15 }
 0x7f5   : > { %v4739_v32 = vsel %vm369_vm0, %v4738_v58, %v12781_v20  ;;  %v4828_v34 = vrot.slane %v8711_v22, 4  ;;  %v8710_v15 = vunpack.i.l.bf16 %v12742_v8  ;;  %v4638_v61 = vrot.slane %v12777_v53, 4 }
 0x7f6   : > { %v4703_v27 = vsel %vm369_vm0, %v4702_v44, %v8690_v35  ;;  %v4716_v26 = vrot.slane %v8691_v41, 4  ;;  %v4704_v45 = vrot.slane %v8690_v35, 4  ;;  %v4715_v33 = vsel %vm369_vm0, %v4714_v40, %v8691_v41 }
 0x7f7   : > { %v4709_v11 = vperm.slane %v4703_v27, %v9735_v6  ;;  %v4721_v29 = vperm.slane %v4715_v33, %v9735_v6  ;;  %v4804_v44 = vrot.slane %v8701_v46, 4  ;;  %v4792_v47 = vrot.slane %v8700_v51, 4 }
 0x7f8   : > { %v4717_v38 = vsel %vm369_vm0, %v8696_v63, %v4716_v26  ;;  %v4705_v39 = vsel %vm369_vm0, %v8695_v24, %v4704_v45  ;;  %v12799_v35 = vperm.slane %v4739_v32, %v9745_v21  ;;  %v4664_v10 = vrot.slane %v12753_v7, 4 }
 0x7f9   : > { %v4752_v23 = vrot.slane %v4709_v11, 4  ;;  %v12795_v59 = vpop.permute.xlu2 %8723  ;;  %v12802_v63 = vperm.slane %v4717_v38, %v9735_v6  ;;  %v12806_v24 = vperm.slane %v4705_v39, %v9735_v6  ;;  %v4750_v32 = vrot.slane %v4721_v29, 4 }
 0x7fa   : > { %v15579_v58 = vunpack.i.h.bf16 %v12795_v59  ;;  %v15578_v8 = vunpack.i.l.bf16 %v12795_v59  ;;  %v4816_v38 = vrot.slane %v8710_v15, 4 }
 0x7fb   : > { %v8704_v1 = vpop.permute.xlu1 %8703  ;;  %v8714_v5 = vpop.permute.xlu0 %8713  ;;  %v4753_v27 = vsel %vm369_vm0, %v4721_v29, %v4752_v23  ;;  %v4639_v23 = vsel %vm369_vm0, %v4638_v61, %v12763_v4  ;;  %v4617_v4 = vsel %vm369_vm0, %v12719_v17, %v4616_v50 }
 0x7fc   : > { %v8706_v62 = vunpack.i.h.bf16 %v8704_v1  ;;  %v8705_v40 = vunpack.i.l.bf16 %v8704_v1  ;;  %v8716_v41 = vunpack.i.h.bf16 %v8714_v5  ;;  %v8715_v33 = vunpack.i.l.bf16 %v8714_v5 }
 0x7fd   : > { %v4914_v29 = vrot.slane %v15579_v58, 4  ;;  %v12842_v61 = vperm.slane %v4639_v23, %v9745_v21  ;;  %v12901_v17 = vperm.slane %v4617_v4, %v9745_v21 }
 0x7fe   : > { %v4802_v18 = vrot.slane %v8706_v62, 4  ;;  %v4790_v42 = vrot.slane %v8705_v40, 4  ;;  %v4805_v26 = vsel %vm369_vm0, %v8706_v62, %v4804_v44  ;;  %v4829_v45 = vsel %vm369_vm0, %v8716_v41, %v4828_v34 }
 0x7ff   : > { %v4793_v1 = vsel %vm369_vm0, %v8705_v40, %v4792_v47  ;;  %v4826_v39 = vrot.slane %v8716_v41, 4  ;;  %v12816_v36 = vperm.slane %v4829_v45, %v9735_v6  ;;  %v12822_v44 = vperm.slane %v4753_v27, %v9745_v21 }
 0x800   : > { %v4803_v56 = vsel %vm369_vm0, %v4802_v18, %v8701_v46  ;;  %v12825_v5 = vperm.slane %v4805_v26, %v9735_v6  ;;  %v4902_v46 = vrot.slane %v15578_v8, 4  ;;  %v4791_v62 = vsel %vm369_vm0, %v4790_v42, %v8700_v51 }
 0x801   : > { %v12835_v47 = vperm.slane %v4793_v1, %v9735_v6  ;;  %v12838_v40 = vperm.slane %v4803_v56, %v9735_v6  ;;  %v4814_v41 = vrot.slane %v8715_v33, 4  ;;  %v4817_v18 = vsel %vm369_vm0, %v8715_v33, %v4816_v38 }
 0x802   : > { %v4727_v27 = vsel %vm369_vm0, %v4726_v49, %v12788_v60  ;;  %v4751_v26 = vsel %vm369_vm0, %v4750_v32, %v4709_v11  ;;  %v4827_v45 = vsel %vm369_vm0, %v4826_v39, %v8711_v22  ;;  %v4874_v51 = vrot.slane %v12816_v36, 4 }
 0x803   : > { %v12831_v34 = vpop.permute.xlu1 %8718  ;;  %v12850_v42 = vperm.slane %v4727_v27, %v9745_v21  ;;  %v12853_v56 = vperm.slane %v4751_v26, %v9745_v21  ;;  %v12856_v33 = vperm.slane %v4791_v62, %v9735_v6  ;;  %v4815_v22 = vsel %vm369_vm0, %v4814_v41, %v8710_v15 }
 0x804   : > { %v8721_v1 = vunpack.i.h.bf16 %v12831_v34  ;;  %v8720_v49 = vunpack.i.l.bf16 %v12831_v34  ;;  %v4825_v32 = vperm.slane %v4817_v18, %v9735_v6  ;;  %v4838_v23 = vrot.slane %v12838_v40, 4  ;;  %v8729_v18 = vpop.permute.xlu0 %8728 }
 0x805   : > { %v4776_v39 = vrot.slane %v12850_v42, 4  ;;  %v12867_v27 = vperm.slane %v4827_v45, %v9735_v6  ;;  %v4665_v62 = vsel %vm369_vm0, %v12842_v61, %v4664_v10  ;;  %v4641_v41 = vsel %vm369_vm0, %v12777_v53, %v4640_v55 }
 0x806   : > { %v4903_v26 = vsel %vm369_vm0, %v4902_v46, %v8720_v49  ;;  %v4875_v34 = vsel %vm369_vm0, %v4874_v51, %v4825_v32  ;;  %v4915_v15 = vsel %vm369_vm0, %v4914_v29, %v8721_v1  ;;  %v4840_v45 = vrot.slane %v12856_v33, 4 }
 0x807   : > { %v4777_v11 = vsel %vm369_vm0, %v12853_v56, %v4776_v39  ;;  %v12882_v38 = vperm.slane %v4815_v22, %v9735_v6  ;;  %v4921_v46 = vperm.slane %v4915_v15, %v9735_v6  ;;  %v4876_v8 = vrot.slane %v4825_v32, 4 }
 0x808   : > { %v8737_v10 = vpack.i.bf16 %v4777_v11, %v4665_v62  ;;  %v4909_v39 = vperm.slane %v4903_v26, %v9735_v6  ;;  %v12891_v53 = vperm.slane %v4641_v41, %v9745_v21  ;;  %v12894_v55 = vperm.slane %v4875_v34, %v9745_v21 }
 0x809   : > { %v4950_v29 = vrot.slane %v4921_v46, 4  ;;  %v4728_v11 = vrot.slane %v12788_v60, 4  ;;  %v8731_v22 = vunpack.i.h.bf16 %v8729_v18  ;;  %v4778_v62 = vrot.slane %v12822_v44, 4 }
 0x80a   : > { %8738 = vrot.lane.b32.xlu2 %v8737_v10, %s15710_s8  ;;  %v4666_v32 = vrot.slane %v12891_v53, 4  ;;  %v8730_v19 = vunpack.i.l.bf16 %v8729_v18  ;;  %v4916_v15 = vrot.slane %v8721_v1, 4  ;;  %v4952_v10 = vrot.slane %v4909_v39, 4 }
 0x80b   : > { %v8734_v51 = vpop.permute.xlu1 %8733  ;;  %v4729_v50 = vsel %vm369_vm0, %v12766_v3, %v4728_v11  ;;  %v4940_v34 = vrot.slane %v8731_v22, 4  ;;  %v4951_v41 = vsel %vm369_vm0, %v4950_v29, %v4909_v39  ;;  %v4839_v1 = vsel %vm369_vm0, %v4838_v23, %v12856_v33 }
 0x80c   : > { %v8736_v26 = vunpack.i.h.bf16 %v8734_v51  ;;  %v12907_v60 = vperm.slane %v4729_v50, %v9745_v21  ;;  %v4928_v58 = vrot.slane %v8730_v19, 4  ;;  %v8735_v25 = vunpack.i.l.bf16 %v8734_v51 }
 0x80d   : > { %v4667_v4 = vsel %vm369_vm0, %v4666_v32, %v12901_v17  ;;  %v12917_v29 = vperm.slane %v4839_v1, %v9745_v21  ;;  %v4862_v39 = vrot.slane %v12867_v27, 4  ;;  %v12932_v1 = vperm.slane %v4951_v41, %v9745_v21 }
 0x80e   : > { %v4938_v7 = vrot.slane %v8736_v26, 4  ;;  %v4941_v18 = vsel %vm369_vm0, %v8736_v26, %v4940_v34  ;;  %v4779_v3 = vsel %vm369_vm0, %v4778_v62, %v12907_v60  ;;  %v4926_v50 = vrot.slane %v8735_v25, 4 }
 0x80f   : > { %v8747_v11 = vpack.i.bf16 %v4779_v3, %v4667_v4  ;;  %v4929_v51 = vsel %vm369_vm0, %v8735_v25, %v4928_v58  ;;  %v4953_v34 = vsel %vm369_vm0, %v4921_v46, %v4952_v10  ;;  %v4949_v23 = vperm.slane %v4941_v18, %v9735_v6 }
 0x810   : > { %v4939_v26 = vsel %vm369_vm0, %v4938_v7, %v8731_v22  ;;  %v4863_v32 = vsel %vm369_vm0, %v4862_v39, %v12882_v38  ;;  %v12929_v62 = vsel %vm369_vm0, %v12816_v36, %v4876_v8  ;;  %v4927_v25 = vsel %vm369_vm0, %v4926_v50, %v8730_v19 }
 0x811   : > { %v4945_v33 = vperm.slane %v4939_v26, %v9735_v6  ;;  %8748 = vrot.lane.b32.xlu1 %v8747_v11, %s15707_s24  ;;  %v4937_v7 = vperm.slane %v4929_v51, %v9735_v6  ;;  %v4904_v58 = vrot.slane %v8720_v49, 4  ;;  %v15896_v46 = vunpack.i.h.bf16 %v12795_v59 }
 0x812   : > { %v4933_v10 = vperm.slane %v4927_v25, %v9735_v6  ;;  %v4961_v36 = vperm.slane %v4953_v34, %v9745_v21  ;;  %v12943_v8 = vperm.slane %v4863_v32, %v9745_v21  ;;  %v4888_v41 = vrot.slane %v12917_v29, 4 }
 0x813   : > { %v4917_v22 = vsel %vm369_vm0, %v15896_v46, %v4916_v15  ;;  %v4974_v18 = vrot.slane %v4945_v33, 4  ;;  %v4841_v19 = vsel %vm369_vm0, %v12838_v40, %v4840_v45  ;;  %v4986_v4 = vrot.slane %v4949_v23, 4 }
 0x814   : > { %v4849_v3 = vperm.slane %v4841_v19, %v9745_v21  ;;  %v4864_v15 = vrot.slane %v12882_v38, 4  ;;  %v4988_v39 = vrot.slane %v4937_v7, 4  ;;  %v5000_v50 = vrot.slane %v12932_v1, 4 }
 0x815   : > { %v4975_v49 = vsel %vm369_vm0, %v4974_v18, %v4933_v10  ;;  %v4976_v51 = vrot.slane %v4933_v10, 4  ;;  %v15897_v26 = vunpack.i.l.bf16 %v12795_v59  ;;  %v4925_v40 = vperm.slane %v4917_v22, %v9735_v6 }
 0x816   : > { %v12952_v11 = vperm.slane %v4975_v49, %v9745_v21  ;;  %v4865_v45 = vsel %vm369_vm0, %v12867_v27, %v4864_v15  ;;  %v4892_v32 = vrot.slane %v4849_v3, 4  ;;  %v4889_v38 = vsel %vm369_vm0, %v12943_v8, %v4888_v41 }
 0x817   : > { %v4905_v34 = vsel %vm369_vm0, %v15897_v26, %v4904_v58  ;;  %v4873_v46 = vperm.slane %v4865_v45, %v9745_v21  ;;  %v4977_v10 = vsel %vm369_vm0, %v4945_v33, %v4976_v51  ;;  %v4987_v59 = vsel %vm369_vm0, %v4986_v4, %v4937_v7 }
 0x818   : > { %v5001_v25 = vsel %vm369_vm0, %v12952_v11, %v5000_v50  ;;  %v4985_v58 = vperm.slane %v4977_v10, %v9745_v21  ;;  %v5004_v22 = vrot.slane %v4961_v36, 4  ;;  %v4989_v19 = vsel %vm369_vm0, %v4949_v23, %v4988_v39 }
 0x819   : > { %v8742_v18 = vpack.i.bf16 %v5001_v25, %v4889_v38  ;;  %v4890_v27 = vrot.slane %v4873_v46, 4  ;;  %v4780_v49 = vrot.slane %v12907_v60, 4  ;;  %v15898_v41 = vrot.slane %v12730_v28, 4 }
 0x81a   : > { %v4893_v33 = vsel %vm369_vm0, %v4873_v46, %v4892_v32  ;;  %v5005_v7 = vsel %vm369_vm0, %v4985_v58, %v5004_v22  ;;  %v5002_v4 = vrot.slane %v4985_v58, 4  ;;  %v15899_v50 = vrot.slane %v12760_v14, 4 }
 0x81b   : > { %v4627_v15 = vsel %vm369_vm0, %v15898_v41, %v12735_v57  ;;  %8743 = vrot.lane.b32.xlu0 %v8742_v18, %s15710_s8  ;;  %v8762_v39 = vpack.i.bf16 %v5005_v7, %v4893_v33  ;;  %v4668_v60 = vrot.slane %v12901_v17, 4  ;;  %v4762_v26 = vrot.slane %v12802_v63, 4 }
 0x81c   : > { %v4651_v23 = vsel %vm369_vm0, %v15899_v50, %v12756_v0  ;;  %v4633_v51 = vperm.slane %v4627_v15, %v9745_v21  ;;  %v4891_v45 = vsel %vm369_vm0, %v4890_v27, %v4849_v3  ;;  %v5003_v38 = vsel %vm369_vm0, %v5002_v4, %v4961_v36 }
 0x81d   : > { %v4781_v32 = vsel %vm369_vm0, %v12822_v44, %v4780_v49  ;;  %v4657_v25 = vperm.slane %v4651_v23, %v9745_v21  ;;  %v4913_v46 = vperm.slane %v4905_v34, %v9735_v6  ;;  %v4993_v10 = vperm.slane %v4987_v59, %v9745_v21  ;;  %8763 = vrot.lane.b32.xlu1 %v8762_v39, %s15716_s17 }
 0x81e   : > { %v8752_v17 = vpack.i.bf16 %v5003_v38, %v4891_v45  ;;  %v4763_v18 = vsel %vm369_vm0, %v4762_v26, %v12806_v24  ;;  %v4669_v3 = vsel %vm369_vm0, %v12891_v53, %v4668_v60  ;;  %v4784_v58 = vrot.slane %v12799_v35, 4 }
 0x81f   : > { %v4769_v36 = vperm.slane %v4763_v18, %v9745_v21  ;;  %v4962_v44 = vrot.slane %v4925_v40, 4  ;;  %v13000_v22 = vperm.slane %v4989_v19, %v9745_v21  ;;  %v8757_v34 = vpack.i.bf16 %v4781_v32, %v4669_v3 }
 0x820   : > { %8753 = vrot.lane.b32.xlu2 %v8752_v17, %s15707_s24  ;;  %v4672_v59 = vrot.slane %v4633_v51, 4  ;;  %v15900_v27 = vrot.slane %v12825_v5, 4  ;;  %v4670_v53 = vrot.slane %v4657_v25, 4  ;;  %v15901_v7 = vrot.slane %v12756_v0, 4 }
 0x821   : > { %v4785_v41 = vsel %vm369_vm0, %v4769_v36, %v4784_v58  ;;  %v4782_v15 = vrot.slane %v4769_v36, 4  ;;  %v4963_v33 = vsel %vm369_vm0, %v4962_v44, %v4913_v46  ;;  %v4764_v4 = vrot.slane %v12806_v24, 4 }
 0x822   : > { %v4851_v49 = vsel %vm369_vm0, %v15900_v27, %v12835_v47  ;;  %v4653_v19 = vsel %vm369_vm0, %v12760_v14, %v15901_v7  ;;  %v5006_v50 = vrot.slane %v4993_v10, 4  ;;  %v4964_v23 = vrot.slane %v4913_v46, 4 }
 0x823   : > { %v4885_v39 = vperm.slane %v12929_v62, %v9745_v21  ;;  %8758 = vrot.lane.b32.xlu0 %v8757_v34, %s15716_s17  ;;  %v4673_v60 = vsel %vm369_vm0, %v4657_v25, %v4672_v59  ;;  %v4783_v26 = vsel %vm369_vm0, %v4782_v15, %v12799_v35  ;;  %v4857_v45 = vperm.slane %v4851_v49, %v9745_v21 }
 0x824   : > { %v8777_v0 = vpack.i.bf16 %v4785_v41, %v4673_v60  ;;  %v4894_v38 = vrot.slane %v12894_v55, 4  ;;  %v4969_v14 = vperm.slane %v4963_v33, %v9745_v21  ;;  %v4965_v24 = vsel %vm369_vm0, %v4925_v40, %v4964_v23  ;;  %v9340_v60 = vld [vmem:[#allocation2 + $0x1] sm:$0xff] }
 0x825   : > { %v4740_v32 = vrot.slane %v12781_v20, 4  ;;  %v4671_v62 = vsel %vm369_vm0, %v4670_v53, %v4633_v51  ;;  %v15902_v46 = vrot.slane %v12835_v47, 4  ;;  %v5010_v35 = vrot.slane %v13000_v22, 4 }
 0x826   : > { %8778 = vrot.lane.b32.xlu1 %v8777_v0, %s9566_s18  ;;  %v8767_v17 = vpack.i.bf16 %v4783_v26, %v4671_v62  ;;  %v5007_v18 = vsel %vm369_vm0, %v5006_v50, %v4969_v14  ;;  %v4765_v3 = vsel %vm369_vm0, %v12802_v63, %v4764_v4  ;;  %v4661_v40 = vperm.slane %v4653_v19, %v9745_v21  ;;  %v9341_v26 = vld [vmem:[#allocation2 + $0x11] sm:$0xff] }
 0x827   : > { %v4853_v25 = vsel %vm369_vm0, %v12825_v5, %v15902_v46  ;;  %v4898_v20 = vrot.slane %v4885_v39, 4  ;;  %v4973_v51 = vperm.slane %v4965_v24, %v9745_v21  ;;  %v4628_v47 = vrot.slane %v12735_v57, 4 }
 0x828   : > { %8768 = vrot.lane.b32.xlu2 %v8767_v17, %s9561_s30  ;;  %v4895_v5 = vsel %vm369_vm0, %v4894_v38, %v4857_v45  ;;  %v4861_v36 = vperm.slane %v4853_v25, %v9745_v21  ;;  %v4896_v58 = vrot.slane %v4857_v45, 4  ;;  %v4773_v44 = vperm.slane %v4765_v3, %v9745_v21  ;;  %v9342_v17 = vld [vmem:[#allocation2 + $0x61] sm:$0xff] }
 0x829   : > { %v8772_v34 = vpack.i.bf16 %v5007_v18, %v4895_v5  ;;  %v5011_v59 = vsel %vm369_vm0, %v5010_v35, %v4973_v51  ;;  %v5008_v63 = vrot.slane %v4969_v14, 4  ;;  %v4741_v27 = vsel %vm369_vm0, %v12747_v2, %v4740_v32  ;;  %v9343_v18 = vld [vmem:[#allocation2 + $0x71] sm:$0xff] }
 0x82a   : > { %v4786_v49 = vrot.slane %v4773_v44, 4  ;;  %v4899_v57 = vsel %vm369_vm0, %v4898_v20, %v4861_v36  ;;  %v4629_v53 = vsel %vm369_vm0, %v12730_v28, %v4628_v47  ;;  %v4674_v33 = vrot.slane %v4661_v40, 4  ;;  %v9344_v20 = vld [vmem:[#allocation2 + $0x21] sm:$0xff] }
 0x82b   : > { %8773 = vrot.lane.b32.xlu0 %v8772_v34, %s9561_s30  ;;  %v5009_v41 = vsel %vm369_vm0, %v4993_v10, %v5008_v63  ;;  %v8792_v15 = vpack.i.bf16 %v5011_v59, %v4899_v57  ;;  %v4749_v7 = vperm.slane %v4741_v27, %v9745_v21  ;;  %v4897_v19 = vsel %vm369_vm0, %v12894_v55, %v4896_v58  ;;  %v9351_v34 = vld [vmem:[#allocation2 + $0x91] sm:$0xff] }
 0x82c   : > { %v8782_v2 = vpack.i.bf16 %v5009_v41, %v4897_v19  ;;  %v4637_v4 = vperm.slane %v4629_v53, %v9745_v21  ;;  %v8807_v45 = vpack.i.bf16 %v9341_v26, %v9340_v60  ;;  %v4900_v38 = vrot.slane %v4861_v36, 4  ;;  %v9349_v36 = vld [vmem:[#allocation2 + $0xd1] sm:$0xff] }
 0x82d   : > { %v4787_v50 = vsel %vm369_vm0, %v4786_v49, %v4749_v7  ;;  %v4788_v28 = vrot.slane %v4749_v7, 4  ;;  %v5012_v14 = vrot.slane %v4973_v51, 4  ;;  %v4774_v46 = vrot.slane %v12853_v56, 4  ;;  %v9345_v51 = vld [vmem:[#allocation2 + $0x31] sm:$0xff]  ;;  %v9346_v56 = vld [vmem:[#allocation2 + $0x41] sm:$0xff] }
 0x82e   : > { %8793 = vrot.lane.b32.xlu1 %v8792_v15, %s9563_s20  ;;  %v4675_v10 = vsel %vm369_vm0, %v4674_v33, %v4637_v4  ;;  %v4676_v0 = vrot.slane %v4637_v4, 4  ;;  %v4901_v25 = vsel %vm369_vm0, %v4885_v39, %v4900_v38  ;;  %v8822_v3 = vpack.i.bf16 %v9343_v18, %v9342_v17  ;;  %v9348_v39 = vld [vmem:[#allocation2 + $0xc1] sm:$0xff]  ;;  %v9353_v63 = vld [vmem:[#allocation2 + $0xb1] sm:$0xff] }
 0x82f   : > { %v8787_v23 = vpack.i.bf16 %v4787_v50, %v4675_v10  ;;  %v4789_v55 = vsel %vm369_vm0, %v4773_v44, %v4788_v28  ;;  %v5013_v62 = vsel %vm369_vm0, %v13000_v22, %v5012_v14  ;;  %v8812_v47 = vpack.i.bf16 %v9345_v51, %v9344_v20  ;;  %v9347_v22 = vld [vmem:[#allocation2 + $0x51] sm:$0xff]  ;;  %v9350_v44 = vld [vmem:[#allocation2 + $0x81] sm:$0xff] }
 0x830   : > { %8783 = vrot.lane.b32.xlu2 %v8782_v2, %s9566_s18  ;;  %v4677_v24 = vsel %vm369_vm0, %v4661_v40, %v4676_v0  ;;  %v8802_v35 = vpack.i.bf16 %v5013_v62, %v4901_v25  ;;  %v13070_v40 = vsel %vm369_vm0, %v4774_v46, %v12850_v42  ;;  %v8817_v5 = vpack.i.bf16 %v9347_v22, %v9346_v56  ;;  %v9352_v42 = vld [vmem:[#allocation2 + $0xa1] sm:$0xff]  ;;  %v9355_v57 = vld [vmem:[#allocation2 + $0x131] sm:$0xff] }
 0x831   : > { %v8797_v32 = vpack.i.bf16 %v4789_v55, %v4677_v24  ;;  %v8837_v58 = vpack.i.bf16 %v9349_v36, %v9348_v39  ;;  %v8827_v59 = vpack.i.bf16 %v9351_v34, %v9350_v44  ;;  %v8832_v27 = vpack.i.bf16 %v9353_v63, %v9352_v42  ;;  %v9354_v49 = vld [vmem:[#allocation2 + $0x121] sm:$0xff]  ;;  %v9357_v7 = vld [vmem:[#allocation2 + $0xf1] sm:$0xff] }
 0x832   : > { %v8852_v41 = vpack.i.bf16 %v9355_v57, %v9354_v49  ;;  %v8621_v53 = vunpack.i.h.bf16 %v12690_v13  ;;  %v8620_v15 = vunpack.i.l.bf16 %v12690_v13  ;;  %v9356_v33 = vld [vmem:[#allocation2 + $0xe1] sm:$0xff]  ;;  %v9359_v4 = vld [vmem:[#allocation2 + $0x111] sm:$0xff]  ;;  %v8626_v13 = vunpack.i.h.bf16 %v12697_v48 }
 0x833   : > { %8788 = vrot.lane.b32.xlu0 %v8787_v23, %s9563_s20  ;;  %v8842_v19 = vpack.i.bf16 %v9357_v7, %v9356_v33  ;;  %v9358_v2 = vld [vmem:[#allocation2 + $0x101] sm:$0xff]  ;;  %v9361_v60 = vld [vmem:[#allocation2 + $0x191] sm:$0xff]  ;;  %v8636_v0 = vunpack.i.h.bf16 %v12699_v12  ;;  %v8635_v55 = vunpack.i.l.bf16 %v12699_v12  ;;  %v8631_v25 = vunpack.i.h.bf16 %v12703_v30 }
 0x834   : > { %v8847_v50 = vpack.i.bf16 %v9359_v4, %v9358_v2  ;;  %v4423_v10 = vsel %vm459_vm4, %v12642_v16, %v8621_v53  ;;  %v4422_v23 = vsel %vm459_vm4, %v12645_v54, %v8620_v15  ;;  %v9360_v28 = vld [vmem:[#allocation2 + $0x181] sm:$0xff]  ;;  %v9363_v14 = vld [vmem:[#allocation2 + $0x151] sm:$0xff]  ;;  %v4425_v62 = vsel %vm459_vm4, %v12681_v43, %v8626_v13 }
 0x835   : > { %v8867_v26 = vpack.i.bf16 %v9361_v60, %v9360_v28  ;;  %v9362_v38 = vld [vmem:[#allocation2 + $0x141] sm:$0xff]  ;;  %v9365_v54 = vld [vmem:[#allocation2 + $0x171] sm:$0xff]  ;;  %v4429_v46 = vsel %vm461_vm5, %v4425_v62, %v8636_v0  ;;  %v8641_v20 = vunpack.i.h.bf16 %v12705_v31  ;;  %v8640_v43 = vunpack.i.l.bf16 %v12705_v31 }
 0x836   : > { %8808 = vrot.lane.b32.xlu1 %v8807_v45, %s9573_s29  ;;  %v8625_v45 = vunpack.i.l.bf16 %v12697_v48  ;;  %v8857_v24 = vpack.i.bf16 %v9363_v14, %v9362_v38  ;;  %v9364_v16 = vld [vmem:[#allocation2 + $0x161] sm:$0xff]  ;;  %v9367_v18 = vld [vmem:[#allocation2 + $0x1f1] sm:$0xff]  ;;  %v8650_v51 = vunpack.i.l.bf16 %v12701_v52  ;;  %v8645_v42 = vunpack.i.l.bf16 %v12707_v9 }
 0x837   : > { %v9366_v17 = vld [vmem:[#allocation2 + $0x1e1] sm:$0xff]  ;;  %v9369_v56 = vld [vmem:[#allocation2 + $0x1b1] sm:$0xff]  ;;  %v4662_v63 = vrot.slane %v12842_v61, 4 }
 0x838   : > { %8798 = vrot.lane.b32.xlu2 %v8797_v32, %s9567_s6  ;;  %v8862_v32 = vpack.i.bf16 %v9365_v54, %v9364_v16  ;;  %v4424_v48 = vsel %vm459_vm4, %v12678_v37, %v8625_v45  ;;  %v8651_v37 = vunpack.i.h.bf16 %v12701_v52  ;;  %v9370_v39 = vld [vmem:[#allocation2 + $0x1c1] sm:$0xff]  ;;  %v9371_v36 = vld [vmem:[#allocation2 + $0x1d1] sm:$0xff] }
 0x839   : > { %v4428_v12 = vsel %vm461_vm5, %v4424_v48, %v8635_v55  ;;  %v4998_v55 = vrot.slane %v12952_v11, 4 }
 0x83a   : > { %v4432_v7 = vsel %vm463_vm6, %v4428_v12, %v8645_v42 }
 0x83b   : > { %8803 = vrot.lane.b32.xlu0 %v8802_v35, %s9567_s6  ;;  %v8630_v35 = vunpack.i.l.bf16 %v12703_v30 }
 0x83d   : > { %v4426_v30 = vsel %vm461_vm5, %v4422_v23, %v8630_v35 }
 0x83e   : > { %8823 = vrot.lane.b32.xlu1 %v8822_v3, %s9573_s29  ;;  %v8882_v3 = vpack.i.bf16 %v9367_v18, %v9366_v17  ;;  %v4430_v44 = vsel %vm463_vm6, %v4426_v30, %v8640_v43 }
 0x83f   : > { %v13116_v34 = vsel %vm465_vm7, %v4430_v44, %v8650_v51 }
 0x840   : > { %8813 = vrot.lane.b32.xlu2 %v8812_v47, %s9573_s29  ;;  %v9368_v47 = vld [vmem:[#allocation2 + $0x1a1] sm:$0xff]  ;;  %15904 = vst [vmem:[#allocation38_spill] sm:$0xff] %v13116_v34 }
 0x841   : > { %v8872_v22 = vpack.i.bf16 %v9369_v56, %v9368_v47 }
 0x843   : > { %8818 = vrot.lane.b32.xlu0 %v8817_v5, %s9573_s29  ;;  %v4427_v5 = vsel %vm461_vm5, %v4423_v10, %v8631_v25 }
 0x844   : > { %v4431_v31 = vsel %vm463_vm6, %v4427_v5, %v8641_v20 }
 0x845   : > { %v13113_v52 = vsel %vm465_vm7, %v4431_v31, %v8651_v37 }
 0x846   : > { %8838 = vrot.lane.b32.xlu1 %v8837_v58, %s9573_s29  ;;  %v8877_v58 = vpack.i.bf16 %v9371_v36, %v9370_v39  ;;  %15903 = vst [vmem:[#allocation20_spill] sm:$0xff] %v13113_v52 }
 0x848   : > { %8828 = vrot.lane.b32.xlu2 %v8827_v59, %s9573_s29  ;;  %v8646_v59 = vunpack.i.h.bf16 %v12707_v9 }
 0x84a   : > { %v4433_v33 = vsel %vm463_vm6, %v4429_v46, %v8646_v59 }
 0x84b   : > { %8833 = vrot.lane.b32.xlu0 %v8832_v27, %s9573_s29  ;;  %v15905_v27 = vld [vmem:[#allocation77_spill] sm:$0xff] }
 0x84c   : > { %v8656_v49 = vunpack.i.h.bf16 %v15905_v27  ;;  %v8655_v57 = vunpack.i.l.bf16 %v15905_v27 }
 0x84e   : > { %8853 = vrot.lane.b32.xlu1 %v8852_v41, %s9573_s29  ;;  %v13132_v4 = vsel %vm465_vm7, %v4433_v33, %v8656_v49 }
 0x84f   : > { %15907 = vst [vmem:[#allocation36_spill] sm:$0xff] %v13132_v4 }
 0x850   : > { %8843 = vrot.lane.b32.xlu2 %v8842_v19, %s9573_s29  ;;  %v15906_v19 = vld [vmem:[#allocation25_spill] sm:$0xff] }
 0x851   : > { %v4663_v2 = vsel %vm369_vm0, %v4662_v63, %v15906_v19 }
 0x853   : > { %8848 = vrot.lane.b32.xlu0 %v8847_v50, %s9573_s29  ;;  %v13135_v50 = vsel %vm465_vm7, %v4432_v7, %v8655_v57 }
 0x854   : > { %15908 = vst [vmem:[#allocation26_spill] sm:$0xff] %v13135_v50 }
 0x856   : > { %8868 = vrot.lane.b32.xlu1 %v8867_v26, %s9573_s29 }
 0x858   : > { %8858 = vrot.lane.b32.xlu2 %v8857_v24, %s9573_s29 }
 0x85b   : > { %8863 = vrot.lane.b32.xlu0 %v8862_v32, %s9573_s29  ;;  %v4999_v32 = vsel %vm369_vm0, %v4998_v55, %v12932_v1 }
 0x85e   : > { %8883 = vrot.lane.b32.xlu1 %v8882_v3, %s9573_s29 }
 0x860   : > { %8873 = vrot.lane.b32.xlu2 %v8872_v22, %s9573_s29 }
 0x863   : > { %8878 = vrot.lane.b32.xlu0 %v8877_v58, %s9573_s29 }
 0x864   : > { %v8739_v41 = vpop.permute.xlu2 %8738 }
 0x865   : > { %v8741_v53 = vunpack.i.h.bf16 %v8739_v41  ;;  %v8740_v15 = vunpack.i.l.bf16 %v8739_v41 }
 0x867   : > { %v5127_v9 = vsel %vm453_vm1, %v13070_v40, %v8741_v53  ;;  %v5126_v61 = vsel %vm453_vm1, %v4663_v2, %v8740_v15  ;;  %v4886_v40 = vrot.slane %v12943_v8, 4 }
 0x869   : > { %v4887_v62 = vsel %vm369_vm0, %v4886_v40, %v12917_v29 }
 0x87a   : > { %v8754_v10 = vpop.permute.xlu2 %8753 }
 0x87b   : > { %v8756_v16 = vunpack.i.h.bf16 %v8754_v10  ;;  %v8755_v54 = vunpack.i.l.bf16 %v8754_v10 }
 0x882   : > { %v13137_v23 = vpop.permute.xlu2 %8768 }
 0x883   : > { %v8749_v28 = vpop.permute.xlu1 %8748 }
 0x884   : > { %v8751_v60 = vunpack.i.h.bf16 %v8749_v28  ;;  %v8750_v26 = vunpack.i.l.bf16 %v8749_v28 }
 0x886   : > { %v5130_v13 = vsel %vm455_vm2, %v5126_v61, %v8750_v26  ;;  %v5131_v45 = vsel %vm455_vm2, %v5127_v9, %v8751_v60 }
 0x88a   : > { %v13141_v0 = vpop.permute.xlu2 %8783 }
 0x88b   : > { %15909 = vst [vmem:[#allocation21_spill] sm:$0xff] %v13141_v0 }
 0x88d   : > { %v8744_v38 = vpop.permute.xlu0 %8743 }
 0x88e   : > { %v8746_v14 = vunpack.i.h.bf16 %v8744_v38  ;;  %v8745_v24 = vunpack.i.l.bf16 %v8744_v38 }
 0x88f   : > { %v8764_v12 = vpop.permute.xlu1 %8763 }
 0x890   : > { %v5129_v48 = vsel %vm453_vm1, %v4999_v32, %v8746_v14  ;;  %v5128_v46 = vsel %vm453_vm1, %v4887_v62, %v8745_v24  ;;  %v8766_v25 = vunpack.i.h.bf16 %v8764_v12  ;;  %v8765_v8 = vunpack.i.l.bf16 %v8764_v12 }
 0x891   : > { %v5132_v11 = vsel %vm455_vm2, %v5128_v46, %v8755_v54  ;;  %v5133_v35 = vsel %vm455_vm2, %v5129_v48, %v8756_v16 }
 0x892   : > { %v13153_v17 = vpop.permute.xlu2 %8798  ;;  %v13156_v18 = vsel %vm457_vm3, %v5132_v11, %v8765_v8  ;;  %v13159_v1 = vsel %vm457_vm3, %v5133_v35, %v8766_v25 }
 0x893   : > { %15910 = vst [vmem:[#allocation19_spill] sm:$0xff] %v13153_v17 }
 0x894   : > { %15911 = vst [vmem:[#allocation18_spill] sm:$0xff] %v13156_v18 }
 0x895   : > { %15912 = vst [vmem:[#allocation37_spill] sm:$0xff] %v13159_v1  ;;  %v8759_v29 = vpop.permute.xlu0 %8758  ;;  %v13723_v1 = vld [vmem:[#allocation2 + $0x1d2] sm:$0xff] }
 0x896   : > { %v8761_v3 = vunpack.i.h.bf16 %v8759_v29  ;;  %v8760_v20 = vunpack.i.l.bf16 %v8759_v29  ;;  %15958 = vst [vmem:[#allocation52_spill] sm:$0xff] %v13723_v1 }
 0x898   : > { %v13162_v43 = vsel %vm457_vm3, %v5130_v13, %v8760_v20  ;;  %v13165_v37 = vsel %vm457_vm3, %v5131_v45, %v8761_v3  ;;  %v13167_v51 = vpop.permute.xlu1 %8778 }
 0x899   : > { %15913 = vst [vmem:[#allocation22_spill] sm:$0xff] %v13162_v43  ;;  %v13701_v43 = vld [vmem:[#allocation2 + $0x1f2] sm:$0xff] }
 0x89a   : > { %15914 = vst [vmem:[#allocation35_spill] sm:$0xff] %v13165_v37  ;;  %v8814_v47 = vpop.permute.xlu2 %8813 }
 0x89b   : > { %15915 = vst [vmem:[#allocation69_spill] sm:$0xff] %v13167_v51  ;;  %v8816_v30 = vunpack.i.h.bf16 %v8814_v47  ;;  %v8815_v58 = vunpack.i.l.bf16 %v8814_v47 }
 0x89d   : > { %v13169_v56 = vpop.permute.xlu0 %8773  ;;  %v5262_v36 = vrot.slane %v8816_v30, 4  ;;  %v5250_v27 = vrot.slane %v8815_v58, 4 }
 0x8a0   : > { %v13171_v22 = vpop.permute.xlu1 %8793 }
 0x8a1   : > { %15916 = vst [vmem:[#allocation70_spill] sm:$0xff] %v13171_v22 }
 0x8a2   : > { %v13173_v5 = vpop.permute.xlu2 %8828 }
 0x8a3   : > { %v8831_v7 = vunpack.i.h.bf16 %v13173_v5  ;;  %v8830_v19 = vunpack.i.l.bf16 %v13173_v5 }
 0x8a5   : > { %v13175_v39 = vpop.permute.xlu0 %8788  ;;  %v5376_v24 = vrot.slane %v8831_v7, 4  ;;  %v5364_v16 = vrot.slane %v8830_v19, 4 }
 0x8a6   : > { %15917 = vst [vmem:[#allocation71_spill] sm:$0xff] %v13175_v39  ;;  %v13714_v39 = vld [vmem:[#allocation2 + $0x1c2] sm:$0xff] }
 0x8a7   : > { %15957 = vst [vmem:[#allocation51_spill] sm:$0xff] %v13714_v39 }
 0x8a8   : > { %v8809_v31 = vpop.permute.xlu1 %8808 }
 0x8a9   : > { %v8811_v44 = vunpack.i.h.bf16 %v8809_v31  ;;  %v8810_v59 = vunpack.i.l.bf16 %v8809_v31 }
 0x8aa   : > { %v13177_v42 = vpop.permute.xlu2 %8843 }
 0x8ab   : > { %v5263_v63 = vsel %vm369_vm0, %v5262_v36, %v8811_v44  ;;  %v5264_v57 = vrot.slane %v8811_v44, 4  ;;  %v5252_v41 = vrot.slane %v8810_v59, 4  ;;  %v5251_v15 = vsel %vm369_vm0, %v5250_v27, %v8810_v59 }
 0x8ac   : > { %v5269_v53 = vperm.slane %v5263_v63, %v9735_v6  ;;  %v5257_v60 = vperm.slane %v5251_v15, %v9735_v6  ;;  %v8846_v26 = vunpack.i.h.bf16 %v13177_v42  ;;  %v8845_v13 = vunpack.i.l.bf16 %v13177_v42 }
 0x8ad   : > { %v13180_v49 = vpop.permute.xlu0 %8803  ;;  %v5253_v61 = vsel %vm369_vm0, %v8815_v58, %v5252_v41  ;;  %v5265_v10 = vsel %vm369_vm0, %v8816_v30, %v5264_v57 }
 0x8ae   : > { %15918 = vst [vmem:[#allocation72_spill] sm:$0xff] %v13180_v49  ;;  %v5298_v28 = vrot.slane %v5269_v53, 4  ;;  %v13194_v38 = vperm.slane %v5253_v61, %v9735_v6  ;;  %v13197_v14 = vperm.slane %v5265_v10, %v9735_v6  ;;  %v5300_v12 = vrot.slane %v5257_v60, 4 }
 0x8af   : > { %v5398_v25 = vrot.slane %v8846_v26, 4  ;;  %v5386_v8 = vrot.slane %v8845_v13, 4  ;;  %v6290_v49 = vrot.slane %v13701_v43, 4 }
 0x8b0   : > { %v8824_v33 = vpop.permute.xlu1 %8823  ;;  %v5299_v32 = vsel %vm369_vm0, %v5298_v28, %v5257_v60 }
 0x8b1   : > { %v8826_v2 = vunpack.i.h.bf16 %v8824_v33  ;;  %v8825_v9 = vunpack.i.l.bf16 %v8824_v33  ;;  %v13209_v30 = vperm.slane %v5299_v32, %v9745_v21 }
 0x8b2   : > { %v13191_v55 = vpop.permute.xlu2 %8858 }
 0x8b3   : > { %v5286_v45 = vrot.slane %v8826_v2, 4  ;;  %v5274_v40 = vrot.slane %v8825_v9, 4  ;;  %v15583_v46 = vunpack.i.h.bf16 %v13191_v55  ;;  %v15582_v11 = vunpack.i.l.bf16 %v13191_v55  ;;  %15919 = vst [vmem:[#allocation27_spill] sm:$0xff] %v13209_v30 }
 0x8b5   : > { %v8819_v54 = vpop.permute.xlu0 %8818  ;;  %v13221_v63 = vrot.slane %v15583_v46, 4  ;;  %v13230_v15 = vrot.slane %v15582_v11, 4 }
 0x8b6   : > { %v8821_v62 = vunpack.i.h.bf16 %v8819_v54  ;;  %v8820_v48 = vunpack.i.l.bf16 %v8819_v54 }
 0x8b8   : > { %v5288_v35 = vrot.slane %v8821_v62, 4  ;;  %v5275_v29 = vsel %vm369_vm0, %v5274_v40, %v8820_v48  ;;  %v5276_v3 = vrot.slane %v8820_v48, 4  ;;  %v5287_v20 = vsel %vm369_vm0, %v5286_v45, %v8821_v62  ;;  %v8839_v47 = vpop.permute.xlu1 %8838 }
 0x8b9   : > { %v13212_v36 = vperm.slane %v5275_v29, %v9735_v6  ;;  %v8841_v58 = vunpack.i.h.bf16 %v8839_v47  ;;  %v8840_v31 = vunpack.i.l.bf16 %v8839_v47  ;;  %v13217_v42 = vperm.slane %v5287_v20, %v9735_v6 }
 0x8ba   : > { %v5277_v59 = vsel %vm369_vm0, %v8825_v9, %v5276_v3  ;;  %v5289_v57 = vsel %vm369_vm0, %v8826_v2, %v5288_v35  ;;  %v5301_v2 = vsel %vm369_vm0, %v5269_v53, %v5300_v12 }
 0x8bb   : > { %v13224_v27 = vperm.slane %v5277_v59, %v9735_v6  ;;  %v5324_v41 = vrot.slane %v13212_v36, 4  ;;  %v5400_v33 = vrot.slane %v8841_v58, 4  ;;  %v5387_v9 = vsel %vm369_vm0, %v5386_v8, %v8840_v31 }
 0x8bc   : > { %v5388_v61 = vrot.slane %v8840_v31, 4  ;;  %v5399_v10 = vsel %vm369_vm0, %v5398_v25, %v8841_v58  ;;  %v13237_v60 = vperm.slane %v5387_v9, %v9735_v6  ;;  %v13242_v54 = vperm.slane %v5289_v57, %v9735_v6  ;;  %v13246_v25 = vpop.permute.xlu2 %8873 }
 0x8bd   : > { %v5325_v28 = vsel %vm369_vm0, %v13217_v42, %v5324_v41  ;;  %v8834_v45 = vpop.permute.xlu0 %8833  ;;  %v13253_v29 = vperm.slane %v5399_v10, %v9735_v6  ;;  %v5401_v12 = vsel %vm369_vm0, %v8846_v26, %v5400_v33  ;;  %v8876_v57 = vunpack.i.h.bf16 %v13246_v25 }
 0x8be   : > { %v5389_v62 = vsel %vm369_vm0, %v8845_v13, %v5388_v61  ;;  %v8836_v48 = vunpack.i.h.bf16 %v8834_v45  ;;  %v13249_v8 = vperm.slane %v5325_v28, %v9745_v21  ;;  %v5436_v53 = vrot.slane %v13237_v60, 4 }
 0x8bf   : > { %v8835_v20 = vunpack.i.l.bf16 %v8834_v45  ;;  %v13259_v58 = vperm.slane %v5389_v62, %v9735_v6  ;;  %v13272_v33 = vperm.slane %v5401_v12, %v9735_v6  ;;  %v5598_v35 = vrot.slane %v8876_v57, 4 }
 0x8c0   : > { %v5374_v3 = vrot.slane %v8836_v48, 4  ;;  %v5377_v47 = vsel %vm369_vm0, %v8836_v48, %v5376_v24  ;;  %v8854_v13 = vpop.permute.xlu1 %8853  ;;  %v5437_v41 = vsel %vm369_vm0, %v13253_v29, %v5436_v53  ;;  %v8875_v48 = vunpack.i.l.bf16 %v13246_v25 }
 0x8c1   : > { %v13262_v31 = vperm.slane %v5377_v47, %v9735_v6  ;;  %v8856_v59 = vunpack.i.h.bf16 %v8854_v13  ;;  %v5362_v9 = vrot.slane %v8835_v20, 4  ;;  %v5365_v26 = vsel %vm369_vm0, %v8835_v20, %v5364_v16 }
 0x8c2   : > { %v5375_v24 = vsel %vm369_vm0, %v5374_v3, %v8831_v7  ;;  %v8855_v16 = vunpack.i.l.bf16 %v8854_v13  ;;  %v13284_v7 = vperm.slane %v5437_v41, %v9745_v21  ;;  %v13289_v3 = vperm.slane %v5365_v26, %v9735_v6 }
 0x8c3   : > { %v13276_v10 = vperm.slane %v5375_v24, %v9735_v6  ;;  %v5422_v28 = vrot.slane %v13262_v31, 4  ;;  %v5363_v45 = vsel %vm369_vm0, %v5362_v9, %v8830_v19  ;;  %v5486_v62 = vrot.slane %v8856_v59, 4 }
 0x8c4   : > { %v5369_v12 = vperm.slane %v5363_v45, %v9735_v6  ;;  %v5474_v47 = vrot.slane %v8855_v16, 4  ;;  %v5586_v13 = vrot.slane %v8875_v48, 4 }
 0x8c5   : > { %v8849_v20 = vpop.permute.xlu0 %8848  ;;  %v5410_v19 = vrot.slane %v13276_v10, 4  ;;  %v5423_v25 = vsel %vm369_vm0, %v5422_v28, %v13289_v3  ;;  %v13303_v28 = vperm.slane %v5301_v2, %v9745_v21 }
 0x8c6   : > { %v8851_v24 = vunpack.i.h.bf16 %v8849_v20  ;;  %v8850_v5 = vunpack.i.l.bf16 %v8849_v20  ;;  %v5412_v41 = vrot.slane %v5369_v12, 4  ;;  %v13300_v32 = vperm.slane %v5423_v25, %v9745_v21 }
 0x8c8   : > { %v5488_v9 = vrot.slane %v8851_v24, 4  ;;  %v5475_v53 = vsel %vm369_vm0, %v5474_v47, %v8850_v5  ;;  %v5476_v44 = vrot.slane %v8850_v5, 4  ;;  %v5487_v45 = vsel %vm369_vm0, %v5486_v62, %v8851_v24  ;;  %v8869_v26 = vpop.permute.xlu1 %8868 }
 0x8c9   : > { %v5481_v40 = vperm.slane %v5475_v53, %v9735_v6  ;;  %v5493_v61 = vperm.slane %v5487_v45, %v9735_v6  ;;  %v8871_v20 = vunpack.i.h.bf16 %v8869_v26  ;;  %v8870_v11 = vunpack.i.l.bf16 %v8869_v26 }
 0x8ca   : > { %v5350_v47 = vrot.slane %v13249_v8, 4  ;;  %v5477_v5 = vsel %vm369_vm0, %v8855_v16, %v5476_v44  ;;  %v5489_v62 = vsel %vm369_vm0, %v8856_v59, %v5488_v9  ;;  %v5413_v44 = vsel %vm369_vm0, %v13276_v10, %v5412_v41 }
 0x8cb   : > { %v5522_v24 = vrot.slane %v5493_v61, 4  ;;  %v5524_v53 = vrot.slane %v5481_v40, 4  ;;  %v5600_v34 = vrot.slane %v8871_v20, 4  ;;  %v5587_v45 = vsel %vm369_vm0, %v5586_v13, %v8870_v11 }
 0x8cc   : > { %v5588_v26 = vrot.slane %v8870_v11, 4  ;;  %v5599_v46 = vsel %vm369_vm0, %v5598_v35, %v8871_v20  ;;  %v5593_v52 = vperm.slane %v5587_v45, %v9735_v6  ;;  %v5351_v11 = vsel %vm369_vm0, %v5350_v47, %v13303_v28 }
 0x8cd   : > { %v5523_v25 = vsel %vm369_vm0, %v5522_v24, %v5481_v40  ;;  %v5605_v2 = vperm.slane %v5599_v46, %v9735_v6  ;;  %v8864_v50 = vpop.permute.xlu0 %8863  ;;  %v5525_v59 = vsel %vm369_vm0, %v5493_v61, %v5524_v53  ;;  %v5601_v9 = vsel %vm369_vm0, %v8876_v57, %v5600_v34 }
 0x8ce   : > { %v5589_v16 = vsel %vm369_vm0, %v8875_v48, %v5588_v26  ;;  %v13321_v35 = vperm.slane %v5477_v5, %v9735_v6  ;;  %v13324_v40 = vperm.slane %v5489_v62, %v9735_v6  ;;  %v13327_v46 = vperm.slane %v5523_v25, %v9745_v21 }
 0x8cf   : > { %v5634_v13 = vrot.slane %v5605_v2, 4  ;;  %v5636_v10 = vrot.slane %v5593_v52, 4  ;;  %v8866_v41 = vunpack.i.h.bf16 %v8864_v50  ;;  %v8865_v61 = vunpack.i.l.bf16 %v8864_v50 }
 0x8d0   : > { %15920 = vst [vmem:[#allocation16_spill] sm:$0xff] %v13327_v46  ;;  %v13330_v48 = vperm.slane %v5413_v44, %v9745_v21  ;;  %v13333_v34 = vperm.slane %v5525_v59, %v9745_v21  ;;  %v13336_v57 = vperm.slane %v5589_v16, %v9735_v6  ;;  %v13339_v20 = vperm.slane %v5601_v9, %v9735_v6  ;;  %v8884_v9 = vpop.permute.xlu1 %8883 }
 0x8d1   : > { %v5462_v47 = vrot.slane %v13284_v7, 4  ;;  %v5635_v5 = vsel %vm369_vm0, %v5634_v13, %v5593_v52  ;;  %v5510_v62 = vrot.slane %v8866_v41, 4  ;;  %v5498_v24 = vrot.slane %v8865_v61, 4 }
 0x8d2   : > { %v15921_v50 = vrot.slane %v13217_v42, 4  ;;  %v5501_v45 = vsel %vm369_vm0, %v8865_v61, %v13230_v15  ;;  %v5513_v26 = vsel %vm369_vm0, %v8866_v41, %v13221_v63  ;;  %v5411_v44 = vsel %vm369_vm0, %v5410_v19, %v5369_v12 }
 0x8d3   : > { %v5463_v25 = vsel %vm369_vm0, %v5462_v47, %v13330_v48  ;;  %v5637_v52 = vsel %vm369_vm0, %v5605_v2, %v5636_v10  ;;  %v5509_v59 = vperm.slane %v5501_v45, %v9735_v6  ;;  %v15922_v16 = vunpack.i.h.bf16 %v13191_v55 }
 0x8d4   : > { %v5323_v53 = vsel %vm369_vm0, %v15921_v50, %v13212_v36  ;;  %v5521_v36 = vperm.slane %v5513_v26, %v9735_v6  ;;  %v13361_v15 = vperm.slane %v5635_v5, %v9745_v21  ;;  %v15924_v63 = vunpack.i.l.bf16 %v13191_v55 }
 0x8d5   : > { %v5511_v42 = vsel %vm369_vm0, %v5510_v62, %v15922_v16  ;;  %v8897_v41 = vpack.i.bf16 %v5463_v25, %v5351_v11  ;;  %v13367_v12 = vperm.slane %v5323_v53, %v9745_v21  ;;  %v8879_v19 = vpop.permute.xlu0 %8878  ;;  %v5560_v61 = vrot.slane %v5509_v59, 4 }
 0x8d6   : > { %15923 = vst [vmem:[#allocation23_spill] sm:$0xff] %v13361_v15  ;;  %v5499_v13 = vsel %vm369_vm0, %v5498_v24, %v15924_v63  ;;  %v5517_v2 = vperm.slane %v5511_v42, %v9735_v6  ;;  %v5558_v10 = vrot.slane %v5521_v36, 4  ;;  %v13371_v47 = vperm.slane %v5411_v44, %v9745_v21 }
 0x8d7   : > { %15925 = vst [vmem:[#allocation17_spill] sm:$0xff] %v13367_v12  ;;  %8898 = vrot.lane.b32.xlu1 %v8897_v41, %s15707_s24  ;;  %v15927_v5 = vrot.slane %v13253_v29, 4  ;;  %v8886_v62 = vunpack.i.h.bf16 %v8884_v9  ;;  %v8885_v11 = vunpack.i.l.bf16 %v8884_v9  ;;  %v8881_v24 = vunpack.i.h.bf16 %v8879_v19 }
 0x8d8   : > { %15926 = vst [vmem:[#allocation33_spill] sm:$0xff] %v13371_v47  ;;  %v5645_v50 = vperm.slane %v5637_v52, %v9745_v21  ;;  %v5559_v53 = vsel %vm369_vm0, %v5558_v10, %v5509_v59  ;;  %v5460_v26 = vrot.slane %v13371_v47, 4  ;;  %v5505_v25 = vperm.slane %v5499_v13, %v9735_v6  ;;  %v13644_v47 = vld [vmem:[#allocation2 + $0x162] sm:$0xff] }
 0x8d9   : > { %v5435_v55 = vsel %vm369_vm0, %v15927_v5, %v13237_v60  ;;  %v15929_v44 = vrot.slane %v13209_v30, 4  ;;  %v5622_v60 = vrot.slane %v8886_v62, 4  ;;  %v5610_v16 = vrot.slane %v8885_v11, 4  ;;  %15947 = vst [vmem:[#allocation39_spill] sm:$0xff] %v13644_v47 }
 0x8da   : > { %v13381_v45 = vperm.slane %v5435_v55, %v9745_v21  ;;  %v5561_v42 = vsel %vm369_vm0, %v5521_v36, %v5560_v61  ;;  %v5624_v59 = vrot.slane %v8881_v24, 4  ;;  %v8880_v9 = vunpack.i.l.bf16 %v8879_v19 }
 0x8db   : > { %v5349_v29 = vsel %vm369_vm0, %v13367_v12, %v15929_v44  ;;  %v13393_v63 = vperm.slane %v5559_v53, %v9745_v21  ;;  %v5623_v13 = vsel %vm369_vm0, %v5622_v60, %v8881_v24  ;;  %v5546_v10 = vrot.slane %v5517_v2, 4 }
 0x8dc   : > { %15928 = vst [vmem:[#allocation24_spill] sm:$0xff] %v13381_v45  ;;  %v5461_v52 = vsel %vm369_vm0, %v13381_v45, %v5460_v26  ;;  %v5611_v5 = vsel %vm369_vm0, %v5610_v16, %v8880_v9  ;;  %v5612_v55 = vrot.slane %v8880_v9, 4  ;;  %v5625_v44 = vsel %vm369_vm0, %v8886_v62, %v5624_v59  ;;  %v13663_v45 = vld [vmem:[#allocation2 + $0x142] sm:$0xff] }
 0x8dd   : > { %v8887_v41 = vpack.i.bf16 %v5461_v52, %v5349_v29  ;;  %v5629_v4 = vperm.slane %v5623_v13, %v9735_v6  ;;  %v13400_v36 = vperm.slane %v5561_v42, %v9745_v21  ;;  %v5617_v19 = vperm.slane %v5611_v5, %v9735_v6 }
 0x8de   : > { %v13405_v61 = vperm.slane %v5625_v44, %v9735_v6  ;;  %v5547_v24 = vsel %vm369_vm0, %v5546_v10, %v5505_v25  ;;  %v5613_v53 = vsel %vm369_vm0, %v8885_v11, %v5612_v55  ;;  %v5548_v62 = vrot.slane %v5505_v25, 4 }
 0x8df   : > { %8888 = vrot.lane.b32.xlu2 %v8887_v41, %s15710_s8  ;;  %v5658_v26 = vrot.slane %v5629_v4, 4  ;;  %v13410_v29 = vperm.slane %v5547_v24, %v9745_v21  ;;  %v13413_v60 = vperm.slane %v5613_v53, %v9735_v6  ;;  %v5660_v16 = vrot.slane %v5617_v19, 4 }
 0x8e0   : > { %v5572_v42 = vrot.slane %v13327_v46, 4  ;;  %v5684_v52 = vrot.slane %v13361_v15, 4  ;;  %v5670_v59 = vrot.slane %v13405_v61, 4  ;;  %v5549_v41 = vsel %vm369_vm0, %v5517_v2, %v5548_v62 }
 0x8e1   : > { %15930 = vst [vmem:[#allocation29_spill] sm:$0xff] %v13410_v29  ;;  %v5659_v9 = vsel %vm369_vm0, %v5658_v26, %v5617_v19  ;;  %v5576_v11 = vrot.slane %v13333_v34, 4  ;;  %v5557_v10 = vperm.slane %v5549_v41, %v9745_v21  ;;  %v5661_v5 = vsel %vm369_vm0, %v5629_v4, %v5660_v16 }
 0x8e2   : > { %v5573_v13 = vsel %vm369_vm0, %v13410_v29, %v5572_v42  ;;  %v13424_v25 = vperm.slane %v5659_v9, %v9745_v21  ;;  %v5669_v55 = vperm.slane %v5661_v5, %v9745_v21  ;;  %v5688_v44 = vrot.slane %v5645_v50, 4  ;;  %v13691_v29 = vld [vmem:[#allocation2 + $0x1e2] sm:$0xff] }
 0x8e3   : > { %v5352_v24 = vrot.slane %v13303_v28, 4  ;;  %v5464_v19 = vrot.slane %v13330_v48, 4  ;;  %v5672_v2 = vrot.slane %v13413_v60, 4  ;;  %v5577_v26 = vsel %vm369_vm0, %v5557_v10, %v5576_v11  ;;  %15956 = vst [vmem:[#allocation65_spill] sm:$0xff] %v13691_v29 }
 0x8e4   : > { %15931 = vst [vmem:[#allocation63_spill] sm:$0xff] %v13424_v25  ;;  %v5685_v53 = vsel %vm369_vm0, %v13424_v25, %v5684_v52  ;;  %v5574_v62 = vrot.slane %v5557_v10, 4  ;;  %v5689_v9 = vsel %vm369_vm0, %v5669_v55, %v5688_v44  ;;  %v5686_v41 = vrot.slane %v5669_v55, 4  ;;  %v13689_v25 = vld [vmem:[#allocation2 + $0x192] sm:$0xff] }
 0x8e5   : > { %v8892_v42 = vpack.i.bf16 %v5685_v53, %v5573_v13  ;;  %v5353_v4 = vsel %vm369_vm0, %v13249_v8, %v5352_v24  ;;  %v8912_v16 = vpack.i.bf16 %v5689_v9, %v5577_v26  ;;  %v5465_v48 = vsel %vm369_vm0, %v13284_v7, %v5464_v19  ;;  %15955 = vst [vmem:[#allocation64_spill] sm:$0xff] %v13689_v25 }
 0x8e6   : > { %v5575_v28 = vsel %vm369_vm0, %v5574_v62, %v13333_v34  ;;  %v15932_v52 = vrot.slane %v13197_v14, 4  ;;  %v5687_v13 = vsel %vm369_vm0, %v5686_v41, %v5645_v50  ;;  %v8907_v10 = vpack.i.bf16 %v5465_v48, %v5353_v4 }
 0x8e7   : > { %8893 = vrot.lane.b32.xlu0 %v8892_v42, %s15710_s8  ;;  %v5334_v8 = vrot.slane %v13242_v54, 4  ;;  %8913 = vrot.lane.b32.xlu1 %v8912_v16, %s15716_s17  ;;  %v8902_v34 = vpack.i.bf16 %v5687_v13, %v5575_v28  ;;  %v5446_v55 = vrot.slane %v13272_v33, 4  ;;  %v5468_v7 = vrot.slane %v13300_v32, 4 }
 0x8e8   : > { %v5311_v11 = vsel %vm369_vm0, %v15932_v52, %v13194_v38  ;;  %v5534_v44 = vrot.slane %v13324_v40, 4  ;;  %v5578_v50 = vrot.slane %v13393_v63, 4  ;;  %v5646_v53 = vrot.slane %v13339_v20, 4 }
 0x8e9   : > { %v5317_v5 = vperm.slane %v5311_v11, %v9745_v21  ;;  %v5335_v24 = vsel %vm369_vm0, %v5334_v8, %v13224_v27  ;;  %8903 = vrot.lane.b32.xlu2 %v8902_v34, %s15707_s24  ;;  %v5447_v62 = vsel %vm369_vm0, %v5446_v55, %v13259_v58  ;;  %v5671_v9 = vsel %vm369_vm0, %v5670_v59, %v13413_v60 }
 0x8ea   : > { %v5341_v26 = vperm.slane %v5335_v24, %v9745_v21  ;;  %v5535_v42 = vsel %vm369_vm0, %v5534_v44, %v13321_v35  ;;  %v5453_v41 = vperm.slane %v5447_v62, %v9745_v21  ;;  %v5647_v16 = vsel %vm369_vm0, %v5646_v53, %v13336_v57 }
 0x8eb   : > { %v5356_v19 = vrot.slane %v5317_v5, 4  ;;  %v5541_v4 = vperm.slane %v5535_v42, %v9745_v21  ;;  %v5677_v28 = vperm.slane %v5671_v9, %v9745_v21  ;;  %v5653_v11 = vperm.slane %v5647_v16, %v9745_v21 }
 0x8ec   : > { %v5354_v52 = vrot.slane %v5341_v26, 4  ;;  %v5536_v13 = vrot.slane %v13321_v35, 4  ;;  %v5469_v8 = vsel %vm369_vm0, %v5453_v41, %v5468_v7  ;;  %v5466_v34 = vrot.slane %v5453_v41, 4 }
 0x8ed   : > { %v5357_v48 = vsel %vm369_vm0, %v5341_v26, %v5356_v19  ;;  %v5579_v60 = vsel %vm369_vm0, %v5578_v50, %v5541_v4  ;;  %v5690_v59 = vrot.slane %v5677_v28, 4  ;;  %v5582_v53 = vrot.slane %v13400_v36, 4 }
 0x8ee   : > { %v8927_v55 = vpack.i.bf16 %v5469_v8, %v5357_v48  ;;  %v5355_v44 = vsel %vm369_vm0, %v5354_v52, %v5317_v5  ;;  %v5537_v24 = vsel %vm369_vm0, %v13324_v40, %v5536_v13  ;;  %v5467_v19 = vsel %vm369_vm0, %v5466_v34, %v13300_v32  ;;  %v13534_v34 = vld [vmem:[#allocation2 + $0xa2] sm:$0xff] }
 0x8ef   : > { %8908 = vrot.lane.b32.xlu0 %v8907_v10, %s15716_s17  ;;  %v5691_v35 = vsel %vm369_vm0, %v5690_v59, %v5653_v11  ;;  %v13485_v7 = vperm.slane %v5537_v24, %v9745_v21  ;;  %v5648_v50 = vrot.slane %v13336_v57, 4  ;;  %v8917_v5 = vpack.i.bf16 %v5467_v19, %v5355_v44  ;;  %v13546_v19 = vld [vmem:[#allocation2 + $0x12] sm:$0xff] }
 0x8f0   : > { %8928 = vrot.lane.b32.xlu1 %v8927_v55, %s9566_s18  ;;  %v8922_v26 = vpack.i.bf16 %v5691_v35, %v5579_v60  ;;  %v5673_v40 = vsel %vm369_vm0, %v13405_v61, %v5672_v2  ;;  %v5580_v62 = vrot.slane %v5541_v4, 4  ;;  %v5692_v2 = vrot.slane %v5653_v11, 4  ;;  %v13519_v11 = vld [vmem:[#allocation2 + $0x22] sm:$0xff]  ;;  %15939 = vst [vmem:[#allocation67_spill] sm:$0xff] %v13546_v19 }
 0x8f1   : > { %v5583_v10 = vsel %vm369_vm0, %v5582_v53, %v13485_v7  ;;  %v5649_v42 = vsel %vm369_vm0, %v13339_v20, %v5648_v50  ;;  %v13497_v9 = vperm.slane %v5673_v40, %v9745_v21  ;;  %8918 = vrot.lane.b32.xlu2 %v8917_v5, %s9561_s30  ;;  %v5312_v41 = vrot.slane %v13194_v38, 4  ;;  %v13521_v38 = vld [vmem:[#allocation2 + $0x32] sm:$0xff]  ;;  %v13540_v55 = vld [vmem:[#allocation2 + $0x2] sm:$0xff] }
 0x8f2   : > { %v13501_v57 = vperm.slane %v5649_v42, %v9745_v21  ;;  %v5581_v61 = vsel %vm369_vm0, %v13393_v63, %v5580_v62  ;;  %v15933_v16 = vrot.slane %v13224_v27, 4  ;;  %v15934_v48 = vrot.slane %v13289_v3, 4  ;;  %15936 = vst [vmem:[#allocation68_spill] sm:$0xff] %v13521_v38  ;;  %v13548_v35 = vld [vmem:[#allocation2 + $0x42] sm:$0xff]  ;;  %v13550_v50 = vld [vmem:[#allocation2 + $0x52] sm:$0xff] }
 0x8f3   : > { %v5694_v4 = vrot.slane %v13497_v9, 4  ;;  %v15935_v13 = vrot.slane %v13259_v58, 4  ;;  %v5693_v27 = vsel %vm369_vm0, %v5677_v28, %v5692_v2  ;;  %v13532_v58 = vld [vmem:[#allocation2 + $0x72] sm:$0xff]  ;;  %15937 = vst [vmem:[#allocation44_spill] sm:$0xff] %v13540_v55  ;;  %v5918_v5 = vrot.slane %v13519_v11, 4 }
 0x8f4   : > { %v5337_v20 = vsel %vm369_vm0, %v13242_v54, %v15933_v16  ;;  %v5425_v52 = vsel %vm369_vm0, %v13262_v31, %v15934_v48  ;;  %v5313_v54 = vsel %vm369_vm0, %v13197_v14, %v5312_v41  ;;  %v13530_v31 = vld [vmem:[#allocation2 + $0x62] sm:$0xff]  ;;  %v8932_v60 = vpack.i.bf16 %v5693_v27, %v5581_v61  ;;  %v13542_v14 = vld [vmem:[#allocation2 + $0xb2] sm:$0xff]  ;;  %15940 = vst [vmem:[#allocation47_spill] sm:$0xff] %v13548_v35 }
 0x8f5   : > { %v5449_v63 = vsel %vm369_vm0, %v13272_v33, %v15935_v13  ;;  %v13528_v3 = vperm.slane %v5337_v20, %v9745_v21  ;;  %v5695_v33 = vsel %vm369_vm0, %v5694_v4, %v13501_v57  ;;  %v5321_v59 = vperm.slane %v5313_v54, %v9745_v21  ;;  %15938 = vst [vmem:[#allocation66_spill] sm:$0xff] %v13542_v14  ;;  %v13560_v41 = vld [vmem:[#allocation2 + $0x82] sm:$0xff]  ;;  %v13562_v4 = vld [vmem:[#allocation2 + $0x92] sm:$0xff] }
 0x8f6   : > { %v5433_v28 = vperm.slane %v5425_v52, %v9745_v21  ;;  %v8942_v44 = vpack.i.bf16 %v5695_v33, %v5583_v10  ;;  %v5457_v53 = vperm.slane %v5449_v63, %v9745_v21  ;;  %15941 = vst [vmem:[#allocation42_spill] sm:$0xff] %v13550_v50  ;;  %v5930_v40 = vrot.slane %v13521_v38, 4  ;;  %v13564_v16 = vld [vmem:[#allocation2 + $0xe2] sm:$0xff]  ;;  %v13582_v33 = vld [vmem:[#allocation2 + $0xf2] sm:$0xff] }
 0x8f7   : > { %v5358_v24 = vrot.slane %v13528_v3, 4  ;;  %8923 = vrot.lane.b32.xlu0 %v8922_v26, %s9561_s30  ;;  %v5942_v62 = vrot.slane %v13530_v31, 4  ;;  %v5954_v10 = vrot.slane %v13532_v58, 4  ;;  %v6030_v42 = vrot.slane %v13534_v34, 4  ;;  %15942 = vst [vmem:[#allocation34_spill] sm:$0xff] %v13560_v41  ;;  %v13580_v54 = vld [vmem:[#allocation2 + $0xc2] sm:$0xff] }
 0x8f8   : > { %8943 = vrot.lane.b32.xlu1 %v8942_v44, %s9563_s20  ;;  %v5470_v2 = vrot.slane %v5457_v53, 4  ;;  %15943 = vst [vmem:[#allocation43_spill] sm:$0xff] %v13562_v4  ;;  %v5919_v26 = vsel %vm369_vm0, %v5918_v5, %v13540_v55  ;;  %v6042_v20 = vrot.slane %v13542_v14, 4  ;;  %v5931_v52 = vsel %vm369_vm0, %v5930_v40, %v13546_v19 }
 0x8f9   : > { %v5359_v61 = vsel %vm369_vm0, %v5358_v24, %v5321_v59  ;;  %v13570_v48 = vperm.slane %v5919_v26, %v9735_v6  ;;  %v5943_v13 = vsel %vm369_vm0, %v5942_v62, %v13548_v35  ;;  %v5955_v63 = vsel %vm369_vm0, %v5954_v10, %v13550_v50  ;;  %8933 = vrot.lane.b32.xlu2 %v8932_v60, %s9566_s18 }
 0x8fa   : > { %v5471_v27 = vsel %vm369_vm0, %v5470_v2, %v5433_v28  ;;  %v13585_v44 = vperm.slane %v5931_v52, %v9735_v6  ;;  %v13588_v24 = vperm.slane %v5943_v13, %v9735_v6  ;;  %v13591_v5 = vperm.slane %v5955_v63, %v9735_v6  ;;  %v13598_v2 = vld [vmem:[#allocation2 + $0xd2] sm:$0xff] }
 0x8fb   : > { %v8937_v40 = vpack.i.bf16 %v5471_v27, %v5359_v61  ;;  %v6031_v62 = vsel %vm369_vm0, %v6030_v42, %v13560_v41  ;;  %v6043_v60 = vsel %vm369_vm0, %v6042_v20, %v13562_v4  ;;  %v6054_v10 = vrot.slane %v13564_v16, 4 }
 0x8fc   : > { %v5966_v26 = vrot.slane %v13585_v44, 4  ;;  %v5990_v52 = vrot.slane %v13591_v5, 4  ;;  %v13603_v13 = vperm.slane %v6031_v62, %v9735_v6  ;;  %v13606_v63 = vperm.slane %v6043_v60, %v9735_v6 }
 0x8fd   : > { %v6055_v42 = vsel %vm369_vm0, %v6054_v10, %v13580_v54  ;;  %v6066_v61 = vrot.slane %v13582_v33, 4  ;;  %v5360_v20 = vrot.slane %v5321_v59, 4  ;;  %v5472_v27 = vrot.slane %v5433_v28, 4 }
 0x8fe   : > { %v5967_v8 = vsel %vm369_vm0, %v5966_v26, %v13570_v48  ;;  %v5991_v32 = vsel %vm369_vm0, %v5990_v52, %v13588_v24  ;;  %v13616_v30 = vperm.slane %v6055_v42, %v9735_v6  ;;  %v6078_v62 = vrot.slane %v13606_v63, 4  ;;  %v13630_v26 = vld [vmem:[#allocation2 + $0x122] sm:$0xff]  ;;  %v13632_v52 = vld [vmem:[#allocation2 + $0x132] sm:$0xff] }
 0x8ff   : > { %8938 = vrot.lane.b32.xlu0 %v8937_v40, %s9563_s20  ;;  %v13621_v60 = vperm.slane %v5967_v8, %v9745_v21  ;;  %v13624_v10 = vperm.slane %v5991_v32, %v9745_v21  ;;  %v6067_v59 = vsel %vm369_vm0, %v6066_v61, %v13598_v2  ;;  %v5361_v28 = vsel %vm369_vm0, %v13528_v3, %v5360_v20  ;;  %v13646_v3 = vld [vmem:[#allocation2 + $0x172] sm:$0xff] }
 0x900   : > { %v13635_v42 = vperm.slane %v6067_v59, %v9735_v6  ;;  %v6079_v8 = vsel %vm369_vm0, %v6078_v62, %v13603_v13  ;;  %v5473_v40 = vsel %vm369_vm0, %v5457_v53, %v5472_v27  ;;  %v15946_v32 = vrot.slane %v13485_v7, 4  ;;  %15948 = vst [vmem:[#allocation46_spill] sm:$0xff] %v13646_v3  ;;  %v13656_v27 = vld [vmem:[#allocation2 + $0x102] sm:$0xff]  ;;  %v13658_v7 = vld [vmem:[#allocation2 + $0x112] sm:$0xff] }
 0x901   : > { %15944 = vst [vmem:[#allocation45_spill] sm:$0xff] %v13621_v60  ;;  %v6016_v20 = vrot.slane %v13621_v60, 4  ;;  %v13650_v15 = vperm.slane %v6079_v8, %v9745_v21  ;;  %v8947_v59 = vpack.i.bf16 %v5473_v40, %v5361_v28  ;;  %v15950_v46 = vrot.slane %v13501_v57, 4  ;;  %v13673_v40 = vld [vmem:[#allocation2 + $0x182] sm:$0xff]  ;;  %v13675_v60 = vld [vmem:[#allocation2 + $0x1b2] sm:$0xff] }
 0x902   : > { %15945 = vst [vmem:[#allocation32_spill] sm:$0xff] %v13624_v10  ;;  %v5585_v61 = vsel %vm369_vm0, %v13400_v36, %v15946_v32  ;;  %v13660_v36 = vld [vmem:[#allocation2 + $0x1a2] sm:$0xff]  ;;  %v6102_v62 = vrot.slane %v13635_v42, 4  ;;  %v6142_v8 = vrot.slane %v13630_v26, 4  ;;  %v6154_v28 = vrot.slane %v13632_v52, 4 }
 0x903   : > { %15949 = vst [vmem:[#allocation40_spill] sm:$0xff] %v13650_v15  ;;  %v5697_v53 = vsel %vm369_vm0, %v13497_v9, %v15950_v46  ;;  %v6017_v57 = vsel %vm369_vm0, %v13624_v10, %v6016_v20  ;;  %v6128_v46 = vrot.slane %v13650_v15, 4  ;;  %8948 = vrot.lane.b32.xlu2 %v8947_v59, %s9567_s6  ;;  %v13671_v9 = vld [vmem:[#allocation2 + $0x152] sm:$0xff]  ;;  %v6254_v59 = vrot.slane %v13660_v36, 4 }
 0x904   : > { %15951 = vst [vmem:[#allocation41_spill] sm:$0xff] %v13656_v27  ;;  %v8952_v32 = vpack.i.bf16 %v5697_v53, %v5585_v61  ;;  %v6166_v61 = vrot.slane %v13644_v47, 4  ;;  %v6178_v53 = vrot.slane %v13646_v3, 4  ;;  %v6103_v12 = vsel %vm369_vm0, %v6102_v62, %v13616_v30 }
 0x905   : > { %15952 = vst [vmem:[#allocation48_spill] sm:$0xff] %v13658_v7  ;;  %v6143_v20 = vsel %vm369_vm0, %v6142_v8, %v13656_v27  ;;  %v6155_v15 = vsel %vm369_vm0, %v6154_v28, %v13658_v7  ;;  %v13687_v10 = vperm.slane %v6103_v12, %v9745_v21  ;;  %v6255_v37 = vsel %vm369_vm0, %v6254_v59, %v13673_v40 }
 0x906   : > { %15953 = vst [vmem:[#allocation50_spill] sm:$0xff] %v13673_v40  ;;  %v13694_v17 = vperm.slane %v6143_v20, %v9735_v6  ;;  %v13697_v62 = vperm.slane %v6155_v15, %v9735_v6  ;;  %v6167_v8 = vsel %vm369_vm0, %v6166_v61, %v13663_v45  ;;  %v6179_v12 = vsel %vm369_vm0, %v6178_v53, %v13671_v9 }
 0x907   : > { %15954 = vst [vmem:[#allocation62_spill] sm:$0xff] %v13687_v10  ;;  %v13704_v28 = vperm.slane %v6167_v8, %v9735_v6  ;;  %v6266_v20 = vrot.slane %v13675_v60, 4  ;;  %v6129_v15 = vsel %vm369_vm0, %v13687_v10, %v6128_v46  ;;  %8953 = vrot.lane.b32.xlu0 %v8952_v32, %s9567_s6  ;;  %v13717_v61 = vperm.slane %v6179_v12, %v9735_v6 }
 0x908   : > { %v6192_v8 = vrot.slane %v13694_v17, 4  ;;  %v13721_v18 = vperm.slane %v6255_v37, %v9735_v6  ;;  %v8957_v53 = vpack.i.bf16 %v6129_v15, %v6017_v57  ;;  %v6278_v32 = vrot.slane %v13691_v29, 4 }
 0x909   : > { %v6216_v59 = vrot.slane %v13704_v28, 4  ;;  %v6267_v46 = vsel %vm369_vm0, %v6266_v20, %v13689_v25  ;;  %v5920_v0 = vrot.slane %v13540_v55, 4 }
 0x90a   : > { %v6193_v10 = vsel %vm369_vm0, %v13697_v62, %v6192_v8  ;;  %v13732_v12 = vperm.slane %v6267_v46, %v9735_v6  ;;  %v6304_v37 = vrot.slane %v13721_v18, 4  ;;  %8958 = vrot.lane.b32.xlu1 %v8957_v53, %s15710_s8  ;;  %v6279_v15 = vsel %vm369_vm0, %v6278_v32, %v13714_v39 }
 0x90b   : > { %v13738_v57 = vperm.slane %v6193_v10, %v9745_v21  ;;  %v6217_v20 = vsel %vm369_vm0, %v13717_v61, %v6216_v59  ;;  %v5968_v8 = vrot.slane %v13570_v48, 4  ;;  %v13749_v22 = vperm.slane %v6279_v15, %v9735_v6 }
 0x90c   : > { %v13746_v46 = vperm.slane %v6217_v20, %v9745_v21  ;;  %v6291_v53 = vsel %vm369_vm0, %v6290_v49, %v13723_v1  ;;  %v6305_v10 = vsel %vm369_vm0, %v13732_v12, %v6304_v37  ;;  %v5992_v32 = vrot.slane %v13588_v24, 4 }
 0x90d   : > { %v13756_v51 = vperm.slane %v6291_v53, %v9735_v6  ;;  %v13759_v59 = vperm.slane %v6305_v10, %v9745_v21  ;;  %v5969_v48 = vsel %vm369_vm0, %v13585_v44, %v5968_v8  ;;  %v6328_v15 = vrot.slane %v13749_v22, 4 }
 0x90e   : > { %v6242_v20 = vrot.slane %v13746_v46, 4  ;;  %v13767_v49 = vperm.slane %v5969_v48, %v9745_v21  ;;  %v6080_v37 = vrot.slane %v13603_v13, 4  ;;  %v5993_v53 = vsel %vm369_vm0, %v13591_v5, %v5992_v32 }
 0x90f   : > { %v6104_v10 = vrot.slane %v13616_v30, 4  ;;  %v5932_v44 = vrot.slane %v13546_v19, 4  ;;  %v6329_v8 = vsel %vm369_vm0, %v13756_v51, %v6328_v15  ;;  %v13780_v48 = vperm.slane %v5993_v53, %v9745_v21 }
 0x910   : > { %v6243_v24 = vsel %vm369_vm0, %v6242_v20, %v13738_v57  ;;  %v6081_v13 = vsel %vm369_vm0, %v13606_v63, %v6080_v37  ;;  %v6337_v5 = vperm.slane %v6329_v8, %v9745_v21  ;;  %v5921_v20 = vsel %vm369_vm0, %v13519_v11, %v5920_v0 }
 0x911   : > { %v13786_v30 = vperm.slane %v6081_v13, %v9745_v21  ;;  %v6105_v32 = vsel %vm369_vm0, %v13635_v42, %v6104_v10  ;;  %v6018_v19 = vrot.slane %v13780_v48, 4  ;;  %v13797_v53 = vperm.slane %v5921_v20, %v9735_v6 }
 0x912   : > { %v13794_v15 = vperm.slane %v6105_v32, %v9745_v21  ;;  %v5933_v63 = vsel %vm369_vm0, %v13521_v38, %v5932_v44  ;;  %v6354_v37 = vrot.slane %v6337_v5, 4  ;;  %v5944_v42 = vrot.slane %v13548_v35, 4 }
 0x913   : > { %v13802_v8 = vperm.slane %v5933_v63, %v9735_v6  ;;  %v5956_v10 = vrot.slane %v13550_v50, 4  ;;  %v6019_v0 = vsel %vm369_vm0, %v6018_v19, %v13767_v49  ;;  %v6032_v32 = vrot.slane %v13560_v41, 4 }
 0x914   : > { %v6130_v13 = vrot.slane %v13794_v15, 4  ;;  %v6044_v20 = vrot.slane %v13562_v4, 4  ;;  %v6355_v44 = vsel %vm369_vm0, %v6354_v37, %v13759_v59  ;;  %v5945_v63 = vsel %vm369_vm0, %v13530_v31, %v5944_v42 }
 0x915   : > { %v5957_v35 = vsel %vm369_vm0, %v13532_v58, %v5956_v10  ;;  %v5978_v50 = vrot.slane %v13802_v8, 4  ;;  %v8972_v55 = vpack.i.bf16 %v6355_v44, %v6243_v24  ;;  %v13821_v38 = vperm.slane %v5945_v63, %v9735_v6 }
 0x916   : > { %v6131_v19 = vsel %vm369_vm0, %v6130_v13, %v13786_v30  ;;  %v13824_v4 = vperm.slane %v5957_v35, %v9735_v6  ;;  %v6033_v42 = vsel %vm369_vm0, %v13534_v34, %v6032_v32  ;;  %v6045_v10 = vsel %vm369_vm0, %v13542_v14, %v6044_v20 }
 0x917   : > { %v8967_v41 = vpack.i.bf16 %v6131_v19, %v6019_v0  ;;  %v5979_v37 = vsel %vm369_vm0, %v5978_v50, %v13797_v53  ;;  %8973 = vrot.lane.b32.xlu1 %v8972_v55, %s15707_s24  ;;  %v13838_v35 = vperm.slane %v6033_v42, %v9735_v6  ;;  %v13841_v0 = vperm.slane %v6045_v10, %v9735_v6 }
 0x918   : > { %v13834_v24 = vperm.slane %v5979_v37, %v9745_v21  ;;  %v6002_v13 = vrot.slane %v13824_v4, 4  ;;  %v6056_v50 = vrot.slane %v13580_v54, 4  ;;  %v6068_v32 = vrot.slane %v13598_v2, 4 }
 0x919   : > { %8968 = vrot.lane.b32.xlu0 %v8967_v41, %s15707_s24  ;;  %v6244_v20 = vrot.slane %v13738_v57, 4  ;;  %v6356_v55 = vrot.slane %v13759_v59, 4  ;;  %v6090_v63 = vrot.slane %v13841_v0, 4  ;;  %v6144_v19 = vrot.slane %v13656_v27, 4 }
 0x91a   : > { %v6003_v44 = vsel %vm369_vm0, %v6002_v13, %v13821_v38  ;;  %v6156_v37 = vrot.slane %v13658_v7, 4  ;;  %v6057_v41 = vsel %vm369_vm0, %v13564_v16, %v6056_v50  ;;  %v6069_v57 = vsel %vm369_vm0, %v13582_v33, %v6068_v32 }
 0x91b   : > { %v13854_v42 = vperm.slane %v6003_v44, %v9745_v21  ;;  %v6245_v59 = vsel %vm369_vm0, %v13746_v46, %v6244_v20  ;;  %v13863_v10 = vperm.slane %v6057_v41, %v9735_v6  ;;  %v13866_v13 = vperm.slane %v6069_v57, %v9735_v6 }
 0x91c   : > { %v6091_v7 = vsel %vm369_vm0, %v6090_v63, %v13838_v35  ;;  %v6357_v44 = vsel %vm369_vm0, %v6337_v5, %v6356_v55  ;;  %v6145_v46 = vsel %vm369_vm0, %v13630_v26, %v6144_v19  ;;  %v6157_v57 = vsel %vm369_vm0, %v13632_v52, %v6156_v37 }
 0x91d   : > { %v6022_v27 = vrot.slane %v13854_v42, 4  ;;  %v13873_v50 = vperm.slane %v6091_v7, %v9745_v21  ;;  %v8982_v32 = vpack.i.bf16 %v6357_v44, %v6245_v59  ;;  %v6114_v20 = vrot.slane %v13866_v13, 4 }
 0x91e   : > { %v13879_v41 = vperm.slane %v6145_v46, %v9735_v6  ;;  %v6168_v63 = vrot.slane %v13663_v45, 4  ;;  %v13887_v7 = vperm.slane %v6157_v57, %v9735_v6  ;;  %v6180_v55 = vrot.slane %v13671_v9, 4 }
 0x91f   : > { %v6023_v5 = vsel %vm369_vm0, %v6022_v27, %v13834_v24  ;;  %v6256_v19 = vrot.slane %v13673_v40, 4  ;;  %v6115_v59 = vsel %vm369_vm0, %v6114_v20, %v13863_v10  ;;  %v6268_v37 = vrot.slane %v13689_v25, 4 }
 0x920   : > { %v6169_v44 = vsel %vm369_vm0, %v13644_v47, %v6168_v63  ;;  %v6280_v46 = vrot.slane %v13714_v39, 4  ;;  %v6121_v14 = vperm.slane %v6115_v59, %v9745_v21  ;;  %v6181_v57 = vsel %vm369_vm0, %v13646_v3, %v6180_v55 }
 0x921   : > { %8983 = vrot.lane.b32.xlu0 %v8982_v32, %s15716_s17  ;;  %v13900_v27 = vperm.slane %v6169_v44, %v9735_v6  ;;  %v6202_v40 = vrot.slane %v13887_v7, 4  ;;  %v13906_v20 = vperm.slane %v6181_v57, %v9735_v6  ;;  %v6257_v63 = vsel %vm369_vm0, %v13660_v36, %v6256_v19 }
 0x922   : > { %v6269_v39 = vsel %vm369_vm0, %v13675_v60, %v6268_v37  ;;  %v6281_v32 = vsel %vm369_vm0, %v13691_v29, %v6280_v46  ;;  %v6134_v59 = vrot.slane %v6121_v14, 4  ;;  %v13917_v55 = vperm.slane %v6257_v63, %v9735_v6 }
 0x923   : > { %v6203_v44 = vsel %vm369_vm0, %v6202_v40, %v13879_v41  ;;  %v13920_v3 = vperm.slane %v6269_v39, %v9735_v6  ;;  %v6226_v19 = vrot.slane %v13906_v20, 4  ;;  %v13927_v37 = vperm.slane %v6281_v32, %v9735_v6 }
 0x924   : > { %v13923_v57 = vperm.slane %v6203_v44, %v9745_v21  ;;  %v6292_v46 = vrot.slane %v13723_v1, 4  ;;  %v6135_v47 = vsel %vm369_vm0, %v6134_v59, %v13873_v50  ;;  %v6190_v63 = vrot.slane %v13697_v62, 4 }
 0x925   : > { %v6314_v40 = vrot.slane %v13920_v3, 4  ;;  %v6214_v39 = vrot.slane %v13717_v61, 4  ;;  %v8987_v29 = vpack.i.bf16 %v6135_v47, %v6023_v5  ;;  %v6227_v44 = vsel %vm369_vm0, %v6226_v19, %v13900_v27 }
 0x926   : > { %v6248_v25 = vrot.slane %v13923_v57, 4  ;;  %v6293_v32 = vsel %vm369_vm0, %v13701_v43, %v6292_v46  ;;  %v13941_v1 = vperm.slane %v6227_v44, %v9745_v21  ;;  %v6191_v47 = vsel %vm369_vm0, %v6190_v63, %v13694_v17 }
 0x927   : > { %v13944_v59 = vperm.slane %v6293_v32, %v9735_v6  ;;  %v6315_v62 = vsel %vm369_vm0, %v6314_v40, %v13917_v55  ;;  %8988 = vrot.lane.b32.xlu1 %v8987_v29, %s9561_s30  ;;  %v13955_v5 = vperm.slane %v6191_v47, %v9745_v21  ;;  %v6215_v19 = vsel %vm369_vm0, %v6214_v39, %v13704_v28 }
 0x928   : > { %v13952_v61 = vperm.slane %v6315_v62, %v9745_v21  ;;  %v6302_v46 = vrot.slane %v13732_v12, 4  ;;  %v6249_v44 = vsel %vm369_vm0, %v13941_v1, %v6248_v25  ;;  %v13964_v17 = vperm.slane %v6215_v19, %v9745_v21 }
 0x929   : > { %v6338_v40 = vrot.slane %v13944_v59, 4  ;;  %v6326_v29 = vrot.slane %v13756_v51, 4  ;;  %v6240_v32 = vrot.slane %v13955_v5, 4  ;;  %v6024_v28 = vrot.slane %v13834_v24, 4 }
 0x92a   : > { %v6360_v63 = vrot.slane %v13952_v61, 4  ;;  %v6303_v62 = vsel %vm369_vm0, %v6302_v46, %v13721_v18  ;;  %v6136_v51 = vrot.slane %v13873_v50, 4 }
 0x92b   : > { %v6339_v12 = vsel %vm369_vm0, %v6338_v40, %v13927_v37  ;;  %v13975_v25 = vperm.slane %v6303_v62, %v9745_v21  ;;  %v6327_v39 = vsel %vm369_vm0, %v6326_v29, %v13749_v22  ;;  %v6241_v19 = vsel %vm369_vm0, %v13964_v17, %v6240_v32 }
 0x92c   : > { %v6345_v47 = vperm.slane %v6339_v12, %v9745_v21  ;;  %v13984_v18 = vperm.slane %v6327_v39, %v9745_v21  ;;  %v6025_v24 = vsel %vm369_vm0, %v13854_v42, %v6024_v28  ;;  %v6137_v40 = vsel %vm369_vm0, %v6121_v14, %v6136_v51 }
 0x92d   : > { %v6352_v46 = vrot.slane %v13975_v25, 4  ;;  %v5980_v62 = vrot.slane %v13797_v53, 4  ;;  %v6004_v22 = vrot.slane %v13821_v38, 4  ;;  %v8997_v29 = vpack.i.bf16 %v6137_v40, %v6025_v24 }
 0x92e   : > { %v6361_v50 = vsel %vm369_vm0, %v6345_v47, %v6360_v63  ;;  %v6092_v12 = vrot.slane %v13838_v35, 4  ;;  %v6116_v32 = vrot.slane %v13863_v10, 4  ;;  %v6228_v51 = vrot.slane %v13900_v27, 4 }
 0x92f   : > { %v9002_v39 = vpack.i.bf16 %v6361_v50, %v6249_v44  ;;  %v6353_v6 = vsel %vm369_vm0, %v13984_v18, %v6352_v46  ;;  %v5981_v42 = vsel %vm369_vm0, %v13802_v8, %v5980_v62  ;;  %v6005_v14 = vsel %vm369_vm0, %v13824_v4, %v6004_v22  ;;  %8998 = vrot.lane.b32.xlu0 %v8997_v29, %s9566_s18 }
 0x930   : > { %v8962_v53 = vpack.i.bf16 %v6353_v6, %v6241_v19  ;;  %v14003_v38 = vperm.slane %v5981_v42, %v9745_v21  ;;  %v14006_v35 = vperm.slane %v6005_v14, %v9745_v21  ;;  %v6093_v10 = vsel %vm369_vm0, %v13841_v0, %v6092_v12 }
 0x931   : > { %9003 = vrot.lane.b32.xlu1 %v9002_v39, %s9566_s18  ;;  %v14012_v44 = vperm.slane %v6093_v10, %v9745_v21  ;;  %v6117_v4 = vsel %vm369_vm0, %v13866_v13, %v6116_v32  ;;  %v6020_v6 = vrot.slane %v13767_v49, 4  ;;  %v6132_v8 = vrot.slane %v13786_v30, 4 }
 0x932   : > { %8963 = vrot.lane.b32.xlu2 %v8962_v53, %s15710_s8  ;;  %v6028_v63 = vrot.slane %v14003_v38, 4  ;;  %v14021_v28 = vperm.slane %v6117_v4, %v9745_v21  ;;  %v6204_v0 = vrot.slane %v13879_v41, 4  ;;  %v6316_v30 = vrot.slane %v13917_v55, 4  ;;  %v15959_v53 = vld [vmem:[#allocation21_spill] sm:$0xff] }
 0x933   : > { %v6140_v19 = vrot.slane %v14012_v44, 4  ;;  %v6021_v13 = vsel %vm369_vm0, %v13780_v48, %v6020_v6  ;;  %v6133_v49 = vsel %vm369_vm0, %v13794_v15, %v6132_v8  ;;  %v6229_v41 = vsel %vm369_vm0, %v13906_v20, %v6228_v51  ;;  %v15960_v4 = vld [vmem:[#allocation69_spill] sm:$0xff]  ;;  %v15961_v8 = vld [vmem:[#allocation70_spill] sm:$0xff] }
 0x934   : > { %v6029_v24 = vsel %vm369_vm0, %v14006_v35, %v6028_v63  ;;  %v6205_v46 = vsel %vm369_vm0, %v13887_v7, %v6204_v0  ;;  %v14040_v40 = vperm.slane %v6229_v41, %v9745_v21  ;;  %v8977_v62 = vpack.i.bf16 %v6133_v49, %v6021_v13  ;;  %v15963_v13 = vld [vmem:[#allocation72_spill] sm:$0xff] }
 0x935   : > { %v6141_v27 = vsel %vm369_vm0, %v14021_v28, %v6140_v19  ;;  %v6317_v15 = vsel %vm369_vm0, %v13920_v3, %v6316_v30  ;;  %v6340_v55 = vrot.slane %v13927_v37, 4  ;;  %v14046_v22 = vperm.slane %v6205_v46, %v9745_v21  ;;  %v15962_v19 = vld [vmem:[#allocation68_spill] sm:$0xff] }
 0x936   : > { %v9017_v48 = vpack.i.bf16 %v6141_v27, %v6029_v24  ;;  %v6250_v7 = vrot.slane %v14040_v40, 4  ;;  %v6246_v20 = vrot.slane %v13941_v1, 4  ;;  %v6358_v50 = vrot.slane %v6345_v47, 4  ;;  %v15964_v27 = vld [vmem:[#allocation37_spill] sm:$0xff] }
 0x937   : > { %v6341_v29 = vsel %vm369_vm0, %v13944_v59, %v6340_v55  ;;  %v6325_v12 = vperm.slane %v6317_v15, %v9745_v21  ;;  %v8771_v3 = vunpack.i.h.bf16 %v13137_v23  ;;  %v8770_v37 = vunpack.i.l.bf16 %v13137_v23  ;;  %v15966_v55 = vld [vmem:[#allocation71_spill] sm:$0xff] }
 0x938   : > { %v6349_v32 = vperm.slane %v6341_v29, %v9745_v21  ;;  %v8776_v39 = vunpack.i.h.bf16 %v13169_v56  ;;  %v8775_v42 = vunpack.i.l.bf16 %v13169_v56  ;;  %v6251_v1 = vsel %vm369_vm0, %v6250_v7, %v14046_v22  ;;  %v15967_v29 = vld [vmem:[#allocation35_spill] sm:$0xff] }
 0x939   : > { %9018 = vrot.lane.b32.xlu1 %v9017_v48, %s9567_s6  ;;  %v6247_v47 = vsel %vm369_vm0, %v6246_v20, %v13923_v57  ;;  %v6359_v14 = vsel %vm369_vm0, %v6358_v50, %v13952_v61  ;;  %v8786_v10 = vunpack.i.h.bf16 %v15959_v53  ;;  %v8785_v23 = vunpack.i.l.bf16 %v15959_v53 }
 0x93a   : > { %8978 = vrot.lane.b32.xlu2 %v8977_v62, %s15716_s17  ;;  %v6362_v59 = vrot.slane %v6349_v32, 4  ;;  %v8781_v6 = vunpack.i.h.bf16 %v15960_v4  ;;  %v8780_v56 = vunpack.i.l.bf16 %v15960_v4  ;;  %v8796_v63 = vunpack.i.h.bf16 %v15961_v8  ;;  %v15965_v62 = vld [vmem:[#allocation18_spill] sm:$0xff] }
 0x93b   : > { %v8795_v0 = vunpack.i.l.bf16 %v15961_v8  ;;  %v9032_v57 = vpack.i.bf16 %v15962_v19, %v13519_v11  ;;  %v8806_v49 = vunpack.i.h.bf16 %v15963_v13  ;;  %v8805_v61 = vunpack.i.l.bf16 %v15963_v13  ;;  %v15970_v8 = vld [vmem:[#allocation44_spill] sm:$0xff]  ;;  %v15973_v13 = vld [vmem:[#allocation43_spill] sm:$0xff] }
 0x93c   : > { %v6363_v51 = vsel %vm369_vm0, %v6362_v59, %v6325_v12  ;;  %v8992_v24 = vpack.i.bf16 %v6359_v14, %v6247_v47  ;;  %v6026_v46 = vrot.slane %v14006_v35, 4  ;;  %v6138_v41 = vrot.slane %v14021_v28, 4  ;;  %v15969_v59 = vld [vmem:[#allocation19_spill] sm:$0xff] }
 0x93d   : > { %v9012_v30 = vpack.i.bf16 %v6363_v51, %v6251_v1  ;;  %v5141_v48 = vsel %vm459_vm4, %v15964_v27, %v8776_v39  ;;  %v5140_v15 = vsel %vm459_vm4, %v15965_v62, %v8775_v42  ;;  %v8791_v7 = vunpack.i.h.bf16 %v15966_v55  ;;  %v15968_v42 = vld [vmem:[#allocation22_spill] sm:$0xff] }
 0x93e   : > { %v8790_v11 = vunpack.i.l.bf16 %v15966_v55  ;;  %v5145_v20 = vsel %vm461_vm5, %v5141_v48, %v8786_v10  ;;  %v5144_v50 = vsel %vm461_vm5, %v5140_v15, %v8785_v23  ;;  %v5139_v39 = vsel %vm459_vm4, %v15967_v29, %v8771_v3  ;;  %v15982_v29 = vld [vmem:[#allocation65_spill] sm:$0xff] }
 0x93f   : > { %9013 = vrot.lane.b32.xlu0 %v9012_v30, %s9563_s20  ;;  %v5149_v35 = vsel %vm463_vm6, %v5145_v20, %v8796_v63  ;;  %v5148_v28 = vsel %vm463_vm6, %v5144_v50, %v8795_v0  ;;  %v5138_v1 = vsel %vm459_vm4, %v15968_v42, %v8770_v37  ;;  %v8801_v47 = vunpack.i.h.bf16 %v15969_v59  ;;  %v15971_v63 = vld [vmem:[#allocation67_spill] sm:$0xff]  ;;  %v15980_v20 = vld [vmem:[#allocation48_spill] sm:$0xff] }
 0x940   : > { %v8800_v14 = vunpack.i.l.bf16 %v15969_v59  ;;  %v14099_v53 = vsel %vm465_vm7, %v5149_v35, %v8806_v49  ;;  %v14102_v10 = vsel %vm465_vm7, %v5148_v28, %v8805_v61  ;;  %v6027_v23 = vsel %vm369_vm0, %v6026_v46, %v14003_v38 }
 0x941   : > { %9033 = vrot.lane.b32.xlu1 %v9032_v57, %s9572_s15  ;;  %v6139_v3 = vsel %vm369_vm0, %v6138_v41, %v14012_v44  ;;  %v5143_v37 = vsel %vm461_vm5, %v5139_v39, %v8781_v6  ;;  %v5142_v4 = vsel %vm461_vm5, %v5138_v1, %v8780_v56  ;;  %v9027_v0 = vpack.i.bf16 %v15971_v63, %v15970_v8  ;;  %v15972_v57 = vld [vmem:[#allocation34_spill] sm:$0xff]  ;;  %v15983_v39 = vld [vmem:[#allocation63_spill] sm:$0xff]  ;;  %v15987_v8 = vld [vmem:[#allocation24_spill] sm:$0xff] }
 0x942   : > { %8993 = vrot.lane.b32.xlu2 %v8992_v24, %s9561_s30  ;;  %v5147_v51 = vsel %vm463_vm6, %v5143_v37, %v8791_v7  ;;  %v5146_v19 = vsel %vm463_vm6, %v5142_v4, %v8790_v11  ;;  %v9047_v49 = vpack.i.bf16 %v15973_v13, %v15972_v57  ;;  %v9007_v44 = vpack.i.bf16 %v6139_v3, %v6027_v23  ;;  %v15978_v7 = vld [vmem:[#allocation64_spill] sm:$0xff]  ;;  %v15985_v23 = vld [vmem:[#allocation46_spill] sm:$0xff]  ;;  %v15986_v37 = vld [vmem:[#allocation17_spill] sm:$0xff] }
 0x943   : > { %v14117_v61 = vsel %vm465_vm7, %v5147_v51, %v8801_v47  ;;  %v14120_v38 = vsel %vm465_vm7, %v5146_v19, %v8800_v14  ;;  %v6252_v6 = vrot.slane %v14046_v22, 4  ;;  %v6364_v56 = vrot.slane %v6325_v12, 4  ;;  %v14140_v12 = vpop.permute.xlu2 %8888  ;;  %v15984_v14 = vld [vmem:[#allocation39_spill] sm:$0xff] }
 0x944   : > { %v9042_v46 = vpack.i.bf16 %v13532_v58, %v13530_v31  ;;  %v9062_v41 = vpack.i.bf16 %v13582_v33, %v13564_v16  ;;  %v9057_v22 = vpack.i.bf16 %v13598_v2, %v13580_v54  ;;  %v15975_v31 = vld [vmem:[#allocation42_spill] sm:$0xff]  ;;  %v9072_v54 = vpack.i.bf16 %v13632_v52, %v13630_v26  ;;  %v15989_v19 = vld [vmem:[#allocation23_spill] sm:$0xff] }
 0x945   : > { %v6253_v30 = vsel %vm369_vm0, %v14040_v40, %v6252_v6  ;;  %v6365_v24 = vsel %vm369_vm0, %v6349_v32, %v6364_v56  ;;  %v9077_v40 = vpack.i.bf16 %v13671_v9, %v13663_v45  ;;  %v15974_v32 = vld [vmem:[#allocation47_spill] sm:$0xff]  ;;  %v9092_v45 = vpack.i.bf16 %v13675_v60, %v13660_v36  ;;  %v15976_v9 = vld [vmem:[#allocation66_spill] sm:$0xff] }
 0x946   : > { %v9022_v27 = vpack.i.bf16 %v6365_v24, %v6253_v30  ;;  %v9037_v58 = vpack.i.bf16 %v15975_v31, %v15974_v32  ;;  %v9052_v48 = vpack.i.bf16 %v15976_v9, %v13534_v34  ;;  %v6238_v62 = vrot.slane %v13964_v17, 4  ;;  %v15977_v36 = vld [vmem:[#allocation50_spill] sm:$0xff]  ;;  %v15979_v17 = vld [vmem:[#allocation41_spill] sm:$0xff] }
 0x947   : > { %9028 = vrot.lane.b32.xlu0 %v9027_v0, %s9572_s15  ;;  %v6350_v15 = vrot.slane %v13984_v18, 4  ;;  %v9087_v11 = vpack.i.bf16 %v15978_v7, %v15977_v36  ;;  %v9067_v18 = vpack.i.bf16 %v15980_v20, %v15979_v17  ;;  %v5682_v42 = vrot.slane %v15983_v39, 4  ;;  %v15988_v0 = vld [vmem:[#allocation16_spill] sm:$0xff]  ;;  %v15992_v7 = vld [vmem:[#allocation51_spill] sm:$0xff] }
 0x948   : > { %v14162_v26 = vsel %vm369_vm0, %v6238_v62, %v13955_v5  ;;  %v15981_v5 = vld [vmem:[#allocation29_spill] sm:$0xff]  ;;  %v9082_v3 = vpack.i.bf16 %v15985_v23, %v15984_v14  ;;  %v5346_v4 = vrot.slane %v15986_v37, 4  ;;  %v5458_v63 = vrot.slane %v15987_v8, 4 }
 0x949   : > { %9048 = vrot.lane.b32.xlu1 %v9047_v49, %s9572_s15  ;;  %v14147_v33 = vpop.permute.xlu1 %8898  ;;  %v14166_v52 = vsel %vm369_vm0, %v6350_v15, %v13975_v25  ;;  %v5570_v28 = vrot.slane %v15981_v5, 4  ;;  %v9102_v25 = vpack.i.bf16 %v13701_v43, %v15982_v29  ;;  %v8891_v43 = vunpack.i.h.bf16 %v14140_v12  ;;  %v15990_v49 = vld [vmem:[#allocation33_spill] sm:$0xff] }
 0x94a   : > { %9008 = vrot.lane.b32.xlu2 %v9007_v44, %s9563_s20  ;;  %v5683_v57 = vsel %vm369_vm0, %v5682_v42, %v15989_v19  ;;  %v5459_v44 = vsel %vm369_vm0, %v5458_v63, %v15990_v49  ;;  %v8901_v6 = vunpack.i.h.bf16 %v14147_v33  ;;  %v8890_v31 = vunpack.i.l.bf16 %v14140_v12 }
 0x94b   : > { %v8904_v2 = vpop.permute.xlu2 %8903  ;;  %v5571_v51 = vsel %vm369_vm0, %v5570_v28, %v15988_v0  ;;  %v8900_v9 = vunpack.i.l.bf16 %v14147_v33 }
 0x94c   : > { %v8905_v56 = vunpack.i.l.bf16 %v8904_v2 }
 0x94f   : > { %9043 = vrot.lane.b32.xlu0 %v9042_v46, %s9572_s15 }
 0x951   : > { %9063 = vrot.lane.b32.xlu1 %v9062_v41, %s9572_s15  ;;  %v15991_v41 = vld [vmem:[#allocation27_spill] sm:$0xff] }
 0x952   : > { %9023 = vrot.lane.b32.xlu2 %v9022_v27, %s9567_s6  ;;  %v5347_v27 = vsel %vm369_vm0, %v5346_v4, %v15991_v41 }
 0x953   : > { %v14172_v50 = vpop.permute.xlu2 %8918  ;;  %v5810_v33 = vsel %vm453_vm1, %v5347_v27, %v8890_v31  ;;  %v15995_v31 = vld [vmem:[#allocation62_spill] sm:$0xff] }
 0x957   : > { %9058 = vrot.lane.b32.xlu0 %v9057_v22, %s9572_s15  ;;  %v8906_v22 = vunpack.i.h.bf16 %v8904_v2  ;;  %v15993_v2 = vld [vmem:[#allocation52_spill] sm:$0xff] }
 0x959   : > { %9078 = vrot.lane.b32.xlu1 %v9077_v40, %s9572_s15  ;;  %v8894_v16 = vpop.permute.xlu0 %8893  ;;  %v8914_v34 = vpop.permute.xlu1 %8913 }
 0x95a   : > { %9038 = vrot.lane.b32.xlu2 %v9037_v58, %s9572_s15  ;;  %v8895_v1 = vunpack.i.l.bf16 %v8894_v16  ;;  %v8896_v47 = vunpack.i.h.bf16 %v8894_v16  ;;  %v8916_v58 = vunpack.i.h.bf16 %v8914_v34 }
 0x95b   : > { %v8934_v30 = vpop.permute.xlu2 %8933 }
 0x95c   : > { %v5812_v13 = vsel %vm453_vm1, %v5571_v51, %v8895_v1  ;;  %v5813_v24 = vsel %vm453_vm1, %v5683_v57, %v8896_v47  ;;  %v8936_v12 = vunpack.i.h.bf16 %v8934_v30  ;;  %v8935_v39 = vunpack.i.l.bf16 %v8934_v30 }
 0x95d   : > { %v5816_v16 = vsel %vm455_vm2, %v5812_v13, %v8905_v56  ;;  %v5817_v62 = vsel %vm455_vm2, %v5813_v24, %v8906_v22 }
 0x95e   : > { %v5821_v17 = vsel %vm457_vm3, %v5817_v62, %v8916_v58  ;;  %v6126_v58 = vrot.slane %v15995_v31, 4  ;;  %v16015_v31 = vld [vmem:[#allocation15_spill] sm:$0xff] }
 0x95f   : > { %9073 = vrot.lane.b32.xlu0 %v9072_v54, %s9572_s15 }
 0x961   : > { %9093 = vrot.lane.b32.xlu1 %v9092_v45, %s9572_s15  ;;  %v8909_v55 = vpop.permute.xlu0 %8908  ;;  %v5811_v45 = vsel %vm453_vm1, %v5459_v44, %v8891_v43 }
 0x962   : > { %9053 = vrot.lane.b32.xlu2 %v9052_v48, %s9572_s15  ;;  %v14180_v59 = vpop.permute.xlu1 %8928  ;;  %v8911_v40 = vunpack.i.h.bf16 %v8909_v55  ;;  %v8915_v48 = vunpack.i.l.bf16 %v8914_v34  ;;  %v5815_v15 = vsel %vm455_vm2, %v5811_v45, %v8901_v6  ;;  %v8910_v36 = vunpack.i.l.bf16 %v8909_v55  ;;  %v15996_v45 = vld [vmem:[#allocation45_spill] sm:$0xff] }
 0x963   : > { %v8921_v34 = vunpack.i.h.bf16 %v14172_v50  ;;  %v5814_v55 = vsel %vm455_vm2, %v5810_v33, %v8900_v9  ;;  %v8931_v37 = vunpack.i.h.bf16 %v14180_v59  ;;  %v8949_v0 = vpop.permute.xlu2 %8948  ;;  %v8930_v19 = vunpack.i.l.bf16 %v14180_v59 }
 0x964   : > { %v5820_v20 = vsel %vm457_vm3, %v5816_v16, %v8915_v48  ;;  %v5818_v1 = vsel %vm457_vm3, %v5814_v55, %v8910_v36  ;;  %v8951_v56 = vunpack.i.h.bf16 %v8949_v0  ;;  %v8950_v59 = vunpack.i.l.bf16 %v8949_v0  ;;  %v15997_v48 = vld [vmem:[#allocation40_spill] sm:$0xff]  ;;  %v16001_v55 = vld [vmem:[#allocation26_spill] sm:$0xff] }
 0x965   : > { %v6127_v62 = vsel %vm369_vm0, %v6126_v58, %v15997_v48 }
 0x967   : > { %9088 = vrot.lane.b32.xlu0 %v9087_v11, %s9572_s15  ;;  %v9097_v11 = vpack.i.bf16 %v15993_v2, %v15992_v7 }
 0x969   : > { %v8924_v35 = vpop.permute.xlu0 %8923 }
 0x96a   : > { %9068 = vrot.lane.b32.xlu2 %v9067_v18, %s9572_s15  ;;  %v8926_v32 = vunpack.i.h.bf16 %v8924_v35  ;;  %v8925_v54 = vunpack.i.l.bf16 %v8924_v35  ;;  %v5819_v18 = vsel %vm457_vm3, %v5815_v15, %v8911_v40  ;;  %v8944_v35 = vpop.permute.xlu1 %8943  ;;  %v15994_v40 = vld [vmem:[#allocation32_spill] sm:$0xff] }
 0x96b   : > { %v8946_v47 = vunpack.i.h.bf16 %v8944_v35 }
 0x96c   : > { %v5825_v5 = vsel %vm459_vm4, %v5821_v17, %v8926_v32  ;;  %v5824_v28 = vsel %vm459_vm4, %v5820_v20, %v8925_v54  ;;  %v6014_v32 = vrot.slane %v15994_v40, 4 }
 0x96d   : > { %v5829_v42 = vsel %vm461_vm5, %v5825_v5, %v8936_v12  ;;  %v5828_v63 = vsel %vm461_vm5, %v5824_v28, %v8935_v39  ;;  %v16000_v5 = vld [vmem:[#allocation36_spill] sm:$0xff] }
 0x96e   : > { %v5833_v43 = vsel %vm463_vm6, %v5829_v42, %v8946_v47  ;;  %v6015_v9 = vsel %vm369_vm0, %v6014_v32, %v15996_v45 }
 0x96f   : > { %9103 = vrot.lane.b32.xlu0 %v9102_v25, %s9572_s15  ;;  %v8920_v25 = vunpack.i.l.bf16 %v14172_v50  ;;  %v8945_v50 = vunpack.i.l.bf16 %v8944_v35 }
 0x971   : > { %v8939_v46 = vpop.permute.xlu0 %8938  ;;  %v5822_v49 = vsel %vm459_vm4, %v5818_v1, %v8920_v25  ;;  %v5832_v44 = vsel %vm463_vm6, %v5828_v63, %v8945_v50  ;;  %v16002_v25 = vld [vmem:[#allocation20_spill] sm:$0xff] }
 0x972   : > { %9083 = vrot.lane.b32.xlu2 %v9082_v3, %s9572_s15  ;;  %v8941_v14 = vunpack.i.h.bf16 %v8939_v46  ;;  %v5823_v3 = vsel %vm459_vm4, %v5819_v18, %v8921_v34  ;;  %v8940_v51 = vunpack.i.l.bf16 %v8939_v46  ;;  %v5826_v24 = vsel %vm461_vm5, %v5822_v49, %v8930_v19 }
 0x973   : > { %v5827_v13 = vsel %vm461_vm5, %v5823_v3, %v8931_v37 }
 0x974   : > { %v5831_v6 = vsel %vm463_vm6, %v5827_v13, %v8941_v14  ;;  %v5830_v46 = vsel %vm463_vm6, %v5826_v24, %v8940_v51  ;;  %v16004_v14 = vld [vmem:[#allocation38_spill] sm:$0xff]  ;;  %v9112_v13 = vpack.i.bf16 %v15982_v29, %v13675_v60 }
 0x975   : > { %v5835_v27 = vsel %vm465_vm7, %v5831_v6, %v8951_v56  ;;  %v5834_v22 = vsel %vm465_vm7, %v5830_v46, %v8950_v59 }
 0x977   : > { %9113 = vrot.lane.b32.xlu0 %v9112_v13, %s9573_s29 }
 0x979   : > { %v8954_v23 = vpop.permute.xlu0 %8953 }
 0x97a   : > { %9098 = vrot.lane.b32.xlu2 %v9097_v11, %s9572_s15  ;;  %v8955_v4 = vunpack.i.l.bf16 %v8954_v23  ;;  %v8956_v8 = vunpack.i.h.bf16 %v8954_v23  ;;  %s16140_s15 = sld [smem:[#allocation82_spill]] }
 0x97c   : > { %v5837_v57 = vsel %vm465_vm7, %v5833_v43, %v8956_v8  ;;  %v5836_v30 = vsel %vm465_vm7, %v5832_v44, %v8955_v4  ;;  %v8959_v41 = vpop.permute.xlu1 %8958 }
 0x97d   : > { %5847 = vmatpush.msra.mxu0 %v5837_v57  ;;  %v8961_v16 = vunpack.i.h.bf16 %v8959_v41  ;;  %v8960_v54 = vunpack.i.l.bf16 %v8959_v41 }
 0x97f   : > { %5848 = vmatpush.msra.mxu0 %v5836_v30 }
 0x980   : > { %s9452_s11 = scalar_lea.hbm %s16140_s15, 32 }
 0x981   : > { %5849 = vmatpush.msra.mxu0 %v5835_v27 }
 0x983   : > { %5850 = vmatpush.msra.mxu0 %v5834_v22 }
 0x985   : > { %5851 = vmatpush.msra.mxu0 %v14099_v53  ;;  %v6479_v53 = vsel %vm453_vm1, %v6127_v62, %v8961_v16 }
 0x987   : > { %5852 = vmatpush.msra.mxu0 %v14102_v10  ;;  %v6478_v10 = vsel %vm453_vm1, %v6015_v9, %v8960_v54 }
 0x989   : > { %5853 = vmatpush.msra.mxu0 %v14117_v61  ;;  %v8974_v15 = vpop.permute.xlu1 %8973 }
 0x98a   : > { %v8976_v2 = vunpack.i.h.bf16 %v8974_v15  ;;  %v8975_v11 = vunpack.i.l.bf16 %v8974_v15 }
 0x98b   : > { %v8969_v36 = vpop.permute.xlu0 %8968  ;;  %5854 = vmatpush.msra.mxu0 %v14120_v38 }
 0x98c   : > { %v8964_v7 = vpop.permute.xlu2 %8963  ;;  %v8971_v17 = vunpack.i.h.bf16 %v8969_v36  ;;  %v8970_v12 = vunpack.i.l.bf16 %v8969_v36 }
 0x98d   : > { %v8966_v20 = vunpack.i.h.bf16 %v8964_v7  ;;  %v8965_v18 = vunpack.i.l.bf16 %v8964_v7  ;;  %5855 = vmatpush.msra.mxu0 %v16000_v5 }
 0x98e   : > { %v14248_v35 = vsel %vm455_vm2, %v6478_v10, %v8970_v12  ;;  %v14251_v61 = vsel %vm455_vm2, %v6479_v53, %v8971_v17 }
 0x98f   : > { %15998 = vst [vmem:[#allocation58_spill] sm:$0xff] %v14248_v35  ;;  %v6481_v33 = vsel %vm453_vm1, %v14166_v52, %v8966_v20  ;;  %v6480_v38 = vsel %vm453_vm1, %v14162_v26, %v8965_v18  ;;  %5856 = vmatpush.msra.mxu0 %v16001_v55 }
 0x990   : > { %15999 = vst [vmem:[#allocation61_spill] sm:$0xff] %v14251_v61  ;;  %v6484_v34 = vsel %vm455_vm2, %v6480_v38, %v8975_v11  ;;  %v6485_v28 = vsel %vm455_vm2, %v6481_v33, %v8976_v2 }
 0x991   : > { %5857 = vmatpush.msra.mxu0 %v16002_v25 }
 0x993   : > { %v8984_v39 = vpop.permute.xlu0 %8983  ;;  %5858 = vmatpush.msra.mxu0 %v16004_v14 }
 0x994   : > { %v14262_v42 = vpop.permute.xlu2 %8978  ;;  %v8986_v1 = vunpack.i.h.bf16 %v8984_v39  ;;  %v8985_v47 = vunpack.i.l.bf16 %v8984_v39 }
 0x995   : > { %16003 = vst [vmem:[#allocation74_spill] sm:$0xff] %v14262_v42 }
 0x996   : > { %v14266_v52 = vsel %vm457_vm3, %v6484_v34, %v8985_v47  ;;  %v14269_v26 = vsel %vm457_vm3, %v6485_v28, %v8986_v1 }
 0x997   : > { %16005 = vst [vmem:[#allocation76_spill] sm:$0xff] %v14266_v52 }
 0x998   : > { %16006 = vst [vmem:[#allocation79_spill] sm:$0xff] %v14269_v26 }
 0x999   : > { %v14271_v23 = vpop.permute.xlu1 %8988 }
 0x99a   : > { %16007 = vst [vmem:[#allocation81_spill] sm:$0xff] %v14271_v23 }
 0x99c   : > { %v14273_v3 = vpop.permute.xlu2 %8993 }
 0x99d   : > { %16008 = vst [vmem:[#allocation60_spill] sm:$0xff] %v14273_v3 }
 0x9a1   : > { %v14279_v8 = vpop.permute.xlu0 %8998 }
 0x9a2   : > { %16011 = vst [vmem:[#allocation49_spill] sm:$0xff] %v14279_v8 }
 0x9a3   : > { %v14275_v37 = vpop.permute.xlu1 %9003 }
 0x9a4   : > { %16009 = vst [vmem:[#allocation59_spill] sm:$0xff] %v14275_v37  ;;  %v14277_v4 = vpop.permute.xlu2 %9008 }
 0x9a5   : > { %16010 = vst [vmem:[#allocation57_spill] sm:$0xff] %v14277_v4 }
 0x9ab   : > { %v14281_v63 = vpop.permute.xlu1 %9018 }
 0x9ac   : > { %16012 = vst [vmem:[#allocation54_spill] sm:$0xff] %v14281_v63  ;;  %v14283_v0 = vpop.permute.xlu2 %9023 }
 0x9ad   : > { %16013 = vst [vmem:[#allocation78_spill] sm:$0xff] %v14283_v0 }
 0x9b1   : > { %v14285_v50 = vpop.permute.xlu0 %9013 }
 0x9b2   : > { %16014 = vst [vmem:[#allocation80_spill] sm:$0xff] %v14285_v50 }
 0x9b3   : > { %v9034_v51 = vpop.permute.xlu1 %9033 }
 0x9b4   : > { %v14287_v43 = vpop.permute.xlu2 %9038  ;;  %v9036_v19 = vunpack.i.h.bf16 %v9034_v51  ;;  %v9035_v57 = vunpack.i.l.bf16 %v9034_v51 }
 0x9b5   : > { %v9041_v48 = vunpack.i.h.bf16 %v14287_v43  ;;  %v9040_v12 = vunpack.i.l.bf16 %v14287_v43 }
 0x9b6   : > { %v6646_v49 = vrot.slane %v9036_v19, 4  ;;  %v6634_v44 = vrot.slane %v9035_v57, 4 }
 0x9b7   : > { %v6672_v25 = vrot.slane %v9041_v48, 4  ;;  %v6660_v14 = vrot.slane %v9040_v12, 4 }
 0x9b9   : > { %v9029_v6 = vpop.permute.xlu0 %9028 }
 0x9ba   : > { %v9031_v56 = vunpack.i.h.bf16 %v9029_v6  ;;  %v9030_v30 = vunpack.i.l.bf16 %v9029_v6 }
 0x9bb   : > { %v9049_v24 = vpop.permute.xlu1 %9048 }
 0x9bc   : > { %v9054_v46 = vpop.permute.xlu2 %9053  ;;  %v9051_v59 = vunpack.i.h.bf16 %v9049_v24  ;;  %v9050_v41 = vunpack.i.l.bf16 %v9049_v24  ;;  %v6648_v27 = vrot.slane %v9031_v56, 4  ;;  %v6635_v22 = vsel %vm369_vm0, %v6634_v44, %v9030_v30 }
 0x9bd   : > { %v6636_v40 = vrot.slane %v9030_v30, 4  ;;  %v6647_v32 = vsel %vm369_vm0, %v6646_v49, %v9031_v56  ;;  %v14295_v58 = vperm.slane %v6635_v22, %v16015_v31  ;;  %v9056_v60 = vunpack.i.h.bf16 %v9054_v46 }
 0x9be   : > { %v9055_v29 = vunpack.i.l.bf16 %v9054_v46  ;;  %v6649_v54 = vsel %vm369_vm0, %v9036_v19, %v6648_v27  ;;  %v6760_v45 = vrot.slane %v9051_v59, 4  ;;  %v6748_v9 = vrot.slane %v9050_v41, 4 }
 0x9bf   : > { %v6637_v16 = vsel %vm369_vm0, %v9035_v57, %v6636_v40  ;;  %v14304_v15 = vperm.slane %v6647_v32, %v16015_v31  ;;  %v6684_v36 = vrot.slane %v14295_v58, 4  ;;  %v6758_v7 = vrot.slane %v9056_v60, 4 }
 0x9c0   : > { %v14301_v62 = vperm.slane %v6637_v16, %v16015_v31  ;;  %v6746_v2 = vrot.slane %v9055_v29, 4  ;;  %v6749_v11 = vsel %vm369_vm0, %v9055_v29, %v6748_v9  ;;  %v6761_v17 = vsel %vm369_vm0, %v9056_v60, %v6760_v45 }
 0x9c1   : > { %v14311_v53 = vperm.slane %v6649_v54, %v16015_v31  ;;  %v14315_v10 = vsel %vm369_vm0, %v14304_v15, %v6684_v36  ;;  %v9044_v18 = vpop.permute.xlu0 %9043  ;;  %v14320_v33 = vperm.slane %v6749_v11, %v16015_v31  ;;  %v6759_v28 = vsel %vm369_vm0, %v6758_v7, %v9051_v59 }
 0x9c2   : > { %16016 = vst [vmem:[#allocation56_spill] sm:$0xff] %v14301_v62  ;;  %v6696_v20 = vrot.slane %v14301_v62, 4  ;;  %v6747_v5 = vsel %vm369_vm0, %v6746_v2, %v9050_v41  ;;  %v14331_v39 = vperm.slane %v6761_v17, %v16015_v31  ;;  %v9046_v47 = vunpack.i.h.bf16 %v9044_v18 }
 0x9c3   : > { %16017 = vst [vmem:[#allocation55_spill] sm:$0xff] %v14311_v53  ;;  %v14327_v34 = vperm.slane %v6747_v5, %v16015_v31  ;;  %v9064_v55 = vpop.permute.xlu1 %9063  ;;  %v6808_v1 = vrot.slane %v14320_v33, 4  ;;  %v6765_v51 = vperm.slane %v6759_v28, %v16015_v31  ;;  %v9045_v19 = vunpack.i.l.bf16 %v9044_v18 }
 0x9c4   : > { %16018 = vst [vmem:[#allocation73_spill] sm:$0xff] %v14320_v33  ;;  %v14324_v38 = vsel %vm369_vm0, %v14311_v53, %v6696_v20  ;;  %v6670_v13 = vrot.slane %v9046_v47, 4  ;;  %v6673_v49 = vsel %vm369_vm0, %v9046_v47, %v6672_v25  ;;  %v9066_v44 = vunpack.i.h.bf16 %v9064_v55  ;;  %v14345_v24 = vpop.permute.xlu2 %9068 }
 0x9c5   : > { %16019 = vst [vmem:[#allocation75_spill] sm:$0xff] %v14331_v39  ;;  %v6796_v43 = vrot.slane %v14327_v34, 4  ;;  %v14338_v57 = vsel %vm369_vm0, %v14331_v39, %v6808_v1  ;;  %v6658_v56 = vrot.slane %v9045_v19, 4  ;;  %v6661_v30 = vsel %vm369_vm0, %v9045_v19, %v6660_v14 }
 0x9c6   : > { %v6669_v46 = vperm.slane %v6661_v30, %v16015_v31  ;;  %v6671_v41 = vsel %vm369_vm0, %v6670_v13, %v9041_v48  ;;  %v6681_v27 = vperm.slane %v6673_v49, %v16015_v31  ;;  %v6782_v60 = vrot.slane %v9066_v44, 4 }
 0x9c7   : > { %v14342_v6 = vsel %vm369_vm0, %v6765_v51, %v6796_v43  ;;  %v6659_v59 = vsel %vm369_vm0, %v6658_v56, %v9040_v12  ;;  %v9065_v29 = vunpack.i.l.bf16 %v9064_v55  ;;  %v6677_v9 = vperm.slane %v6671_v41, %v16015_v31 }
 0x9c8   : > { %v14352_v40 = vperm.slane %v6659_v59, %v16015_v31  ;;  %v6720_v32 = vrot.slane %v6669_v46, 4  ;;  %v6718_v16 = vrot.slane %v6681_v27, 4  ;;  %v6682_v5 = vrot.slane %v14304_v15, 4 }
 0x9c9   : > { %v9059_v22 = vpop.permute.xlu0 %9058  ;;  %v6770_v48 = vrot.slane %v9065_v29, 4  ;;  %v6794_v1 = vrot.slane %v6765_v51, 4  ;;  %v9071_v43 = vunpack.i.h.bf16 %v14345_v24  ;;  %v15622_v15 = vunpack.i.l.bf16 %v14345_v24 }
 0x9ca   : > { %v9061_v54 = vunpack.i.h.bf16 %v9059_v22  ;;  %v9060_v45 = vunpack.i.l.bf16 %v9059_v22  ;;  %v6708_v36 = vrot.slane %v14352_v40, 4  ;;  %v14357_v7 = vsel %vm369_vm0, %v6681_v27, %v6720_v32 }
 0x9cb   : > { %v14360_v2 = vsel %vm369_vm0, %v6718_v16, %v6669_v46  ;;  %v6872_v51 = vrot.slane %v9071_v43, 4  ;;  %v6683_v59 = vsel %vm369_vm0, %v6682_v5, %v14295_v58  ;;  %v6860_v27 = vrot.slane %v15622_v15, 4  ;;  %v9079_v58 = vpop.permute.xlu1 %9078  ;;  %v9372_v5 = vld [vmem:[#allocation2 + $0x162] sm:$0xff] }
 0x9cc   : > { %v6784_v11 = vrot.slane %v9061_v54, 4  ;;  %v6772_v17 = vrot.slane %v9060_v45, 4  ;;  %v14363_v12 = vsel %vm369_vm0, %v6677_v9, %v6708_v36  ;;  %v6771_v20 = vsel %vm369_vm0, %v6770_v48, %v9060_v45  ;;  %v9084_v56 = vpop.permute.xlu2 %9083 }
 0x9cd   : > { %v6783_v18 = vsel %vm369_vm0, %v6782_v60, %v9061_v54  ;;  %v6777_v55 = vperm.slane %v6771_v20, %v16015_v31  ;;  %v6795_v32 = vsel %vm369_vm0, %v6794_v1, %v14327_v34  ;;  %v9086_v16 = vunpack.i.h.bf16 %v9084_v56 }
 0x9ce   : > { %v6773_v28 = vsel %vm369_vm0, %v9065_v29, %v6772_v17  ;;  %v6785_v25 = vsel %vm369_vm0, %v9066_v44, %v6784_v11  ;;  %v6789_v47 = vperm.slane %v6783_v18, %v16015_v31  ;;  %v9085_v44 = vunpack.i.l.bf16 %v9084_v56 }
 0x9cf   : > { %v14373_v14 = vperm.slane %v6785_v25, %v16015_v31  ;;  %v14377_v19 = vperm.slane %v6773_v28, %v16015_v31  ;;  %v6820_v13 = vrot.slane %v6777_v55, 4  ;;  %v6706_v54 = vrot.slane %v6677_v9, 4  ;;  %v9373_v9 = vld [vmem:[#allocation2 + $0x1c2] sm:$0xff] }
 0x9d0   : > { %v6818_v30 = vrot.slane %v6789_v47, 4  ;;  %v6882_v17 = vrot.slane %v9085_v44, 4  ;;  %v14401_v20 = vperm.slane %v6683_v59, %v9745_v21  ;;  %v14404_v34 = vperm.slane %v6795_v32, %v9745_v21 }
 0x9d1   : > { %16020 = vst [vmem:[#allocation53_spill] sm:$0xff] %v14373_v14  ;;  %v9074_v49 = vpop.permute.xlu0 %9073  ;;  %v6830_v46 = vrot.slane %v14373_v14, 4  ;;  %v14386_v41 = vsel %vm369_vm0, %v6789_v47, %v6820_v13  ;;  %v9127_v28 = vpack.i.bf16 %v9373_v9, %v9372_v5  ;;  %v6894_v1 = vrot.slane %v9086_v16, 4 }
 0x9d2   : > { %16021 = vst [vmem:[#allocation30_spill] sm:$0xff] %v14377_v19  ;;  %v9075_v22 = vunpack.i.l.bf16 %v9074_v49  ;;  %v9076_v29 = vunpack.i.h.bf16 %v9074_v49  ;;  %v6819_v36 = vsel %vm369_vm0, %v6818_v30, %v6777_v55  ;;  %v9081_v47 = vunpack.i.h.bf16 %v9079_v58 }
 0x9d3   : > { %v14394_v60 = vsel %vm369_vm0, %v6830_v46, %v14377_v19  ;;  %16022 = vst [vmem:[#allocation28_spill] sm:$0xff] %v14401_v20  ;;  %v9080_v55 = vunpack.i.l.bf16 %v9079_v58  ;;  %v14408_v13 = vperm.slane %v6819_v36, %v9745_v21  ;;  %9128 = vrot.lane.b32.xlu0 %v9127_v28, %s9573_s29  ;;  %v6707_v30 = vsel %vm369_vm0, %v6706_v54, %v14352_v40 }
 0x9d4   : > { %v6861_v45 = vsel %vm369_vm0, %v9075_v22, %v6860_v27  ;;  %v6873_v11 = vsel %vm369_vm0, %v9076_v29, %v6872_v51  ;;  %16023 = vst [vmem:[#allocation31_spill] sm:$0xff] %v14404_v34  ;;  %v6870_v49 = vrot.slane %v9076_v29, 4  ;;  %v6858_v51 = vrot.slane %v9075_v22, 4 }
 0x9d5   : > { %v6869_v48 = vperm.slane %v6861_v45, %v16015_v31  ;;  %v6881_v18 = vperm.slane %v6873_v11, %v16015_v31  ;;  %16024 = vst [vmem:[#allocation77_spill] sm:$0xff] %v14408_v13  ;;  %v6896_v27 = vrot.slane %v9081_v47, 4  ;;  %v6883_v32 = vsel %vm369_vm0, %v6882_v17, %v9080_v55 }
 0x9d6   : > { %v6884_v58 = vrot.slane %v9080_v55, 4  ;;  %v14421_v29 = vperm.slane %v6883_v32, %v16015_v31  ;;  %v6732_v36 = vrot.slane %v14401_v20, 4  ;;  %v6895_v11 = vsel %vm369_vm0, %v6894_v1, %v9081_v47  ;;  %v9094_v1 = vpop.permute.xlu1 %9093 }
 0x9d7   : > { %v6920_v25 = vrot.slane %v6869_v48, 4  ;;  %v6918_v56 = vrot.slane %v6881_v18, 4  ;;  %v6897_v40 = vsel %vm369_vm0, %v9086_v16, %v6896_v27  ;;  %v14427_v22 = vperm.slane %v6707_v30, %v9745_v21  ;;  %v9099_v30 = vpop.permute.xlu2 %9098 }
 0x9d8   : > { %v6844_v54 = vrot.slane %v14404_v34, 4  ;;  %v6885_v17 = vsel %vm369_vm0, %v9085_v44, %v6884_v58  ;;  %v6932_v5 = vrot.slane %v14421_v29, 4  ;;  %v6871_v27 = vsel %vm369_vm0, %v6870_v49, %v9071_v43 }
 0x9d9   : > { %v9089_v46 = vpop.permute.xlu0 %9088  ;;  %v14414_v59 = vsel %vm369_vm0, %v6881_v18, %v6920_v25  ;;  %v14418_v45 = vsel %vm369_vm0, %v6918_v56, %v6869_v48  ;;  %16025 = vst [vmem:[#allocation25_spill] sm:$0xff] %v14427_v22  ;;  %v14432_v48 = vperm.slane %v6895_v11, %v16015_v31  ;;  %v6905_v18 = vperm.slane %v6897_v40, %v16015_v31  ;;  %v9375_v11 = vld [vmem:[#allocation2 + $0x182] sm:$0xff] }
 0x9da   : > { %v6893_v9 = vperm.slane %v6885_v17, %v16015_v31  ;;  %v6733_v28 = vsel %vm369_vm0, %v14427_v22, %v6732_v36  ;;  %v6845_v16 = vsel %vm369_vm0, %v14408_v13, %v6844_v54  ;;  %v9091_v25 = vunpack.i.h.bf16 %v9089_v46  ;;  %v9374_v36 = vld [vmem:[#allocation2 + $0x172] sm:$0xff] }
 0x9db   : > { %v14443_v44 = vsel %vm369_vm0, %v14432_v48, %v6932_v5  ;;  %v6942_v47 = vrot.slane %v6905_v18, 4  ;;  %v9107_v55 = vpack.i.bf16 %v6845_v16, %v6733_v28  ;;  %v9090_v56 = vunpack.i.l.bf16 %v9089_v46  ;;  %v9392_v22 = vld [vmem:[#allocation2 + $0xf2] sm:$0xff] }
 0x9dc   : > { %v6944_v32 = vrot.slane %v6893_v9, 4  ;;  %v6984_v58 = vrot.slane %v9091_v25, 4  ;;  %v9142_v40 = vpack.i.bf16 %v9375_v11, %v9374_v36  ;;  %v9096_v5 = vunpack.i.h.bf16 %v9094_v1 }
 0x9dd   : > { %v14449_v54 = vsel %vm369_vm0, %v6942_v47, %v6893_v9  ;;  %9108 = vrot.lane.b32.xlu1 %v9107_v55, %s15710_s8  ;;  %v6972_v17 = vrot.slane %v9090_v56, 4  ;;  %v9095_v15 = vunpack.i.l.bf16 %v9094_v1  ;;  %v16026_v46 = vunpack.i.l.bf16 %v14345_v24 }
 0x9de   : > { %v14456_v16 = vsel %vm369_vm0, %v6905_v18, %v6944_v32  ;;  %9143 = vrot.lane.b32.xlu0 %v9142_v40, %s9573_s29  ;;  %v9101_v43 = vunpack.i.h.bf16 %v9099_v30  ;;  %v9100_v49 = vunpack.i.l.bf16 %v9099_v30  ;;  %v14460_v36 = vperm.slane %v6871_v27, %v16015_v31  ;;  %v9376_v27 = vld [vmem:[#allocation2 + $0x132] sm:$0xff] }
 0x9df   : > { %v6859_v28 = vsel %vm369_vm0, %v6858_v51, %v16026_v46  ;;  %v6982_v9 = vrot.slane %v9096_v5, 4  ;;  %v6985_v47 = vsel %vm369_vm0, %v9096_v5, %v6984_v58  ;;  %v6970_v55 = vrot.slane %v9095_v15, 4  ;;  %v9377_v40 = vld [vmem:[#allocation2 + $0x192] sm:$0xff] }
 0x9e0   : > { %v6993_v1 = vperm.slane %v6985_v47, %v16015_v31  ;;  %v6973_v24 = vsel %vm369_vm0, %v9095_v15, %v6972_v17  ;;  %v7008_v51 = vrot.slane %v9101_v43, 4  ;;  %v6996_v46 = vrot.slane %v9100_v49, 4 }
 0x9e1   : > { %v9104_v11 = vpop.permute.xlu0 %9103  ;;  %v14466_v18 = vsel %vm369_vm0, %v6982_v9, %v9091_v25  ;;  %v14469_v32 = vsel %vm369_vm0, %v6970_v55, %v9090_v56  ;;  %v6981_v30 = vperm.slane %v6973_v24, %v16015_v31  ;;  %v9117_v20 = vpack.i.bf16 %v9377_v40, %v9376_v27 }
 0x9e2   : > { %v14473_v58 = vperm.slane %v6859_v28, %v16015_v31  ;;  %v7030_v5 = vrot.slane %v6993_v1, 4  ;;  %v9106_v47 = vunpack.i.h.bf16 %v9104_v11  ;;  %v9105_v15 = vunpack.i.l.bf16 %v9104_v11 }
 0x9e3   : > { %v7032_v34 = vrot.slane %v6981_v30, 4  ;;  %v6906_v17 = vrot.slane %v14460_v36, 4  ;;  %v6930_v25 = vrot.slane %v14432_v48, 4 }
 0x9e4   : > { %v14478_v9 = vsel %vm369_vm0, %v7030_v5, %v6981_v30  ;;  %v7006_v56 = vrot.slane %v9106_v47, 4  ;;  %v7009_v55 = vsel %vm369_vm0, %v9106_v47, %v7008_v51  ;;  %v6994_v28 = vrot.slane %v9105_v15, 4  ;;  %v9378_v47 = vld [vmem:[#allocation2 + $0xa2] sm:$0xff] }
 0x9e5   : > { %v14482_v24 = vsel %vm369_vm0, %v6993_v1, %v7032_v34  ;;  %9118 = vrot.lane.b32.xlu1 %v9117_v20, %s9573_s29  ;;  %v6997_v27 = vsel %vm369_vm0, %v9105_v15, %v6996_v46  ;;  %v7017_v48 = vperm.slane %v7009_v55, %v16015_v31  ;;  %v6907_v51 = vsel %vm369_vm0, %v6906_v17, %v14473_v58  ;;  %v9381_v55 = vld [vmem:[#allocation2 + $0x1d2] sm:$0xff] }
 0x9e6   : > { %v7005_v11 = vperm.slane %v6997_v27, %v16015_v31  ;;  %v14488_v40 = vsel %vm369_vm0, %v7006_v56, %v9101_v43  ;;  %v14492_v30 = vsel %vm369_vm0, %v6994_v28, %v9100_v49  ;;  %v6931_v34 = vsel %vm369_vm0, %v6930_v25, %v14421_v29  ;;  %v9379_v43 = vld [vmem:[#allocation2 + $0x92] sm:$0xff] }
 0x9e7   : > { %v7054_v20 = vrot.slane %v7017_v48, 4  ;;  %v6913_v46 = vperm.slane %v6907_v51, %v9745_v21  ;;  %v6937_v5 = vperm.slane %v6931_v34, %v9745_v21  ;;  %v9157_v15 = vpack.i.bf16 %v9378_v47, %v9379_v43  ;;  %v9380_v56 = vld [vmem:[#allocation2 + $0xb2] sm:$0xff]  ;;  %v9384_v47 = vld [vmem:[#allocation2 + $0x1a2] sm:$0xff] }
 0x9e8   : > { %v7056_v1 = vrot.slane %v7005_v11, 4  ;;  %v9132_v27 = vpack.i.bf16 %v9380_v56, %v9381_v55  ;;  %v9382_v25 = vld [vmem:[#allocation2 + $0x12] sm:$0xff] }
 0x9e9   : > { %v14501_v49 = vsel %vm369_vm0, %v7054_v20, %v7005_v11  ;;  %v6956_v28 = vrot.slane %v6913_v46, 4  ;;  %9158 = vrot.lane.b32.xlu0 %v9157_v15, %s9573_s29  ;;  %v9383_v51 = vld [vmem:[#allocation2 + $0xd2] sm:$0xff]  ;;  %v9386_v11 = vld [vmem:[#allocation2 + $0xe2] sm:$0xff] }
 0x9ea   : > { %v14504_v17 = vsel %vm369_vm0, %v7017_v48, %v7056_v1  ;;  %v9172_v34 = vpack.i.bf16 %v9382_v25, %v9383_v51  ;;  %v9385_v43 = vld [vmem:[#allocation2 + $0x1f2] sm:$0xff]  ;;  %v9387_v20 = vld [vmem:[#allocation2 + $0x142] sm:$0xff] }
 0x9eb   : > { %v6957_v29 = vsel %vm369_vm0, %v6937_v5, %v6956_v28  ;;  %v9122_v56 = vpack.i.bf16 %v9385_v43, %v9384_v47  ;;  %v9147_v55 = vpack.i.bf16 %v9387_v20, %v9386_v11  ;;  %v9388_v48 = vld [vmem:[#allocation2 + $0x2] sm:$0xff]  ;;  %v9389_v1 = vld [vmem:[#allocation2 + $0x52] sm:$0xff] }
 0x9ec   : > { %7090 = vrot.lane.b32.xlu2 %v6957_v29, %s15710_s8  ;;  %v9187_v15 = vpack.i.bf16 %v9388_v48, %v9389_v1  ;;  %v9390_v28 = vld [vmem:[#allocation2 + $0x122] sm:$0xff]  ;;  %v9395_v47 = vld [vmem:[#allocation2 + $0x152] sm:$0xff] }
 0x9ed   : > { %9133 = vrot.lane.b32.xlu1 %v9132_v27, %s9573_s29  ;;  %v9391_v27 = vld [vmem:[#allocation2 + $0x112] sm:$0xff]  ;;  %v9393_v25 = vld [vmem:[#allocation2 + $0x102] sm:$0xff] }
 0x9ee   : > { %v9137_v29 = vpack.i.bf16 %v9390_v28, %v9391_v27  ;;  %v9162_v51 = vpack.i.bf16 %v9393_v25, %v9392_v22  ;;  %v9397_v11 = vld [vmem:[#allocation2 + $0x72] sm:$0xff]  ;;  %v9399_v48 = vld [vmem:[#allocation2 + $0xc2] sm:$0xff]  ;;  %v6954_v27 = vrot.slane %v6937_v5, 4  ;;  %v14521_v25 = vpop.permute.xlu0 %9113 }
 0x9ef   : > { %v9400_v22 = vld [vmem:[#allocation2 + $0x42] sm:$0xff] }
 0x9f1   : > { %9173 = vrot.lane.b32.xlu0 %v9172_v34, %s9573_s29  ;;  %v9394_v34 = vld [vmem:[#allocation2 + $0x32] sm:$0xff] }
 0x9f2   : > { %v9152_v43 = vpack.i.bf16 %v9394_v34, %v9395_v47  ;;  %v14544_v47 = vperm.slane %v14315_v10, %v9745_v21  ;;  %v14560_v10 = vperm.slane %v14342_v6, %v9745_v21  ;;  %v6908_v6 = vrot.slane %v14473_v58, 4 }
 0x9f3   : > { %v14581_v34 = vperm.slane %v14469_v32, %v16015_v31  ;;  %v14596_v58 = vperm.slane %v14418_v45, %v9745_v21  ;;  %v14600_v32 = vperm.slane %v14414_v59, %v9745_v21  ;;  %v14615_v45 = vperm.slane %v14466_v18, %v16015_v31 }
 0x9f4   : > { %9123 = vrot.lane.b32.xlu2 %v9122_v56, %s9573_s29  ;;  %v9396_v56 = vld [vmem:[#allocation2 + $0x22] sm:$0xff]  ;;  %16027 = vst [vmem:[#allocation21_spill] sm:$0xff] %v14544_v47  ;;  %v14630_v18 = vperm.slane %v14478_v9, %v9745_v21  ;;  %v14650_v9 = vperm.slane %v14501_v49, %v9745_v21 }
 0x9f5   : > { %9148 = vrot.lane.b32.xlu1 %v9147_v55, %s9573_s29  ;;  %v9177_v20 = vpack.i.bf16 %v9397_v11, %v9396_v56  ;;  %v9398_v55 = vld [vmem:[#allocation2 + $0x62] sm:$0xff]  ;;  %16030 = vst [vmem:[#allocation68_spill] sm:$0xff] %v14560_v10  ;;  %v7020_v59 = vrot.slane %v14581_v34, 4  ;;  %v6964_v35 = vrot.slane %v14596_v58, 4 }
 0x9f6   : > { %v9167_v1 = vpack.i.bf16 %v9399_v48, %v9398_v55  ;;  %v14576_v55 = vperm.slane %v14360_v2, %v9745_v21  ;;  %v14592_v2 = vperm.slane %v14394_v60, %v9745_v21  ;;  %16036 = vst [vmem:[#allocation22_spill] sm:$0xff] %v14600_v32  ;;  %v15627_v60 = vunpack.i.l.bf16 %v14521_v25 }
 0x9f7   : > { %v7074_v63 = vrot.slane %v14650_v9, 4 }
 0x9f8   : > { %16033 = vst [vmem:[#allocation18_spill] sm:$0xff] %v14576_v55 }
 0x9f9   : > { %9188 = vrot.lane.b32.xlu0 %v9187_v15, %s9573_s29  ;;  %v9401_v15 = vld [vmem:[#allocation2 + $0x82] sm:$0xff]  ;;  %16035 = vst [vmem:[#allocation35_spill] sm:$0xff] %v14592_v2 }
 0x9fa   : > { %v9182_v28 = vpack.i.bf16 %v9400_v22, %v9401_v15  ;;  %v14549_v22 = vperm.slane %v14324_v38, %v9745_v21  ;;  %v14554_v15 = vperm.slane %v14338_v57, %v9745_v21  ;;  %v14572_v57 = vperm.slane %v14363_v12, %v9745_v21 }
 0x9fb   : > { %v6941_v12 = vperm.slane %v14443_v44, %v9745_v21  ;;  %v14609_v44 = vperm.slane %v14456_v16, %v9745_v21 }
 0x9fc   : > { %9138 = vrot.lane.b32.xlu2 %v9137_v29, %s9573_s29  ;;  %v6955_v29 = vsel %vm369_vm0, %v6954_v27, %v6913_v46  ;;  %v9116_v46 = vunpack.i.h.bf16 %v14521_v25  ;;  %16028 = vst [vmem:[#allocation69_spill] sm:$0xff] %v14549_v22 }
 0x9fd   : > { %9163 = vrot.lane.b32.xlu1 %v9162_v51, %s9573_s29  ;;  %16029 = vst [vmem:[#allocation70_spill] sm:$0xff] %v14554_v15  ;;  %v14605_v51 = vperm.slane %v14449_v54, %v9745_v21  ;;  %v6909_v54 = vsel %vm369_vm0, %v14460_v36, %v6908_v6  ;;  %v14638_v36 = vperm.slane %v14488_v40, %v16015_v31  ;;  %v7666_v40 = vrot.slane %v15627_v60, 4 }
 0x9fe   : > { %v7678_v27 = vrot.slane %v9116_v46, 4  ;;  %v6917_v56 = vperm.slane %v6909_v54, %v9745_v21 }
 0x9ff   : > { %v6962_v23 = vrot.slane %v14605_v51, 4 }
 0xa00   : > { %v6960_v0 = vrot.slane %v6917_v56, 4 }
 0xa04   : > { %9153 = vrot.lane.b32.xlu2 %v9152_v43, %s9573_s29 }
 0xa05   : > { %9178 = vrot.lane.b32.xlu1 %v9177_v20, %s9573_s29  ;;  %v14564_v20 = vperm.slane %v14357_v7, %v9745_v21  ;;  %v14585_v7 = vperm.slane %v14386_v41, %v9745_v21 }
 0xa07   : > { %16031 = vst [vmem:[#allocation72_spill] sm:$0xff] %v14564_v20 }
 0xa08   : > { %16034 = vst [vmem:[#allocation71_spill] sm:$0xff] %v14585_v7 }
 0xa0c   : > { %9168 = vrot.lane.b32.xlu2 %v9167_v1, %s9573_s29 }
 0xa14   : > { %9183 = vrot.lane.b32.xlu2 %v9182_v28, %s9573_s29 }
 0xa45   : > { %v14556_v48 = vpop.permute.xlu0 %9128 }
 0xa46   : > { %v7091_v43 = vpop.permute.xlu2 %7090  ;;  %v9131_v5 = vunpack.i.h.bf16 %v14556_v48 }
 0xa47   : > { %v14567_v38 = vsel %vm453_vm1, %v6955_v29, %v7091_v43 }
 0xa48   : > { %16032 = vst [vmem:[#allocation37_spill] sm:$0xff] %v14567_v38  ;;  %v7680_v43 = vrot.slane %v9131_v5, 4  ;;  %v7679_v41 = vsel %vm369_vm0, %v7678_v27, %v9131_v5  ;;  %v15631_v5 = vunpack.i.l.bf16 %v14556_v48 }
 0xa49   : > { %v14622_v27 = vperm.slane %v7679_v41, %v16015_v31 }
 0xa4a   : > { %v7681_v11 = vsel %vm369_vm0, %v9116_v46, %v7680_v43  ;;  %v6958_v46 = vrot.slane %v6941_v12, 4  ;;  %v14634_v43 = vperm.slane %v14482_v24, %v9745_v21  ;;  %v14654_v24 = vperm.slane %v14504_v17, %v9745_v21 }
 0xa4b   : > { %v14625_v16 = vperm.slane %v7681_v11, %v16015_v31  ;;  %v14646_v11 = vperm.slane %v14492_v30, %v16015_v31  ;;  %v14663_v28 = vrot.slane %v15631_v5, 4  ;;  %v7021_v5 = vsel %vm369_vm0, %v14615_v45, %v7020_v59 }
 0xa4c   : > { %16037 = vst [vmem:[#allocation19_spill] sm:$0xff] %v14634_v43  ;;  %v14668_v1 = vsel %vm369_vm0, %v6958_v46, %v6917_v56  ;;  %v7029_v46 = vperm.slane %v7021_v5, %v9745_v21 }
 0xa4d   : > { %v7044_v49 = vrot.slane %v14646_v11, 4  ;;  %16039 = vst [vmem:[#allocation67_spill] sm:$0xff] %v14668_v1 }
 0xa4e   : > { %v14640_v6 = vpop.permute.xlu2 %9123 }
 0xa4f   : > { %v14642_v41 = vpop.permute.xlu1 %9108  ;;  %v9125_v54 = vunpack.i.l.bf16 %v14640_v6  ;;  %v7045_v4 = vsel %vm369_vm0, %v14638_v36, %v7044_v49  ;;  %v16040_v59 = vunpack.i.h.bf16 %v14640_v6  ;;  %v14688_v49 = vsel %vm369_vm0, %v6941_v12, %v6960_v0 }
 0xa50   : > { %16038 = vst [vmem:[#allocation44_spill] sm:$0xff] %v14642_v41  ;;  %v14659_v29 = vpop.permute.xlu0 %9143  ;;  %v7053_v17 = vperm.slane %v7045_v4, %v9745_v21 }
 0xa51   : > { %v9146_v30 = vunpack.i.h.bf16 %v14659_v29  ;;  %v7654_v41 = vrot.slane %v9125_v54, 4  ;;  %v7690_v50 = vrot.slane %v16040_v59, 4  ;;  %16041 = vst [vmem:[#allocation34_spill] sm:$0xff] %v14688_v49  ;;  %v16042_v4 = vunpack.i.l.bf16 %v14659_v29 }
 0xa52   : > { %v7070_v37 = vrot.slane %v7053_v17, 4  ;;  %v16055_v49 = vunpack.i.l.bf16 %v14556_v48 }
 0xa53   : > { %v7656_v38 = vrot.slane %v9146_v30, 4  ;;  %v7655_v8 = vsel %vm369_vm0, %v7654_v41, %v9146_v30  ;;  %v7072_v41 = vrot.slane %v7029_v46, 4  ;;  %v7578_v56 = vrot.slane %v16042_v4, 4 }
 0xa54   : > { %v7661_v13 = vperm.slane %v7655_v8, %v16015_v31  ;;  %v14703_v30 = vsel %vm369_vm0, %v7074_v63, %v14630_v18  ;;  %v14708_v4 = vsel %vm369_vm0, %v7070_v37, %v7029_v46 }
 0xa55   : > { %v7657_v60 = vsel %vm369_vm0, %v9125_v54, %v7656_v38  ;;  %v14699_v54 = vsel %vm369_vm0, %v6962_v23, %v14596_v58  ;;  %16044 = vst [vmem:[#allocation47_spill] sm:$0xff] %v14703_v30 }
 0xa56   : > { %v14690_v5 = vpop.permute.xlu2 %9138  ;;  %v14695_v38 = vperm.slane %v7657_v60, %v16015_v31  ;;  %16043 = vst [vmem:[#allocation43_spill] sm:$0xff] %v14699_v54  ;;  %v7704_v12 = vrot.slane %v7661_v13, 4  ;;  %v14711_v60 = vsel %vm369_vm0, %v7053_v17, %v7072_v41  ;;  %v16047_v17 = vunpack.i.l.bf16 %v14521_v25 }
 0xa57   : > { %v9119_v8 = vpop.permute.xlu1 %9118  ;;  %v9140_v0 = vunpack.i.l.bf16 %v14690_v5  ;;  %16045 = vst [vmem:[#allocation42_spill] sm:$0xff] %v14708_v4  ;;  %v15649_v42 = vunpack.i.h.bf16 %v14690_v5 }
 0xa58   : > { %v9121_v59 = vunpack.i.h.bf16 %v9119_v8  ;;  %v9120_v61 = vunpack.i.l.bf16 %v9119_v8  ;;  %16046 = vst [vmem:[#allocation66_spill] sm:$0xff] %v14711_v60  ;;  %v14728_v8 = vsel %vm369_vm0, %v14605_v51, %v6964_v35 }
 0xa59   : > { %v7556_v63 = vrot.slane %v9140_v0, 4  ;;  %16048 = vst [vmem:[#allocation50_spill] sm:$0xff] %v14728_v8 }
 0xa5a   : > { %v7667_v52 = vsel %vm369_vm0, %v7666_v40, %v9121_v59  ;;  %v7668_v26 = vrot.slane %v9121_v59, 4  ;;  %v7554_v15 = vrot.slane %v9120_v61, 4  ;;  %v7076_v40 = vrot.slane %v14630_v18, 4 }
 0xa5b   : > { %v7673_v3 = vperm.slane %v7667_v52, %v16015_v31  ;;  %v7557_v41 = vsel %vm369_vm0, %v9120_v61, %v7556_v63  ;;  %v14736_v58 = vpop.permute.xlu0 %9158 }
 0xa5c   : > { %v7669_v46 = vsel %vm369_vm0, %v16047_v17, %v7668_v26  ;;  %v7555_v37 = vsel %vm369_vm0, %v7554_v15, %v9140_v0  ;;  %v14740_v26 = vrot.slane %v15649_v42, 4  ;;  %v14744_v35 = vperm.slane %v7557_v41, %v16015_v31 }
 0xa5d   : > { %v14732_v52 = vperm.slane %v7669_v46, %v16015_v31  ;;  %v7702_v59 = vrot.slane %v7673_v3, 4  ;;  %v7705_v23 = vsel %vm369_vm0, %v7673_v3, %v7704_v12  ;;  %v15652_v25 = vunpack.i.h.bf16 %v14736_v58 }
 0xa5e   : > { %v14749_v18 = vperm.slane %v7705_v23, %v9745_v21  ;;  %v14751_v3 = vpop.permute.xlu2 %9153  ;;  %v9160_v15 = vunpack.i.l.bf16 %v14736_v58  ;;  %v14756_v12 = vsel %vm369_vm0, %v14650_v9, %v7076_v40  ;;  %v14763_v46 = vperm.slane %v7555_v37, %v16015_v31 }
 0xa5f   : > { %v7703_v51 = vsel %vm369_vm0, %v7702_v59, %v7661_v13  ;;  %v9134_v0 = vpop.permute.xlu1 %9133  ;;  %16049 = vst [vmem:[#allocation64_spill] sm:$0xff] %v14756_v12  ;;  %v9155_v13 = vunpack.i.l.bf16 %v14751_v3  ;;  %v16050_v23 = vunpack.i.l.bf16 %v14659_v29 }
 0xa60   : > { %v14759_v63 = vperm.slane %v7703_v51, %v9745_v21  ;;  %v7444_v41 = vrot.slane %v9160_v15, 4  ;;  %v9136_v59 = vunpack.i.h.bf16 %v9134_v0  ;;  %v9135_v61 = vunpack.i.l.bf16 %v9134_v0 }
 0xa61   : > { %v7579_v9 = vsel %vm369_vm0, %v7578_v56, %v9155_v13  ;;  %v7580_v40 = vrot.slane %v9155_v13, 4  ;;  %v14771_v51 = vrot.slane %v15652_v25, 4  ;;  %v16051_v25 = vunpack.i.h.bf16 %v14751_v3 }
 0xa62   : > { %v7585_v17 = vperm.slane %v7579_v9, %v16015_v31  ;;  %v7442_v37 = vrot.slane %v9136_v59, 4  ;;  %v7445_v30 = vsel %vm369_vm0, %v9136_v59, %v7444_v41  ;;  %v7691_v54 = vsel %vm369_vm0, %v7690_v50, %v9135_v61 }
 0xa63   : > { %v7581_v0 = vsel %vm369_vm0, %v16050_v23, %v7580_v40  ;;  %v14780_v42 = vperm.slane %v7445_v30, %v16015_v31  ;;  %v7692_v56 = vrot.slane %v9135_v61, 4  ;;  %v14783_v13 = vperm.slane %v7691_v54, %v16015_v31  ;;  %v14791_v50 = vpop.permute.xlu0 %9173 }
 0xa64   : > { %v7330_v60 = vrot.slane %v16051_v25, 4  ;;  %v14788_v9 = vperm.slane %v7581_v0, %v16015_v31  ;;  %v7443_v41 = vsel %vm369_vm0, %v7442_v37, %v9160_v15  ;;  %v7614_v23 = vrot.slane %v7585_v17, 4 }
 0xa65   : > { %v14796_v30 = vperm.slane %v7443_v41, %v16015_v31  ;;  %v16052_v54 = vunpack.i.h.bf16 %v14640_v6  ;;  %v16053_v15 = vrot.slane %v14622_v27, 4  ;;  %v9176_v41 = vunpack.i.h.bf16 %v14791_v50 }
 0xa66   : > { %v9169_v0 = vpop.permute.xlu2 %9168  ;;  %v7626_v6 = vrot.slane %v14788_v9, 4 }
 0xa67   : > { %v7693_v61 = vsel %vm369_vm0, %v16052_v54, %v7692_v56  ;;  %v7729_v37 = vsel %vm369_vm0, %v14783_v13, %v16053_v15  ;;  %v9149_v29 = vpop.permute.xlu1 %9148  ;;  %v9171_v54 = vunpack.i.h.bf16 %v9169_v0  ;;  %v9170_v8 = vunpack.i.l.bf16 %v9169_v0 }
 0xa68   : > { %v14804_v40 = vperm.slane %v7693_v61, %v16015_v31  ;;  %v9151_v25 = vunpack.i.h.bf16 %v9149_v29  ;;  %v14814_v59 = vperm.slane %v7729_v37, %v9745_v21  ;;  %v16054_v61 = vrot.slane %v14625_v16, 4 }
 0xa69   : > { %v9150_v15 = vunpack.i.l.bf16 %v9149_v29  ;;  %v7456_v4 = vrot.slane %v9171_v54, 4  ;;  %v7478_v56 = vrot.slane %v14796_v30, 4  ;;  %v7332_v19 = vrot.slane %v9176_v41, 4 }
 0xa6a   : > { %v7741_v12 = vsel %vm369_vm0, %v14804_v40, %v16054_v61  ;;  %v7567_v1 = vsel %vm369_vm0, %v14663_v28, %v9151_v25  ;;  %v7568_v20 = vrot.slane %v9151_v25, 4  ;;  %v9175_v29 = vunpack.i.l.bf16 %v14791_v50 }
 0xa6b   : > { %v7573_v14 = vperm.slane %v7567_v1, %v16015_v31  ;;  %v7454_v37 = vrot.slane %v9150_v15, 4  ;;  %v14826_v22 = vperm.slane %v7741_v12, %v9745_v21  ;;  %v7457_v61 = vsel %vm369_vm0, %v9150_v15, %v7456_v4 }
 0xa6c   : > { %v7331_v0 = vsel %vm369_vm0, %v7330_v60, %v9176_v41  ;;  %v7569_v28 = vsel %vm369_vm0, %v16055_v49, %v7568_v20  ;;  %v7342_v39 = vrot.slane %v9170_v8, 4  ;;  %v14843_v4 = vperm.slane %v7457_v61, %v16015_v31 }
 0xa6d   : > { %v7615_v2 = vsel %vm369_vm0, %v7614_v23, %v7573_v14  ;;  %v7616_v25 = vrot.slane %v7573_v14, 4  ;;  %v7455_v1 = vsel %vm369_vm0, %v7454_v37, %v9171_v54  ;;  %v14837_v33 = vperm.slane %v7569_v28, %v16015_v31 }
 0xa6e   : > { %v14840_v12 = vperm.slane %v7455_v1, %v16015_v31  ;;  %v14847_v48 = vperm.slane %v7615_v2, %v9745_v21  ;;  %v9184_v20 = vpop.permute.xlu2 %9183  ;;  %v16056_v14 = vunpack.i.h.bf16 %v14751_v3  ;;  %v14859_v15 = vperm.slane %v7331_v0, %v16015_v31 }
 0xa6f   : > { %v7617_v60 = vsel %vm369_vm0, %v7585_v17, %v7616_v25  ;;  %v9164_v50 = vpop.permute.xlu1 %9163  ;;  %v7627_v54 = vsel %vm369_vm0, %v7626_v6, %v14837_v33  ;;  %v7468_v17 = vrot.slane %v9175_v29, 4  ;;  %v9186_v3 = vunpack.i.h.bf16 %v9184_v20 }
 0xa70   : > { %v7333_v49 = vsel %vm369_vm0, %v16056_v14, %v7332_v19  ;;  %v14854_v41 = vperm.slane %v7617_v60, %v9745_v21  ;;  %v7504_v37 = vrot.slane %v14840_v12, 4  ;;  %v9185_v61 = vunpack.i.l.bf16 %v9184_v20 }
 0xa71   : > { %v14864_v19 = vperm.slane %v7627_v54, %v9745_v21  ;;  %v7516_v28 = vrot.slane %v14843_v4, 4  ;;  %v9166_v25 = vunpack.i.h.bf16 %v9164_v50  ;;  %v9165_v1 = vunpack.i.l.bf16 %v9164_v50 }
 0xa72   : > { %v7344_v60 = vrot.slane %v9186_v3, 4  ;;  %v7343_v6 = vsel %vm369_vm0, %v7342_v39, %v9186_v3  ;;  %v7431_v0 = vsel %vm369_vm0, %v14771_v51, %v9185_v61  ;;  %v7432_v14 = vrot.slane %v9185_v61, 4 }
 0xa73   : > { %v14871_v2 = vperm.slane %v7343_v6, %v16015_v31  ;;  %v14874_v23 = vperm.slane %v7431_v0, %v16015_v31  ;;  %v7543_v20 = vsel %vm369_vm0, %v14740_v26, %v9166_v25  ;;  %v7544_v54 = vrot.slane %v9166_v25, 4  ;;  %v9189_v25 = vpop.permute.xlu0 %9188 }
 0xa74   : > { %v7345_v55 = vsel %vm369_vm0, %v9170_v8, %v7344_v60  ;;  %v16057_v50 = vunpack.i.h.bf16 %v14736_v58  ;;  %v7549_v3 = vperm.slane %v7543_v20, %v16015_v31  ;;  %v7466_v51 = vrot.slane %v9165_v1, 4 }
 0xa75   : > { %v7479_v6 = vsel %vm369_vm0, %v7478_v56, %v14874_v23  ;;  %v14889_v0 = vperm.slane %v7333_v49, %v16015_v31  ;;  %v7366_v26 = vrot.slane %v14859_v15, 4  ;;  %v7353_v8 = vperm.slane %v7345_v55, %v16015_v31 }
 0xa76   : > { %v7433_v39 = vsel %vm369_vm0, %v16057_v50, %v7432_v14  ;;  %v7392_v58 = vrot.slane %v14871_v2, 4  ;;  %v16058_v14 = vunpack.i.h.bf16 %v14690_v5  ;;  %v14899_v50 = vperm.slane %v7479_v6, %v9745_v21 }
 0xa77   : > { %v14884_v61 = vperm.slane %v7433_v39, %v16015_v31  ;;  %v7467_v49 = vsel %vm369_vm0, %v7466_v51, %v9175_v29  ;;  %v7469_v39 = vsel %vm369_vm0, %v9165_v1, %v7468_v17  ;;  %v16059_v60 = vrot.slane %v14763_v46, 4  ;;  %v9179_v10 = vpop.permute.xlu1 %9178 }
 0xa78   : > { %v7545_v20 = vsel %vm369_vm0, %v16058_v14, %v7544_v54  ;;  %v14907_v55 = vperm.slane %v7467_v49, %v16015_v31  ;;  %v7477_v53 = vperm.slane %v7469_v39, %v16015_v31  ;;  %v9191_v54 = vunpack.i.h.bf16 %v9189_v25 }
 0xa79   : > { %v14902_v56 = vperm.slane %v7545_v20, %v16015_v31  ;;  %v7591_v5 = vsel %vm369_vm0, %v16059_v60, %v7549_v3  ;;  %v7592_v14 = vrot.slane %v7549_v3, 4  ;;  %v9190_v62 = vunpack.i.l.bf16 %v9189_v25 }
 0xa7a   : > { %v7505_v29 = vsel %vm369_vm0, %v14907_v55, %v7504_v37  ;;  %v7514_v17 = vrot.slane %v7477_v53, 4  ;;  %v7517_v1 = vsel %vm369_vm0, %v7477_v53, %v7516_v28  ;;  %v14919_v51 = vperm.slane %v7591_v5, %v9745_v21 }
 0xa7b   : > { %v7320_v60 = vrot.slane %v9191_v54, 4  ;;  %v7356_v39 = vrot.slane %v9190_v62, 4  ;;  %v7378_v6 = vrot.slane %v14889_v0, 4  ;;  %v14924_v3 = vperm.slane %v7505_v29, %v9745_v21 }
 0xa7c   : > { %v7515_v25 = vsel %vm369_vm0, %v7514_v17, %v14843_v4  ;;  %v9181_v20 = vunpack.i.h.bf16 %v9179_v10  ;;  %v9180_v37 = vunpack.i.l.bf16 %v9179_v10  ;;  %v14932_v53 = vperm.slane %v7517_v1, %v9745_v21 }
 0xa7d   : > { %v14929_v7 = vperm.slane %v7515_v25, %v9745_v21  ;;  %v7404_v28 = vrot.slane %v7353_v8, 4  ;;  %v7593_v5 = vsel %vm369_vm0, %v14763_v46, %v7592_v14  ;;  %v7642_v1 = vrot.slane %v14854_v41, 4 }
 0xa7e   : > { %v7354_v49 = vrot.slane %v9181_v20, 4  ;;  %v7357_v47 = vsel %vm369_vm0, %v9181_v20, %v7356_v39  ;;  %v7318_v29 = vrot.slane %v9180_v37, 4  ;;  %v7321_v43 = vsel %vm369_vm0, %v9180_v37, %v7320_v60 }
 0xa7f   : > { %v7365_v4 = vperm.slane %v7357_v47, %v16015_v31  ;;  %v14940_v10 = vperm.slane %v7321_v43, %v16015_v31  ;;  %v7601_v17 = vperm.slane %v7593_v5, %v9745_v21  ;;  %v16060_v46 = vrot.slane %v14814_v59, 4 }
 0xa80   : > { %v7355_v25 = vsel %vm369_vm0, %v7354_v49, %v9190_v62  ;;  %v7319_v32 = vsel %vm369_vm0, %v7318_v29, %v9191_v54  ;;  %v7640_v20 = vrot.slane %v14919_v51, 4  ;;  %v16061_v54 = vrot.slane %v14783_v13, 4 }
 0xa81   : > { %v7755_v14 = vsel %vm369_vm0, %v16060_v46, %v14749_v18  ;;  %v7361_v47 = vperm.slane %v7355_v25, %v16015_v31  ;;  %v7402_v60 = vrot.slane %v7365_v4, 4  ;;  %v7405_v43 = vsel %vm369_vm0, %v7365_v4, %v7404_v28 }
 0xa82   : > { %v7325_v39 = vperm.slane %v7319_v32, %v16015_v31  ;;  %v14955_v37 = vperm.slane %v7405_v43, %v9745_v21  ;;  %v7643_v62 = vsel %vm369_vm0, %v7642_v1, %v7601_v17  ;;  %v7727_v49 = vsel %vm369_vm0, %v16061_v54, %v14622_v27 }
 0xa83   : > { %v7752_v5 = vrot.slane %v14759_v63, 4  ;;  %v7393_v29 = vsel %vm369_vm0, %v7361_v47, %v7392_v58  ;;  %v7403_v25 = vsel %vm369_vm0, %v7402_v60, %v7353_v8  ;;  %v14968_v31 = vsel %vm369_vm0, %v7378_v6, %v14940_v10 }
 0xa84   : > { %v7367_v28 = vsel %vm369_vm0, %v7366_v26, %v7325_v39  ;;  %v7390_v32 = vrot.slane %v7361_v47, 4  ;;  %v7401_v4 = vperm.slane %v7393_v29, %v9745_v21  ;;  %v14972_v1 = vperm.slane %v7403_v25, %v9745_v21 }
 0xa85   : > { %v7380_v27 = vrot.slane %v14940_v10, 4  ;;  %v7368_v13 = vrot.slane %v7325_v39, 4  ;;  %v9197_v46 = vpack.i.bf16 %v7643_v62, %v7755_v14  ;;  %v7641_v58 = vsel %vm369_vm0, %v14847_v48, %v7640_v20 }
 0xa86   : > { %v14978_v8 = vperm.slane %v7727_v49, %v9745_v21  ;;  %v14981_v26 = vperm.slane %v7367_v28, %v9745_v21  ;;  %v7644_v6 = vrot.slane %v7601_v17, 4  ;;  %v7756_v47 = vrot.slane %v14749_v18, 4 }
 0xa87   : > { %v16062_v60 = vrot.slane %v14744_v35, 4  ;;  %9198 = vrot.lane.b32.xlu2 %v9197_v46, %s15707_s24  ;;  %v16063_v39 = vrot.slane %v14732_v52, 4  ;;  %v16064_v18 = vrot.slane %v14804_v40, 4  ;;  %v7646_v28 = vrot.slane %v14864_v19, 4 }
 0xa88   : > { %v7753_v14 = vsel %vm369_vm0, %v14978_v8, %v7752_v5  ;;  %v7645_v49 = vsel %vm369_vm0, %v14854_v41, %v7644_v6  ;;  %v7757_v29 = vsel %vm369_vm0, %v14814_v59, %v7756_v47  ;;  %v16065_v41 = vrot.slane %v14907_v55, 4 }
 0xa89   : > { %v7603_v43 = vsel %vm369_vm0, %v16062_v60, %v14902_v56  ;;  %v7715_v62 = vsel %vm369_vm0, %v16063_v39, %v14695_v38  ;;  %v7739_v17 = vsel %vm369_vm0, %v16064_v18, %v14625_v16  ;;  %v9192_v54 = vpack.i.bf16 %v7641_v58, %v7753_v14 }
 0xa8a   : > { %v7609_v20 = vperm.slane %v7603_v43, %v9745_v21  ;;  %v7721_v5 = vperm.slane %v7715_v62, %v9745_v21  ;;  %v9202_v25 = vpack.i.bf16 %v7645_v49, %v7757_v29  ;;  %v7745_v46 = vperm.slane %v7739_v17, %v9745_v21 }
 0xa8b   : > { %9193 = vrot.lane.b32.xlu1 %v9192_v54, %s15710_s8  ;;  %v7391_v16 = vsel %vm369_vm0, %v7390_v32, %v14871_v2  ;;  %v7416_v58 = vrot.slane %v14981_v26, 4  ;;  %v7503_v59 = vsel %vm369_vm0, %v16065_v41, %v14840_v12  ;;  %v7528_v32 = vrot.slane %v14899_v50, 4 }
 0xa8c   : > { %v7648_v60 = vrot.slane %v7609_v20, 4  ;;  %v7760_v40 = vrot.slane %v7721_v5, 4  ;;  %9203 = vrot.lane.b32.xlu0 %v9202_v25, %s15716_s17  ;;  %v7758_v6 = vrot.slane %v7745_v46, 4  ;;  %v15019_v43 = vperm.slane %v7391_v16, %v9745_v21 }
 0xa8d   : > { %v15022_v14 = vperm.slane %v7503_v59, %v9745_v21  ;;  %v7647_v2 = vsel %vm369_vm0, %v7646_v28, %v7609_v20  ;;  %v7369_v55 = vsel %vm369_vm0, %v14859_v15, %v7368_v13  ;;  %v7418_v12 = vrot.slane %v7401_v4, 4 }
 0xa8e   : > { %v7649_v47 = vsel %vm369_vm0, %v14864_v19, %v7648_v60  ;;  %v7759_v39 = vsel %vm369_vm0, %v7758_v6, %v7721_v5  ;;  %v7761_v62 = vsel %vm369_vm0, %v7745_v46, %v7760_v40  ;;  %v7417_v19 = vsel %vm369_vm0, %v15019_v43, %v7416_v58 }
 0xa8f   : > { %v7377_v18 = vperm.slane %v7369_v55, %v9745_v21  ;;  %v9217_v17 = vpack.i.bf16 %v7649_v47, %v7761_v62  ;;  %v7529_v54 = vsel %vm369_vm0, %v15022_v14, %v7528_v32  ;;  %v16066_v20 = vrot.slane %v14874_v23, 4 }
 0xa90   : > { %v7530_v15 = vrot.slane %v14924_v3, 4  ;;  %v9207_v13 = vpack.i.bf16 %v7647_v2, %v7759_v39  ;;  %v9212_v29 = vpack.i.bf16 %v7417_v19, %v7529_v54  ;;  %v16067_v46 = vrot.slane %v14902_v56, 4 }
 0xa91   : > { %v7481_v49 = vsel %vm369_vm0, %v14796_v30, %v16066_v20  ;;  %v7420_v25 = vrot.slane %v7377_v18, 4  ;;  %v7419_v28 = vsel %vm369_vm0, %v7418_v12, %v7377_v18  ;;  %v16068_v40 = vrot.slane %v14837_v33, 4 }
 0xa92   : > { %v7489_v5 = vperm.slane %v7481_v49, %v9745_v21  ;;  %v7605_v60 = vsel %vm369_vm0, %v14744_v35, %v16067_v46  ;;  %v16069_v30 = vrot.slane %v14695_v38, 4  ;;  %9213 = vrot.lane.b32.xlu2 %v9212_v29, %s15710_s8  ;;  %v7762_v35 = vrot.slane %v14826_v22, 4 }
 0xa93   : > { %v7629_v23 = vsel %vm369_vm0, %v14788_v9, %v16068_v40  ;;  %v7421_v41 = vsel %vm369_vm0, %v7401_v4, %v7420_v25  ;;  %v7613_v56 = vperm.slane %v7605_v60, %v9745_v21  ;;  %9208 = vrot.lane.b32.xlu1 %v9207_v13, %s9561_s30  ;;  %v7018_v59 = vrot.slane %v14615_v45, 4 }
 0xa94   : > { %v7717_v16 = vsel %vm369_vm0, %v14732_v52, %v16069_v30  ;;  %v7531_v58 = vsel %vm369_vm0, %v7530_v15, %v7489_v5  ;;  %v7532_v33 = vrot.slane %v7489_v5, 4  ;;  %v7637_v9 = vperm.slane %v7629_v23, %v9745_v21  ;;  %9218 = vrot.lane.b32.xlu0 %v9217_v17, %s9566_s18 }
 0xa95   : > { %v7725_v38 = vperm.slane %v7717_v16, %v9745_v21  ;;  %v7385_v52 = vperm.slane %v14968_v31, %v9745_v21  ;;  %v9222_v6 = vpack.i.bf16 %v7419_v28, %v7531_v58  ;;  %v7652_v4 = vrot.slane %v7613_v56, 4 }
 0xa96   : > { %v7042_v47 = vrot.slane %v14638_v36, 4  ;;  %v7533_v2 = vsel %vm369_vm0, %v14924_v3, %v7532_v33  ;;  %v7650_v32 = vrot.slane %v7637_v9, 4  ;;  %v7422_v12 = vrot.slane %v14972_v1, 4 }
 0xa97   : > { %v7764_v55 = vrot.slane %v7725_v38, 4  ;;  %v9232_v39 = vpack.i.bf16 %v7421_v41, %v7533_v2  ;;  %v7763_v62 = vsel %vm369_vm0, %v7762_v35, %v7725_v38  ;;  %v7019_v45 = vsel %vm369_vm0, %v7018_v59, %v14581_v34  ;;  %v16072_v38 = vld [vmem:[#allocation22_spill] sm:$0xff]  ;;  %v16073_v59 = vld [vmem:[#allocation19_spill] sm:$0xff] }
 0xa98   : > { %v7043_v31 = vsel %vm369_vm0, %v7042_v47, %v14646_v11  ;;  %v7651_v19 = vsel %vm369_vm0, %v7650_v32, %v7613_v56  ;;  %v7653_v36 = vsel %vm369_vm0, %v7637_v9, %v7652_v4  ;;  %v15080_v18 = vperm.slane %v7019_v45, %v9745_v21  ;;  %v16075_v32 = vld [vmem:[#allocation71_spill] sm:$0xff]  ;;  %v16077_v45 = vld [vmem:[#allocation56_spill] sm:$0xff] }
 0xa99   : > { %v7765_v3 = vsel %vm369_vm0, %v14826_v22, %v7764_v55  ;;  %v9227_v17 = vpack.i.bf16 %v7651_v19, %v7763_v62  ;;  %v15083_v54 = vperm.slane %v7043_v31, %v9745_v21  ;;  %v16070_v34 = vrot.slane %v14780_v42, 4  ;;  %v16078_v31 = vld [vmem:[#allocation55_spill] sm:$0xff] }
 0xa9a   : > { %v7534_v11 = vrot.slane %v14929_v7, 4  ;;  %v7068_v49 = vrot.slane %v15080_v18, 4  ;;  %v7424_v13 = vrot.slane %v7385_v52, 4  ;;  %v7381_v22 = vsel %vm369_vm0, %v14889_v0, %v7380_v27 }
 0xa9b   : > { %v7491_v20 = vsel %vm369_vm0, %v16070_v34, %v14884_v61  ;;  %9228 = vrot.lane.b32.xlu2 %v9227_v17, %s9563_s20  ;;  %v7389_v29 = vperm.slane %v7381_v22, %v9745_v21  ;;  %v7426_v5 = vrot.slane %v14955_v37, 4  ;;  %v16071_v25 = vrot.slane %v14884_v61, 4  ;;  %9223 = vrot.lane.b32.xlu1 %v9222_v6, %s15707_s24  ;;  %v16074_v6 = vld [vmem:[#allocation21_spill] sm:$0xff] }
 0xa9c   : > { %v7497_v15 = vperm.slane %v7491_v20, %v9745_v21  ;;  %v7538_v46 = vrot.slane %v14932_v53, 4  ;;  %v9237_v60 = vpack.i.bf16 %v7653_v36, %v7765_v3  ;;  %v7423_v10 = vsel %vm369_vm0, %v7422_v12, %v7385_v52  ;;  %9233 = vrot.lane.b32.xlu0 %v9232_v39, %s15716_s17  ;;  %v16076_v39 = vld [vmem:[#allocation68_spill] sm:$0xff]  ;;  %v16080_v3 = vld [vmem:[#allocation18_spill] sm:$0xff] }
 0xa9d   : > { %v7493_v28 = vsel %vm369_vm0, %v14780_v42, %v16071_v25  ;;  %v15108_v0 = vsel %vm369_vm0, %v14972_v1, %v7424_v13  ;;  %v7069_v61 = vsel %vm369_vm0, %v15083_v54, %v7068_v49  ;;  %v7428_v23 = vrot.slane %v7389_v29, 4  ;;  %v16081_v49 = vld [vmem:[#allocation73_spill] sm:$0xff] }
 0xa9e   : > { %v7536_v27 = vrot.slane %v7497_v15, 4  ;;  %v7535_v40 = vsel %vm369_vm0, %v7534_v11, %v7497_v15  ;;  %v15115_v42 = vperm.slane %v7493_v28, %v9745_v21  ;;  %v6966_v16 = vrot.slane %v14609_v44, 4  ;;  %v16082_v15 = vld [vmem:[#allocation75_spill] sm:$0xff] }
 0xa9f   : > { %v7078_v1 = vrot.slane %v14654_v24, 4  ;;  %v6734_v58 = vrot.slane %v14572_v57, 4  ;;  %v9242_v41 = vpack.i.bf16 %v7423_v10, %v7535_v40  ;;  %v7427_v35 = vsel %vm369_vm0, %v7426_v5, %v7389_v29  ;;  %v16084_v28 = vld [vmem:[#allocation35_spill] sm:$0xff] }
 0xaa0   : > { %v7537_v30 = vsel %vm369_vm0, %v14929_v7, %v7536_v27  ;;  %v7539_v33 = vsel %vm369_vm0, %v7538_v46, %v15115_v42  ;;  %v15128_v9 = vsel %vm369_vm0, %v14955_v37, %v7428_v23  ;;  %v15132_v7 = vsel %vm369_vm0, %v6966_v16, %v16072_v38 }
 0xaa1   : > { %v9247_v56 = vpack.i.bf16 %v15108_v0, %v7537_v30  ;;  %v15136_v52 = vsel %vm369_vm0, %v7078_v1, %v16073_v59  ;;  %v15140_v4 = vsel %vm369_vm0, %v6734_v58, %v16074_v6  ;;  %v7540_v47 = vrot.slane %v15115_v42, 4  ;;  %v16085_v30 = vld [vmem:[#allocation69_spill] sm:$0xff] }
 0xaa2   : > { %v9287_v2 = vpack.i.bf16 %v15132_v7, %v15136_v52  ;;  %v6846_v37 = vrot.slane %v16075_v32, 4  ;;  %v6736_v55 = vrot.slane %v16074_v6, 4  ;;  %v9257_v12 = vpack.i.bf16 %v7427_v35, %v7539_v33  ;;  %v16088_v33 = vld [vmem:[#allocation53_spill] sm:$0xff] }
 0xaa3   : > { %v6848_v62 = vrot.slane %v16076_v39, 4  ;;  %v16079_v19 = vrot.slane %v16078_v31, 4  ;;  %v6738_v17 = vrot.slane %v16080_v3, 4  ;;  %9243 = vrot.lane.b32.xlu2 %v9242_v41, %s9561_s30  ;;  %v16083_v13 = vrot.slane %v16082_v15, 4  ;;  %9238 = vrot.lane.b32.xlu1 %v9237_v60, %s9567_s6  ;;  %v16086_v41 = vld [vmem:[#allocation30_spill] sm:$0xff] }
 0xaa4   : > { %v6847_v34 = vsel %vm369_vm0, %v6846_v37, %v16076_v39  ;;  %v15158_v20 = vsel %vm369_vm0, %v14572_v57, %v6736_v55  ;;  %v6850_v46 = vrot.slane %v16084_v28, 4  ;;  %7092 = vrot.lane.b32.xlu0 %v7069_v61, %s15710_s8  ;;  %v6968_v0 = vrot.slane %v16072_v38, 4  ;;  %v16090_v39 = vld [vmem:[#allocation70_spill] sm:$0xff] }
 0xaa5   : > { %v6695_v36 = vsel %vm369_vm0, %v16079_v19, %v16077_v45  ;;  %v6807_v22 = vsel %vm369_vm0, %v16083_v13, %v16081_v49  ;;  %v9282_v29 = vpack.i.bf16 %v15140_v4, %v6847_v34  ;;  %v6849_v5 = vsel %vm369_vm0, %v16075_v32, %v6848_v62  ;;  %v16089_v32 = vld [vmem:[#allocation72_spill] sm:$0xff]  ;;  %v16093_v19 = vld [vmem:[#allocation79_spill] sm:$0xff]  ;;  %v16098_v49 = vld [vmem:[#allocation61_spill] sm:$0xff] }
 0xaa6   : > { %v6701_v11 = vperm.slane %v6695_v36, %v9745_v21  ;;  %v6813_v25 = vperm.slane %v6807_v22, %v9745_v21  ;;  %v9292_v57 = vpack.i.bf16 %v15158_v20, %v6849_v5  ;;  %v7080_v27 = vrot.slane %v16073_v59, 4  ;;  %v16091_v45 = vld [vmem:[#allocation60_spill] sm:$0xff]  ;;  %v16096_v20 = vld [vmem:[#allocation74_spill] sm:$0xff]  ;;  %v16101_v5 = vld [vmem:[#allocation67_spill] sm:$0xff] }
 0xaa7   : > { %v6744_v16 = vrot.slane %v16085_v30, 4  ;;  %v6969_v58 = vsel %vm369_vm0, %v14609_v44, %v6968_v0  ;;  %v16087_v35 = vrot.slane %v16086_v41, 4  ;;  %v6742_v62 = vrot.slane %v16089_v32, 4  ;;  %v16100_v13 = vld [vmem:[#allocation58_spill] sm:$0xff] }
 0xaa8   : > { %v6739_v10 = vsel %vm369_vm0, %v6738_v17, %v6701_v11  ;;  %v6851_v60 = vsel %vm369_vm0, %v6850_v46, %v6813_v25  ;;  %v6740_v40 = vrot.slane %v6701_v11, 4  ;;  %v6852_v23 = vrot.slane %v6813_v25, 4  ;;  %v16095_v17 = vld [vmem:[#allocation76_spill] sm:$0xff]  ;;  %v16102_v25 = vld [vmem:[#allocation42_spill] sm:$0xff] }
 0xaa9   : > { %v9302_v1 = vpack.i.bf16 %v6739_v10, %v6851_v60  ;;  %v7081_v61 = vsel %vm369_vm0, %v14654_v24, %v7080_v27  ;;  %v6833_v38 = vsel %vm369_vm0, %v16088_v33, %v16087_v35  ;;  %v6745_v37 = vsel %vm369_vm0, %v16089_v32, %v6744_v16  ;;  %v16104_v27 = vld [vmem:[#allocation59_spill] sm:$0xff]  ;;  %v16106_v16 = vld [vmem:[#allocation80_spill] sm:$0xff]  ;;  %v16109_v33 = vld [vmem:[#allocation81_spill] sm:$0xff] }
 0xaaa   : > { %v9297_v6 = vpack.i.bf16 %v6969_v58, %v7081_v61  ;;  %v6741_v59 = vsel %vm369_vm0, %v16080_v3, %v6740_v40  ;;  %v6853_v4 = vsel %vm369_vm0, %v16084_v28, %v6852_v23  ;;  %v6841_v44 = vperm.slane %v6833_v38, %v9745_v21 }
 0xaab   : > { %v9307_v55 = vpack.i.bf16 %v6741_v59, %v6853_v4  ;;  %v6856_v24 = vrot.slane %v16090_v39, 4  ;;  %v16092_v31 = vunpack.i.h.bf16 %v16091_v45  ;;  %v16094_v3 = vunpack.i.l.bf16 %v16091_v45  ;;  %9248 = vrot.lane.b32.xlu1 %v9247_v56, %s9566_s18  ;;  %v16111_v4 = vld [vmem:[#allocation78_spill] sm:$0xff] }
 0xaac   : > { %v16097_v11 = vunpack.i.h.bf16 %v16096_v20  ;;  %v16099_v21 = vunpack.i.l.bf16 %v16096_v20  ;;  %v16103_v28 = vpack.i.bf16 %v16101_v5, %v16102_v25  ;;  %v6743_v10 = vsel %vm369_vm0, %v6742_v62, %v16085_v30  ;;  %9258 = vrot.lane.b32.xlu0 %v9257_v12, %s9563_s20  ;;  %v16120_v20 = vld [vmem:[#allocation54_spill] sm:$0xff] }
 0xaad   : > { %v6493_v36 = vsel %vm459_vm4, %v16093_v19, %v16092_v31  ;;  %v6492_v34 = vsel %vm459_vm4, %v16095_v17, %v16094_v3  ;;  %v6857_v46 = vsel %vm369_vm0, %v6841_v44, %v6856_v24  ;;  %v6854_v0 = vrot.slane %v6841_v44, 4  ;;  %v16114_v24 = vld [vmem:[#allocation49_spill] sm:$0xff] }
 0xaae   : > { %v6487_v15 = vsel %vm457_vm3, %v16098_v49, %v16097_v11  ;;  %v6486_v22 = vsel %vm457_vm3, %v16100_v13, %v16099_v21  ;;  %9253 = vrot.lane.b32.xlu2 %v16103_v28, %s15707_s24  ;;  %v16105_v60 = vunpack.i.h.bf16 %v16104_v27  ;;  %v9317_v23 = vpack.i.bf16 %v6745_v37, %v6857_v46 }
 0xaaf   : > { %v16107_v58 = vunpack.i.h.bf16 %v16106_v16  ;;  %v16108_v41 = vunpack.i.l.bf16 %v16104_v27  ;;  %v16110_v38 = vunpack.i.h.bf16 %v16109_v33  ;;  %v6855_v59 = vsel %vm369_vm0, %v6854_v0, %v16090_v39  ;;  %v16117_v39 = vld [vmem:[#allocation57_spill] sm:$0xff]  ;;  %v16126_v0 = vld [vmem:[#allocation66_spill] sm:$0xff] }
 0xab0   : > { %v6497_v40 = vsel %vm461_vm5, %v6493_v36, %v16105_v60  ;;  %v16112_v56 = vunpack.i.h.bf16 %v16111_v4  ;;  %v16113_v37 = vunpack.i.l.bf16 %v16106_v16  ;;  %v16115_v62 = vunpack.i.h.bf16 %v16114_v24  ;;  %v16132_v60 = vld [vmem:[#allocation64_spill] sm:$0xff] }
 0xab1   : > { %v6501_v61 = vsel %vm463_vm6, %v6497_v40, %v16107_v58  ;;  %v6496_v35 = vsel %vm461_vm5, %v6492_v34, %v16108_v41  ;;  %v6491_v30 = vsel %vm459_vm4, %v6487_v15, %v16110_v38  ;;  %v9312_v31 = vpack.i.bf16 %v6743_v10, %v6855_v59  ;;  %v16125_v10 = vld [vmem:[#allocation34_spill] sm:$0xff] }
 0xab2   : > { %v15237_v32 = vsel %vm465_vm7, %v6501_v61, %v16112_v56  ;;  %v6500_v44 = vsel %vm463_vm6, %v6496_v35, %v16113_v37  ;;  %v6495_v45 = vsel %vm461_vm5, %v6491_v30, %v16115_v62  ;;  %v16116_v19 = vunpack.i.l.bf16 %v16111_v4 }
 0xab3   : > { %v16118_v36 = vunpack.i.h.bf16 %v16117_v39  ;;  %v16119_v17 = vunpack.i.l.bf16 %v16109_v33  ;;  %v16121_v11 = vunpack.i.h.bf16 %v16120_v20  ;;  %v16122_v15 = vunpack.i.l.bf16 %v16114_v24 }
 0xab4   : > { %v15248_v12 = vsel %vm465_vm7, %v6500_v44, %v16116_v19  ;;  %v7541_v13 = vsel %vm369_vm0, %v14932_v53, %v7540_v47  ;;  %v16123_v5 = vunpack.i.l.bf16 %v16117_v39  ;;  %v16124_v28 = vunpack.i.l.bf16 %v16120_v20  ;;  %v16128_v53 = vld [vmem:[#allocation43_spill] sm:$0xff] }
 0xab5   : > { %v6499_v3 = vsel %vm463_vm6, %v6495_v45, %v16118_v36  ;;  %v6490_v34 = vsel %vm459_vm4, %v6486_v22, %v16119_v17  ;;  %v9267_v22 = vpack.i.bf16 %v15128_v9, %v7541_v13  ;;  %v16127_v42 = vpack.i.bf16 %v16125_v10, %v16126_v0  ;;  %v16129_v47 = vld [vmem:[#allocation47_spill] sm:$0xff]  ;;  %v16131_v9 = vld [vmem:[#allocation50_spill] sm:$0xff] }
 0xab6   : > { %v15259_v49 = vsel %vm465_vm7, %v6499_v3, %v16121_v11  ;;  %v6494_v21 = vsel %vm461_vm5, %v6490_v34, %v16122_v15  ;;  %v16130_v27 = vpack.i.bf16 %v16128_v53, %v16129_v47  ;;  %v16133_v40 = vpack.i.bf16 %v16131_v9, %v16132_v60 }
 0xab7   : > { %v6498_v25 = vsel %vm463_vm6, %v6494_v21, %v16123_v5  ;;  %9268 = vrot.lane.b32.xlu2 %v9267_v22, %s9567_s6  ;;  %9263 = vrot.lane.b32.xlu1 %v16127_v42, %s15716_s17  ;;  %v7414_v16 = vrot.slane %v15019_v43, 4  ;;  %v7526_v58 = vrot.slane %v15022_v14, 4  ;;  %v7750_v14 = vrot.slane %v14978_v8, 4 }
 0xab8   : > { %v15275_v46 = vsel %vm465_vm7, %v6498_v25, %v16124_v28  ;;  %9273 = vrot.lane.b32.xlu0 %v16130_v27, %s9561_s30 }
 0xab9   : > { %v7527_v61 = vsel %vm369_vm0, %v7526_v58, %v14899_v50  ;;  %v7638_v50 = vrot.slane %v14847_v48, 4 }
 0xabb   : > { %v7639_v38 = vsel %vm369_vm0, %v7638_v50, %v14919_v51 }
 0xabf   : > { %9283 = vrot.lane.b32.xlu2 %v9282_v29, %s15707_s24  ;;  %9278 = vrot.lane.b32.xlu1 %v16133_v40, %s9566_s18  ;;  %v7415_v29 = vsel %vm369_vm0, %v7414_v16, %v14981_v26  ;;  %s8081_s24 = sshll.u32 %s7944_s13, 3 }
 0xac0   : > { %9288 = vrot.lane.b32.xlu0 %v9287_v2, %s9563_s20  ;;  %s7946_s29 = scalar_lea.hbm %s16140_s15, %s8081_s24 }
 0xac7   : > { %9298 = vrot.lane.b32.xlu2 %v9297_v6, %s9567_s6  ;;  %9293 = vrot.lane.b32.xlu1 %v9292_v57, %s15716_s17 }
 0xac8   : > { %9303 = vrot.lane.b32.xlu0 %v9302_v1, %s9561_s30  ;;  %s7950_s30 = sshll.u32 %s7946_s29, 4  ;;  %s7951_s30 = int_to_ptr.hbm [resolvable:$true] %s7950_s30 }
 0xacf   : > { %9313 = vrot.lane.b32.xlu2 %v9312_v31, %s9563_s20  ;;  %9308 = vrot.lane.b32.xlu1 %v9307_v55, %s9566_s18  ;;  %v7751_v55 = vsel %vm369_vm0, %v7750_v14, %v14759_v63  ;;  %s9446_s20 = sshra.s32 %s7951_s30, 4  ;;  %s9447_s20 = int_to_ptr.hbm [resolvable:$true] %s9446_s20 }
 0xad0   : > { %9318 = vrot.lane.b32.xlu0 %v9317_v23, %s9567_s6  ;;  %s7948_s6 = sshll.u32 %s285_s9, 4  ;;  %s9448_s18 = scalar_lea.hbm %s9447_s20, 8  ;;  %s7949_s6 = int_to_ptr.vmem [resolvable:$true] %s7948_s6 }
 0xad1   : > { %p9449_p9 = scmp.ne.s32.totalorder %s9447_s20, %s9448_s18  ;;  %p9453_p13 = scmp.lt.s32.totalorder %s9447_s20, %s16140_s15 }
 0xad2   : > { %p9454_p0 = scmp.lt.s32.totalorder %s9452_s11, %s9448_s18 }
 0xad3   : > { %p9450_p10 = pnand %p9449_p9, %p9691_p12 }
 0xad4   : > { %p9455_p1 = por %p9454_p0, %p9453_p13 }
 0xad5   : > { %p9451_p11 = pneg %p9450_p10 }
 0xad7   : > { %p9456_p4 = pnand %p9455_p1, %p9451_p11 }
 0xae1   : > { %v9199_v7 = vpop.permute.xlu2 %9198 }
 0xae2   : > { %v9200_v33 = vunpack.i.l.bf16 %v9199_v7  ;;  %v9201_v59 = vunpack.i.h.bf16 %v9199_v7 }
 0xaec   : > { %v9214_v52 = vpop.permute.xlu2 %9213 }
 0xaed   : > { %v9216_v36 = vunpack.i.h.bf16 %v9214_v52  ;;  %v9215_v17 = vunpack.i.l.bf16 %v9214_v52 }
 0xaef   : > { %v7878_v28 = vsel %vm453_vm1, %v7415_v29, %v9216_v36  ;;  %v7879_v42 = vsel %vm453_vm1, %v7527_v61, %v9215_v17 }
 0xaf5   : > { %v9229_v2 = vpop.permute.xlu2 %9228 }
 0xaf6   : > { %v9230_v20 = vunpack.i.l.bf16 %v9229_v2  ;;  %v9231_v10 = vunpack.i.h.bf16 %v9229_v2 }
 0xafd   : > { %v9194_v43 = vpop.permute.xlu1 %9193  ;;  %v15308_v1 = vpop.permute.xlu2 %9243 }
 0xafe   : > { %v9204_v57 = vpop.permute.xlu0 %9203  ;;  %v9195_v26 = vunpack.i.l.bf16 %v9194_v43  ;;  %v9196_v35 = vunpack.i.h.bf16 %v9194_v43  ;;  %v9246_v61 = vunpack.i.h.bf16 %v15308_v1  ;;  %v9245_v52 = vunpack.i.l.bf16 %v15308_v1 }
 0xaff   : > { %v9205_v8 = vunpack.i.l.bf16 %v9204_v57  ;;  %v9206_v44 = vunpack.i.h.bf16 %v9204_v57 }
 0xb00   : > { %v7881_v23 = vsel %vm453_vm1, %v7751_v55, %v9195_v26  ;;  %v7880_v30 = vsel %vm453_vm1, %v7639_v38, %v9196_v35 }
 0xb01   : > { %v7885_v37 = vsel %vm455_vm2, %v7881_v23, %v9200_v33  ;;  %v7884_v48 = vsel %vm455_vm2, %v7880_v30, %v9201_v59 }
 0xb02   : > { %v7889_v31 = vsel %vm457_vm3, %v7885_v37, %v9205_v8  ;;  %v7888_v19 = vsel %vm457_vm3, %v7884_v48, %v9206_v44  ;;  %v7066_v8 = vrot.slane %v15083_v54, 4 }
 0xb05   : > { %v9209_v6 = vpop.permute.xlu1 %9208 }
 0xb06   : > { %v9219_v41 = vpop.permute.xlu0 %9218  ;;  %v9210_v4 = vunpack.i.l.bf16 %v9209_v6  ;;  %v9211_v62 = vunpack.i.h.bf16 %v9209_v6 }
 0xb07   : > { %v9220_v45 = vunpack.i.l.bf16 %v9219_v41  ;;  %v9221_v39 = vunpack.i.h.bf16 %v9219_v41 }
 0xb08   : > { %v15319_v63 = vpop.permute.xlu2 %9253  ;;  %v7893_v51 = vsel %vm459_vm4, %v7889_v31, %v9210_v4  ;;  %v7892_v3 = vsel %vm459_vm4, %v7888_v19, %v9211_v62 }
 0xb09   : > { %v7897_v34 = vsel %vm461_vm5, %v7893_v51, %v9220_v45  ;;  %v7896_v22 = vsel %vm461_vm5, %v7892_v3, %v9221_v39  ;;  %v9256_v44 = vunpack.i.h.bf16 %v15319_v63  ;;  %v9255_v31 = vunpack.i.l.bf16 %v15319_v63  ;;  %v16134_v51 = vld [vmem:[#allocation37_spill] sm:$0xff]  ;;  %v8074_v63 = vld [vmem:[%s15467_s5 + $0x8] sm:$0xff] }
 0xb0a   : > { %v7901_v0 = vsel %vm463_vm6, %v7897_v34, %v9230_v20  ;;  %v7900_v16 = vsel %vm463_vm6, %v7896_v22, %v9231_v10  ;;  %8075 = vmatmul.msk.f32.vlgmr.msra.gmra.mxu0 %vm463_vm6, %v8074_v63 }
 0xb0b   : > { %v7200_v54 = vsel %vm455_vm2, %v16134_v51, %v9256_v44 }
 0xb0d   : > { %v9224_v56 = vpop.permute.xlu1 %9223 }
 0xb0e   : > { %v9234_v24 = vpop.permute.xlu0 %9233  ;;  %v9226_v11 = vunpack.i.h.bf16 %v9224_v56  ;;  %v9225_v15 = vunpack.i.l.bf16 %v9224_v56 }
 0xb0f   : > { %v9236_v53 = vunpack.i.h.bf16 %v9234_v24  ;;  %v9235_v47 = vunpack.i.l.bf16 %v9234_v24  ;;  %v7067_v24 = vsel %vm369_vm0, %v7066_v8, %v15080_v18 }
 0xb10   : > { %v7882_v9 = vsel %vm455_vm2, %v7878_v28, %v9226_v11  ;;  %v7883_v60 = vsel %vm455_vm2, %v7879_v42, %v9225_v15 }
 0xb11   : > { %v9269_v40 = vpop.permute.xlu2 %9268  ;;  %v7886_v29 = vsel %vm457_vm3, %v7882_v9, %v9236_v53  ;;  %v7887_v7 = vsel %vm457_vm3, %v7883_v60, %v9235_v47  ;;  %v16135_v60 = vld [vmem:[#allocation77_spill] sm:$0xff] }
 0xb12   : > { %v7891_v41 = vsel %vm459_vm4, %v7887_v7, %v9245_v52  ;;  %v7890_v35 = vsel %vm459_vm4, %v7886_v29, %v9246_v61  ;;  %v9270_v50 = vunpack.i.l.bf16 %v9269_v40  ;;  %v9271_v1 = vunpack.i.h.bf16 %v9269_v40  ;;  %v16137_v7 = vld [vmem:[#allocation44_spill] sm:$0xff] }
 0xb13   : > { %v6842_v40 = vrot.slane %v16135_v60, 4  ;;  %v9111_v61 = vunpack.i.h.bf16 %v16137_v7  ;;  %v9110_v52 = vunpack.i.l.bf16 %v16137_v7 }
 0xb15   : > { %v9239_v21 = vpop.permute.xlu1 %9238 }
 0xb16   : > { %v9241_v13 = vunpack.i.h.bf16 %v9239_v21  ;;  %v7093_v5 = vpop.permute.xlu0 %7092  ;;  %v9240_v25 = vunpack.i.l.bf16 %v9239_v21  ;;  %v3817_v21 = vld [vmem:[%s15467_s5] sm:$0xff] }
 0xb17   : > { %v7197_v48 = vsel %vm453_vm1, %v7067_v24, %v7093_v5  ;;  %8076 = vmatmul.msk.f32.vlgmr.msra.gmra.mxu1 %vm463_vm6, %v3817_v21 }
 0xb18   : > { %v7905_v27 = vsel %vm465_vm7, %v7901_v0, %v9240_v25  ;;  %v7904_v58 = vsel %vm465_vm7, %v7900_v16, %v9241_v13  ;;  %v7201_v19 = vsel %vm455_vm2, %v7197_v48, %v9255_v31  ;;  %v16136_v16 = vld [vmem:[#allocation25_spill] sm:$0xff] }
 0xb19   : > { %7915 = vmatpush.msra.mxu2 %v7905_v27  ;;  %v9284_v59 = vpop.permute.xlu2 %9283 }
 0xb1b   : > { %7916 = vmatpush.msra.mxu2 %v7904_v58  ;;  %v6730_v58 = vrot.slane %v16136_v16, 4 }
 0xb1d   : > { %v9249_v2 = vpop.permute.xlu1 %9248 }
 0xb1e   : > { %v9251_v43 = vunpack.i.h.bf16 %v9249_v2  ;;  %v9250_v57 = vunpack.i.l.bf16 %v9249_v2  ;;  %v9259_v14 = vpop.permute.xlu0 %9258 }
 0xb1f   : > { %v9261_v6 = vunpack.i.h.bf16 %v9259_v14  ;;  %v9260_v26 = vunpack.i.l.bf16 %v9259_v14 }
 0xb20   : > { %v7895_v55 = vsel %vm461_vm5, %v7891_v41, %v9250_v57  ;;  %v7894_v23 = vsel %vm461_vm5, %v7890_v35, %v9251_v43  ;;  %v9286_v43 = vunpack.i.h.bf16 %v9284_v59  ;;  %v9285_v57 = vunpack.i.l.bf16 %v9284_v59  ;;  %v16139_v35 = vld [vmem:[#allocation28_spill] sm:$0xff] }
 0xb21   : > { %v7899_v33 = vsel %vm463_vm6, %v7895_v55, %v9260_v26  ;;  %v7898_v38 = vsel %vm463_vm6, %v7894_v23, %v9261_v6  ;;  %v9299_v34 = vpop.permute.xlu2 %9298  ;;  %v16138_v26 = vld [vmem:[#allocation31_spill] sm:$0xff] }
 0xb22   : > { %v7903_v30 = vsel %vm465_vm7, %v7899_v33, %v9270_v50  ;;  %v7902_v4 = vsel %vm465_vm7, %v7898_v38, %v9271_v1  ;;  %v9300_v28 = vunpack.i.l.bf16 %v9299_v34  ;;  %v9301_v47 = vunpack.i.h.bf16 %v9299_v34 }
 0xb23   : > { %7917 = vmatpush.msra.mxu2 %v7903_v30  ;;  %v6843_v41 = vsel %vm369_vm0, %v6842_v40, %v16138_v26  ;;  %v6731_v50 = vsel %vm369_vm0, %v6730_v58, %v16139_v35 }
 0xb24   : > { %v7195_v55 = vsel %vm453_vm1, %v6843_v41, %v9111_v61  ;;  %v7194_v23 = vsel %vm453_vm1, %v6731_v50, %v9110_v52 }
 0xb25   : > { %7918 = vmatpush.msra.mxu2 %v7902_v4  ;;  %v7198_v33 = vsel %vm455_vm2, %v7194_v23, %v9286_v43  ;;  %v7199_v38 = vsel %vm455_vm2, %v7195_v55, %v9285_v57 }
 0xb29   : > { %v9264_v56 = vpop.permute.xlu1 %9263  ;;  %v9314_v1 = vpop.permute.xlu2 %9313 }
 0xb2a   : > { %v9274_v37 = vpop.permute.xlu0 %9273  ;;  %v9266_v62 = vunpack.i.h.bf16 %v9264_v56  ;;  %v9265_v45 = vunpack.i.l.bf16 %v9264_v56 }
 0xb2b   : > { %v9276_v39 = vunpack.i.h.bf16 %v9274_v37  ;;  %v9275_v36 = vunpack.i.l.bf16 %v9274_v37  ;;  %v9316_v37 = vunpack.i.h.bf16 %v9314_v1 }
 0xb2c   : > { %v7204_v3 = vsel %vm457_vm3, %v7200_v54, %v9266_v62  ;;  %v7205_v17 = vsel %vm457_vm3, %v7201_v19, %v9265_v45  ;;  %v9315_v62 = vunpack.i.l.bf16 %v9314_v1 }
 0xb2d   : > { %v7209_v25 = vsel %vm459_vm4, %v7205_v17, %v9275_v36  ;;  %v7208_v22 = vsel %vm459_vm4, %v7204_v3, %v9276_v39 }
 0xb31   : > { %v9279_v20 = vpop.permute.xlu1 %9278 }
 0xb32   : > { %v9281_v18 = vunpack.i.h.bf16 %v9279_v20  ;;  %v9280_v11 = vunpack.i.l.bf16 %v9279_v20  ;;  %v9289_v15 = vpop.permute.xlu0 %9288  ;;  %v8077_v20 = vld [vmem:[%s15467_s5 + $0x10] sm:$0xff] }
 0xb33   : > { %v9291_v13 = vunpack.i.h.bf16 %v9289_v15  ;;  %v9290_v5 = vunpack.i.l.bf16 %v9289_v15 }
 0xb34   : > { %v7213_v10 = vsel %vm461_vm5, %v7209_v25, %v9280_v11  ;;  %v7212_v0 = vsel %vm461_vm5, %v7208_v22, %v9281_v18 }
 0xb35   : > { %v7217_v42 = vsel %vm463_vm6, %v7213_v10, %v9290_v5  ;;  %v7216_v53 = vsel %vm463_vm6, %v7212_v0, %v9291_v13 }
 0xb36   : > { %v7221_v27 = vsel %vm465_vm7, %v7217_v42, %v9300_v28  ;;  %v7220_v9 = vsel %vm465_vm7, %v7216_v53, %v9301_v47 }
 0xb37   : > { %7919 = vmatpush.msra.mxu2 %v7221_v27 }
 0xb39   : > { %v9294_v29 = vpop.permute.xlu1 %9293  ;;  %7920 = vmatpush.msra.mxu2 %v7220_v9 }
 0xb3a   : > { %v9304_v2 = vpop.permute.xlu0 %9303  ;;  %v9296_v14 = vunpack.i.h.bf16 %v9294_v29  ;;  %v9295_v6 = vunpack.i.l.bf16 %v9294_v29 }
 0xb3b   : > { %v9306_v30 = vunpack.i.h.bf16 %v9304_v2  ;;  %v9305_v8 = vunpack.i.l.bf16 %v9304_v2 }
 0xb3c   : > { %v7202_v59 = vsel %vm457_vm3, %v7198_v33, %v9296_v14  ;;  %v7203_v4 = vsel %vm457_vm3, %v7199_v38, %v9295_v6 }
 0xb3d   : > { %v7207_v31 = vsel %vm459_vm4, %v7203_v4, %v9305_v8  ;;  %v7206_v51 = vsel %vm459_vm4, %v7202_v59, %v9306_v30 }
 0xb41   : > { %v9309_v56 = vpop.permute.xlu1 %9308 }
 0xb42   : > { %v9311_v44 = vunpack.i.h.bf16 %v9309_v56  ;;  %v9310_v24 = vunpack.i.l.bf16 %v9309_v56  ;;  %v9319_v48 = vpop.permute.xlu0 %9318 }
 0xb43   : > { %v9320_v45 = vunpack.i.l.bf16 %v9319_v48  ;;  %v9321_v54 = vunpack.i.h.bf16 %v9319_v48 }
 0xb44   : > { %v7211_v19 = vsel %vm461_vm5, %v7207_v31, %v9310_v24  ;;  %v7210_v39 = vsel %vm461_vm5, %v7206_v51, %v9311_v44 }
 0xb45   : > { %v7215_v36 = vsel %vm463_vm6, %v7211_v19, %v9315_v62  ;;  %v7214_v3 = vsel %vm463_vm6, %v7210_v39, %v9316_v37 }
 0xb46   : > { %v7219_v17 = vsel %vm465_vm7, %v7215_v36, %v9320_v45  ;;  %v7218_v34 = vsel %vm465_vm7, %v7214_v3, %v9321_v54 }
 0xb47   : > { %7921 = vmatpush.msra.mxu2 %v7219_v17 }
 0xb49   : > { %7922 = vmatpush.msra.mxu2 %v7218_v34 }
 0xb4b   : > { %7923 = vmatpush.msra.mxu2 %v15237_v32 }
 0xb4d   : > { %7924 = vmatpush.msra.mxu2 %v15248_v12 }
 0xb4f   : > { %7925 = vmatpush.msra.mxu2 %v15259_v49 }
 0xb51   : > { %7926 = vmatpush.msra.mxu2 %v15275_v46 }
 0xb52   : > { %8078 = vmatmul.msk.f32.vlgmr.msra.gmra.mxu2 %vm463_vm6, %v8077_v20 }
 0xb87   : > { %v5860_v18 = vpop.f32.mrf.mxu0 }
 0xb94   : > { %v5883_v32 = vpop.f32.mrf.mxu1 }
 0xb95   : > { %v5884_v12 = vadd.f32 %v5883_v32, %v5860_v18 }
 0xbd5   : > { %v7928_v49 = vpop.f32.mrf.mxu2 }
 0xbd6   : > { %v7931_v11 = vadd.f32 %v7928_v49, %v5884_v12 }
 0xbd8   : > { %7932 = vst [vmem:[%s285_s9] sm:$0xff] %v7931_v11 }
 0xbd9   : > { %9459 = shalt.err (!%p9456_p4)
}
 0xbda   : > { %8096 = dma.vmem_to_hbm [thread:$0]  (%p9691_p12), %s7949_s6, 128, %s7951_s30, %s7934_s27  }
 0xbdb PF: > { %p8107_p5 = scmp.ge.s32.totalorder %s9554_s7, 2  ;;  %s7962_s12 = sand.u32 1, %s9514_s21  }
 0xbdc   : > { %s7963_s9 = scalar_lea.sflag [#allocation5], %s7962_s12 }
 0xbdd   : > { %p8103_p6 = pnand %p8107_p5, %p9704_p2 }
 0xbdf   : > { %p8104_p8 = pneg %p8103_p6 }
 0xbe1   : > { %9509 = dma.done.wait (%p8104_p8), %s7963_s9, 128  }
 0xbe2   : > { %9511 = vsyncadd (%p8104_p8), %s7963_s9, 4294967168  ;;  %s22_s7 = sadd.s32 1, %s9554_s7   ;;  %s16142_s8 = sld [smem:[#allocation14_spill]] }
 0xbe3   : > { %p19_p3 = scmp.ge.s32.totalorder %s22_s7, 6   ;;  %s16143_s19 = sld [smem:[#allocation13_spill]] }
 0xbe4   : > { %s16144_s27 = sld [smem:[#allocation9_spill]]  ;;  %s16148_s21 = smov %s9518_s22 }
 0xbe5   : > { %s16145_s28 = sld [smem:[#allocation10_spill]]  ;;  %s16149_s22 = smov %s9522_s23 }
 0xbe6   : > { %s16146_s29 = sld [smem:[#allocation11_spill]]  ;;  %s16151_s24 = smov %s9530_s25 }
 0xbe7   : > { %s16147_s30 = sld [smem:[#allocation12_spill]]  ;;  %s16152_s25 = smov %s9534_s26 }
 0xbe8   : > { %s16150_s23 = smov %s16142_s8  ;;  %21 = sbr.rel (!%p19_p3) target bundleno = 11 (0xb), region = 102 }
 0xbe9   : > { %s16153_s26 = smov %s16143_s19 }
 0xbed   :  { %7969 = vsyncpa [#allocation4], 1 }
 0xbee   :  { %7971 = vsyncpa [#allocation4 + $0x1], 1 }
 0xbef   :  { %7972 = vsyncpa [#allocation5], 1 }
 0xbf0   :  { %7974 = vsyncpa [#allocation5 + $0x1], 1 }

</bundles_post_ra>
